<compile_context>
chip_gen: v6e
topology: v6e:2x2x1
jax: 0.10.0
libtpu: 0.0.40
codegen_flags: <defaults>
</compile_context>

<pallas_src>
import numpy as np
import jax
import jax.numpy as jnp
from jax import lax
from jax.experimental import pallas as pl
from jax.experimental.pallas import tpu as pltpu


# Geometry implied by fc1 = Linear(9216, 128):  28x28 -> 26x26 -> 24x24 -> 12x12
H_IN = 28
H1 = 26            # after conv1 (3x3, VALID)
H2 = 24            # after conv2
HP = 12            # after 2x2 max-pool
C1 = 32
C2 = 64
K_FC = HP * HP * C2          # 9216
N_HID = 128
N_CLS = 10


# ----------------------------------------------------------------------------
# Kernel 1: conv1 (1->32, 3x3, VALID) + ReLU.  One image per grid step.
#   x_ref : (1, 28, 28)      raw image (C_in = 1, channel squeezed)
#   w_ref : (3, 28, 832)     Toeplitz-expanded weight: w_ref[ky, xx+kx, xx*32+o] = w1[o,0,ky,kx]
#   b_ref : (1, 832)         bias tiled over the 26 output columns
#   o_ref : (1, 26, 832)     (26, 26, 32) output stored lane-dense
# ----------------------------------------------------------------------------
def _conv1_kernel(x_ref, w_ref, b_ref, o_ref):
    acc = jnp.zeros((H1, H1 * C1), jnp.float32)
    for ky in range(3):
        acc = acc + jnp.dot(x_ref[0, ky:ky + H1, :], w_ref[ky],
                            preferred_element_type=jnp.float32)
    o_ref[0] = jnp.maximum(acc + b_ref[...], 0.0)


def conv1_relu(x2d, w1t, b1t):
    n = x2d.shape[0]
    return pl.pallas_call(
        _conv1_kernel,
        out_shape=jax.ShapeDtypeStruct((n, H1, H1 * C1), jnp.float32),
        grid=(n,),
        in_specs=[
            pl.BlockSpec((1, H_IN, H_IN), lambda i: (i, 0, 0)),
            pl.BlockSpec((3, H_IN, H1 * C1), lambda i: (0, 0, 0)),
            pl.BlockSpec((1, H1 * C1), lambda i: (0, 0)),
        ],
        out_specs=pl.BlockSpec((1, H1, H1 * C1), lambda i: (i, 0, 0)),
        compiler_params=pltpu.CompilerParams(dimension_semantics=("parallel",)),
    )(x2d, w1t, b1t)


# ----------------------------------------------------------------------------
# Kernel 2: conv2 (32->64, 3x3, VALID) + ReLU + fused 2x2 max-pool.  One image per step.
#   x_ref : (1, 26, 26, 32)   conv1 output, NHWC
#   w_ref : (3, 3, 32, 64)    HWIO weights
#   b_ref : (1, 64)
#   o_ref : (1, 12, 12, 64)   pooled output, NHWC
#   s_ref : VMEM (24, 24, 64) scratch holding the un-pooled activation
# ----------------------------------------------------------------------------
def _conv2_pool_kernel(x_ref, w_ref, b_ref, o_ref, s_ref):
    # conv as accumulation of 9 shifted-window matmuls (in-VMEM, no HBM im2col).
    acc = jnp.zeros((H2 * H2, C2), jnp.float32)
    for ky in range(3):
        for kx in range(3):
            xs = x_ref[0, ky:ky + H2, kx:kx + H2, :].reshape(H2 * H2, C1)
            acc = acc + jnp.dot(xs, w_ref[ky, kx],
                                preferred_element_type=jnp.float32)
    acc = jnp.maximum(acc + b_ref[...], 0.0)

    # Fused 2x2 max-pool: park the activation in VMEM scratch, pool columns (x) with
    # stride-2 sublane reads, then pool rows (y) with a leading-dim split.
    s_ref[...] = acc.reshape(H2, H2, C2)
    xp = jnp.maximum(s_ref[:, pl.ds(0, HP, 2), :],
                     s_ref[:, pl.ds(1, HP, 2), :])        # (24, 12, 64)
    xp = xp.reshape(HP, 2, HP, C2)                        # split leading 24 -> (12, 2)
    o_ref[0] = jnp.maximum(xp[:, 0], xp[:, 1])            # (12, 12, 64)


def conv2_relu_pool(y1, w2, b2):
    n = y1.shape[0]
    return pl.pallas_call(
        _conv2_pool_kernel,
        out_shape=jax.ShapeDtypeStruct((n, HP, HP, C2), jnp.float32),
        grid=(n,),
        in_specs=[
            pl.BlockSpec((1, H1, H1, C1), lambda i: (i, 0, 0, 0)),
            pl.BlockSpec((3, 3, C1, C2), lambda i: (0, 0, 0, 0)),
            pl.BlockSpec((1, C2), lambda i: (0, 0)),
        ],
        out_specs=pl.BlockSpec((1, HP, HP, C2), lambda i: (i, 0, 0, 0)),
        scratch_shapes=[pltpu.VMEM((H2, H2, C2), jnp.float32)],
        compiler_params=pltpu.CompilerParams(dimension_semantics=("parallel",)),
    )(y1, w2, b2)


# ----------------------------------------------------------------------------
# Kernel 3: fused fc1 + ReLU + fc2 + log_softmax, K-tiled over the 9216 input features.
#   grid = (M tiles [parallel], K tiles [arbitrary]);  acc_ref: VMEM (tm, 128) f32.
# ----------------------------------------------------------------------------
def _fc_head_kernel(x_ref, w1_ref, b1_ref, w2_ref, b2_ref, o_ref, acc_ref):
    k = pl.program_id(1)

    @pl.when(k == 0)
    def _():
        acc_ref[...] = jnp.zeros_like(acc_ref)

    acc_ref[...] += jnp.dot(x_ref[...], w1_ref[...],
                            preferred_element_type=jnp.float32)

    @pl.when(k == pl.num_programs(1) - 1)
    def _():
        h = jnp.maximum(acc_ref[...] + b1_ref[...], 0.0)                  # fc1 + relu
        logits = jnp.dot(h, w2_ref[...],
                         preferred_element_type=jnp.float32) + b2_ref[...]  # fc2
        m = jnp.max(logits, axis=-1, keepdims=True)
        s = logits - m
        out = s - jnp.log(jnp.sum(jnp.exp(s), axis=-1, keepdims=True))    # log_softmax
        o_ref[...] = out.astype(o_ref.dtype)


def fc_head(flat, w1, b1, w2, b2, *, tk=2304):
    m, k_dim = flat.shape
    assert k_dim == K_FC and K_FC % tk == 0
    # Always tile M: pad the batch up and keep tiles bounded regardless of batch size.
    if m >= 128:
        mp = pl.cdiv(m, 128) * 128
        tm = 128
    else:
        mp = max(8, pl.cdiv(m, 8) * 8)
        tm = mp
    xp = flat if mp == m else jnp.pad(flat, ((0, mp - m), (0, 0)))
    grid = (mp // tm, K_FC // tk)
    out = pl.pallas_call(
        _fc_head_kernel,
        out_shape=jax.ShapeDtypeStruct((mp, N_CLS), jnp.float32),
        grid=grid,
        in_specs=[
            pl.BlockSpec((tm, tk), lambda i, k: (i, k)),
            pl.BlockSpec((tk, N_HID), lambda i, k: (k, 0)),
            pl.BlockSpec((1, N_HID), lambda i, k: (0, 0)),
            pl.BlockSpec((N_HID, N_CLS), lambda i, k: (0, 0)),
            pl.BlockSpec((1, N_CLS), lambda i, k: (0, 0)),
        ],
        out_specs=pl.BlockSpec((tm, N_CLS), lambda i, k: (i, 0)),
        scratch_shapes=[pltpu.VMEM((tm, N_HID), jnp.float32)],
        compiler_params=pltpu.CompilerParams(
            dimension_semantics=("parallel", "arbitrary"),
            vmem_limit_bytes=32 * 1024 * 1024),
    )(xp, w1, b1, w2, b2)
    return out[:m]


# ----------------------------------------------------------------------------
# One-time host-side repack of the PyTorch-convention weights into kernel layouts.
# ----------------------------------------------------------------------------
def prepare_params(params):
    w1 = np.asarray(params["conv1_w"], np.float32)             # (32, 1, 3, 3)  OIHW
    b1 = np.asarray(params["conv1_b"], np.float32)             # (32,)
    # Toeplitz expansion: conv1 over one row window becomes a (28 -> 26*32) matmul.
    w1t = np.zeros((3, H_IN, H1 * C1), np.float32)
    for ky in range(3):
        for kx in range(3):
            for xx in range(H1):
                w1t[ky, xx + kx, xx * C1:(xx + 1) * C1] = w1[:, 0, ky, kx]
    b1t = np.tile(b1, H1).reshape(1, H1 * C1)

    w2 = np.asarray(params["conv2_w"], np.float32).transpose(2, 3, 1, 0)   # HWIO (3,3,32,64)
    b2 = np.asarray(params["conv2_b"], np.float32).reshape(1, C2)

    # fc1 columns permuted from NCHW-flatten (c,h,w) to NHWC-flatten (h,w,c) order, so no
    # activation transpose is needed before the fc head.
    fw1 = np.asarray(params["fc1_w"], np.float32)               # (128, 9216)
    fw1 = fw1.reshape(N_HID, C2, HP, HP).transpose(0, 2, 3, 1).reshape(N_HID, K_FC).T
    fb1 = np.asarray(params["fc1_b"], np.float32).reshape(1, N_HID)
    fw2 = np.asarray(params["fc2_w"], np.float32).T             # (128, 10)
    fb2 = np.asarray(params["fc2_b"], np.float32).reshape(1, N_CLS)

    pp = dict(conv1_wt=w1t, conv1_bt=b1t, conv2_w=w2, conv2_b=b2,
              fc1_w=fw1, fc1_b=fb1, fc2_w=fw2, fc2_b=fb2)
    return {k: jnp.asarray(v) for k, v in pp.items()}


# ----------------------------------------------------------------------------
# Full forward pass.
# ----------------------------------------------------------------------------
def dnn_forward(x_nchw, pp):
    n = x_nchw.shape[0]
    assert x_nchw.shape[1:] == (1, H_IN, H_IN)
    x2d = x_nchw.reshape(n, H_IN, H_IN)                       # C_in = 1 -> free squeeze
    y1 = conv1_relu(x2d, pp["conv1_wt"], pp["conv1_bt"])      # (n, 26, 832), lane-dense
    y1 = y1.reshape(n, H1, H1, C1)                            # free row-major reinterpret
    y2 = conv2_relu_pool(y1, pp["conv2_w"], pp["conv2_b"])    # (n, 12, 12, 64)
    # dropout1: identity at inference
    flat = y2.reshape(n, K_FC)                                # NHWC flatten, free reshape
    # dropout2: identity at inference
    return fc_head(flat, pp["fc1_w"], pp["fc1_b"], pp["fc2_w"], pp["fc2_b"])


# ----------------------------------------------------------------------------
# Pure-JAX reference (uses the original PyTorch-convention parameters).
# ----------------------------------------------------------------------------
def ref_forward(x, params):
    dn = ("NCHW", "OIHW", "NCHW")
    y = lax.conv_general_dilated(x, params["conv1_w"], (1, 1), "VALID",
                                 dimension_numbers=dn)
    y = jnp.maximum(y + params["conv1_b"][None, :, None, None], 0.0)
    y = lax.conv_general_dilated(y, params["conv2_w"], (1, 1), "VALID",
                                 dimension_numbers=dn)
    y = jnp.maximum(y + params["conv2_b"][None, :, None, None], 0.0)
    nb = y.shape[0]
    y = y.reshape(nb, 64, 12, 2, 12, 2).max(axis=(3, 5))      # maxpool 2x2
    f = y.reshape(nb, -1)
    h = jnp.maximum(f @ params["fc1_w"].T + params["fc1_b"], 0.0)
    logits = h @ params["fc2_w"].T + params["fc2_b"]
    return jax.nn.log_softmax(logits, axis=1)


# ----------------------------------------------------------------------------
# Main
# ----------------------------------------------------------------------------
if __name__ == "__main__":
    key = jax.random.PRNGKey(0)
    ks = jax.random.split(key, 9)

    # Deterministic synthetic parameters with the module's shapes (PyTorch conventions).
    params = {
        "conv1_w": jax.random.normal(ks[0], (32, 1, 3, 3), jnp.float32) * 0.10,
        "conv1_b": jax.random.normal(ks[1], (32,), jnp.float32) * 0.10,
        "conv2_w": jax.random.normal(ks[2], (64, 32, 3, 3), jnp.float32) * 0.05,
        "conv2_b": jax.random.normal(ks[3], (64,), jnp.float32) * 0.05,
        "fc1_w": jax.random.normal(ks[4], (128, 9216), jnp.float32) * 0.01,
        "fc1_b": jax.random.normal(ks[5], (128,), jnp.float32) * 0.01,
        "fc2_w": jax.random.normal(ks[6], (10, 128), jnp.float32) * 0.05,
        "fc2_b": jax.random.normal(ks[7], (10,), jnp.float32) * 0.05,
    }

    # Input: batch=2, NCHW (1, 28, 28) — the spatial size the fc1=9216 layer implies.
    x = jax.random.normal(ks[8], (2, 1, 28, 28), jnp.float32)

    pp = prepare_params(params)      # one-time weight repack (Toeplitz conv1, HWIO conv2,
                                     # NHWC-permuted fc1)

    out = jax.jit(dnn_forward)(x, pp)
    out = jax.block_until_ready(out)

    ref = ref_forward(x, params)
    np.testing.assert_allclose(np.asarray(out), np.asarray(ref), atol=1e-3, rtol=1e-3)

    print("KERNEL_OK")
</pallas_src>

<mosaic_0001>
module attributes {stable_mosaic.version = 11 : i64} {
  func.func @_conv1_kernel(%arg0: i32, %arg1: memref<1x28x28xf32, #tpu.memory_space<vmem>>, %arg2: memref<3x28x832xf32, #tpu.memory_space<vmem>>, %arg3: memref<1x832xf32, #tpu.memory_space<vmem>>, %arg4: memref<1x26x832xf32, #tpu.memory_space<vmem>>) attributes {dimension_semantics = [#tpu.dimension_semantics<parallel>], iteration_bounds = array<i64: 2>, scalar_prefetch = 0 : i64, scratch_operands = 0 : i64, tpu.core_type = #tpu.core_type<tc>, window_params = [{transform_indices = @transform_0, window_bounds = array<i64: 1, 28, 28>}, {pipeline_mode = #tpu.pipeline_mode<synchronous>, transform_indices = @transform_1, window_bounds = array<i64: 3, 28, 832>}, {pipeline_mode = #tpu.pipeline_mode<synchronous>, transform_indices = @transform_2, window_bounds = array<i64: 1, 832>}, {transform_indices = @transform_3, window_bounds = array<i64: 1, 26, 832>}]} {
    %cst = arith.constant 0.000000e+00 : f32
    %0 = vector.broadcast %cst : f32 to vector<26x832xf32>
    %c0 = arith.constant 0 : index
    %c0_0 = arith.constant 0 : index
    %c0_1 = arith.constant 0 : index
    %1 = vector.load %arg1[%c0, %c0_0, %c0_1] : memref<1x28x28xf32, #tpu.memory_space<vmem>>, vector<1x26x28xf32>
    %2 = vector.shape_cast %1 : vector<1x26x28xf32> to vector<26x28xf32>
    %c0_2 = arith.constant 0 : index
    %c0_3 = arith.constant 0 : index
    %c0_4 = arith.constant 0 : index
    %3 = vector.load %arg2[%c0_2, %c0_3, %c0_4] : memref<3x28x832xf32, #tpu.memory_space<vmem>>, vector<1x28x832xf32>
    %4 = vector.shape_cast %3 : vector<1x28x832xf32> to vector<28x832xf32>
    %cst_5 = arith.constant dense<0.000000e+00> : vector<26x832xf32>
    %5 = tpu.matmul %2, %4, %cst_5 {dimension_numbers = #tpu.dot_dimension_numbers<[1], [0], [0], [1], [0, 0, 1, 1], [], []>} : vector<26x28xf32>, vector<28x832xf32>, vector<26x832xf32> -> vector<26x832xf32>
    %6 = arith.addf %0, %5 : vector<26x832xf32>
    %c0_6 = arith.constant 0 : index
    %c1 = arith.constant 1 : index
    %c0_7 = arith.constant 0 : index
    %7 = vector.load %arg1[%c0_6, %c1, %c0_7] : memref<1x28x28xf32, #tpu.memory_space<vmem>>, vector<1x26x28xf32>
    %8 = vector.shape_cast %7 : vector<1x26x28xf32> to vector<26x28xf32>
    %c1_8 = arith.constant 1 : index
    %c0_9 = arith.constant 0 : index
    %c0_10 = arith.constant 0 : index
    %9 = vector.load %arg2[%c1_8, %c0_9, %c0_10] : memref<3x28x832xf32, #tpu.memory_space<vmem>>, vector<1x28x832xf32>
    %10 = vector.shape_cast %9 : vector<1x28x832xf32> to vector<28x832xf32>
    %cst_11 = arith.constant dense<0.000000e+00> : vector<26x832xf32>
    %11 = tpu.matmul %8, %10, %cst_11 {dimension_numbers = #tpu.dot_dimension_numbers<[1], [0], [0], [1], [0, 0, 1, 1], [], []>} : vector<26x28xf32>, vector<28x832xf32>, vector<26x832xf32> -> vector<26x832xf32>
    %12 = arith.addf %6, %11 : vector<26x832xf32>
    %c0_12 = arith.constant 0 : index
    %c2 = arith.constant 2 : index
    %c0_13 = arith.constant 0 : index
    %13 = vector.load %arg1[%c0_12, %c2, %c0_13] : memref<1x28x28xf32, #tpu.memory_space<vmem>>, vector<1x26x28xf32>
    %14 = vector.shape_cast %13 : vector<1x26x28xf32> to vector<26x28xf32>
    %c2_14 = arith.constant 2 : index
    %c0_15 = arith.constant 0 : index
    %c0_16 = arith.constant 0 : index
    %15 = vector.load %arg2[%c2_14, %c0_15, %c0_16] : memref<3x28x832xf32, #tpu.memory_space<vmem>>, vector<1x28x832xf32>
    %16 = vector.shape_cast %15 : vector<1x28x832xf32> to vector<28x832xf32>
    %cst_17 = arith.constant dense<0.000000e+00> : vector<26x832xf32>
    %17 = tpu.matmul %14, %16, %cst_17 {dimension_numbers = #tpu.dot_dimension_numbers<[1], [0], [0], [1], [0, 0, 1, 1], [], []>} : vector<26x28xf32>, vector<28x832xf32>, vector<26x832xf32> -> vector<26x832xf32>
    %18 = arith.addf %12, %17 : vector<26x832xf32>
    %c0_18 = arith.constant 0 : index
    %c0_19 = arith.constant 0 : index
    %19 = vector.load %arg3[%c0_18, %c0_19] : memref<1x832xf32, #tpu.memory_space<vmem>>, vector<1x832xf32>
    %20 = vector.broadcast %19 : vector<1x832xf32> to vector<26x832xf32>
    %21 = arith.addf %18, %20 : vector<26x832xf32>
    %cst_20 = arith.constant 0.000000e+00 : f32
    %22 = vector.broadcast %cst_20 : f32 to vector<26x832xf32>
    %23 = arith.maximumf %21, %22 : vector<26x832xf32>
    %c0_21 = arith.constant 0 : index
    %c0_22 = arith.constant 0 : index
    %c0_23 = arith.constant 0 : index
    %24 = vector.load %arg4[%c0_21, %c0_22, %c0_23] : memref<1x26x832xf32, #tpu.memory_space<vmem>>, vector<1x26x832xf32>
    %25 = vector.shape_cast %24 : vector<1x26x832xf32> to vector<26x832xf32>
    %26 = vector.shape_cast %23 : vector<26x832xf32> to vector<1x26x832xf32>
    tpu.vector_store %arg4[%c0_21, %c0_22, %c0_23], %26 {strides = array<i32>} : memref<1x26x832xf32, #tpu.memory_space<vmem>>, vector<1x26x832xf32>,
    return
  }
  func.func @transform_0(%arg0: i32) -> (i32, i32, i32) {
    %c0_i32 = arith.constant 0 : i32
    %c0_i32_0 = arith.constant 0 : i32
    %c0_i32_1 = arith.constant 0 : i32
    return %arg0, %c0_i32, %c0_i32_0 : i32, i32, i32
  }
  func.func @transform_1(%arg0: i32) -> (i32, i32, i32) {
    %c0_i32 = arith.constant 0 : i32
    %c0_i32_0 = arith.constant 0 : i32
    %c0_i32_1 = arith.constant 0 : i32
    %c0_i32_2 = arith.constant 0 : i32
    return %c0_i32, %c0_i32_0, %c0_i32_1 : i32, i32, i32
  }
  func.func @transform_2(%arg0: i32) -> (i32, i32) {
    %c0_i32 = arith.constant 0 : i32
    %c0_i32_0 = arith.constant 0 : i32
    %c0_i32_1 = arith.constant 0 : i32
    return %c0_i32, %c0_i32_0 : i32, i32
  }
  func.func @transform_3(%arg0: i32) -> (i32, i32, i32) {
    %c0_i32 = arith.constant 0 : i32
    %c0_i32_0 = arith.constant 0 : i32
    %c0_i32_1 = arith.constant 0 : i32
    return %arg0, %c0_i32, %c0_i32_0 : i32, i32, i32
  }
}

module attributes {stable_mosaic.version = 11 : i64} {
  func.func @_conv2_pool_kernel(%arg0: i32, %arg1: memref<1x26x26x32xf32, #tpu.memory_space<vmem>>, %arg2: memref<3x3x32x64xf32, #tpu.memory_space<vmem>>, %arg3: memref<1x64xf32, #tpu.memory_space<vmem>>, %arg4: memref<1x12x12x64xf32, #tpu.memory_space<vmem>>, %arg5: memref<24x24x64xf32, #tpu.memory_space<vmem>>) attributes {dimension_semantics = [#tpu.dimension_semantics<parallel>], iteration_bounds = array<i64: 2>, scalar_prefetch = 0 : i64, scratch_operands = 1 : i64, tpu.core_type = #tpu.core_type<tc>, window_params = [{transform_indices = @transform_0, window_bounds = array<i64: 1, 26, 26, 32>}, {pipeline_mode = #tpu.pipeline_mode<synchronous>, transform_indices = @transform_1, window_bounds = array<i64: 3, 3, 32, 64>}, {pipeline_mode = #tpu.pipeline_mode<synchronous>, transform_indices = @transform_2, window_bounds = array<i64: 1, 64>}, {transform_indices = @transform_3, window_bounds = array<i64: 1, 12, 12, 64>}]} {
    %cst = arith.constant 0.000000e+00 : f32
    %0 = vector.broadcast %cst : f32 to vector<576x64xf32>
    %c0 = arith.constant 0 : index
    %c0_0 = arith.constant 0 : index
    %c0_1 = arith.constant 0 : index
    %c0_2 = arith.constant 0 : index
    %1 = vector.load %arg1[%c0, %c0_0, %c0_1, %c0_2] : memref<1x26x26x32xf32, #tpu.memory_space<vmem>>, vector<1x24x24x32xf32>
    %2 = vector.shape_cast %1 : vector<1x24x24x32xf32> to vector<24x24x32xf32>
    %3 = vector.shape_cast %2 : vector<24x24x32xf32> to vector<576x32xf32>
    %c0_3 = arith.constant 0 : index
    %c0_4 = arith.constant 0 : index
    %c0_5 = arith.constant 0 : index
    %c0_6 = arith.constant 0 : index
    %4 = vector.load %arg2[%c0_3, %c0_4, %c0_5, %c0_6] : memref<3x3x32x64xf32, #tpu.memory_space<vmem>>, vector<1x1x32x64xf32>
    %5 = vector.shape_cast %4 : vector<1x1x32x64xf32> to vector<32x64xf32>
    %cst_7 = arith.constant dense<0.000000e+00> : vector<576x64xf32>
    %6 = tpu.matmul %3, %5, %cst_7 {dimension_numbers = #tpu.dot_dimension_numbers<[1], [0], [0], [1], [0, 0, 1, 1], [], []>} : vector<576x32xf32>, vector<32x64xf32>, vector<576x64xf32> -> vector<576x64xf32>
    %7 = arith.addf %0, %6 : vector<576x64xf32>
    %c0_8 = arith.constant 0 : index
    %c0_9 = arith.constant 0 : index
    %c1 = arith.constant 1 : index
    %c0_10 = arith.constant 0 : index
    %8 = vector.load %arg1[%c0_8, %c0_9, %c1, %c0_10] : memref<1x26x26x32xf32, #tpu.memory_space<vmem>>, vector<1x24x24x32xf32>
    %9 = vector.shape_cast %8 : vector<1x24x24x32xf32> to vector<24x24x32xf32>
    %10 = vector.shape_cast %9 : vector<24x24x32xf32> to vector<576x32xf32>
    %c0_11 = arith.constant 0 : index
    %c1_12 = arith.constant 1 : index
    %c0_13 = arith.constant 0 : index
    %c0_14 = arith.constant 0 : index
    %11 = vector.load %arg2[%c0_11, %c1_12, %c0_13, %c0_14] : memref<3x3x32x64xf32, #tpu.memory_space<vmem>>, vector<1x1x32x64xf32>
    %12 = vector.shape_cast %11 : vector<1x1x32x64xf32> to vector<32x64xf32>
    %cst_15 = arith.constant dense<0.000000e+00> : vector<576x64xf32>
    %13 = tpu.matmul %10, %12, %cst_15 {dimension_numbers = #tpu.dot_dimension_numbers<[1], [0], [0], [1], [0, 0, 1, 1], [], []>} : vector<576x32xf32>, vector<32x64xf32>, vector<576x64xf32> -> vector<576x64xf32>
    %14 = arith.addf %7, %13 : vector<576x64xf32>
    %c0_16 = arith.constant 0 : index
    %c0_17 = arith.constant 0 : index
    %c2 = arith.constant 2 : index
    %c0_18 = arith.constant 0 : index
    %15 = vector.load %arg1[%c0_16, %c0_17, %c2, %c0_18] : memref<1x26x26x32xf32, #tpu.memory_space<vmem>>, vector<1x24x24x32xf32>
    %16 = vector.shape_cast %15 : vector<1x24x24x32xf32> to vector<24x24x32xf32>
    %17 = vector.shape_cast %16 : vector<24x24x32xf32> to vector<576x32xf32>
    %c0_19 = arith.constant 0 : index
    %c2_20 = arith.constant 2 : index
    %c0_21 = arith.constant 0 : index
    %c0_22 = arith.constant 0 : index
    %18 = vector.load %arg2[%c0_19, %c2_20, %c0_21, %c0_22] : memref<3x3x32x64xf32, #tpu.memory_space<vmem>>, vector<1x1x32x64xf32>
    %19 = vector.shape_cast %18 : vector<1x1x32x64xf32> to vector<32x64xf32>
    %cst_23 = arith.constant dense<0.000000e+00> : vector<576x64xf32>
    %20 = tpu.matmul %17, %19, %cst_23 {dimension_numbers = #tpu.dot_dimension_numbers<[1], [0], [0], [1], [0, 0, 1, 1], [], []>} : vector<576x32xf32>, vector<32x64xf32>, vector<576x64xf32> -> vector<576x64xf32>
    %21 = arith.addf %14, %20 : vector<576x64xf32>
    %c0_24 = arith.constant 0 : index
    %c1_25 = arith.constant 1 : index
    %c0_26 = arith.constant 0 : index
    %c0_27 = arith.constant 0 : index
    %22 = vector.load %arg1[%c0_24, %c1_25, %c0_26, %c0_27] : memref<1x26x26x32xf32, #tpu.memory_space<vmem>>, vector<1x24x24x32xf32>
    %23 = vector.shape_cast %22 : vector<1x24x24x32xf32> to vector<24x24x32xf32>
    %24 = vector.shape_cast %23 : vector<24x24x32xf32> to vector<576x32xf32>
    %c1_28 = arith.constant 1 : index
    %c0_29 = arith.constant 0 : index
    %c0_30 = arith.constant 0 : index
    %c0_31 = arith.constant 0 : index
    %25 = vector.load %arg2[%c1_28, %c0_29, %c0_30, %c0_31] : memref<3x3x32x64xf32, #tpu.memory_space<vmem>>, vector<1x1x32x64xf32>
    %26 = vector.shape_cast %25 : vector<1x1x32x64xf32> to vector<32x64xf32>
    %cst_32 = arith.constant dense<0.000000e+00> : vector<576x64xf32>
    %27 = tpu.matmul %24, %26, %cst_32 {dimension_numbers = #tpu.dot_dimension_numbers<[1], [0], [0], [1], [0, 0, 1, 1], [], []>} : vector<576x32xf32>, vector<32x64xf32>, vector<576x64xf32> -> vector<576x64xf32>
    %28 = arith.addf %21, %27 : vector<576x64xf32>
    %c0_33 = arith.constant 0 : index
    %c1_34 = arith.constant 1 : index
    %c1_35 = arith.constant 1 : index
    %c0_36 = arith.constant 0 : index
    %29 = vector.load %arg1[%c0_33, %c1_34, %c1_35, %c0_36] : memref<1x26x26x32xf32, #tpu.memory_space<vmem>>, vector<1x24x24x32xf32>
    %30 = vector.shape_cast %29 : vector<1x24x24x32xf32> to vector<24x24x32xf32>
    %31 = vector.shape_cast %30 : vector<24x24x32xf32> to vector<576x32xf32>
    %c1_37 = arith.constant 1 : index
    %c1_38 = arith.constant 1 : index
    %c0_39 = arith.constant 0 : index
    %c0_40 = arith.constant 0 : index
    %32 = vector.load %arg2[%c1_37, %c1_38, %c0_39, %c0_40] : memref<3x3x32x64xf32, #tpu.memory_space<vmem>>, vector<1x1x32x64xf32>
    %33 = vector.shape_cast %32 : vector<1x1x32x64xf32> to vector<32x64xf32>
    %cst_41 = arith.constant dense<0.000000e+00> : vector<576x64xf32>
    %34 = tpu.matmul %31, %33, %cst_41 {dimension_numbers = #tpu.dot_dimension_numbers<[1], [0], [0], [1], [0, 0, 1, 1], [], []>} : vector<576x32xf32>, vector<32x64xf32>, vector<576x64xf32> -> vector<576x64xf32>
    %35 = arith.addf %28, %34 : vector<576x64xf32>
    %c0_42 = arith.constant 0 : index
    %c1_43 = arith.constant 1 : index
    %c2_44 = arith.constant 2 : index
    %c0_45 = arith.constant 0 : index
    %36 = vector.load %arg1[%c0_42, %c1_43, %c2_44, %c0_45] : memref<1x26x26x32xf32, #tpu.memory_space<vmem>>, vector<1x24x24x32xf32>
    %37 = vector.shape_cast %36 : vector<1x24x24x32xf32> to vector<24x24x32xf32>
    %38 = vector.shape_cast %37 : vector<24x24x32xf32> to vector<576x32xf32>
    %c1_46 = arith.constant 1 : index
    %c2_47 = arith.constant 2 : index
    %c0_48 = arith.constant 0 : index
    %c0_49 = arith.constant 0 : index
    %39 = vector.load %arg2[%c1_46, %c2_47, %c0_48, %c0_49] : memref<3x3x32x64xf32, #tpu.memory_space<vmem>>, vector<1x1x32x64xf32>
    %40 = vector.shape_cast %39 : vector<1x1x32x64xf32> to vector<32x64xf32>
    %cst_50 = arith.constant dense<0.000000e+00> : vector<576x64xf32>
    %41 = tpu.matmul %38, %40, %cst_50 {dimension_numbers = #tpu.dot_dimension_numbers<[1], [0], [0], [1], [0, 0, 1, 1], [], []>} : vector<576x32xf32>, vector<32x64xf32>, vector<576x64xf32> -> vector<576x64xf32>
    %42 = arith.addf %35, %41 : vector<576x64xf32>
    %c0_51 = arith.constant 0 : index
    %c2_52 = arith.constant 2 : index
    %c0_53 = arith.constant 0 : index
    %c0_54 = arith.constant 0 : index
    %43 = vector.load %arg1[%c0_51, %c2_52, %c0_53, %c0_54] : memref<1x26x26x32xf32, #tpu.memory_space<vmem>>, vector<1x24x24x32xf32>
    %44 = vector.shape_cast %43 : vector<1x24x24x32xf32> to vector<24x24x32xf32>
    %45 = vector.shape_cast %44 : vector<24x24x32xf32> to vector<576x32xf32>
    %c2_55 = arith.constant 2 : index
    %c0_56 = arith.constant 0 : index
    %c0_57 = arith.constant 0 : index
    %c0_58 = arith.constant 0 : index
    %46 = vector.load %arg2[%c2_55, %c0_56, %c0_57, %c0_58] : memref<3x3x32x64xf32, #tpu.memory_space<vmem>>, vector<1x1x32x64xf32>
    %47 = vector.shape_cast %46 : vector<1x1x32x64xf32> to vector<32x64xf32>
    %cst_59 = arith.constant dense<0.000000e+00> : vector<576x64xf32>
    %48 = tpu.matmul %45, %47, %cst_59 {dimension_numbers = #tpu.dot_dimension_numbers<[1], [0], [0], [1], [0, 0, 1, 1], [], []>} : vector<576x32xf32>, vector<32x64xf32>, vector<576x64xf32> -> vector<576x64xf32>
    %49 = arith.addf %42, %48 : vector<576x64xf32>
    %c0_60 = arith.constant 0 : index
    %c2_61 = arith.constant 2 : index
    %c1_62 = arith.constant 1 : index
    %c0_63 = arith.constant 0 : index
    %50 = vector.load %arg1[%c0_60, %c2_61, %c1_62, %c0_63] : memref<1x26x26x32xf32, #tpu.memory_space<vmem>>, vector<1x24x24x32xf32>
    %51 = vector.shape_cast %50 : vector<1x24x24x32xf32> to vector<24x24x32xf32>
    %52 = vector.shape_cast %51 : vector<24x24x32xf32> to vector<576x32xf32>
    %c2_64 = arith.constant 2 : index
    %c1_65 = arith.constant 1 : index
    %c0_66 = arith.constant 0 : index
    %c0_67 = arith.constant 0 : index
    %53 = vector.load %arg2[%c2_64, %c1_65, %c0_66, %c0_67] : memref<3x3x32x64xf32, #tpu.memory_space<vmem>>, vector<1x1x32x64xf32>
    %54 = vector.shape_cast %53 : vector<1x1x32x64xf32> to vector<32x64xf32>
    %cst_68 = arith.constant dense<0.000000e+00> : vector<576x64xf32>
    %55 = tpu.matmul %52, %54, %cst_68 {dimension_numbers = #tpu.dot_dimension_numbers<[1], [0], [0], [1], [0, 0, 1, 1], [], []>} : vector<576x32xf32>, vector<32x64xf32>, vector<576x64xf32> -> vector<576x64xf32>
    %56 = arith.addf %49, %55 : vector<576x64xf32>
    %c0_69 = arith.constant 0 : index
    %c2_70 = arith.constant 2 : index
    %c2_71 = arith.constant 2 : index
    %c0_72 = arith.constant 0 : index
    %57 = vector.load %arg1[%c0_69, %c2_70, %c2_71, %c0_72] : memref<1x26x26x32xf32, #tpu.memory_space<vmem>>, vector<1x24x24x32xf32>
    %58 = vector.shape_cast %57 : vector<1x24x24x32xf32> to vector<24x24x32xf32>
    %59 = vector.shape_cast %58 : vector<24x24x32xf32> to vector<576x32xf32>
    %c2_73 = arith.constant 2 : index
    %c2_74 = arith.constant 2 : index
    %c0_75 = arith.constant 0 : index
    %c0_76 = arith.constant 0 : index
    %60 = vector.load %arg2[%c2_73, %c2_74, %c0_75, %c0_76] : memref<3x3x32x64xf32, #tpu.memory_space<vmem>>, vector<1x1x32x64xf32>
    %61 = vector.shape_cast %60 : vector<1x1x32x64xf32> to vector<32x64xf32>
    %cst_77 = arith.constant dense<0.000000e+00> : vector<576x64xf32>
    %62 = tpu.matmul %59, %61, %cst_77 {dimension_numbers = #tpu.dot_dimension_numbers<[1], [0], [0], [1], [0, 0, 1, 1], [], []>} : vector<576x32xf32>, vector<32x64xf32>, vector<576x64xf32> -> vector<576x64xf32>
    %63 = arith.addf %56, %62 : vector<576x64xf32>
    %c0_78 = arith.constant 0 : index
    %c0_79 = arith.constant 0 : index
    %64 = vector.load %arg3[%c0_78, %c0_79] : memref<1x64xf32, #tpu.memory_space<vmem>>, vector<1x64xf32>
    %65 = vector.broadcast %64 : vector<1x64xf32> to vector<576x64xf32>
    %66 = arith.addf %63, %65 : vector<576x64xf32>
    %cst_80 = arith.constant 0.000000e+00 : f32
    %67 = vector.broadcast %cst_80 : f32 to vector<576x64xf32>
    %68 = arith.maximumf %66, %67 : vector<576x64xf32>
    %69 = vector.shape_cast %68 : vector<576x64xf32> to vector<24x24x64xf32>
    %c0_81 = arith.constant 0 : index
    %c0_82 = arith.constant 0 : index
    %c0_83 = arith.constant 0 : index
    %70 = vector.load %arg5[%c0_81, %c0_82, %c0_83] : memref<24x24x64xf32, #tpu.memory_space<vmem>>, vector<24x24x64xf32>
    tpu.vector_store %arg5[%c0_81, %c0_82, %c0_83], %69 {strides = array<i32>} : memref<24x24x64xf32, #tpu.memory_space<vmem>>, vector<24x24x64xf32>,
    %c0_84 = arith.constant 0 : index
    %c0_85 = arith.constant 0 : index
    %c0_86 = arith.constant 0 : index
    %71 = tpu.strided_load %arg5[%c0_84, %c0_85, %c0_86] {strides = array<i32: 1, 2, 1>} : memref<24x24x64xf32, #tpu.memory_space<vmem>>, vector<24x12x64xf32>
    %c0_87 = arith.constant 0 : index
    %c1_88 = arith.constant 1 : index
    %c0_89 = arith.constant 0 : index
    %72 = tpu.strided_load %arg5[%c0_87, %c1_88, %c0_89] {strides = array<i32: 1, 2, 1>} : memref<24x24x64xf32, #tpu.memory_space<vmem>>, vector<24x12x64xf32>
    %73 = arith.maximumf %71, %72 : vector<24x12x64xf32>
    %74 = vector.shape_cast %73 : vector<24x12x64xf32> to vector<12x2x12x64xf32>
    %75 = vector.extract_strided_slice %74 {offsets = [0, 0, 0, 0], sizes = [12, 1, 12, 64], strides = [1, 1, 1, 1]} : vector<12x2x12x64xf32> to vector<12x1x12x64xf32>
    %76 = vector.shape_cast %75 : vector<12x1x12x64xf32> to vector<12x12x64xf32>
    %77 = vector.extract_strided_slice %74 {offsets = [0, 1, 0, 0], sizes = [12, 1, 12, 64], strides = [1, 1, 1, 1]} : vector<12x2x12x64xf32> to vector<12x1x12x64xf32>
    %78 = vector.shape_cast %77 : vector<12x1x12x64xf32> to vector<12x12x64xf32>
    %79 = arith.maximumf %76, %78 : vector<12x12x64xf32>
    %c0_90 = arith.constant 0 : index
    %c0_91 = arith.constant 0 : index
    %c0_92 = arith.constant 0 : index
    %c0_93 = arith.constant 0 : index
    %80 = vector.load %arg4[%c0_90, %c0_91, %c0_92, %c0_93] : memref<1x12x12x64xf32, #tpu.memory_space<vmem>>, vector<1x12x12x64xf32>
    %81 = vector.shape_cast %80 : vector<1x12x12x64xf32> to vector<12x12x64xf32>
    %82 = vector.shape_cast %79 : vector<12x12x64xf32> to vector<1x12x12x64xf32>
    tpu.vector_store %arg4[%c0_90, %c0_91, %c0_92, %c0_93], %82 {strides = array<i32>} : memref<1x12x12x64xf32, #tpu.memory_space<vmem>>, vector<1x12x12x64xf32>,
    return
  }
  func.func @transform_0(%arg0: i32) -> (i32, i32, i32, i32) {
    %c0_i32 = arith.constant 0 : i32
    %c0_i32_0 = arith.constant 0 : i32
    %c0_i32_1 = arith.constant 0 : i32
    %c0_i32_2 = arith.constant 0 : i32
    return %arg0, %c0_i32, %c0_i32_0, %c0_i32_1 : i32, i32, i32, i32
  }
  func.func @transform_1(%arg0: i32) -> (i32, i32, i32, i32) {
    %c0_i32 = arith.constant 0 : i32
    %c0_i32_0 = arith.constant 0 : i32
    %c0_i32_1 = arith.constant 0 : i32
    %c0_i32_2 = arith.constant 0 : i32
    %c0_i32_3 = arith.constant 0 : i32
    return %c0_i32, %c0_i32_0, %c0_i32_1, %c0_i32_2 : i32, i32, i32, i32
  }
  func.func @transform_2(%arg0: i32) -> (i32, i32) {
    %c0_i32 = arith.constant 0 : i32
    %c0_i32_0 = arith.constant 0 : i32
    %c0_i32_1 = arith.constant 0 : i32
    return %c0_i32, %c0_i32_0 : i32, i32
  }
  func.func @transform_3(%arg0: i32) -> (i32, i32, i32, i32) {
    %c0_i32 = arith.constant 0 : i32
    %c0_i32_0 = arith.constant 0 : i32
    %c0_i32_1 = arith.constant 0 : i32
    %c0_i32_2 = arith.constant 0 : i32
    return %arg0, %c0_i32, %c0_i32_0, %c0_i32_1 : i32, i32, i32, i32
  }
}

module attributes {stable_mosaic.version = 11 : i64} {
  func.func @_fc_head_kernel(%arg0: i32, %arg1: i32, %arg2: memref<8x2304xf32, #tpu.memory_space<vmem>>, %arg3: memref<2304x128xf32, #tpu.memory_space<vmem>>, %arg4: memref<1x128xf32, #tpu.memory_space<vmem>>, %arg5: memref<128x10xf32, #tpu.memory_space<vmem>>, %arg6: memref<1x10xf32, #tpu.memory_space<vmem>>, %arg7: memref<8x10xf32, #tpu.memory_space<vmem>>, %arg8: memref<8x128xf32, #tpu.memory_space<vmem>>) attributes {dimension_semantics = [#tpu.dimension_semantics<parallel>, #tpu.dimension_semantics<arbitrary>], iteration_bounds = array<i64: 1, 4>, scalar_prefetch = 0 : i64, scratch_operands = 1 : i64, tpu.core_type = #tpu.core_type<tc>, window_params = [{transform_indices = @transform_0, window_bounds = array<i64: 8, 2304>}, {transform_indices = @transform_1, window_bounds = array<i64: 2304, 128>}, {pipeline_mode = #tpu.pipeline_mode<synchronous>, transform_indices = @transform_2, window_bounds = array<i64: 1, 128>}, {pipeline_mode = #tpu.pipeline_mode<synchronous>, transform_indices = @transform_3, window_bounds = array<i64: 128, 10>}, {pipeline_mode = #tpu.pipeline_mode<synchronous>, transform_indices = @transform_4, window_bounds = array<i64: 1, 10>}, {transform_indices = @transform_5, window_bounds = array<i64: 8, 10>}]} {
    %c0_i32 = arith.constant 0 : i32
    %0 = arith.cmpi eq, %arg1, %c0_i32 : i32
    %1 = arith.extui %0 : i1 to i32
    %c0_i32_0 = arith.constant 0 : i32
    %2 = arith.cmpi ne, %1, %c0_i32_0 : i32
    scf.if %2 {
      %cst_9 = arith.constant 0.000000e+00 : f32
      %12 = vector.broadcast %cst_9 : f32 to vector<8x128xf32>
      %c0_10 = arith.constant 0 : index
      %c0_11 = arith.constant 0 : index
      %13 = vector.load %arg8[%c0_10, %c0_11] : memref<8x128xf32, #tpu.memory_space<vmem>>, vector<8x128xf32>
      tpu.vector_store %arg8[%c0_10, %c0_11], %12 {strides = array<i32>} : memref<8x128xf32, #tpu.memory_space<vmem>>, vector<8x128xf32>,
    } else {
    }
    %c0 = arith.constant 0 : index
    %c0_1 = arith.constant 0 : index
    %3 = vector.load %arg8[%c0, %c0_1] : memref<8x128xf32, #tpu.memory_space<vmem>>, vector<8x128xf32>
    %c0_2 = arith.constant 0 : index
    %c0_3 = arith.constant 0 : index
    %4 = vector.load %arg2[%c0_2, %c0_3] : memref<8x2304xf32, #tpu.memory_space<vmem>>, vector<8x2304xf32>
    %c0_4 = arith.constant 0 : index
    %c0_5 = arith.constant 0 : index
    %5 = vector.load %arg3[%c0_4, %c0_5] : memref<2304x128xf32, #tpu.memory_space<vmem>>, vector<2304x128xf32>
    %cst = arith.constant dense<0.000000e+00> : vector<8x128xf32>
    %6 = tpu.matmul %4, %5, %cst {dimension_numbers = #tpu.dot_dimension_numbers<[1], [0], [0], [1], [0, 0, 1, 1], [], []>} : vector<8x2304xf32>, vector<2304x128xf32>, vector<8x128xf32> -> vector<8x128xf32>
    %7 = arith.addf %3, %6 : vector<8x128xf32>
    %c0_6 = arith.constant 0 : index
    %c0_7 = arith.constant 0 : index
    %8 = vector.load %arg8[%c0_6, %c0_7] : memref<8x128xf32, #tpu.memory_space<vmem>>, vector<8x128xf32>
    tpu.vector_store %arg8[%c0_6, %c0_7], %7 {strides = array<i32>} : memref<8x128xf32, #tpu.memory_space<vmem>>, vector<8x128xf32>,
    %c3_i32 = arith.constant 3 : i32
    %9 = arith.cmpi eq, %arg1, %c3_i32 : i32
    %10 = arith.extui %9 : i1 to i32
    %c0_i32_8 = arith.constant 0 : i32
    %11 = arith.cmpi ne, %10, %c0_i32_8 : i32
    scf.if %11 {
      %c0_9 = arith.constant 0 : index
      %c0_10 = arith.constant 0 : index
      %12 = vector.load %arg8[%c0_9, %c0_10] : memref<8x128xf32, #tpu.memory_space<vmem>>, vector<8x128xf32>
      %c0_11 = arith.constant 0 : index
      %c0_12 = arith.constant 0 : index
      %13 = vector.load %arg4[%c0_11, %c0_12] : memref<1x128xf32, #tpu.memory_space<vmem>>, vector<1x128xf32>
      %14 = vector.broadcast %13 : vector<1x128xf32> to vector<8x128xf32>
      %15 = arith.addf %12, %14 : vector<8x128xf32>
      %cst_13 = arith.constant 0.000000e+00 : f32
      %16 = vector.broadcast %cst_13 : f32 to vector<8x128xf32>
      %17 = arith.maximumf %15, %16 : vector<8x128xf32>
      %c0_14 = arith.constant 0 : index
      %c0_15 = arith.constant 0 : index
      %18 = vector.load %arg5[%c0_14, %c0_15] : memref<128x10xf32, #tpu.memory_space<vmem>>, vector<128x10xf32>
      %cst_16 = arith.constant dense<0.000000e+00> : vector<8x10xf32>
      %19 = tpu.matmul %17, %18, %cst_16 {dimension_numbers = #tpu.dot_dimension_numbers<[1], [0], [0], [1], [0, 0, 1, 1], [], []>} : vector<8x128xf32>, vector<128x10xf32>, vector<8x10xf32> -> vector<8x10xf32>
      %c0_17 = arith.constant 0 : index
      %c0_18 = arith.constant 0 : index
      %20 = vector.load %arg6[%c0_17, %c0_18] : memref<1x10xf32, #tpu.memory_space<vmem>>, vector<1x10xf32>
      %21 = vector.broadcast %20 : vector<1x10xf32> to vector<8x10xf32>
      %22 = arith.addf %19, %21 : vector<8x10xf32>
      %cst_19 = arith.constant dense<0xFF800000> : vector<8xf32>
      %23 = vector.multi_reduction <maximumf>, %22, %cst_19 [1] : vector<8x10xf32> to vector<8xf32>
      %24 = vector.shape_cast %23 : vector<8xf32> to vector<8x1xf32>
      %25 = vector.broadcast %24 : vector<8x1xf32> to vector<8x10xf32>
      %26 = arith.subf %22, %25 : vector<8x10xf32>
      %27 = math.exp %26 : vector<8x10xf32>
      %cst_20 = arith.constant dense<0.000000e+00> : vector<8xf32>
      %28 = vector.multi_reduction <add>, %27, %cst_20 [1] : vector<8x10xf32> to vector<8xf32>
      %29 = vector.shape_cast %28 : vector<8xf32> to vector<8x1xf32>
      %30 = math.log %29 : vector<8x1xf32>
      %31 = vector.broadcast %30 : vector<8x1xf32> to vector<8x10xf32>
      %32 = arith.subf %26, %31 : vector<8x10xf32>
      %c0_21 = arith.constant 0 : index
      %c0_22 = arith.constant 0 : index
      %33 = vector.load %arg7[%c0_21, %c0_22] : memref<8x10xf32, #tpu.memory_space<vmem>>, vector<8x10xf32>
      tpu.vector_store %arg7[%c0_21, %c0_22], %32 {strides = array<i32>} : memref<8x10xf32, #tpu.memory_space<vmem>>, vector<8x10xf32>,
    } else {
    }
    return
  }
  func.func @transform_0(%arg0: i32, %arg1: i32) -> (i32, i32) {
    %c0_i32 = arith.constant 0 : i32
    return %arg0, %arg1 : i32, i32
  }
  func.func @transform_1(%arg0: i32, %arg1: i32) -> (i32, i32) {
    %c0_i32 = arith.constant 0 : i32
    %c0_i32_0 = arith.constant 0 : i32
    return %arg1, %c0_i32 : i32, i32
  }
  func.func @transform_2(%arg0: i32, %arg1: i32) -> (i32, i32) {
    %c0_i32 = arith.constant 0 : i32
    %c0_i32_0 = arith.constant 0 : i32
    %c0_i32_1 = arith.constant 0 : i32
    return %c0_i32, %c0_i32_0 : i32, i32
  }
  func.func @transform_3(%arg0: i32, %arg1: i32) -> (i32, i32) {
    %c0_i32 = arith.constant 0 : i32
    %c0_i32_0 = arith.constant 0 : i32
    %c0_i32_1 = arith.constant 0 : i32
    return %c0_i32, %c0_i32_0 : i32, i32
  }
  func.func @transform_4(%arg0: i32, %arg1: i32) -> (i32, i32) {
    %c0_i32 = arith.constant 0 : i32
    %c0_i32_0 = arith.constant 0 : i32
    %c0_i32_1 = arith.constant 0 : i32
    return %c0_i32, %c0_i32_0 : i32, i32
  }
  func.func @transform_5(%arg0: i32, %arg1: i32) -> (i32, i32) {
    %c0_i32 = arith.constant 0 : i32
    %c0_i32_0 = arith.constant 0 : i32
    return %arg0, %c0_i32 : i32, i32
  }
}

</mosaic_0001>

<bundles_post_ra>
// kernel: dnn_forward.3
= control target key start
LH: loop header
LB: loop body
LE: loop exit
PB: predicated region body
PF: predicated region fallthrough
CT: control target
= control target key end

     0   :  { %8 = vsyncpa [#allocation3], 0  ;;  %s2384_s0 = inlined_call_operand.vmem [shape: f32[2,28,28], index: 0, kind: input, shape index: {}]   ;;  %s2385_s1 = inlined_call_operand.hbm [shape: f32[3,28,832], index: 1, kind: input, shape index: {}]   ;;  %s2386_s2 = inlined_call_operand.hbm [shape: f32[1,832], index: 2, kind: input, shape index: {}]   ;;  %s2387_s3 = inlined_call_operand.vmem [shape: f32[2,26,832], index: 3, kind: output, shape index: {}]  }
   0x1   :  { %9 = vsyncpa [#allocation5], 0  ;;  %s1958_s12 = smov 0  }
   0x2 LB: > { %s1964_s13 = sadd.s32 4294967295, %s1931_s12   ;;  %p1684_p0 = scmp.ge.s32.totalorder %s1931_s12, 1  ;;  %s1931_s12 = sphi %s1958_s12, %s15_s12  }
   0x3   : > { %p114_p1 = scmp.lt.s32.totalorder %s1931_s12, 3  ;;  %s1933_s14 = smov [#allocation2]  }
   0x4   : > { %s126_s15 = sshll.u32 %s1933_s14, 4  ;;  %p1848_p3 = scmp.eq.s32.totalorder %s1964_s13, 0  ;;  %s127_s15 = int_to_ptr.vmem [resolvable:$true] %s126_s15 }
   0x5   : > { %p1968_p2 = pnand %p1684_p0, %p114_p1  ;;  %s1934_s17 = smov [#allocation4]  }
   0x6   : > { %s140_s18 = sshll.u32 %s1934_s17, 4  ;;  %s1876_s20 = scalar_lea.vmem %s127_s15, 10752  ;;  %s141_s18 = int_to_ptr.vmem [resolvable:$true] %s140_s18 }
   0x7   : > { %p1841_p4 = pneg %p1968_p2  ;;  %p1877_p7 = scmp.ne.s32.totalorder %s127_s15, %s1876_s20 }
   0x8   : > { %p1884_p10 = scmp.lt.s32.totalorder %s127_s15, %s127_s15  ;;  %p1885_p11 = scmp.lt.s32.totalorder %s1876_s20, %s1876_s20 }
   0x9   : > { %p1977_p5 = pnand %p1848_p3, %p1841_p4 }
   0xa   : > { %p1886_p12 = por %p1885_p11, %p1884_p10 }
   0xb   : > { %p1867_p6 = pneg %p1977_p5 }
   0xd   : > { %p1879_p8 = pnand %p1877_p7, %p1867_p6 }
   0xf   : > { %p1880_p9 = pneg %p1879_p8 }
  0x11   : > { %p1887_p13 = pnand %p1886_p12, %p1880_p9 }
  0x13   : > { %1890 = shalt.err (!%p1887_p13)
}
  0x14   : > { %s1935_s21 = smov 896   ;;  %s1936_s22 = smov 56  }
  0x15   : > { %1844 = dma.hbm_to_vmem [thread:$0]  (!%p1977_p5), %s2385_s1, 10752, %s127_s15, [#allocation3], %s1935_s21, %s1935_s21, %s1936_s22  }
  0x16   : > { %s1902_s25 = scalar_lea.vmem %s141_s18, 112  ;;  %s1909_s26 = scalar_lea.vmem %s141_s18, 128 }
  0x17   : > { %p1903_p0 = scmp.ne.s32.totalorder %s141_s18, %s1902_s25  ;;  %p1910_p7 = scmp.lt.s32.totalorder %s141_s18, %s141_s18 }
  0x18   : > { %p1911_p8 = scmp.lt.s32.totalorder %s1909_s26, %s1902_s25 }
  0x19   : > { %p1905_p1 = pnand %p1903_p0, %p1867_p6 }
  0x1a   : > { %p1912_p9 = por %p1911_p8, %p1910_p7 }
  0x1b   : > { %p1906_p4 = pneg %p1905_p1 }
  0x1d   : > { %p1913_p10 = pnand %p1912_p9, %p1906_p4 }
  0x1f   : > { %1916 = shalt.err (!%p1913_p10)
}
  0x20   : > { %1847 = dma.hbm_to_vmem [thread:$0]  (!%p1977_p5), %s2386_s2, 112, %s141_s18, [#allocation5]  }
  0x21   : > { %161 = sbr.rel (%p1968_p2) target bundleno = 341 (0x155), region = 32 }
  0x26   : > { %1922 = dma.done.wait (%p1848_p3), [#allocation3], 10752  }
  0x27   : > { %1924 = vsyncadd (%p1848_p3), [#allocation3], 4294956544 }
  0x28   : > { %1926 = dma.done.wait (%p1848_p3), [#allocation5], 112  }
  0x29   : > { %1928 = vsyncadd (%p1848_p3), [#allocation5], 4294967184  ;;  %p189_p6 = scmp.lt.s32.totalorder %s1964_s13, 1  ;;  %v1937_v0 = vmov 0.0   ;;  %vm277_vm0 = vcmask 1043456   ;;  %v251_v5 = vld [vmem:[#allocation2 + $0x158] sm:$0xff] }
  0x2a   : > { %363 = vmatprep.mubr.f32.mxu0 %v1937_v0  ;;  %452 = vmatprep.mubr.f32.mxu1 %v1937_v0  ;;  %v258_v1 = vld [vmem:[#allocation2 + $0x190] sm:$0xf]  ;;  %v260_v2 = vld [vmem:[#allocation2 + $0x1a0] sm:$0xf]  ;;  %v257_v3 = vld [vmem:[#allocation2 + $0x188] sm:$0xf] }
  0x2b   : > { %s2417_s13 = smov (!%p189_p6, %s1964_s13), 1  ;;  %1694 = vmatprep.subr.msk.mxu0 %vm277_vm0, %v258_v1  ;;  %1700 = vmatprep.subr.msk.mxu1 %vm277_vm0, %v260_v2  ;;  %v259_v4 = vld [vmem:[#allocation2 + $0x198] sm:$0xf]  ;;  %v253_v6 = vld [vmem:[#allocation2 + $0x168] sm:$0xff]  ;;  %v250_v7 = vld [vmem:[#allocation2 + $0x150] sm:$0xff]  ;;  %vm264_vm1 = vcmask 228352  }
  0x2c   : > { %s1765_s29 = sshll.u32 %s2417_s13, 5  ;;  %1695 = vmatpush1.msk.msra.mxu0 %vm277_vm0, %v257_v3  ;;  %1701 = vmatpush1.msk.msra.mxu1 %vm277_vm0, %v259_v4  ;;  %v252_v8 = vld [vmem:[#allocation2 + $0x160] sm:$0xff]  ;;  %v246_v10 = vld [vmem:[#allocation2 + $0x130] sm:$0xff]  ;;  %v243_v11 = vld [vmem:[#allocation2 + $0x118] sm:$0xff]  ;;  %s1832_s6 = smul.u32 224, %s2417_s13  ;;  %vm1581_vm2 = vcmask 523264  }
  0x2d   : > { %v244_v9 = vld [vmem:[#allocation2 + $0x120] sm:$0xff]  ;;  %325 = vmatprep.subr.mxu0 %v251_v5  ;;  %414 = vmatprep.subr.mxu1 %v253_v6  ;;  %v245_v12 = vld [vmem:[#allocation2 + $0x128] sm:$0xff]  ;;  %s2023_s5 = scalar_lea.vmem %s2384_s0, %s1765_s29  ;;  %v239_v14 = vld [vmem:[#allocation2 + $0xf8] sm:$0xff]  ;;  %vm1603_vm3 = vcmask 517120  }
  0x2e   : > { %326 = vmatpush1.msra.mxu0 %v250_v7  ;;  %415 = vmatpush1.msra.mxu1 %v252_v8  ;;  %v237_v13 = vld [vmem:[#allocation2 + $0xe8] sm:$0xff]  ;;  %v236_v15 = vld [vmem:[#allocation2 + $0xe0] sm:$0xff]  ;;  %v238_v16 = vld [vmem:[#allocation2 + $0xf0] sm:$0xff]  ;;  %s2275_s9 = scalar_lea.vmem %s2387_s3, %s1832_s6 }
  0x2f   : > { %327 = vmatprep.subr.mxu0 %v244_v9  ;;  %416 = vmatprep.subr.mxu1 %v246_v10  ;;  %v231_v17 = vld [vmem:[%s2023_s5 + $0x1] sm:$0xff]  ;;  %v262_v18 = vld [vmem:[#allocation2 + $0x1b0] sm:$0xf]  ;;  %v255_v20 = vld [vmem:[#allocation2 + $0x178] sm:$0xff] }
  0x30   : > { %328 = vmatpush1.msra.mxu0 %v243_v11  ;;  %417 = vmatpush1.msra.mxu1 %v245_v12  ;;  %v261_v19 = vld [vmem:[#allocation2 + $0x1a8] sm:$0xf]  ;;  %v263_v21 = vld [vmem:[#allocation2 + $0x1b8] sm:$0xf]  ;;  %v254_v23 = vld [vmem:[#allocation2 + $0x170] sm:$0xff] }
  0x31   : > { %329 = vmatprep.subr.mxu0 %v237_v13  ;;  %418 = vmatprep.subr.mxu1 %v239_v14  ;;  %v232_v22 = vld [vmem:[%s2023_s5 + $0x9] sm:$0xff]  ;;  %v248_v24 = vld [vmem:[#allocation2 + $0x140] sm:$0xff]  ;;  %v247_v25 = vld [vmem:[#allocation2 + $0x138] sm:$0xff] }
  0x32   : > { %330 = vmatpush1.msra.mxu0 %v236_v15  ;;  %419 = vmatpush1.msra.mxu1 %v238_v16  ;;  %v233_v26 = vld [vmem:[%s2023_s5 + $0x11] sm:$0xff]  ;;  %v256_v27 = vld [vmem:[#allocation2 + $0x180] sm:$0xff]  ;;  %v241_v28 = vld [vmem:[#allocation2 + $0x108] sm:$0xff] }
  0x33   : > { %1696 = vmatmul.mubr.msk.f32.vlgmr.msra.gmra.mxu0 %vm264_vm1, %v231_v17  ;;  %1702 = vmatmul.mubr.msk.f32.vlgmr.msra.gmra.mxu1 %vm264_vm1, %v231_v17  ;;  %v249_v29 = vld [vmem:[#allocation2 + $0x148] sm:$0xff]  ;;  %v2044_v30 = vld [vmem:[%s2023_s5 + $0x19] sm:$0x3]  ;;  %v240_v31 = vld [vmem:[#allocation2 + $0x100] sm:$0xff] }
  0x34   : > { %1706 = vmatprep.subr.msk.mxu0 %vm277_vm0, %v262_v18  ;;  %369 = vmatprep.mubr.f32.mxu0 %v1937_v0  ;;  %v242_v32 = vld [vmem:[#allocation2 + $0x110] sm:$0xff]  ;;  %v227_v34 = vld [vmem:[#allocation2 + $0xc0] sm:$0xf]  ;;  %v224_v35 = vld [vmem:[#allocation2 + $0xa8] sm:$0xf] }
  0x35   : > { %1707 = vmatpush1.msk.msra.mxu0 %vm277_vm0, %v261_v19  ;;  %458 = vmatprep.mubr.f32.mxu1 %v1937_v0  ;;  %v225_v33 = vld [vmem:[#allocation2 + $0xb0] sm:$0xf]  ;;  %v226_v36 = vld [vmem:[#allocation2 + $0xb8] sm:$0xf]  ;;  %v211_v39 = vld [vmem:[#allocation2 + $0x40] sm:$0xff] }
  0x36   : > { %503 = vmatprep.subr.mxu0 %v255_v20  ;;  %1790 = vmatprep.subr.msk.mxu1 %vm277_vm0, %v263_v21  ;;  %v218_v37 = vld [vmem:[#allocation2 + $0x78] sm:$0xff]  ;;  %v217_v38 = vld [vmem:[#allocation2 + $0x70] sm:$0xff]  ;;  %v220_v40 = vld [vmem:[#allocation2 + $0x88] sm:$0xff] }
  0x37   : > { %1697 = vmatmul.mubr.msk.f32.gmra.mxu0 %vm264_vm1, %v232_v22  ;;  %1703 = vmatmul.mubr.msk.f32.gmra.mxu1 %vm264_vm1, %v232_v22  ;;  %v210_v41 = vld [vmem:[#allocation2 + $0x38] sm:$0xff]  ;;  %v219_v42 = vld [vmem:[#allocation2 + $0x80] sm:$0xff]  ;;  %v204_v43 = vld [vmem:[#allocation2 + $0x8] sm:$0xff] }
  0x38   : > { %504 = vmatpush1.msra.mxu0 %v254_v23  ;;  %375 = vmatprep.mubr.f32.mxu0 %v1937_v0  ;;  %v203_v44 = vld [vmem:[#allocation2] sm:$0xff]  ;;  %v213_v46 = vld [vmem:[#allocation2 + $0x50] sm:$0xff]  ;;  %v212_v47 = vld [vmem:[#allocation2 + $0x48] sm:$0xff] }
  0x39   : > { %464 = vmatprep.mubr.f32.mxu1 %v1937_v0  ;;  %505 = vmatprep.subr.mxu0 %v248_v24  ;;  %v2065_v45 = vld [vmem:[%s2023_s5] sm:$0xff]  ;;  %v206_v48 = vld [vmem:[#allocation2 + $0x18] sm:$0xff]  ;;  %v229_v49 = vld [vmem:[#allocation2 + $0xd0] sm:$0xf] }
  0x3a   : > { %506 = vmatpush1.msra.mxu0 %v247_v25  ;;  %1791 = vmatpush3.msk.msra.mxu1 %vm277_vm0, %v263_v21  ;;  %v2074_v50 = vld [vmem:[%s2023_s5 + $0x8] sm:$0xff]  ;;  %v205_v51 = vld [vmem:[#allocation2 + $0x10] sm:$0xff]  ;;  %v230_v52 = vld [vmem:[#allocation2 + $0xd8] sm:$0xf] }
  0x3b   : > { %1698 = vmatmul.mubr.msk.f32.gmra.mxu0 %vm264_vm1, %v233_v26  ;;  %1704 = vmatmul.mubr.msk.f32.gmra.mxu1 %vm264_vm1, %v233_v26  ;;  %v228_v53 = vld [vmem:[#allocation2 + $0xc8] sm:$0xf]  ;;  %v201_v54 = vld [vmem:[%s2023_s5 + $0x10] sm:$0xff]  ;;  %v222_v55 = vld [vmem:[#allocation2 + $0x98] sm:$0xff] }
  0x3c   : > { %1792 = vmatprep.subr.mxu1 %v256_v27  ;;  %381 = vmatprep.mubr.f32.mxu0 %v1937_v0  ;;  %v221_v56 = vld [vmem:[#allocation2 + $0x90] sm:$0xff]  ;;  %v223_v57 = vld [vmem:[#allocation2 + $0xa0] sm:$0xff]  ;;  %v202_v58 = vld [vmem:[%s2023_s5 + $0x18] sm:$0x3] }
  0x3d   : > { %470 = vmatprep.mubr.f32.mxu1 %v1937_v0  ;;  %1793 = vmatpush3.msra.mxu1 %v256_v27  ;;  %v215_v59 = vld [vmem:[#allocation2 + $0x60] sm:$0xff]  ;;  %v214_v60 = vld [vmem:[#allocation2 + $0x58] sm:$0xff]  ;;  %v208_v61 = vld [vmem:[#allocation2 + $0x28] sm:$0xff] }
  0x3e   : > { %507 = vmatprep.subr.mxu0 %v241_v28  ;;  %1794 = vmatprep.subr.mxu1 %v249_v29  ;;  %v207_v62 = vld [vmem:[#allocation2 + $0x20] sm:$0xff]  ;;  %v216_v63 = vld [vmem:[#allocation2 + $0x68] sm:$0xff]  ;;  %v209_v1 = vld [vmem:[#allocation2 + $0x30] sm:$0xff] }
  0x3f   : > { %1699 = vmatmul.mubr.msk.f32.gmra.mxu0 %vm264_vm1, %v2044_v30  ;;  %1705 = vmatmul.mubr.msk.f32.gmra.mxu1 %vm264_vm1, %v2044_v30  ;;  %v1065_v2 = vld [vmem:[#allocation2 + $0x280] sm:$0xf]  ;;  %v1063_v3 = vld [vmem:[#allocation2 + $0x270] sm:$0xf]  ;;  %v1064_v4 = vld [vmem:[#allocation2 + $0x278] sm:$0xf] }
  0x40   : > { %508 = vmatpush1.msra.mxu0 %v240_v31  ;;  %1795 = vmatpush3.msra.mxu1 %v249_v29  ;;  %v1058_v5 = vld [vmem:[#allocation2 + $0x248] sm:$0xff]  ;;  %v1056_v7 = vld [vmem:[#allocation2 + $0x238] sm:$0xff]  ;;  %v1055_v8 = vld [vmem:[#allocation2 + $0x230] sm:$0xff] }
  0x41   : > { %1796 = vmatprep.subr.mxu1 %v242_v32  ;;  %541 = vmatprep.mubr.f32.mxu0 %v1937_v0  ;;  %v1062_v6 = vld [vmem:[#allocation2 + $0x268] sm:$0xf]  ;;  %v1057_v9 = vld [vmem:[#allocation2 + $0x240] sm:$0xff]  ;;  %v1051_v11 = vld [vmem:[#allocation2 + $0x210] sm:$0xff] }
  0x42   : > { %1797 = vmatpush3.msra.mxu1 %v242_v32  ;;  %1798 = vmatprep.mubr.msk.f32.mxu1 %vm264_vm1, %v231_v17  ;;  %v1049_v10 = vld [vmem:[#allocation2 + $0x200] sm:$0xff]  ;;  %v1048_v12 = vld [vmem:[#allocation2 + $0x1f8] sm:$0xff]  ;;  %v1050_v13 = vld [vmem:[#allocation2 + $0x208] sm:$0xff] }
  0x43   : > { %1708 = vmatmul.mubr.msk.f32.vlgmr.msra.gmra.mxu0 %vm264_vm1, %v231_v17  ;;  %1799 = vmatmul.mubr.msk.f32.vlgmr.msra.gmra.mxu1 %vm264_vm1, %v232_v22  ;;  %v1042_v14 = vld [vmem:[#allocation2 + $0x1c8] sm:$0xff]  ;;  %v1044_v15 = vld [vmem:[#allocation2 + $0x1d8] sm:$0xff]  ;;  %v1041_v16 = vld [vmem:[#allocation2 + $0x1c0] sm:$0xff] }
  0x44   : > { %1717 = vmatprep.subr.msk.mxu1 %vm277_vm0, %v225_v33  ;;  %1723 = vmatprep.subr.msk.mxu0 %vm277_vm0, %v227_v34  ;;  %v1043_v17 = vld [vmem:[#allocation2 + $0x1d0] sm:$0xff]  ;;  %v1036_v18 = vld [vmem:[%s2023_s5 + $0x2] sm:$0xff]  ;;  %v1060_v21 = vld [vmem:[#allocation2 + $0x258] sm:$0xff] }
  0x45   : > { %1718 = vmatpush1.msk.msra.mxu1 %vm277_vm0, %v224_v35  ;;  %1724 = vmatpush1.msk.msra.mxu0 %vm277_vm0, %v226_v36  ;;  %v1067_v19 = vld [vmem:[#allocation2 + $0x290] sm:$0xf]  ;;  %v1066_v20 = vld [vmem:[#allocation2 + $0x288] sm:$0xf]  ;;  %v1068_v23 = vld [vmem:[#allocation2 + $0x298] sm:$0xf] }
  0x46   : > { %710 = vmatprep.subr.mxu1 %v218_v37  ;;  %547 = vmatprep.mubr.f32.mxu0 %v1937_v0  ;;  %v1059_v24 = vld [vmem:[#allocation2 + $0x250] sm:$0xff]  ;;  %v1053_v25 = vld [vmem:[#allocation2 + $0x220] sm:$0xff]  ;;  %v1052_v28 = vld [vmem:[#allocation2 + $0x218] sm:$0xff] }
  0x47   : > { %1801 = vmatprep.mubr.msk.f32.mxu1 %vm264_vm1, %v233_v26  ;;  %711 = vmatpush1.msra.mxu1 %v217_v38  ;;  %v1061_v27 = vld [vmem:[#allocation2 + $0x260] sm:$0xff]  ;;  %v1046_v29 = vld [vmem:[#allocation2 + $0x1e8] sm:$0xff]  ;;  %v1047_v33 = vld [vmem:[#allocation2 + $0x1f0] sm:$0xff] }
  0x48   : > { %1709 = vmatmul.mubr.msk.f32.gmra.mxu0 %vm264_vm1, %v232_v22  ;;  %1802 = vmatmul.mubr.msk.f32.gmra.mxu1 %vm264_vm1, %v2044_v30  ;;  %v1037_v22 = vld [vmem:[%s2023_s5 + $0xa] sm:$0xff]  ;;  %v1045_v32 = vld [vmem:[#allocation2 + $0x1e0] sm:$0xff] }
  0x49   : > { %712 = vmatprep.subr.mxu1 %v211_v39  ;;  %799 = vmatprep.subr.mxu0 %v220_v40  ;;  %v1054_v31 = vld [vmem:[#allocation2 + $0x228] sm:$0xff] }
  0x4a   : > { %713 = vmatpush1.msra.mxu1 %v210_v41  ;;  %800 = vmatpush1.msra.mxu0 %v219_v42 }
  0x4b   : > { %714 = vmatprep.subr.mxu1 %v204_v43  ;;  %553 = vmatprep.mubr.f32.mxu0 %v1937_v0 }
  0x4c   : > { %715 = vmatpush1.msra.mxu1 %v203_v44  ;;  %748 = vmatprep.mubr.f32.mxu1 %v1937_v0 }
  0x4d   : > { %1710 = vmatmul.mubr.msk.f32.gmra.mxu0 %vm264_vm1, %v233_v26  ;;  %1719 = vmatmul.mubr.msk.f32.vlgmr.msra.gmra.mxu1 %vm264_vm1, %v2065_v45  ;;  %v1038_v26 = vld [vmem:[%s2023_s5 + $0x12] sm:$0xff] }
  0x4e   : > { %801 = vmatprep.subr.mxu0 %v213_v46  ;;  %559 = vmatprep.mubr.f32.mxu0 %v1937_v0 }
  0x4f   : > { %802 = vmatpush1.msra.mxu0 %v212_v47  ;;  %754 = vmatprep.mubr.f32.mxu1 %v1937_v0 }
  0x50   : > { %803 = vmatprep.subr.mxu0 %v206_v48  ;;  %1729 = vmatprep.subr.msk.mxu1 %vm277_vm0, %v229_v49 }
  0x51   : > { %1711 = vmatmul.mubr.msk.f32.gmra.mxu0 %vm264_vm1, %v2044_v30  ;;  %1720 = vmatmul.mubr.msk.f32.gmra.mxu1 %vm264_vm1, %v2074_v50  ;;  %v1039_v30 = vld [vmem:[%s2023_s5 + $0x1a] sm:$0x3] }
  0x52   : > { %804 = vmatpush1.msra.mxu0 %v205_v51  ;;  %760 = vmatprep.mubr.f32.mxu1 %v1937_v0 }
  0x53   : > { %837 = vmatprep.mubr.f32.mxu0 %v1937_v0  ;;  %1804 = vmatprep.subr.msk.mxu0 %vm277_vm0, %v230_v52 }
  0x54   : > { %1730 = vmatpush1.msk.msra.mxu1 %vm277_vm0, %v228_v53 }
  0x55   : > { %1721 = vmatmul.mubr.msk.f32.gmra.mxu1 %vm264_vm1, %v201_v54  ;;  %1725 = vmatmul.mubr.msk.f32.vlgmr.msra.gmra.mxu0 %vm264_vm1, %v2065_v45 }
  0x56   : > { %1805 = vmatpush3.msk.msra.mxu0 %vm277_vm0, %v230_v52  ;;  %888 = vmatprep.subr.mxu1 %v222_v55 }
  0x57   : > { %766 = vmatprep.mubr.f32.mxu1 %v1937_v0  ;;  %843 = vmatprep.mubr.f32.mxu0 %v1937_v0 }
  0x58   : > { %889 = vmatpush1.msra.mxu1 %v221_v56  ;;  %1806 = vmatprep.subr.mxu0 %v223_v57 }
  0x59   : > { %1722 = vmatmul.mubr.msk.f32.gmra.mxu1 %vm264_vm1, %v202_v58  ;;  %1726 = vmatmul.mubr.msk.f32.gmra.mxu0 %vm264_vm1, %v2074_v50 }
  0x5a   : > { %890 = vmatprep.subr.mxu1 %v215_v59  ;;  %1807 = vmatpush3.msra.mxu0 %v223_v57 }
  0x5b   : > { %891 = vmatpush1.msra.mxu1 %v214_v60  ;;  %849 = vmatprep.mubr.f32.mxu0 %v1937_v0 }
  0x5c   : > { %892 = vmatprep.subr.mxu1 %v208_v61  ;;  %926 = vmatprep.mubr.f32.mxu1 %v1937_v0 }
  0x5d   : > { %893 = vmatpush1.msra.mxu1 %v207_v62  ;;  %1727 = vmatmul.mubr.msk.f32.gmra.mxu0 %vm264_vm1, %v201_v54 }
  0x5e   : > { %1731 = vmatmul.mubr.msk.f32.vlgmr.msra.gmra.mxu1 %vm264_vm1, %v2065_v45  ;;  %1808 = vmatprep.subr.mxu0 %v216_v63 }
  0x5f   : > { %1809 = vmatpush3.msra.mxu0 %v216_v63  ;;  %855 = vmatprep.mubr.f32.mxu0 %v1937_v0 }
  0x60   : > { %932 = vmatprep.mubr.f32.mxu1 %v1937_v0  ;;  %1810 = vmatprep.subr.mxu0 %v209_v1 }
  0x61   : > { %1728 = vmatmul.mubr.msk.f32.gmra.mxu0 %vm264_vm1, %v202_v58  ;;  %1746 = vmatprep.subr.msk.mxu1 %vm277_vm0, %v1065_v2 }
  0x62   : > { %1732 = vmatmul.mubr.msk.f32.gmra.mxu1 %vm264_vm1, %v2074_v50  ;;  %1811 = vmatpush3.msra.mxu0 %v209_v1 }
  0x63   : > { %938 = vmatprep.mubr.f32.mxu1 %v1937_v0  ;;  %1812 = vmatprep.mubr.msk.f32.mxu0 %vm264_vm1, %v2065_v45 }
  0x64   : > { %1740 = vmatprep.subr.msk.mxu0 %vm277_vm0, %v1063_v3  ;;  %1747 = vmatpush1.msk.msra.mxu1 %vm277_vm0, %v1064_v4 }
  0x65   : > { %1813 = vmatmul.mubr.msk.f32.vlgmr.msra.gmra.mxu0 %vm264_vm1, %v2074_v50  ;;  %1217 = vmatprep.subr.mxu1 %v1058_v5 }
  0x66   : > { %1733 = vmatmul.mubr.msk.f32.gmra.mxu1 %vm264_vm1, %v201_v54  ;;  %1741 = vmatpush1.msk.msra.mxu0 %vm277_vm0, %v1062_v6 }
  0x67   : > { %1128 = vmatprep.subr.mxu0 %v1056_v7  ;;  %944 = vmatprep.mubr.f32.mxu1 %v1937_v0 }
  0x68   : > { %1815 = vmatprep.mubr.msk.f32.mxu0 %vm264_vm1, %v201_v54  ;;  %1129 = vmatpush1.msra.mxu0 %v1055_v8 }
  0x69   : > { %1218 = vmatpush1.msra.mxu1 %v1057_v9  ;;  %1816 = vmatmul.mubr.msk.f32.gmra.mxu0 %vm264_vm1, %v202_v58 }
  0x6a   : > { %1734 = vmatmul.mubr.msk.f32.gmra.mxu1 %vm264_vm1, %v202_v58  ;;  %1130 = vmatprep.subr.mxu0 %v1049_v10 }
  0x6b   : > { %1219 = vmatprep.subr.mxu1 %v1051_v11  ;;  %1131 = vmatpush1.msra.mxu0 %v1048_v12 }
  0x6c   : > { %1220 = vmatpush1.msra.mxu1 %v1050_v13  ;;  %1132 = vmatprep.subr.mxu0 %v1042_v14 }
  0x6d   : > { %1221 = vmatprep.subr.mxu1 %v1044_v15  ;;  %1133 = vmatpush1.msra.mxu0 %v1041_v16  ;;  %v1484_v16 = vlaneseq }
  0x6e   : > { %1166 = vmatprep.mubr.f32.mxu0 %v1937_v0  ;;  %1222 = vmatpush1.msra.mxu1 %v1043_v17 }
  0x6f   : > { %1255 = vmatprep.mubr.f32.mxu1 %v1937_v0  ;;  %1742 = vmatmul.mubr.msk.f32.vlgmr.msra.gmra.mxu0 %vm264_vm1, %v1036_v18 }
  0x70   : > { %1748 = vmatmul.mubr.msk.f32.vlgmr.msra.gmra.mxu1 %vm264_vm1, %v1036_v18  ;;  %1752 = vmatprep.subr.msk.mxu0 %vm277_vm0, %v1067_v19 }
  0x71   : > { %1753 = vmatpush1.msk.msra.mxu0 %vm277_vm0, %v1066_v20  ;;  %1172 = vmatprep.mubr.f32.mxu0 %v1937_v0 }
  0x72   : > { %1261 = vmatprep.mubr.f32.mxu1 %v1937_v0  ;;  %1306 = vmatprep.subr.mxu0 %v1060_v21  ;;  %v1485_v21 = vshrl.u32 %v1484_v16, 7 }
  0x73   : > { %1743 = vmatmul.mubr.msk.f32.gmra.mxu0 %vm264_vm1, %v1037_v22  ;;  %1818 = vmatprep.subr.msk.mxu1 %vm277_vm0, %v1068_v23 }
  0x74   : > { %1749 = vmatmul.mubr.msk.f32.gmra.mxu1 %vm264_vm1, %v1037_v22  ;;  %1307 = vmatpush1.msra.mxu0 %v1059_v24 }
  0x75   : > { %1178 = vmatprep.mubr.f32.mxu0 %v1937_v0  ;;  %1267 = vmatprep.mubr.f32.mxu1 %v1937_v0 }
  0x76   : > { %1308 = vmatprep.subr.mxu0 %v1053_v25  ;;  %1819 = vmatpush3.msk.msra.mxu1 %vm277_vm0, %v1068_v23 }
  0x77   : > { %1744 = vmatmul.mubr.msk.f32.gmra.mxu0 %vm264_vm1, %v1038_v26  ;;  %1820 = vmatprep.subr.mxu1 %v1061_v27 }
  0x78   : > { %1750 = vmatmul.mubr.msk.f32.gmra.mxu1 %vm264_vm1, %v1038_v26  ;;  %1309 = vmatpush1.msra.mxu0 %v1052_v28  ;;  %v1482_v28 = vld [vmem:[#allocation4] sm:$0x7f] }
  0x79   : > { %1184 = vmatprep.mubr.f32.mxu0 %v1937_v0  ;;  %1273 = vmatprep.mubr.f32.mxu1 %v1937_v0 }
  0x7a   : > { %1821 = vmatpush3.msra.mxu1 %v1061_v27  ;;  %1310 = vmatprep.subr.mxu0 %v1046_v29  ;;  %v1494_v29 = vsub.s32 2, %v1485_v21 }
  0x7b   : > { %1745 = vmatmul.mubr.msk.f32.gmra.mxu0 %vm264_vm1, %v1039_v30  ;;  %1822 = vmatprep.subr.mxu1 %v1054_v31 }
  0x7c   : > { %1751 = vmatmul.mubr.msk.f32.gmra.mxu1 %vm264_vm1, %v1039_v30  ;;  %1311 = vmatpush1.msra.mxu0 %v1045_v32  ;;  %v1498_v32 = vsub.s32 3, %v1485_v21 }
  0x7d   : > { %1823 = vmatpush3.msra.mxu1 %v1054_v31  ;;  %1344 = vmatprep.mubr.f32.mxu0 %v1937_v0  ;;  %v1490_v31 = vsub.s32 1, %v1485_v21 }
  0x7e   : > { %1824 = vmatprep.subr.mxu1 %v1047_v33  ;;  %1826 = vmatprep.mubr.msk.f32.mxu1 %vm264_vm1, %v1036_v18 }
  0x7f   : > { %1825 = vmatpush3.msra.mxu1 %v1047_v33  ;;  %1754 = vmatmul.mubr.msk.f32.vlgmr.msra.gmra.mxu0 %vm264_vm1, %v1036_v18  ;;  %v1502_v33 = vsub.s32 4, %v1485_v21 }
  0x80   : > { %1827 = vmatmul.mubr.msk.f32.vlgmr.msra.gmra.mxu1 %vm264_vm1, %v1037_v22  ;;  %1350 = vmatprep.mubr.f32.mxu0 %v1937_v0 }
  0x81   : > { %1829 = vmatprep.mubr.msk.f32.mxu1 %vm264_vm1, %v1038_v26 }
  0x83   : > { %1755 = vmatmul.mubr.msk.f32.gmra.mxu0 %vm264_vm1, %v1037_v22 }
  0x84   : > { %1830 = vmatmul.mubr.msk.f32.gmra.mxu1 %vm264_vm1, %v1039_v30  ;;  %1356 = vmatprep.mubr.f32.mxu0 %v1937_v0 }
  0x87   : > { %1756 = vmatmul.mubr.msk.f32.gmra.mxu0 %vm264_vm1, %v1038_v26  ;;  %v1486_v26 = vsub.s32 0, %v1485_v21 }
  0x88   : > { %1362 = vmatprep.mubr.f32.mxu0 %v1937_v0 }
  0x8b   : > { %1757 = vmatmul.mubr.msk.f32.gmra.mxu0 %vm264_vm1, %v1039_v30 }
  0xf3   : > { %v2157_v34 = vpop.f32.mrf.mxu0  ;;  %v2159_v35 = vpop.f32.mrf.mxu1 }
  0xf5   : > { %v2161_v36 = vpop.f32.mrf.mxu0  ;;  %v2163_v37 = vpop.f32.mrf.mxu1 }
  0xf7   : > { %v2165_v38 = vpop.f32.mrf.mxu0  ;;  %v2167_v39 = vpop.f32.mrf.mxu1 }
  0xf9   : > { %v2169_v40 = vpop.f32.mrf.mxu0  ;;  %v2171_v41 = vpop.f32.mrf.mxu1 }
  0xfb   : > { %v2173_v42 = vpop.f32.mrf.mxu0  ;;  %v2175_v0 = vpop.f32.mrf.mxu1 }
  0xfd   : > { %v2177_v43 = vpop.f32.mrf.mxu0  ;;  %v2179_v44 = vpop.f32.mrf.mxu1 }
  0xff   : > { %v2181_v45 = vpop.f32.mrf.mxu0  ;;  %v2183_v46 = vpop.f32.mrf.mxu1 }
 0x101   : > { %v2185_v47 = vpop.f32.mrf.mxu0  ;;  %v2187_v48 = vpop.f32.mrf.mxu1 }
 0x103   : > { %v2189_v49 = vpop.f32.mrf.mxu0  ;;  %v2191_v50 = vpop.f32.mrf.mxu1 }
 0x105   : > { %v2193_v51 = vpop.f32.mrf.mxu0  ;;  %v2195_v52 = vpop.f32.mrf.mxu1 }
 0x108   : > { %v2197_v53 = vpop.f32.mrf.mxu0  ;;  %v2199_v54 = vpop.f32.mrf.mxu1 }
 0x10a   : > { %v2201_v55 = vpop.f32.mrf.mxu0  ;;  %v2203_v56 = vpop.f32.mrf.mxu1 }
 0x10b   : > { %2390 = vst [vmem:[#allocation8_spill] sm:$0xff] %v2201_v55  ;;  %2391 = vst [vmem:[#allocation9_spill] sm:$0xff] %v2203_v56 }
 0x10d   : > { %v2205_v57 = vpop.f32.mrf.mxu0  ;;  %v750_v58 = vpop.f32.mrf.mxu1 }
 0x10e   : > { %2392 = vst [vmem:[#allocation10_spill] sm:$0xff] %v2205_v57  ;;  %v751_v16 = vadd.f32 %v750_v58, %v2157_v34  ;;  %v2264_v58 = vrot.slane %v1482_v28, %v1498_v32 }
 0x10f   : > { %v2207_v59 = vpop.f32.mrf.mxu0  ;;  %v752_v60 = vpop.f32.mrf.mxu1 }
 0x110   : > { %2393 = vst [vmem:[#allocation11_spill] sm:$0xff] %v2207_v59  ;;  %v753_v57 = vadd.f32 %v752_v60, %v2161_v36 }
 0x111   : > { %v2209_v61 = vpop.f32.mrf.mxu0  ;;  %v756_v62 = vpop.f32.mrf.mxu1 }
 0x112   : > { %2394 = vst [vmem:[#allocation12_spill] sm:$0xff] %v2209_v61  ;;  %v1510_v61 = vsub.s32 6, %v1485_v21 }
 0x113   : > { %v2211_v63 = vpop.f32.mrf.mxu0  ;;  %v758_v1 = vpop.f32.mrf.mxu1 }
 0x114   : > { %2395 = vst [vmem:[#allocation13_spill] sm:$0xff] %v2211_v63  ;;  %v2254_v63 = vrot.slane %v1482_v28, %v1486_v26  ;;  %v2266_v26 = vrot.slane %v1482_v28, %v1502_v33 }
 0x115   : > { %v2213_v2 = vpop.f32.mrf.mxu1  ;;  %v839_v3 = vpop.f32.mrf.mxu0 }
 0x117   : > { %v2215_v4 = vpop.f32.mrf.mxu1  ;;  %v841_v5 = vpop.f32.mrf.mxu0 }
 0x119   : > { %v2217_v6 = vpop.f32.mrf.mxu1  ;;  %v845_v7 = vpop.f32.mrf.mxu0 }
 0x11a   : > { %v846_v36 = vadd.f32 %v845_v7, %v2167_v39 }
 0x11b   : > { %v2219_v8 = vpop.f32.mrf.mxu1  ;;  %v847_v9 = vpop.f32.mrf.mxu0 }
 0x11d   : > { %v2221_v10 = vpop.f32.mrf.mxu0 }
 0x11e   : > { %v2223_v11 = vpop.f32.mrf.mxu1 }
 0x11f   : > { %v2225_v12 = vpop.f32.mrf.mxu0 }
 0x120   : > { %v2227_v13 = vpop.f32.mrf.mxu1 }
 0x121   : > { %v2229_v14 = vpop.f32.mrf.mxu0 }
 0x122   : > { %v2231_v15 = vpop.f32.mrf.mxu1 }
 0x123   : > { %v2233_v17 = vpop.f32.mrf.mxu0 }
 0x124   : > { %v2235_v18 = vpop.f32.mrf.mxu1 }
 0x125   : > { %2396 = vst [vmem:[#allocation14_spill] sm:$0xff] %v2235_v18  ;;  %v2237_v19 = vpop.f32.mrf.mxu0  ;;  %v842_v18 = vadd.f32 %v841_v5, %v2163_v37 }
 0x126   : > { %v2239_v20 = vpop.f32.mrf.mxu1 }
 0x127   : > { %2397 = vst [vmem:[#allocation15_spill] sm:$0xff] %v2239_v20  ;;  %v2241_v22 = vpop.f32.mrf.mxu0  ;;  %v1506_v20 = vsub.s32 5, %v1485_v21 }
 0x128   : > { %v2243_v23 = vpop.f32.mrf.mxu1 }
 0x129   : > { %2398 = vst [vmem:[#allocation16_spill] sm:$0xff] %v2243_v23  ;;  %v2245_v24 = vpop.f32.mrf.mxu0  ;;  %v840_v23 = vadd.f32 %v839_v3, %v2159_v35  ;;  %v757_v35 = vadd.f32 %v756_v62, %v2165_v38  ;;  %v2279_v60 = vrot.slane %v1482_v28, %v1506_v20  ;;  %v759_v38 = vadd.f32 %v758_v1, %v2169_v40 }
 0x12a   : > { %2399 = vst [vmem:[#allocation17_spill] sm:$0xff] %v2245_v24  ;;  %v2247_v25 = vpop.f32.mrf.mxu1  ;;  %v2270_v24 = vrot.slane %v1482_v28, %v1510_v61 }
 0x12b   : > { %2400 = vst [vmem:[#allocation18_spill] sm:$0xff] %v2247_v25  ;;  %v2249_v27 = vpop.f32.mrf.mxu0  ;;  %v2258_v25 = vrot.slane %v1482_v28, %v1494_v29 }
 0x12c   : > { %2401 = vst [vmem:[#allocation19_spill] sm:$0xff] %v2249_v27  ;;  %v2251_v30 = vpop.f32.mrf.mxu1 }
 0x12d   : > { %2402 = vst [vmem:[#allocation20_spill] sm:$0xff] %v2251_v30  ;;  %v2261_v30 = vrot.slane %v1482_v28, %v1490_v31  ;;  %v852_v31 = vadd.f32 %v2221_v10, %v2175_v0  ;;  %v854_v0 = vadd.f32 %v2225_v12, %v2179_v44  ;;  %v858_v44 = vadd.f32 %v2229_v14, %v2183_v46 }
 0x12e   : > { %v860_v46 = vadd.f32 %v2233_v17, %v2187_v48  ;;  %v1023_v48 = vadd.f32 %v2237_v19, %v2191_v50  ;;  %v1018_v50 = vadd.f32 %v2241_v22, %v2195_v52 }
 0x12f   : > { %v1168_v59 = vpop.f32.mrf.mxu0 }
 0x130   : > { %v1454_v27 = vadd.f32 %v1168_v59, %v751_v16  ;;  %v1257_v56 = vpop.f32.mrf.mxu1 }
 0x131   : > { %v1456_v55 = vadd.f32 %v1257_v56, %v840_v23  ;;  %v1170_v34 = vpop.f32.mrf.mxu0  ;;  %v848_v23 = vadd.f32 %v847_v9, %v2171_v41 }
 0x132   : > { %v1519_v3 = vadd.f32 %v2254_v63, %v1454_v27  ;;  %v1455_v29 = vadd.f32 %v1170_v34, %v753_v57  ;;  %v1259_v21 = vpop.f32.mrf.mxu1 }
 0x133   : > { %v1521_v37 = vadd.f32 %v2258_v25, %v1456_v55  ;;  %v1457_v56 = vadd.f32 %v1259_v21, %v842_v18  ;;  %v1174_v59 = vpop.f32.mrf.mxu0  ;;  %v763_v18 = vadd.f32 %v2213_v2, %v2173_v42  ;;  %v765_v42 = vadd.f32 %v2215_v4, %v2177_v43 }
 0x134   : > { %v1547_v57 = vmax.f32 %v1519_v3, 0.0  ;;  %v1520_v61 = vadd.f32 %v2261_v30, %v1455_v29  ;;  %v1461_v62 = vadd.f32 %v1174_v59, %v757_v35  ;;  %v1263_v5 = vpop.f32.mrf.mxu1  ;;  %v769_v43 = vadd.f32 %v2217_v6, %v2181_v45 }
 0x135   : > { %v1549_v27 = vmax.f32 %v1521_v37, 0.0  ;;  %v1522_v39 = vadd.f32 %v2264_v58, %v1457_v56  ;;  %v1463_v7 = vadd.f32 %v1263_v5, %v846_v36  ;;  %v1176_v55 = vpop.f32.mrf.mxu0  ;;  %v771_v45 = vadd.f32 %v2219_v8, %v2185_v47 }
 0x136   : > { %1575 = vst [vmem:[%s2275_s9] sm:$0xff] %v1547_v57  ;;  %v1548_v20 = vmax.f32 %v1520_v61, 0.0  ;;  %v1526_v40 = vadd.f32 %v2254_v63, %v1461_v62  ;;  %v1462_v1 = vadd.f32 %v1176_v55, %v759_v38  ;;  %v1265_v28 = vpop.f32.mrf.mxu1  ;;  %v929_v47 = vadd.f32 %v2223_v11, %v2189_v49 }
 0x137   : > { %1577 = vst [vmem:[%s2275_s9 + $0x10] sm:$0xff] %v1549_v27  ;;  %v1550_v41 = vmax.f32 %v1522_v39, 0.0  ;;  %v1528_v9 = vadd.f32 %v2258_v25, %v1463_v7  ;;  %v1464_v32 = vadd.f32 %v1265_v28, %v848_v23  ;;  %v1180_v33 = vpop.f32.mrf.mxu0  ;;  %v931_v49 = vadd.f32 %v2227_v13, %v2193_v51 }
 0x138   : > { %1576 = vst [vmem:[%s2275_s9 + $0x8] sm:$0xff] %v1548_v20  ;;  %v1554_v2 = vmax.f32 %v1526_v40, 0.0  ;;  %v1527_v16 = vadd.f32 %v2261_v30, %v1462_v1  ;;  %v1468_v34 = vadd.f32 %v1180_v33, %v763_v18  ;;  %v1269_v35 = vpop.f32.mrf.mxu1  ;;  %v935_v51 = vadd.f32 %v2231_v15, %v2197_v53 }
 0x139   : > { %1578 = vst [vmem:[%s2275_s9 + $0x18] sm:$0xff] %v1550_v41  ;;  %v1556_v10 = vmax.f32 %v1528_v9, 0.0  ;;  %v1529_v3 = vadd.f32 %v2264_v58, %v1464_v32  ;;  %v1470_v29 = vadd.f32 %v1269_v35, %v852_v31  ;;  %v1182_v21 = vpop.f32.mrf.mxu0  ;;  %v2405_v35 = vld [vmem:[#allocation14_spill] sm:$0xff] }
 0x13a   : > { %1583 = vst [vmem:[%s2275_s9 + $0x38] sm:$0xff] %v1554_v2  ;;  %v1555_v4 = vmax.f32 %v1527_v16, 0.0  ;;  %v1533_v36 = vadd.f32 %v2254_v63, %v1468_v34  ;;  %v1469_v37 = vadd.f32 %v1182_v21, %v765_v42  ;;  %v1271_v56 = vpop.f32.mrf.mxu1  ;;  %v2403_v42 = vld [vmem:[#allocation17_spill] sm:$0xff]  ;;  %v2404_v34 = vld [vmem:[#allocation8_spill] sm:$0xff]  ;;  %v2407_v21 = vld [vmem:[#allocation19_spill] sm:$0xff] }
 0x13b   : > { %1585 = vst [vmem:[%s2275_s9 + $0x48] sm:$0xff] %v1556_v10  ;;  %v1557_v12 = vmax.f32 %v1529_v3, 0.0  ;;  %v1535_v59 = vadd.f32 %v2258_v25, %v1470_v29  ;;  %v1471_v38 = vadd.f32 %v1271_v56, %v854_v0  ;;  %v1186_v57 = vpop.f32.mrf.mxu0  ;;  %v1033_v52 = vadd.f32 %v2403_v42, %v2199_v54  ;;  %v2406_v29 = vld [vmem:[#allocation9_spill] sm:$0xff]  ;;  %v2408_v56 = vld [vmem:[#allocation10_spill] sm:$0xff] }
 0x13c   : > { %1584 = vst [vmem:[%s2275_s9 + $0x40] sm:$0xff] %v1555_v4  ;;  %v1561_v6 = vmax.f32 %v1533_v36, 0.0  ;;  %v1534_v61 = vadd.f32 %v2261_v30, %v1469_v37  ;;  %v1475_v62 = vadd.f32 %v1186_v57, %v769_v43  ;;  %v1275_v5 = vpop.f32.mrf.mxu1  ;;  %v937_v53 = vadd.f32 %v2405_v35, %v2404_v34 }
 0x13d   : > { %1586 = vst [vmem:[%s2275_s9 + $0x50] sm:$0xff] %v1557_v12  ;;  %v1563_v14 = vmax.f32 %v1535_v59, 0.0  ;;  %v1536_v23 = vadd.f32 %v2264_v58, %v1471_v38  ;;  %v1477_v27 = vadd.f32 %v1275_v5, %v858_v44  ;;  %v1188_v39 = vpop.f32.mrf.mxu0  ;;  %v1028_v54 = vadd.f32 %v2407_v21, %v2406_v29  ;;  %v2409_v44 = vld [vmem:[#allocation15_spill] sm:$0xff] }
 0x13e   : > { %1590 = vst [vmem:[%s2275_s9 + $0x70] sm:$0xff] %v1561_v6  ;;  %v1562_v8 = vmax.f32 %v1534_v61, 0.0  ;;  %v1540_v7 = vadd.f32 %v2254_v63, %v1475_v62  ;;  %v1476_v55 = vadd.f32 %v1188_v39, %v771_v45  ;;  %v1277_v18 = vpop.f32.mrf.mxu1  ;;  %v941_v12 = vadd.f32 %v2409_v44, %v2408_v56 }
 0x13f   : > { %1592 = vst [vmem:[%s2275_s9 + $0x80] sm:$0xff] %v1563_v14  ;;  %v1564_v17 = vmax.f32 %v1536_v23, 0.0  ;;  %v1542_v20 = vadd.f32 %v2258_v25, %v1477_v27  ;;  %v1478_v40 = vadd.f32 %v1277_v18, %v860_v46  ;;  %v1346_v1 = vpop.f32.mrf.mxu0  ;;  %v2410_v46 = vld [vmem:[#allocation11_spill] sm:$0xff]  ;;  %v2411_v14 = vld [vmem:[#allocation16_spill] sm:$0xff] }
 0x140   : > { %1591 = vst [vmem:[%s2275_s9 + $0x78] sm:$0xff] %v1562_v8  ;;  %v1568_v11 = vmax.f32 %v1540_v7, 0.0  ;;  %v1541_v63 = vadd.f32 %v2261_v30, %v1476_v55  ;;  %v1458_v28 = vadd.f32 %v1346_v1, %v929_v47  ;;  %v1828_v31 = vpop.f32.mrf.mxu1  ;;  %v943_v23 = vadd.f32 %v2411_v14, %v2410_v46  ;;  %v2412_v18 = vld [vmem:[#allocation12_spill] sm:$0xff] }
 0x141   : > { %1593 = vst [vmem:[%s2275_s9 + $0x88] sm:$0xff] %v1564_v17  ;;  %v1570_v19 = vmax.f32 %v1542_v20, 0.0  ;;  %v1543_v25 = vadd.f32 %v2264_v58, %v1478_v40  ;;  %v1467_v41 = vadd.f32 %v1828_v31, %v1023_v48  ;;  %v1348_v9 = vpop.f32.mrf.mxu0  ;;  %v2413_v48 = vld [vmem:[#allocation18_spill] sm:$0xff] }
 0x142   : > { %1597 = vst [vmem:[%s2275_s9 + $0xa8] sm:$0x3] %v1568_v11  ;;  %v1569_v13 = vmax.f32 %v1541_v63, 0.0  ;;  %v1523_v30 = vadd.f32 %v2266_v26, %v1458_v28  ;;  %v1459_v32 = vadd.f32 %v1348_v9, %v931_v49  ;;  %v1435_v33 = vpop.f32.mrf.mxu1  ;;  %v947_v17 = vadd.f32 %v2413_v48, %v2412_v18  ;;  %v2414_v63 = vld [vmem:[#allocation13_spill] sm:$0xff]  ;;  %v2415_v28 = vld [vmem:[#allocation20_spill] sm:$0xff] }
 0x143   : > { %1599 = vst [vmem:[%s2275_s9 + $0xb8] sm:$0x3] %v1570_v19  ;;  %v1571_v22 = vmax.f32 %v1543_v25, 0.0  ;;  %v1532_v58 = vadd.f32 %v2270_v24, %v1467_v41  ;;  %v1460_v2 = vadd.f32 %v1435_v33, %v1018_v50  ;;  %v1352_v16 = vpop.f32.mrf.mxu0  ;;  %v949_v31 = vadd.f32 %v2415_v28, %v2414_v63 }
 0x144   : > { %1598 = vst [vmem:[%s2275_s9 + $0xb0] sm:$0x3] %v1569_v13  ;;  %v1551_v15 = vmax.f32 %v1523_v30, 0.0  ;;  %v1524_v0 = vadd.f32 %v2279_v60, %v1459_v32  ;;  %v1465_v10 = vadd.f32 %v1352_v16, %v935_v51  ;;  %v1831_v3 = vpop.f32.mrf.mxu1 }
 0x145   : > { %1600 = vst [vmem:[%s2275_s9 + $0xc0] sm:$0x3] %v1571_v22  ;;  %v1560_v43 = vmax.f32 %v1532_v58, 0.0  ;;  %v1525_v4 = vadd.f32 %v2270_v24, %v1460_v2  ;;  %v1481_v36 = vadd.f32 %v1831_v3, %v1033_v52  ;;  %v1354_v37 = vpop.f32.mrf.mxu0 }
 0x146   : > { %1579 = vst [vmem:[%s2275_s9 + $0x20] sm:$0xff] %v1551_v15  ;;  %v1552_v59 = vmax.f32 %v1524_v0, 0.0  ;;  %v1530_v38 = vadd.f32 %v2266_v26, %v1465_v10  ;;  %v1466_v57 = vadd.f32 %v1354_v37, %v937_v53  ;;  %v1445_v45 = vpop.f32.mrf.mxu1 }
 0x147   : > { %1589 = vst.msk [vmem:[%s2275_s9 + $0x68] sm:$0xff] %vm1581_vm2, %v1560_v43  ;;  %v1553_v6 = vmax.f32 %v1525_v4, 0.0  ;;  %v1546_v61 = vadd.f32 %v2270_v24, %v1481_v36  ;;  %v1474_v62 = vadd.f32 %v1445_v45, %v1028_v54  ;;  %v1358_v5 = vpop.f32.mrf.mxu0 }
 0x148   : > { %1580 = vst [vmem:[%s2275_s9 + $0x28] sm:$0xff] %v1552_v59  ;;  %v1558_v27 = vmax.f32 %v1530_v38, 0.0  ;;  %v1531_v39 = vadd.f32 %v2279_v60, %v1466_v57  ;;  %v1472_v47 = vadd.f32 %v1358_v5, %v941_v12 }
 0x149   : > { %1582 = vst.msk [vmem:[%s2275_s9 + $0x30] sm:$0xff] %vm1581_vm2, %v1553_v6  ;;  %v1574_v8 = vmax.f32 %v1546_v61, 0.0  ;;  %v1539_v7 = vadd.f32 %v2270_v24, %v1474_v62  ;;  %v1360_v55 = vpop.f32.mrf.mxu0 }
 0x14a   : > { %1587 = vst [vmem:[%s2275_s9 + $0x58] sm:$0xff] %v1558_v27  ;;  %v1559_v20 = vmax.f32 %v1531_v39, 0.0  ;;  %v1537_v40 = vadd.f32 %v2266_v26, %v1472_v47  ;;  %v1473_v1 = vadd.f32 %v1360_v55, %v943_v23 }
 0x14b   : > { %1604 = vst.msk [vmem:[%s2275_s9 + $0xd8] sm:$0x3] %vm1603_vm3, %v1574_v8  ;;  %v1567_v49 = vmax.f32 %v1539_v7, 0.0  ;;  %v1364_v11 = vpop.f32.mrf.mxu0 }
 0x14c   : > { %1588 = vst [vmem:[%s2275_s9 + $0x60] sm:$0xff] %v1559_v20  ;;  %v1565_v24 = vmax.f32 %v1537_v40, 0.0  ;;  %v1538_v50 = vadd.f32 %v2279_v60, %v1473_v1  ;;  %v1479_v19 = vadd.f32 %v1364_v11, %v947_v17 }
 0x14d   : > { %1596 = vst.msk [vmem:[%s2275_s9 + $0xa0] sm:$0xff] %vm1581_vm2, %v1567_v49  ;;  %v1366_v25 = vpop.f32.mrf.mxu0 }
 0x14e   : > { %1594 = vst [vmem:[%s2275_s9 + $0x90] sm:$0xff] %v1565_v24  ;;  %v1566_v41 = vmax.f32 %v1538_v50, 0.0  ;;  %v1544_v9 = vadd.f32 %v2266_v26, %v1479_v19  ;;  %v1480_v51 = vadd.f32 %v1366_v25, %v949_v31 }
 0x150   : > { %1595 = vst [vmem:[%s2275_s9 + $0x98] sm:$0xff] %v1566_v41  ;;  %v1572_v13 = vmax.f32 %v1544_v9, 0.0  ;;  %v1545_v30 = vadd.f32 %v2279_v60, %v1480_v51 }
 0x152   : > { %1601 = vst [vmem:[%s2275_s9 + $0xc8] sm:$0x3] %v1572_v13  ;;  %v1573_v32 = vmax.f32 %v1545_v30, 0.0 }
 0x154   : > { %1602 = vst [vmem:[%s2275_s9 + $0xd0] sm:$0x3] %v1573_v32 }
 0x155 PF: > { %s15_s12 = sadd.s32 1, %s1931_s12  }
 0x156   : > { %p12_p2 = scmp.ge.s32.totalorder %s15_s12, 4  }
 0x158   :  { %14 = sbr.rel (!%p12_p2) target bundleno = 2 (0x2), region = 73 }
 0x15d   :  { %1626 = vsyncpa [#allocation3], 1 }
 0x15e   :  { %1628 = vsyncpa [#allocation3 + $0x1], 1 }
 0x15f   :  { %1629 = vsyncpa [#allocation5], 1 }

// kernel: dnn_forward.5
= control target key start
LH: loop header
LB: loop body
LE: loop exit
PB: predicated region body
PF: predicated region fallthrough
CT: control target
= control target key end

     0   :  { %10 = vsyncpa [#allocation4], 0  ;;  %s2634_s0 = inlined_call_operand.vmem [shape: f32[8,9216], index: 0, kind: input, shape index: {}]   ;;  %s2635_s1 = inlined_call_operand.hbm [shape: f32[9216,128], index: 1, kind: input, shape index: {}]   ;;  %s2636_s2 = inlined_call_operand.hbm [shape: f32[1,128], index: 2, kind: input, shape index: {}]   ;;  %s2637_s3 = inlined_call_operand.vmem [shape: f32[128,10], index: 3, kind: input, shape index: {}]   ;;  %s2638_s4 = inlined_call_operand.hbm [shape: f32[1,10], index: 4, kind: input, shape index: {}]   ;;  %s2639_s5 = inlined_call_operand.vmem [shape: f32[8,10], index: 5, kind: output, shape index: {}]  }
   0x1   :  { %12 = vsyncpa [#allocation4 + $0x1], 0 }
   0x2   :  { %13 = vsyncpa [#allocation6], 0  ;;  %s2135_s18 = smov 0   ;;  %s2137_s19 = smov 0  }
   0x3   :  { %s2139_s20 = smov 0   ;;  %s2141_s21 = smov 0  }
   0x4   :  { %s2143_s22 = smov 0   ;;  %s2145_s23 = smov 0  }
   0x5 LB: > { %s1489_s24 = sadd.s32 4294967295, %s2095_s23   ;;  %s66_s25 = sadd.s32 1, %s2083_s20  ;;  %s2095_s23 = sphi %s2145_s23, %s19_s23   ;;  %s2091_s22 = sphi %s2143_s22, %s2652_s22   ;;  %s2087_s21 = sphi %s2141_s21, %s2651_s21   ;;  %s2083_s20 = sphi %s2139_s20, %s2650_s20   ;;  %s2079_s19 = sphi %s2137_s19, %s2649_s19   ;;  %s2075_s18 = sphi %s2135_s18, %s2648_s18  }
   0x6   : > { %p73_p0 = scmp.ne.s32.totalorder %s2083_s20, %s2079_s19  ;;  %p74_p1 = scmp.eq.s32.totalorder %s2095_s23, 0 }
   0x7   : > { %p79_p2 = scmp.ne.s32.totalorder %s2079_s19, %s2075_s18  ;;  %p2169_p3 = scmp.eq.s32.totalorder %s1489_s24, 0 }
   0x8   : > { %p75_p4 = por %p74_p1, %p73_p0  ;;  %p1490_p5 = scmp.ge.s32.totalorder %s2095_s23, 1 }
   0x9   : > { %s2642_s26 = scalar_select %p2169_p3, 1, 0 }
   0xa   : > { %p2176_p6 = por %p2169_p3, %p79_p2  ;;  %p179_p7 = scmp.lt.s32.totalorder %s2095_s23, 5 }
   0xb   : > { %s2097_s29 = smov [#allocation5]   ;;  %p1899_p10 = scmp.lt.s32.totalorder %s2095_s23, 4 }
   0xc   : > { %p2181_p8 = pnand %p1490_p5, %p179_p7  ;;  %s192_s30 = sshll.u32 %s2097_s29, 4  ;;  %s193_s30 = int_to_ptr.vmem [resolvable:$true] %s192_s30 }
   0xd   : > { %p2194_p12 = pnand %p1899_p10, %p75_p4  ;;  %s2098_s8 = smov [#allocation7]  }
   0xe   : > { %p1886_p9 = pneg %p2181_p8  ;;  %s206_s9 = sshll.u32 %s2098_s8, 4  ;;  %s207_s9 = int_to_ptr.vmem [resolvable:$true] %s206_s9 }
   0xf   : > { %s1972_s10 = scalar_lea.vmem %s193_s30, 16  ;;  %s1979_s11 = scalar_lea.vmem %s193_s30, 32 }
  0x10   : > { %p2190_p11 = pnand %p1886_p9, %p2169_p3  ;;  %p1973_p0 = scmp.ne.s32.totalorder %s193_s30, %s1972_s10 }
  0x11   : > { %p1980_p5 = scmp.lt.s32.totalorder %s193_s30, %s193_s30  ;;  %p1981_p7 = scmp.lt.s32.totalorder %s1979_s11, %s1972_s10 }
  0x12   : > { %p1963_p13 = pneg %p2190_p11 }
  0x13   : > { %p1982_p9 = por %p1981_p7, %p1980_p5 }
  0x14   : > { %p1975_p1 = pnand %p1973_p0, %p1963_p13 }
  0x16   : > { %p1976_p2 = pneg %p1975_p1 }
  0x18   : > { %p1983_p3 = pnand %p1982_p9, %p1976_p2 }
  0x1a   : > { %1986 = shalt.err (!%p1983_p3)
}
  0x1b   : > { %1889 = dma.hbm_to_vmem [thread:$0]  (!%p2190_p11), %s2636_s2, 16, %s193_s30, [#allocation6]  }
  0x1c   : > { %s28_s14 = sadd.s32 1, %s2091_s22  ;;  %s1998_s15 = scalar_lea.vmem %s207_s9, 16 }
  0x1d   : > { %p1999_p4 = scmp.ne.s32.totalorder %s207_s9, %s1998_s15  ;;  %s2005_s16 = scalar_lea.vmem %s207_s9, 32 }
  0x1e   : > { %p2006_p1 = scmp.lt.s32.totalorder %s207_s9, %s207_s9  ;;  %p2007_p2 = scmp.lt.s32.totalorder %s2005_s16, %s1998_s15 }
  0x1f   : > { %p2001_p10 = pnand %p1999_p4, %p1963_p13 }
  0x20   : > { %p2008_p3 = por %p2007_p2, %p2006_p1 }
  0x21   : > { %p2002_p0 = pneg %p2001_p10 }
  0x23   : > { %p2009_p5 = pnand %p2008_p3, %p2002_p0 }
  0x25   : > { %2012 = shalt.err (!%p2009_p5)
}
  0x26   : > { %1892 = dma.hbm_to_vmem [thread:$0]  (!%p2190_p11), %s2638_s4, 16, %s207_s9, [#allocation6]  }
  0x27   : > { %p29_p13 = scmp.ge.s32.totalorder %s28_s14, 4  ;;  %s230_s24 = sand.u32 1, %s2083_s20  }
  0x28   : > { %s1874_s29 = smul.u32 2304, %s230_s24  ;;  %s231_s9 = scalar_lea.sflag [#allocation4], %s230_s24 }
  0x29   : > { %s2654_s14 = smov (%p29_p13, %s28_s14), 0  ;;  %s1506_s30 = smul.u32 36864, %s2091_s22 }
  0x2a   : > { %s63_s8 = ssub.s32 %s2091_s22, %s2654_s14  ;;  %s234_s10 = scalar_lea.vmem [#allocation3], %s1874_s29 }
  0x2b   : > { %s241_s6 = sshll.u32 %s234_s10, 4  ;;  %p64_p7 = scmp.eq.s32.totalorder %s63_s8, 0  ;;  %s242_s6 = int_to_ptr.vmem [resolvable:$true] %s241_s6 }
  0x2c   : > { %s240_s13 = scalar_lea.hbm %s2635_s1, %s1506_s30  ;;  %p2015_p11 = pneg %p2194_p12 }
  0x2d   : > { %s2229_s15 = scalar_select %p64_p7, %s2083_s20, %s66_s25  }
  0x2e   : > { %s2026_s16 = scalar_lea.vmem %s242_s6, 36864  ;;  %s2099_s17 = smov [#allocation3]  }
  0x2f   : > { %p2027_p9 = scmp.ne.s32.totalorder %s242_s6, %s2026_s16  ;;  %s2031_s18 = sshll.u32 %s2099_s17, 4  ;;  %s2032_s18 = int_to_ptr.vmem [resolvable:$false] %s2031_s18 }
  0x30   : > { %s2033_s29 = scalar_lea.vmem %s2032_s18, 73728  ;;  %p2034_p0 = scmp.lt.s32.totalorder %s242_s6, %s2032_s18 }
  0x31   : > { %p2029_p4 = pnand %p2027_p9, %p2015_p11  ;;  %p2035_p1 = scmp.lt.s32.totalorder %s2033_s29, %s2026_s16 }
  0x33   : > { %p2030_p10 = pneg %p2029_p4  ;;  %p2036_p2 = por %p2035_p1, %p2034_p0 }
  0x35   : > { %p2037_p3 = pnand %p2036_p2, %p2030_p10 }
  0x37   : > { %2040 = shalt.err (!%p2037_p3)
}
  0x38   : > { %s2100_s30 = smov 128   ;;  %s2101_s25 = smov 8  }
  0x39   : > { %1896 = dma.hbm_to_vmem [thread:$0]  (!%p2194_p12), %s240_s13, 36864, %s242_s6, %s231_s9, %s2100_s30, %s2100_s30, %s2101_s25  }
  0x3a   : > { %253 = sbr.rel (%p2181_p8) target bundleno = 990 (0x3de), region = 40  ;;  %s255_s24 = sand.u32 (!%p2181_p8), 1, %s2079_s19  }
  0x3b   : > { %s1875_s8 = smul.u32 (!%p2181_p8), 2304, %s255_s24  ;;  %s256_s10 = scalar_lea.sflag (!%p2181_p8), [#allocation4], %s255_s24 }
  0x3d   : > { %s2238_s11 = scalar_lea.vmem (!%p2181_p8), [#allocation3], %s1875_s8 }
  0x3f   : > { %2066 = dma.done.wait (%p2176_p6), %s256_s10, 36864  }
  0x40   : > { %2068 = vsyncadd (%p2176_p6), %s256_s10, 4294930432  ;;  %p2647_p5 = scmp.ne.s32.totalorder %s2642_s26, 0 }
  0x42   : > { %2070 = dma.done.wait (%p2647_p5), [#allocation6], 32  }
  0x43   : > { %2072 = vsyncadd (%p2647_p5), [#allocation6], 4294967264  ;;  %s302_s28 = smul.u32 18, %s2087_s21  ;;  %p1499_p12 = scmp.ne.s32.totalorder %s2087_s21, 0 }
  0x45   : > { %p305_p8 = scmp.lt.s32.totalorder %s302_s28, 71  ;;  %320 = sbr.rel (%p1499_p12) target bundleno = 76 (0x4c), region = 56 }
  0x47   : > { %s2656_s28 = smov (!%p305_p8, %s302_s28), 71 }
  0x48   : > { %s1498_s7 = sshll.u32 %s2656_s28, 3 }
  0x49   : > { %s2252_s13 = scalar_lea.vmem %s2634_s0, %s1498_s7 }
  0x4a   : > { %v2102_v0 = vmov 0.0  }
  0x4b   : > { %321 = vst [vmem:[#allocation2] sm:$0xff] %v2102_v0 }
  0x4c PF: > { %v372_v1 = vld [vmem:[%s2238_s11 + $0xf8] sm:$0xff]  ;;  %v371_v5 = vld [vmem:[%s2238_s11 + $0xf0] sm:$0xff]  ;;  %v370_v9 = vld [vmem:[%s2238_s11 + $0xe8] sm:$0xff]  ;;  %p1500_p6 = scmp.ne.s32.totalorder %s2087_s21, 3 }
  0x4d   : > { %v404_v2 = vld [vmem:[%s2238_s11 + $0x1f8] sm:$0xff]  ;;  %1507 = vmatprep.subr.mxu0 %v372_v1  ;;  %v403_v6 = vld [vmem:[%s2238_s11 + $0x1f0] sm:$0xff]  ;;  %v402_v10 = vld [vmem:[%s2238_s11 + $0x1e8] sm:$0xff] }
  0x4e   : > { %v356_v3 = vld [vmem:[%s2238_s11 + $0x78] sm:$0xff]  ;;  %1542 = vmatprep.subr.mxu1 %v404_v2  ;;  %v355_v7 = vld [vmem:[%s2238_s11 + $0x70] sm:$0xff]  ;;  %v354_v11 = vld [vmem:[%s2238_s11 + $0x68] sm:$0xff] }
  0x4f   : > { %v388_v4 = vld [vmem:[%s2238_s11 + $0x178] sm:$0xff]  ;;  %1508 = vmatpush3.msra.mxu0 %v356_v3  ;;  %v387_v8 = vld [vmem:[%s2238_s11 + $0x170] sm:$0xff]  ;;  %v386_v12 = vld [vmem:[%s2238_s11 + $0x168] sm:$0xff] }
  0x50   : > { %1543 = vmatpush3.msra.mxu1 %v388_v4  ;;  %1509 = vmatprep.subr.mxu0 %v371_v5  ;;  %v369_v13 = vld [vmem:[%s2238_s11 + $0xe0] sm:$0xff]  ;;  %v368_v17 = vld [vmem:[%s2238_s11 + $0xd8] sm:$0xff]  ;;  %v367_v21 = vld [vmem:[%s2238_s11 + $0xd0] sm:$0xff] }
  0x51   : > { %1544 = vmatprep.subr.mxu1 %v403_v6  ;;  %1510 = vmatpush3.msra.mxu0 %v355_v7  ;;  %v401_v14 = vld [vmem:[%s2238_s11 + $0x1e0] sm:$0xff]  ;;  %v400_v18 = vld [vmem:[%s2238_s11 + $0x1d8] sm:$0xff]  ;;  %v399_v22 = vld [vmem:[%s2238_s11 + $0x1d0] sm:$0xff] }
  0x52   : > { %1545 = vmatpush3.msra.mxu1 %v387_v8  ;;  %1511 = vmatprep.subr.mxu0 %v370_v9  ;;  %v353_v15 = vld [vmem:[%s2238_s11 + $0x60] sm:$0xff]  ;;  %v352_v19 = vld [vmem:[%s2238_s11 + $0x58] sm:$0xff]  ;;  %v351_v23 = vld [vmem:[%s2238_s11 + $0x50] sm:$0xff] }
  0x53   : > { %1546 = vmatprep.subr.mxu1 %v402_v10  ;;  %v385_v16 = vld [vmem:[%s2238_s11 + $0x160] sm:$0xff]  ;;  %1512 = vmatpush3.msra.mxu0 %v354_v11  ;;  %v384_v20 = vld [vmem:[%s2238_s11 + $0x158] sm:$0xff]  ;;  %v383_v24 = vld [vmem:[%s2238_s11 + $0x150] sm:$0xff] }
  0x54   : > { %1547 = vmatpush3.msra.mxu1 %v386_v12  ;;  %1513 = vmatprep.subr.mxu0 %v369_v13  ;;  %v366_v25 = vld [vmem:[%s2238_s11 + $0xc8] sm:$0xff]  ;;  %v365_v29 = vld [vmem:[%s2238_s11 + $0xc0] sm:$0xff]  ;;  %v364_v33 = vld [vmem:[%s2238_s11 + $0xb8] sm:$0xff] }
  0x55   : > { %1548 = vmatprep.subr.mxu1 %v401_v14  ;;  %1514 = vmatpush3.msra.mxu0 %v353_v15  ;;  %v398_v26 = vld [vmem:[%s2238_s11 + $0x1c8] sm:$0xff]  ;;  %v397_v30 = vld [vmem:[%s2238_s11 + $0x1c0] sm:$0xff]  ;;  %v396_v34 = vld [vmem:[%s2238_s11 + $0x1b8] sm:$0xff] }
  0x56   : > { %1549 = vmatpush3.msra.mxu1 %v385_v16  ;;  %1515 = vmatprep.subr.mxu0 %v368_v17  ;;  %v350_v27 = vld [vmem:[%s2238_s11 + $0x48] sm:$0xff]  ;;  %v349_v31 = vld [vmem:[%s2238_s11 + $0x40] sm:$0xff]  ;;  %v348_v35 = vld [vmem:[%s2238_s11 + $0x38] sm:$0xff] }
  0x57   : > { %1550 = vmatprep.subr.mxu1 %v400_v18  ;;  %1516 = vmatpush3.msra.mxu0 %v352_v19  ;;  %v382_v28 = vld [vmem:[%s2238_s11 + $0x148] sm:$0xff]  ;;  %v381_v32 = vld [vmem:[%s2238_s11 + $0x140] sm:$0xff]  ;;  %v380_v36 = vld [vmem:[%s2238_s11 + $0x138] sm:$0xff] }
  0x58   : > { %1551 = vmatpush3.msra.mxu1 %v384_v20  ;;  %1517 = vmatprep.subr.mxu0 %v367_v21  ;;  %v363_v37 = vld [vmem:[%s2238_s11 + $0xb0] sm:$0xff]  ;;  %v362_v41 = vld [vmem:[%s2238_s11 + $0xa8] sm:$0xff]  ;;  %v361_v45 = vld [vmem:[%s2238_s11 + $0xa0] sm:$0xff] }
  0x59   : > { %1552 = vmatprep.subr.mxu1 %v399_v22  ;;  %1518 = vmatpush3.msra.mxu0 %v351_v23  ;;  %v395_v38 = vld [vmem:[%s2238_s11 + $0x1b0] sm:$0xff]  ;;  %v394_v42 = vld [vmem:[%s2238_s11 + $0x1a8] sm:$0xff]  ;;  %v393_v46 = vld [vmem:[%s2238_s11 + $0x1a0] sm:$0xff] }
  0x5a   : > { %1553 = vmatpush3.msra.mxu1 %v383_v24  ;;  %1519 = vmatprep.subr.mxu0 %v366_v25  ;;  %v347_v39 = vld [vmem:[%s2238_s11 + $0x30] sm:$0xff]  ;;  %v346_v43 = vld [vmem:[%s2238_s11 + $0x28] sm:$0xff]  ;;  %v345_v47 = vld [vmem:[%s2238_s11 + $0x20] sm:$0xff] }
  0x5b   : > { %1554 = vmatprep.subr.mxu1 %v398_v26  ;;  %1520 = vmatpush3.msra.mxu0 %v350_v27  ;;  %v379_v40 = vld [vmem:[%s2238_s11 + $0x130] sm:$0xff]  ;;  %v378_v44 = vld [vmem:[%s2238_s11 + $0x128] sm:$0xff]  ;;  %v377_v48 = vld [vmem:[%s2238_s11 + $0x120] sm:$0xff] }
  0x5c   : > { %1555 = vmatpush3.msra.mxu1 %v382_v28  ;;  %1521 = vmatprep.subr.mxu0 %v365_v29  ;;  %v360_v49 = vld [vmem:[%s2238_s11 + $0x98] sm:$0xff]  ;;  %v359_v53 = vld [vmem:[%s2238_s11 + $0x90] sm:$0xff]  ;;  %v358_v57 = vld [vmem:[%s2238_s11 + $0x88] sm:$0xff] }
  0x5d   : > { %1556 = vmatprep.subr.mxu1 %v397_v30  ;;  %1522 = vmatpush3.msra.mxu0 %v349_v31  ;;  %v392_v50 = vld [vmem:[%s2238_s11 + $0x198] sm:$0xff]  ;;  %v391_v54 = vld [vmem:[%s2238_s11 + $0x190] sm:$0xff]  ;;  %v390_v58 = vld [vmem:[%s2238_s11 + $0x188] sm:$0xff] }
  0x5e   : > { %1557 = vmatpush3.msra.mxu1 %v381_v32  ;;  %1523 = vmatprep.subr.mxu0 %v364_v33  ;;  %v344_v51 = vld [vmem:[%s2238_s11 + $0x18] sm:$0xff]  ;;  %v343_v55 = vld [vmem:[%s2238_s11 + $0x10] sm:$0xff]  ;;  %v342_v59 = vld [vmem:[%s2238_s11 + $0x8] sm:$0xff] }
  0x5f   : > { %1558 = vmatprep.subr.mxu1 %v396_v34  ;;  %1524 = vmatpush3.msra.mxu0 %v348_v35  ;;  %v376_v52 = vld [vmem:[%s2238_s11 + $0x118] sm:$0xff]  ;;  %v375_v56 = vld [vmem:[%s2238_s11 + $0x110] sm:$0xff]  ;;  %v374_v60 = vld [vmem:[%s2238_s11 + $0x108] sm:$0xff] }
  0x60   : > { %1559 = vmatpush3.msra.mxu1 %v380_v36  ;;  %1525 = vmatprep.subr.mxu0 %v363_v37  ;;  %v357_v61 = vld [vmem:[%s2238_s11 + $0x80] sm:$0xff]  ;;  %v326_v2 = vld [vmem:[%s2252_s13 + $0x18] sm:$0xff]  ;;  %v323_v3 = vld [vmem:[%s2252_s13] sm:$0xff] }
  0x61   : > { %1560 = vmatprep.subr.mxu1 %v395_v38  ;;  %1526 = vmatpush3.msra.mxu0 %v347_v39  ;;  %v389_v62 = vld [vmem:[%s2238_s11 + $0x180] sm:$0xff]  ;;  %v325_v4 = vld [vmem:[%s2252_s13 + $0x10] sm:$0xff]  ;;  %v436_v5 = vld [vmem:[%s2238_s11 + $0x2f8] sm:$0xff] }
  0x62   : > { %1561 = vmatpush3.msra.mxu1 %v379_v40  ;;  %1527 = vmatprep.subr.mxu0 %v362_v41  ;;  %v341_v63 = vld [vmem:[%s2238_s11] sm:$0xff]  ;;  %v468_v6 = vld [vmem:[%s2238_s11 + $0x3f8] sm:$0xff]  ;;  %v435_v9 = vld [vmem:[%s2238_s11 + $0x2f0] sm:$0xff] }
  0x63   : > { %1562 = vmatprep.subr.mxu1 %v394_v42  ;;  %1528 = vmatpush3.msra.mxu0 %v346_v43  ;;  %v324_v0 = vld [vmem:[%s2252_s13 + $0x8] sm:$0xff]  ;;  %v420_v7 = vld [vmem:[%s2238_s11 + $0x278] sm:$0xff]  ;;  %v467_v10 = vld [vmem:[%s2238_s11 + $0x3f0] sm:$0xff] }
  0x64   : > { %1563 = vmatpush3.msra.mxu1 %v378_v44  ;;  %1529 = vmatprep.subr.mxu0 %v361_v45  ;;  %v373_v1 = vld [vmem:[%s2238_s11 + $0x100] sm:$0xff]  ;;  %v452_v8 = vld [vmem:[%s2238_s11 + $0x378] sm:$0xff]  ;;  %v419_v11 = vld [vmem:[%s2238_s11 + $0x270] sm:$0xff] }
  0x65   : > { %1564 = vmatprep.subr.mxu1 %v393_v46  ;;  %1530 = vmatpush3.msra.mxu0 %v345_v47  ;;  %v451_v12 = vld [vmem:[%s2238_s11 + $0x370] sm:$0xff]  ;;  %v434_v13 = vld [vmem:[%s2238_s11 + $0x2e8] sm:$0xff]  ;;  %v433_v17 = vld [vmem:[%s2238_s11 + $0x2e0] sm:$0xff] }
  0x66   : > { %1565 = vmatpush3.msra.mxu1 %v377_v48  ;;  %1531 = vmatprep.subr.mxu0 %v360_v49  ;;  %v466_v14 = vld [vmem:[%s2238_s11 + $0x3e8] sm:$0xff]  ;;  %v465_v18 = vld [vmem:[%s2238_s11 + $0x3e0] sm:$0xff]  ;;  %v432_v21 = vld [vmem:[%s2238_s11 + $0x2d8] sm:$0xff] }
  0x67   : > { %1566 = vmatprep.subr.mxu1 %v392_v50  ;;  %1532 = vmatpush3.msra.mxu0 %v344_v51  ;;  %v418_v15 = vld [vmem:[%s2238_s11 + $0x268] sm:$0xff]  ;;  %v417_v19 = vld [vmem:[%s2238_s11 + $0x260] sm:$0xff]  ;;  %v464_v22 = vld [vmem:[%s2238_s11 + $0x3d8] sm:$0xff] }
  0x68   : > { %1567 = vmatpush3.msra.mxu1 %v376_v52  ;;  %1533 = vmatprep.subr.mxu0 %v359_v53  ;;  %v450_v16 = vld [vmem:[%s2238_s11 + $0x368] sm:$0xff]  ;;  %v449_v20 = vld [vmem:[%s2238_s11 + $0x360] sm:$0xff]  ;;  %v416_v23 = vld [vmem:[%s2238_s11 + $0x258] sm:$0xff] }
  0x69   : > { %1568 = vmatprep.subr.mxu1 %v391_v54  ;;  %1534 = vmatpush3.msra.mxu0 %v343_v55  ;;  %v448_v24 = vld [vmem:[%s2238_s11 + $0x358] sm:$0xff]  ;;  %v431_v25 = vld [vmem:[%s2238_s11 + $0x2d0] sm:$0xff]  ;;  %v430_v29 = vld [vmem:[%s2238_s11 + $0x2c8] sm:$0xff] }
  0x6a   : > { %1569 = vmatpush3.msra.mxu1 %v375_v56  ;;  %1535 = vmatprep.subr.mxu0 %v358_v57  ;;  %v463_v26 = vld [vmem:[%s2238_s11 + $0x3d0] sm:$0xff]  ;;  %v462_v30 = vld [vmem:[%s2238_s11 + $0x3c8] sm:$0xff]  ;;  %v429_v33 = vld [vmem:[%s2238_s11 + $0x2c0] sm:$0xff] }
  0x6b   : > { %1570 = vmatprep.subr.mxu1 %v390_v58  ;;  %1536 = vmatpush3.msra.mxu0 %v342_v59  ;;  %v415_v27 = vld [vmem:[%s2238_s11 + $0x250] sm:$0xff]  ;;  %v414_v31 = vld [vmem:[%s2238_s11 + $0x248] sm:$0xff]  ;;  %v461_v34 = vld [vmem:[%s2238_s11 + $0x3c0] sm:$0xff] }
  0x6c   : > { %1571 = vmatpush3.msra.mxu1 %v374_v60  ;;  %1537 = vmatprep.subr.mxu0 %v357_v61  ;;  %v447_v28 = vld [vmem:[%s2238_s11 + $0x350] sm:$0xff]  ;;  %v446_v32 = vld [vmem:[%s2238_s11 + $0x348] sm:$0xff]  ;;  %v413_v35 = vld [vmem:[%s2238_s11 + $0x240] sm:$0xff] }
  0x6d   : > { %1572 = vmatprep.subr.mxu1 %v389_v62  ;;  %1538 = vmatpush3.msra.mxu0 %v341_v63  ;;  %v445_v36 = vld [vmem:[%s2238_s11 + $0x340] sm:$0xff]  ;;  %v428_v37 = vld [vmem:[%s2238_s11 + $0x2b8] sm:$0xff]  ;;  %v427_v41 = vld [vmem:[%s2238_s11 + $0x2b0] sm:$0xff] }
  0x6e   : > { %693 = vmatprep.mubr.f32.mxu0 %v324_v0  ;;  %1573 = vmatpush3.msra.mxu1 %v373_v1  ;;  %v460_v38 = vld [vmem:[%s2238_s11 + $0x3b8] sm:$0xff]  ;;  %v459_v42 = vld [vmem:[%s2238_s11 + $0x3b0] sm:$0xff]  ;;  %v426_v45 = vld [vmem:[%s2238_s11 + $0x2a8] sm:$0xff] }
  0x6f   : > { %763 = vmatprep.mubr.f32.mxu1 %v326_v2  ;;  %694 = vmatmul.mubr.f32.vlgmr.msra.gmra.mxu0 %v323_v3  ;;  %v412_v39 = vld [vmem:[%s2238_s11 + $0x238] sm:$0xff]  ;;  %v411_v43 = vld [vmem:[%s2238_s11 + $0x230] sm:$0xff]  ;;  %v458_v46 = vld [vmem:[%s2238_s11 + $0x3a8] sm:$0xff] }
  0x70   : > { %764 = vmatmul.mubr.f32.vlgmr.msra.gmra.mxu1 %v325_v4  ;;  %1577 = vmatprep.subr.mxu0 %v436_v5  ;;  %v444_v40 = vld [vmem:[%s2238_s11 + $0x338] sm:$0xff]  ;;  %v443_v44 = vld [vmem:[%s2238_s11 + $0x330] sm:$0xff]  ;;  %v410_v47 = vld [vmem:[%s2238_s11 + $0x228] sm:$0xff] }
  0x71   : > { %1612 = vmatprep.subr.mxu1 %v468_v6  ;;  %1578 = vmatpush3.msra.mxu0 %v420_v7  ;;  %v442_v48 = vld [vmem:[%s2238_s11 + $0x328] sm:$0xff]  ;;  %v425_v49 = vld [vmem:[%s2238_s11 + $0x2a0] sm:$0xff]  ;;  %v424_v53 = vld [vmem:[%s2238_s11 + $0x298] sm:$0xff] }
  0x72   : > { %1613 = vmatpush3.msra.mxu1 %v452_v8  ;;  %1579 = vmatprep.subr.mxu0 %v435_v9  ;;  %v457_v50 = vld [vmem:[%s2238_s11 + $0x3a0] sm:$0xff]  ;;  %v456_v54 = vld [vmem:[%s2238_s11 + $0x398] sm:$0xff]  ;;  %v423_v57 = vld [vmem:[%s2238_s11 + $0x290] sm:$0xff] }
  0x73   : > { %1614 = vmatprep.subr.mxu1 %v467_v10  ;;  %1580 = vmatpush3.msra.mxu0 %v419_v11  ;;  %v409_v51 = vld [vmem:[%s2238_s11 + $0x220] sm:$0xff]  ;;  %v408_v55 = vld [vmem:[%s2238_s11 + $0x218] sm:$0xff]  ;;  %v455_v58 = vld [vmem:[%s2238_s11 + $0x390] sm:$0xff] }
  0x74   : > { %1615 = vmatpush3.msra.mxu1 %v451_v12  ;;  %1581 = vmatprep.subr.mxu0 %v434_v13  ;;  %v441_v52 = vld [vmem:[%s2238_s11 + $0x320] sm:$0xff]  ;;  %v440_v56 = vld [vmem:[%s2238_s11 + $0x318] sm:$0xff]  ;;  %v407_v59 = vld [vmem:[%s2238_s11 + $0x210] sm:$0xff] }
  0x75   : > { %1616 = vmatprep.subr.mxu1 %v466_v14  ;;  %1582 = vmatpush3.msra.mxu0 %v418_v15  ;;  %v439_v60 = vld [vmem:[%s2238_s11 + $0x310] sm:$0xff]  ;;  %v422_v61 = vld [vmem:[%s2238_s11 + $0x288] sm:$0xff]  ;;  %v328_v0 = vld [vmem:[%s2252_s13 + $0x28] sm:$0xff] }
  0x76   : > { %1617 = vmatpush3.msra.mxu1 %v450_v16  ;;  %1583 = vmatprep.subr.mxu0 %v433_v17  ;;  %v454_v62 = vld [vmem:[%s2238_s11 + $0x388] sm:$0xff]  ;;  %v421_v1 = vld [vmem:[%s2238_s11 + $0x280] sm:$0xff]  ;;  %v327_v5 = vld [vmem:[%s2252_s13 + $0x20] sm:$0xff] }
  0x77   : > { %1618 = vmatprep.subr.mxu1 %v465_v18  ;;  %1584 = vmatpush3.msra.mxu0 %v417_v19  ;;  %v406_v63 = vld [vmem:[%s2238_s11 + $0x208] sm:$0xff]  ;;  %v405_v3 = vld [vmem:[%s2238_s11 + $0x200] sm:$0xff]  ;;  %v500_v6 = vld [vmem:[%s2238_s11 + $0x4f8] sm:$0xff] }
  0x78   : > { %1619 = vmatpush3.msra.mxu1 %v449_v20  ;;  %1585 = vmatprep.subr.mxu0 %v432_v21  ;;  %v438_v2 = vld [vmem:[%s2238_s11 + $0x308] sm:$0xff]  ;;  %v453_v4 = vld [vmem:[%s2238_s11 + $0x380] sm:$0xff]  ;;  %v330_v8 = vld [vmem:[%s2252_s13 + $0x38] sm:$0xff] }
  0x79   : > { %1620 = vmatprep.subr.mxu1 %v464_v22  ;;  %1586 = vmatpush3.msra.mxu0 %v416_v23  ;;  %v437_v7 = vld [vmem:[%s2238_s11 + $0x300] sm:$0xff]  ;;  %v484_v9 = vld [vmem:[%s2238_s11 + $0x478] sm:$0xff]  ;;  %v329_v10 = vld [vmem:[%s2252_s13 + $0x30] sm:$0xff] }
  0x7a   : > { %1621 = vmatpush3.msra.mxu1 %v448_v24  ;;  %1587 = vmatprep.subr.mxu0 %v431_v25  ;;  %v499_v11 = vld [vmem:[%s2238_s11 + $0x4f0] sm:$0xff]  ;;  %v532_v12 = vld [vmem:[%s2238_s11 + $0x5f8] sm:$0xff]  ;;  %v498_v15 = vld [vmem:[%s2238_s11 + $0x4e8] sm:$0xff] }
  0x7b   : > { %1622 = vmatprep.subr.mxu1 %v463_v26  ;;  %1588 = vmatpush3.msra.mxu0 %v415_v27  ;;  %v483_v13 = vld [vmem:[%s2238_s11 + $0x470] sm:$0xff]  ;;  %v516_v14 = vld [vmem:[%s2238_s11 + $0x578] sm:$0xff]  ;;  %v482_v17 = vld [vmem:[%s2238_s11 + $0x468] sm:$0xff] }
  0x7c   : > { %1623 = vmatpush3.msra.mxu1 %v447_v28  ;;  %1589 = vmatprep.subr.mxu0 %v430_v29  ;;  %v531_v16 = vld [vmem:[%s2238_s11 + $0x5f0] sm:$0xff]  ;;  %v497_v19 = vld [vmem:[%s2238_s11 + $0x4e0] sm:$0xff]  ;;  %v530_v20 = vld [vmem:[%s2238_s11 + $0x5e8] sm:$0xff] }
  0x7d   : > { %1624 = vmatprep.subr.mxu1 %v462_v30  ;;  %1590 = vmatpush3.msra.mxu0 %v414_v31  ;;  %v515_v18 = vld [vmem:[%s2238_s11 + $0x570] sm:$0xff]  ;;  %v481_v21 = vld [vmem:[%s2238_s11 + $0x460] sm:$0xff]  ;;  %v514_v22 = vld [vmem:[%s2238_s11 + $0x568] sm:$0xff] }
  0x7e   : > { %1625 = vmatpush3.msra.mxu1 %v446_v32  ;;  %1591 = vmatprep.subr.mxu0 %v429_v33  ;;  %v496_v23 = vld [vmem:[%s2238_s11 + $0x4d8] sm:$0xff]  ;;  %v529_v24 = vld [vmem:[%s2238_s11 + $0x5e0] sm:$0xff]  ;;  %v495_v27 = vld [vmem:[%s2238_s11 + $0x4d0] sm:$0xff] }
  0x7f   : > { %1626 = vmatprep.subr.mxu1 %v461_v34  ;;  %1592 = vmatpush3.msra.mxu0 %v413_v35  ;;  %v480_v25 = vld [vmem:[%s2238_s11 + $0x458] sm:$0xff]  ;;  %v513_v26 = vld [vmem:[%s2238_s11 + $0x560] sm:$0xff]  ;;  %v479_v29 = vld [vmem:[%s2238_s11 + $0x450] sm:$0xff] }
  0x80   : > { %1627 = vmatpush3.msra.mxu1 %v445_v36  ;;  %1593 = vmatprep.subr.mxu0 %v428_v37  ;;  %v528_v28 = vld [vmem:[%s2238_s11 + $0x5d8] sm:$0xff]  ;;  %v494_v31 = vld [vmem:[%s2238_s11 + $0x4c8] sm:$0xff]  ;;  %v527_v32 = vld [vmem:[%s2238_s11 + $0x5d0] sm:$0xff] }
  0x81   : > { %1628 = vmatprep.subr.mxu1 %v460_v38  ;;  %1594 = vmatpush3.msra.mxu0 %v412_v39  ;;  %v512_v30 = vld [vmem:[%s2238_s11 + $0x558] sm:$0xff]  ;;  %v478_v33 = vld [vmem:[%s2238_s11 + $0x448] sm:$0xff]  ;;  %v511_v34 = vld [vmem:[%s2238_s11 + $0x550] sm:$0xff] }
  0x82   : > { %1629 = vmatpush3.msra.mxu1 %v444_v40  ;;  %1595 = vmatprep.subr.mxu0 %v427_v41  ;;  %v493_v35 = vld [vmem:[%s2238_s11 + $0x4c0] sm:$0xff]  ;;  %v526_v36 = vld [vmem:[%s2238_s11 + $0x5c8] sm:$0xff]  ;;  %v492_v39 = vld [vmem:[%s2238_s11 + $0x4b8] sm:$0xff] }
  0x83   : > { %1630 = vmatprep.subr.mxu1 %v459_v42  ;;  %1596 = vmatpush3.msra.mxu0 %v411_v43  ;;  %v477_v37 = vld [vmem:[%s2238_s11 + $0x440] sm:$0xff]  ;;  %v510_v38 = vld [vmem:[%s2238_s11 + $0x548] sm:$0xff]  ;;  %v476_v41 = vld [vmem:[%s2238_s11 + $0x438] sm:$0xff] }
  0x84   : > { %1631 = vmatpush3.msra.mxu1 %v443_v44  ;;  %1597 = vmatprep.subr.mxu0 %v426_v45  ;;  %v525_v40 = vld [vmem:[%s2238_s11 + $0x5c0] sm:$0xff]  ;;  %v491_v43 = vld [vmem:[%s2238_s11 + $0x4b0] sm:$0xff]  ;;  %v524_v44 = vld [vmem:[%s2238_s11 + $0x5b8] sm:$0xff] }
  0x85   : > { %1632 = vmatprep.subr.mxu1 %v458_v46  ;;  %1598 = vmatpush3.msra.mxu0 %v410_v47  ;;  %v509_v42 = vld [vmem:[%s2238_s11 + $0x540] sm:$0xff]  ;;  %v475_v45 = vld [vmem:[%s2238_s11 + $0x430] sm:$0xff]  ;;  %v508_v46 = vld [vmem:[%s2238_s11 + $0x538] sm:$0xff] }
  0x86   : > { %1633 = vmatpush3.msra.mxu1 %v442_v48  ;;  %1599 = vmatprep.subr.mxu0 %v425_v49  ;;  %v490_v47 = vld [vmem:[%s2238_s11 + $0x4a8] sm:$0xff]  ;;  %v523_v48 = vld [vmem:[%s2238_s11 + $0x5b0] sm:$0xff] }
  0x87   : > { %1634 = vmatprep.subr.mxu1 %v457_v50  ;;  %1600 = vmatpush3.msra.mxu0 %v409_v51  ;;  %v474_v49 = vld [vmem:[%s2238_s11 + $0x428] sm:$0xff]  ;;  %v507_v50 = vld [vmem:[%s2238_s11 + $0x530] sm:$0xff]  ;;  %v489_v51 = vld [vmem:[%s2238_s11 + $0x4a0] sm:$0xff] }
  0x88   : > { %1635 = vmatpush3.msra.mxu1 %v441_v52  ;;  %1601 = vmatprep.subr.mxu0 %v424_v53  ;;  %v522_v52 = vld [vmem:[%s2238_s11 + $0x5a8] sm:$0xff]  ;;  %v473_v53 = vld [vmem:[%s2238_s11 + $0x420] sm:$0xff] }
  0x89   : > { %1636 = vmatprep.subr.mxu1 %v456_v54  ;;  %1602 = vmatpush3.msra.mxu0 %v408_v55  ;;  %v506_v54 = vld [vmem:[%s2238_s11 + $0x528] sm:$0xff]  ;;  %v488_v55 = vld [vmem:[%s2238_s11 + $0x498] sm:$0xff] }
  0x8a   : > { %1637 = vmatpush3.msra.mxu1 %v440_v56  ;;  %1603 = vmatprep.subr.mxu0 %v423_v57  ;;  %v521_v56 = vld [vmem:[%s2238_s11 + $0x5a0] sm:$0xff]  ;;  %v472_v57 = vld [vmem:[%s2238_s11 + $0x418] sm:$0xff] }
  0x8b   : > { %1638 = vmatprep.subr.mxu1 %v455_v58  ;;  %1604 = vmatpush3.msra.mxu0 %v407_v59  ;;  %v505_v58 = vld [vmem:[%s2238_s11 + $0x520] sm:$0xff]  ;;  %v487_v59 = vld [vmem:[%s2238_s11 + $0x490] sm:$0xff] }
  0x8c   : > { %1639 = vmatpush3.msra.mxu1 %v439_v60  ;;  %1605 = vmatprep.subr.mxu0 %v422_v61  ;;  %v520_v60 = vld [vmem:[%s2238_s11 + $0x598] sm:$0xff]  ;;  %v471_v61 = vld [vmem:[%s2238_s11 + $0x410] sm:$0xff] }
  0x8d   : > { %1640 = vmatprep.subr.mxu1 %v454_v62  ;;  %1606 = vmatpush3.msra.mxu0 %v406_v63  ;;  %v504_v62 = vld [vmem:[%s2238_s11 + $0x518] sm:$0xff]  ;;  %v486_v63 = vld [vmem:[%s2238_s11 + $0x488] sm:$0xff] }
  0x8e   : > { %833 = vmatprep.mubr.f32.mxu0 %v328_v0  ;;  %1607 = vmatprep.subr.mxu0 %v421_v1  ;;  %v519_v0 = vld [vmem:[%s2238_s11 + $0x590] sm:$0xff]  ;;  %v470_v1 = vld [vmem:[%s2238_s11 + $0x408] sm:$0xff] }
  0x8f   : > { %1641 = vmatpush3.msra.mxu1 %v438_v2  ;;  %1608 = vmatpush3.msra.mxu0 %v405_v3  ;;  %v503_v2 = vld [vmem:[%s2238_s11 + $0x510] sm:$0xff]  ;;  %v485_v3 = vld [vmem:[%s2238_s11 + $0x480] sm:$0xff] }
  0x90   : > { %1642 = vmatprep.subr.mxu1 %v453_v4  ;;  %834 = vmatmul.mubr.f32.vlgmr.msra.gmra.mxu0 %v327_v5  ;;  %v518_v4 = vld [vmem:[%s2238_s11 + $0x588] sm:$0xff]  ;;  %v469_v5 = vld [vmem:[%s2238_s11 + $0x400] sm:$0xff] }
  0x91   : > { %1647 = vmatprep.subr.mxu0 %v500_v6  ;;  %1643 = vmatpush3.msra.mxu1 %v437_v7  ;;  %v332_v6 = vld [vmem:[%s2252_s13 + $0x48] sm:$0xff]  ;;  %v502_v7 = vld [vmem:[%s2238_s11 + $0x508] sm:$0xff] }
  0x92   : > { %903 = vmatprep.mubr.f32.mxu1 %v330_v8  ;;  %1648 = vmatpush3.msra.mxu0 %v484_v9  ;;  %v331_v8 = vld [vmem:[%s2252_s13 + $0x40] sm:$0xff]  ;;  %v517_v9 = vld [vmem:[%s2238_s11 + $0x580] sm:$0xff] }
  0x93   : > { %904 = vmatmul.mubr.f32.vlgmr.msra.gmra.mxu1 %v329_v10  ;;  %1649 = vmatprep.subr.mxu0 %v499_v11  ;;  %v564_v10 = vld [vmem:[%s2238_s11 + $0x6f8] sm:$0xff]  ;;  %v501_v11 = vld [vmem:[%s2238_s11 + $0x500] sm:$0xff] }
  0x94   : > { %1682 = vmatprep.subr.mxu1 %v532_v12  ;;  %1650 = vmatpush3.msra.mxu0 %v483_v13  ;;  %v334_v12 = vld [vmem:[%s2252_s13 + $0x58] sm:$0xff]  ;;  %v548_v13 = vld [vmem:[%s2238_s11 + $0x678] sm:$0xff] }
  0x95   : > { %1683 = vmatpush3.msra.mxu1 %v516_v14  ;;  %1651 = vmatprep.subr.mxu0 %v498_v15  ;;  %v333_v14 = vld [vmem:[%s2252_s13 + $0x50] sm:$0xff]  ;;  %v563_v15 = vld [vmem:[%s2238_s11 + $0x6f0] sm:$0xff] }
  0x96   : > { %1684 = vmatprep.subr.mxu1 %v531_v16  ;;  %1652 = vmatpush3.msra.mxu0 %v482_v17  ;;  %v596_v16 = vld [vmem:[%s2238_s11 + $0x7f8] sm:$0xff]  ;;  %v547_v17 = vld [vmem:[%s2238_s11 + $0x670] sm:$0xff] }
  0x97   : > { %1685 = vmatpush3.msra.mxu1 %v515_v18  ;;  %1653 = vmatprep.subr.mxu0 %v497_v19  ;;  %v580_v18 = vld [vmem:[%s2238_s11 + $0x778] sm:$0xff]  ;;  %v562_v19 = vld [vmem:[%s2238_s11 + $0x6e8] sm:$0xff] }
  0x98   : > { %1686 = vmatprep.subr.mxu1 %v530_v20  ;;  %1654 = vmatpush3.msra.mxu0 %v481_v21  ;;  %v595_v20 = vld [vmem:[%s2238_s11 + $0x7f0] sm:$0xff]  ;;  %v546_v21 = vld [vmem:[%s2238_s11 + $0x668] sm:$0xff] }
  0x99   : > { %1687 = vmatpush3.msra.mxu1 %v514_v22  ;;  %1655 = vmatprep.subr.mxu0 %v496_v23  ;;  %v579_v22 = vld [vmem:[%s2238_s11 + $0x770] sm:$0xff]  ;;  %v561_v23 = vld [vmem:[%s2238_s11 + $0x6e0] sm:$0xff] }
  0x9a   : > { %1688 = vmatprep.subr.mxu1 %v529_v24  ;;  %1656 = vmatpush3.msra.mxu0 %v480_v25  ;;  %v594_v24 = vld [vmem:[%s2238_s11 + $0x7e8] sm:$0xff]  ;;  %v545_v25 = vld [vmem:[%s2238_s11 + $0x660] sm:$0xff] }
  0x9b   : > { %1689 = vmatpush3.msra.mxu1 %v513_v26  ;;  %1657 = vmatprep.subr.mxu0 %v495_v27  ;;  %v578_v26 = vld [vmem:[%s2238_s11 + $0x768] sm:$0xff]  ;;  %v560_v27 = vld [vmem:[%s2238_s11 + $0x6d8] sm:$0xff] }
  0x9c   : > { %1690 = vmatprep.subr.mxu1 %v528_v28  ;;  %1658 = vmatpush3.msra.mxu0 %v479_v29  ;;  %v593_v28 = vld [vmem:[%s2238_s11 + $0x7e0] sm:$0xff]  ;;  %v544_v29 = vld [vmem:[%s2238_s11 + $0x658] sm:$0xff] }
  0x9d   : > { %1691 = vmatpush3.msra.mxu1 %v512_v30  ;;  %1659 = vmatprep.subr.mxu0 %v494_v31  ;;  %v577_v30 = vld [vmem:[%s2238_s11 + $0x760] sm:$0xff]  ;;  %v559_v31 = vld [vmem:[%s2238_s11 + $0x6d0] sm:$0xff] }
  0x9e   : > { %1692 = vmatprep.subr.mxu1 %v527_v32  ;;  %1660 = vmatpush3.msra.mxu0 %v478_v33  ;;  %v592_v32 = vld [vmem:[%s2238_s11 + $0x7d8] sm:$0xff]  ;;  %v543_v33 = vld [vmem:[%s2238_s11 + $0x650] sm:$0xff] }
  0x9f   : > { %1693 = vmatpush3.msra.mxu1 %v511_v34  ;;  %1661 = vmatprep.subr.mxu0 %v493_v35  ;;  %v576_v34 = vld [vmem:[%s2238_s11 + $0x758] sm:$0xff]  ;;  %v558_v35 = vld [vmem:[%s2238_s11 + $0x6c8] sm:$0xff] }
  0xa0   : > { %1694 = vmatprep.subr.mxu1 %v526_v36  ;;  %1662 = vmatpush3.msra.mxu0 %v477_v37  ;;  %v591_v36 = vld [vmem:[%s2238_s11 + $0x7d0] sm:$0xff]  ;;  %v542_v37 = vld [vmem:[%s2238_s11 + $0x648] sm:$0xff] }
  0xa1   : > { %1695 = vmatpush3.msra.mxu1 %v510_v38  ;;  %1663 = vmatprep.subr.mxu0 %v492_v39  ;;  %v575_v38 = vld [vmem:[%s2238_s11 + $0x750] sm:$0xff]  ;;  %v557_v39 = vld [vmem:[%s2238_s11 + $0x6c0] sm:$0xff] }
  0xa2   : > { %1696 = vmatprep.subr.mxu1 %v525_v40  ;;  %1664 = vmatpush3.msra.mxu0 %v476_v41  ;;  %v590_v40 = vld [vmem:[%s2238_s11 + $0x7c8] sm:$0xff]  ;;  %v541_v41 = vld [vmem:[%s2238_s11 + $0x640] sm:$0xff] }
  0xa3   : > { %1697 = vmatpush3.msra.mxu1 %v509_v42  ;;  %1665 = vmatprep.subr.mxu0 %v491_v43  ;;  %v574_v42 = vld [vmem:[%s2238_s11 + $0x748] sm:$0xff]  ;;  %v556_v43 = vld [vmem:[%s2238_s11 + $0x6b8] sm:$0xff] }
  0xa4   : > { %1698 = vmatprep.subr.mxu1 %v524_v44  ;;  %1666 = vmatpush3.msra.mxu0 %v475_v45  ;;  %v589_v44 = vld [vmem:[%s2238_s11 + $0x7c0] sm:$0xff]  ;;  %v540_v45 = vld [vmem:[%s2238_s11 + $0x638] sm:$0xff] }
  0xa5   : > { %1699 = vmatpush3.msra.mxu1 %v508_v46  ;;  %1667 = vmatprep.subr.mxu0 %v490_v47  ;;  %v573_v46 = vld [vmem:[%s2238_s11 + $0x740] sm:$0xff]  ;;  %v555_v47 = vld [vmem:[%s2238_s11 + $0x6b0] sm:$0xff] }
  0xa6   : > { %1700 = vmatprep.subr.mxu1 %v523_v48  ;;  %1668 = vmatpush3.msra.mxu0 %v474_v49  ;;  %v588_v48 = vld [vmem:[%s2238_s11 + $0x7b8] sm:$0xff]  ;;  %v539_v49 = vld [vmem:[%s2238_s11 + $0x630] sm:$0xff] }
  0xa7   : > { %1701 = vmatpush3.msra.mxu1 %v507_v50  ;;  %1669 = vmatprep.subr.mxu0 %v489_v51  ;;  %v572_v50 = vld [vmem:[%s2238_s11 + $0x738] sm:$0xff]  ;;  %v554_v51 = vld [vmem:[%s2238_s11 + $0x6a8] sm:$0xff] }
  0xa8   : > { %1702 = vmatprep.subr.mxu1 %v522_v52  ;;  %1670 = vmatpush3.msra.mxu0 %v473_v53  ;;  %v587_v52 = vld [vmem:[%s2238_s11 + $0x7b0] sm:$0xff]  ;;  %v538_v53 = vld [vmem:[%s2238_s11 + $0x628] sm:$0xff] }
  0xa9   : > { %1703 = vmatpush3.msra.mxu1 %v506_v54  ;;  %1671 = vmatprep.subr.mxu0 %v488_v55  ;;  %v571_v54 = vld [vmem:[%s2238_s11 + $0x730] sm:$0xff]  ;;  %v553_v55 = vld [vmem:[%s2238_s11 + $0x6a0] sm:$0xff] }
  0xaa   : > { %1704 = vmatprep.subr.mxu1 %v521_v56  ;;  %1672 = vmatpush3.msra.mxu0 %v472_v57  ;;  %v586_v56 = vld [vmem:[%s2238_s11 + $0x7a8] sm:$0xff]  ;;  %v537_v57 = vld [vmem:[%s2238_s11 + $0x620] sm:$0xff] }
  0xab   : > { %1705 = vmatpush3.msra.mxu1 %v505_v58  ;;  %1673 = vmatprep.subr.mxu0 %v487_v59  ;;  %v570_v58 = vld [vmem:[%s2238_s11 + $0x728] sm:$0xff]  ;;  %v552_v59 = vld [vmem:[%s2238_s11 + $0x698] sm:$0xff] }
  0xac   : > { %1706 = vmatprep.subr.mxu1 %v520_v60  ;;  %1674 = vmatpush3.msra.mxu0 %v471_v61  ;;  %v585_v60 = vld [vmem:[%s2238_s11 + $0x7a0] sm:$0xff]  ;;  %v536_v61 = vld [vmem:[%s2238_s11 + $0x618] sm:$0xff] }
  0xad   : > { %1707 = vmatpush3.msra.mxu1 %v504_v62  ;;  %1675 = vmatprep.subr.mxu0 %v486_v63  ;;  %v569_v62 = vld [vmem:[%s2238_s11 + $0x720] sm:$0xff]  ;;  %v551_v63 = vld [vmem:[%s2238_s11 + $0x690] sm:$0xff] }
  0xae   : > { %1708 = vmatprep.subr.mxu1 %v519_v0  ;;  %1676 = vmatpush3.msra.mxu0 %v470_v1  ;;  %v584_v0 = vld [vmem:[%s2238_s11 + $0x798] sm:$0xff]  ;;  %v535_v1 = vld [vmem:[%s2238_s11 + $0x610] sm:$0xff] }
  0xaf   : > { %1709 = vmatpush3.msra.mxu1 %v503_v2  ;;  %1677 = vmatprep.subr.mxu0 %v485_v3  ;;  %v568_v2 = vld [vmem:[%s2238_s11 + $0x718] sm:$0xff]  ;;  %v550_v3 = vld [vmem:[%s2238_s11 + $0x688] sm:$0xff] }
  0xb0   : > { %1710 = vmatprep.subr.mxu1 %v518_v4  ;;  %1678 = vmatpush3.msra.mxu0 %v469_v5  ;;  %v583_v4 = vld [vmem:[%s2238_s11 + $0x790] sm:$0xff]  ;;  %v534_v5 = vld [vmem:[%s2238_s11 + $0x608] sm:$0xff] }
  0xb1   : > { %973 = vmatprep.mubr.f32.mxu0 %v332_v6  ;;  %1711 = vmatpush3.msra.mxu1 %v502_v7  ;;  %v567_v6 = vld [vmem:[%s2238_s11 + $0x710] sm:$0xff]  ;;  %v549_v7 = vld [vmem:[%s2238_s11 + $0x680] sm:$0xff] }
  0xb2   : > { %974 = vmatmul.mubr.f32.vlgmr.msra.gmra.mxu0 %v331_v8  ;;  %1712 = vmatprep.subr.mxu1 %v517_v9  ;;  %v582_v8 = vld [vmem:[%s2238_s11 + $0x788] sm:$0xff]  ;;  %v533_v9 = vld [vmem:[%s2238_s11 + $0x600] sm:$0xff] }
  0xb3   : > { %1717 = vmatprep.subr.mxu0 %v564_v10  ;;  %1713 = vmatpush3.msra.mxu1 %v501_v11  ;;  %v336_v10 = vld [vmem:[%s2252_s13 + $0x68] sm:$0xff]  ;;  %v566_v11 = vld [vmem:[%s2238_s11 + $0x708] sm:$0xff] }
  0xb4   : > { %1043 = vmatprep.mubr.f32.mxu1 %v334_v12  ;;  %1718 = vmatpush3.msra.mxu0 %v548_v13  ;;  %v335_v12 = vld [vmem:[%s2252_s13 + $0x60] sm:$0xff]  ;;  %v581_v13 = vld [vmem:[%s2238_s11 + $0x780] sm:$0xff] }
  0xb5   : > { %1044 = vmatmul.mubr.f32.vlgmr.msra.gmra.mxu1 %v333_v14  ;;  %1719 = vmatprep.subr.mxu0 %v563_v15  ;;  %v628_v14 = vld [vmem:[%s2238_s11 + $0x8f8] sm:$0xff]  ;;  %v565_v15 = vld [vmem:[%s2238_s11 + $0x700] sm:$0xff] }
  0xb6   : > { %1752 = vmatprep.subr.mxu1 %v596_v16  ;;  %1720 = vmatpush3.msra.mxu0 %v547_v17  ;;  %v338_v16 = vld [vmem:[%s2252_s13 + $0x78] sm:$0xff]  ;;  %v612_v17 = vld [vmem:[%s2238_s11 + $0x878] sm:$0xff] }
  0xb7   : > { %1753 = vmatpush3.msra.mxu1 %v580_v18  ;;  %1721 = vmatprep.subr.mxu0 %v562_v19  ;;  %v337_v18 = vld [vmem:[%s2252_s13 + $0x70] sm:$0xff]  ;;  %v627_v19 = vld [vmem:[%s2238_s11 + $0x8f0] sm:$0xff] }
  0xb8   : > { %1754 = vmatprep.subr.mxu1 %v595_v20  ;;  %1722 = vmatpush3.msra.mxu0 %v546_v21  ;;  %v340_v20 = vld [vmem:[%s2252_s13 + $0x88] sm:$0xff]  ;;  %v611_v21 = vld [vmem:[%s2238_s11 + $0x870] sm:$0xff] }
  0xb9   : > { %1755 = vmatpush3.msra.mxu1 %v579_v22  ;;  %1723 = vmatprep.subr.mxu0 %v561_v23  ;;  %v626_v22 = vld [vmem:[%s2238_s11 + $0x8e8] sm:$0xff] }
  0xba   : > { %1756 = vmatprep.subr.mxu1 %v594_v24  ;;  %1724 = vmatpush3.msra.mxu0 %v545_v25  ;;  %v610_v23 = vld [vmem:[%s2238_s11 + $0x868] sm:$0xff]  ;;  %v625_v24 = vld [vmem:[%s2238_s11 + $0x8e0] sm:$0xff] }
  0xbb   : > { %1757 = vmatpush3.msra.mxu1 %v578_v26  ;;  %1725 = vmatprep.subr.mxu0 %v560_v27  ;;  %v609_v25 = vld [vmem:[%s2238_s11 + $0x860] sm:$0xff]  ;;  %v624_v26 = vld [vmem:[%s2238_s11 + $0x8d8] sm:$0xff] }
  0xbc   : > { %1758 = vmatprep.subr.mxu1 %v593_v28  ;;  %1726 = vmatpush3.msra.mxu0 %v544_v29  ;;  %v608_v27 = vld [vmem:[%s2238_s11 + $0x858] sm:$0xff]  ;;  %v623_v28 = vld [vmem:[%s2238_s11 + $0x8d0] sm:$0xff] }
  0xbd   : > { %1759 = vmatpush3.msra.mxu1 %v577_v30  ;;  %1727 = vmatprep.subr.mxu0 %v559_v31  ;;  %v607_v29 = vld [vmem:[%s2238_s11 + $0x850] sm:$0xff]  ;;  %v622_v30 = vld [vmem:[%s2238_s11 + $0x8c8] sm:$0xff] }
  0xbe   : > { %1760 = vmatprep.subr.mxu1 %v592_v32  ;;  %1728 = vmatpush3.msra.mxu0 %v543_v33  ;;  %v606_v31 = vld [vmem:[%s2238_s11 + $0x848] sm:$0xff]  ;;  %v621_v32 = vld [vmem:[%s2238_s11 + $0x8c0] sm:$0xff] }
  0xbf   : > { %1761 = vmatpush3.msra.mxu1 %v576_v34  ;;  %1729 = vmatprep.subr.mxu0 %v558_v35  ;;  %v605_v33 = vld [vmem:[%s2238_s11 + $0x840] sm:$0xff]  ;;  %v620_v34 = vld [vmem:[%s2238_s11 + $0x8b8] sm:$0xff] }
  0xc0   : > { %1762 = vmatprep.subr.mxu1 %v591_v36  ;;  %1730 = vmatpush3.msra.mxu0 %v542_v37  ;;  %v604_v35 = vld [vmem:[%s2238_s11 + $0x838] sm:$0xff]  ;;  %v619_v36 = vld [vmem:[%s2238_s11 + $0x8b0] sm:$0xff] }
  0xc1   : > { %1763 = vmatpush3.msra.mxu1 %v575_v38  ;;  %1731 = vmatprep.subr.mxu0 %v557_v39  ;;  %v603_v37 = vld [vmem:[%s2238_s11 + $0x830] sm:$0xff]  ;;  %v618_v38 = vld [vmem:[%s2238_s11 + $0x8a8] sm:$0xff] }
  0xc2   : > { %1764 = vmatprep.subr.mxu1 %v590_v40  ;;  %1732 = vmatpush3.msra.mxu0 %v541_v41  ;;  %v602_v39 = vld [vmem:[%s2238_s11 + $0x828] sm:$0xff]  ;;  %v617_v40 = vld [vmem:[%s2238_s11 + $0x8a0] sm:$0xff] }
  0xc3   : > { %1765 = vmatpush3.msra.mxu1 %v574_v42  ;;  %1733 = vmatprep.subr.mxu0 %v556_v43  ;;  %v601_v41 = vld [vmem:[%s2238_s11 + $0x820] sm:$0xff]  ;;  %v616_v42 = vld [vmem:[%s2238_s11 + $0x898] sm:$0xff] }
  0xc4   : > { %1766 = vmatprep.subr.mxu1 %v589_v44  ;;  %1734 = vmatpush3.msra.mxu0 %v540_v45  ;;  %v600_v43 = vld [vmem:[%s2238_s11 + $0x818] sm:$0xff]  ;;  %v615_v44 = vld [vmem:[%s2238_s11 + $0x890] sm:$0xff] }
  0xc5   : > { %1767 = vmatpush3.msra.mxu1 %v573_v46  ;;  %1735 = vmatprep.subr.mxu0 %v555_v47  ;;  %v599_v45 = vld [vmem:[%s2238_s11 + $0x810] sm:$0xff]  ;;  %v614_v46 = vld [vmem:[%s2238_s11 + $0x888] sm:$0xff] }
  0xc6   : > { %1768 = vmatprep.subr.mxu1 %v588_v48  ;;  %1736 = vmatpush3.msra.mxu0 %v539_v49  ;;  %v598_v47 = vld [vmem:[%s2238_s11 + $0x808] sm:$0xff]  ;;  %v613_v48 = vld [vmem:[%s2238_s11 + $0x880] sm:$0xff] }
  0xc7   : > { %1769 = vmatpush3.msra.mxu1 %v572_v50  ;;  %1737 = vmatprep.subr.mxu0 %v554_v51  ;;  %v597_v49 = vld [vmem:[%s2238_s11 + $0x800] sm:$0xff]  ;;  %v339_v50 = vld [vmem:[%s2252_s13 + $0x80] sm:$0xff] }
  0xc8   : > { %1770 = vmatprep.subr.mxu1 %v587_v52  ;;  %1738 = vmatpush3.msra.mxu0 %v538_v53 }
  0xc9   : > { %1771 = vmatpush3.msra.mxu1 %v571_v54  ;;  %1739 = vmatprep.subr.mxu0 %v553_v55 }
  0xca   : > { %1772 = vmatprep.subr.mxu1 %v586_v56  ;;  %1740 = vmatpush3.msra.mxu0 %v537_v57 }
  0xcb   : > { %1773 = vmatpush3.msra.mxu1 %v570_v58  ;;  %1741 = vmatprep.subr.mxu0 %v552_v59 }
  0xcc   : > { %1774 = vmatprep.subr.mxu1 %v585_v60  ;;  %1742 = vmatpush3.msra.mxu0 %v536_v61 }
  0xcd   : > { %1775 = vmatpush3.msra.mxu1 %v569_v62  ;;  %1743 = vmatprep.subr.mxu0 %v551_v63 }
  0xce   : > { %1776 = vmatprep.subr.mxu1 %v584_v0  ;;  %1744 = vmatpush3.msra.mxu0 %v535_v1 }
  0xcf   : > { %1777 = vmatpush3.msra.mxu1 %v568_v2  ;;  %1745 = vmatprep.subr.mxu0 %v550_v3 }
  0xd0   : > { %1778 = vmatprep.subr.mxu1 %v583_v4  ;;  %1746 = vmatpush3.msra.mxu0 %v534_v5 }
  0xd1   : > { %1779 = vmatpush3.msra.mxu1 %v567_v6  ;;  %1747 = vmatprep.subr.mxu0 %v549_v7 }
  0xd2   : > { %1780 = vmatprep.subr.mxu1 %v582_v8  ;;  %1748 = vmatpush3.msra.mxu0 %v533_v9 }
  0xd3   : > { %1113 = vmatprep.mubr.f32.mxu0 %v336_v10  ;;  %1781 = vmatpush3.msra.mxu1 %v566_v11 }
  0xd4   : > { %1114 = vmatmul.mubr.f32.vlgmr.msra.gmra.mxu0 %v335_v12  ;;  %1782 = vmatprep.subr.mxu1 %v581_v13 }
  0xd5   : > { %1787 = vmatprep.subr.mxu0 %v628_v14  ;;  %1783 = vmatpush3.msra.mxu1 %v565_v15 }
  0xd6   : > { %1183 = vmatprep.mubr.f32.mxu1 %v338_v16  ;;  %1788 = vmatpush3.msra.mxu0 %v612_v17 }
  0xd7   : > { %1184 = vmatmul.mubr.f32.vlgmr.msra.gmra.mxu1 %v337_v18  ;;  %1789 = vmatprep.subr.mxu0 %v627_v19 }
  0xd8   : > { %1253 = vmatprep.mubr.f32.mxu0 %v340_v20  ;;  %1790 = vmatpush3.msra.mxu0 %v611_v21  ;;  %v322_v21 = vld [vmem:[#allocation2] sm:$0xff] }
  0xd9   : > { %1791 = vmatprep.subr.mxu0 %v626_v22 }
  0xda   : > { %1792 = vmatpush3.msra.mxu0 %v610_v23 }
  0xdb   : > { %1793 = vmatprep.subr.mxu0 %v625_v24 }
  0xdc   : > { %1794 = vmatpush3.msra.mxu0 %v609_v25 }
  0xdd   : > { %1795 = vmatprep.subr.mxu0 %v624_v26 }
  0xde   : > { %1796 = vmatpush3.msra.mxu0 %v608_v27 }
  0xdf   : > { %1797 = vmatprep.subr.mxu0 %v623_v28 }
  0xe0   : > { %1798 = vmatpush3.msra.mxu0 %v607_v29 }
  0xe1   : > { %1799 = vmatprep.subr.mxu0 %v622_v30 }
  0xe2   : > { %1800 = vmatpush3.msra.mxu0 %v606_v31 }
  0xe3   : > { %1801 = vmatprep.subr.mxu0 %v621_v32 }
  0xe4   : > { %1802 = vmatpush3.msra.mxu0 %v605_v33 }
  0xe5   : > { %1803 = vmatprep.subr.mxu0 %v620_v34 }
  0xe6   : > { %1804 = vmatpush3.msra.mxu0 %v604_v35 }
  0xe7   : > { %1805 = vmatprep.subr.mxu0 %v619_v36 }
  0xe8   : > { %1806 = vmatpush3.msra.mxu0 %v603_v37 }
  0xe9   : > { %1807 = vmatprep.subr.mxu0 %v618_v38 }
  0xea   : > { %1808 = vmatpush3.msra.mxu0 %v602_v39 }
  0xeb   : > { %1809 = vmatprep.subr.mxu0 %v617_v40 }
  0xec   : > { %1810 = vmatpush3.msra.mxu0 %v601_v41 }
  0xed   : > { %1811 = vmatprep.subr.mxu0 %v616_v42 }
  0xee   : > { %1812 = vmatpush3.msra.mxu0 %v600_v43 }
  0xef   : > { %1813 = vmatprep.subr.mxu0 %v615_v44 }
  0xf0   : > { %1814 = vmatpush3.msra.mxu0 %v599_v45 }
  0xf1   : > { %1815 = vmatprep.subr.mxu0 %v614_v46 }
  0xf2   : > { %1816 = vmatpush3.msra.mxu0 %v598_v47 }
  0xf3   : > { %1817 = vmatprep.subr.mxu0 %v613_v48 }
  0xf4   : > { %1818 = vmatpush3.msra.mxu0 %v597_v49 }
  0xf5   : > { %1254 = vmatmul.mubr.f32.vlgmr.msra.gmra.mxu0 %v339_v50 }
 0x12f   : > { %v1539_v51 = vpop.f32.mrf.mxu0 }
 0x130   : > { %v1574_v52 = vpop.f32.mrf.mxu1 }
 0x131   : > { %v1540_v53 = vpop.f32.mrf.mxu0 }
 0x132   : > { %v1575_v55 = vpop.f32.mrf.mxu1  ;;  %v1541_v58 = vadd.f32 %v1540_v53, %v1539_v51 }
 0x133   : > { %v1576_v59 = vadd.f32 %v1575_v55, %v1574_v52 }
 0x135   : > { %v766_v63 = vadd.f32 %v1576_v59, %v1541_v58 }
 0x150   : > { %v1609_v54 = vpop.f32.mrf.mxu0 }
 0x152   : > { %v1610_v56 = vpop.f32.mrf.mxu0 }
 0x153   : > { %v1644_v57 = vpop.f32.mrf.mxu1  ;;  %v1611_v61 = vadd.f32 %v1610_v56, %v1609_v54 }
 0x155   : > { %v1645_v62 = vpop.f32.mrf.mxu1  ;;  %v836_v2 = vadd.f32 %v1611_v61, %v766_v63 }
 0x156   : > { %v1646_v3 = vadd.f32 %v1645_v62, %v1644_v57 }
 0x158   : > { %v906_v7 = vadd.f32 %v1646_v3, %v836_v2 }
 0x172   : > { %v1679_v60 = vpop.f32.mrf.mxu0 }
 0x174   : > { %v1680_v0 = vpop.f32.mrf.mxu0 }
 0x175   : > { %v1714_v1 = vpop.f32.mrf.mxu1  ;;  %v1681_v5 = vadd.f32 %v1680_v0, %v1679_v60 }
 0x177   : > { %v1715_v6 = vpop.f32.mrf.mxu1  ;;  %v976_v10 = vadd.f32 %v1681_v5, %v906_v7 }
 0x178   : > { %v1716_v11 = vadd.f32 %v1715_v6, %v1714_v1 }
 0x17a   : > { %v1046_v14 = vadd.f32 %v1716_v11, %v976_v10 }
 0x194   : > { %v1749_v4 = vpop.f32.mrf.mxu0 }
 0x196   : > { %v1750_v8 = vpop.f32.mrf.mxu0 }
 0x197   : > { %v1784_v9 = vpop.f32.mrf.mxu1  ;;  %v1751_v12 = vadd.f32 %v1750_v8, %v1749_v4 }
 0x199   : > { %v1785_v13 = vpop.f32.mrf.mxu1  ;;  %v1116_v15 = vadd.f32 %v1751_v12, %v1046_v14 }
 0x19a   : > { %v1786_v16 = vadd.f32 %v1785_v13, %v1784_v9 }
 0x19c   : > { %v1186_v19 = vadd.f32 %v1786_v16, %v1116_v15 }
 0x1b5   : > { %v1819_v17 = vpop.f32.mrf.mxu0 }
 0x1b7   : > { %v1820_v18 = vpop.f32.mrf.mxu0 }
 0x1b8   : > { %v1821_v20 = vadd.f32 %v1820_v18, %v1819_v17 }
 0x1ba   : > { %v1256_v22 = vadd.f32 %v1821_v20, %v1186_v19  ;;  %1264 = sbr.rel (%p1500_p6) target bundleno = 990 (0x3de), region = 60 }
 0x1bc   : > { %v1259_v23 = vadd.f32 %v1256_v22, %v322_v21 }
 0x1be   : > { %1260 = vst [vmem:[#allocation2] sm:$0xff] %v1259_v23 }
 0x1bf   : > { %v1290_v24 = vld [vmem:[%s2637_s3 + $0x78] sm:$0xff]  ;;  %v2103_v25 = vmov 0.0   ;;  %v1289_v26 = vld [vmem:[%s2637_s3 + $0x70] sm:$0xff]  ;;  %vm2104_vm0 = vmmov 0   ;;  %v1288_v27 = vld [vmem:[%s2637_s3 + $0x68] sm:$0xff]  ;;  %vm1368_vm1 = vcmask 80896  }
 0x1c0   : > { %1839 = vmatprep.subr.mxu0 %v2103_v25  ;;  %1871 = vmatprep.mubr.msk.f32.mxu0 %vm2104_vm0, %v2103_v25  ;;  %v1287_v28 = vld [vmem:[%s2637_s3 + $0x60] sm:$0xff]  ;;  %v1286_v29 = vld [vmem:[%s2637_s3 + $0x58] sm:$0xff]  ;;  %v1285_v30 = vld [vmem:[%s2637_s3 + $0x50] sm:$0xff] }
 0x1c1   : > { %1840 = vmatpush3.msra.mxu0 %v1290_v24  ;;  %v1284_v31 = vld [vmem:[%s2637_s3 + $0x48] sm:$0xff]  ;;  %v1283_v32 = vld [vmem:[%s2637_s3 + $0x40] sm:$0xff]  ;;  %v1282_v33 = vld [vmem:[%s2637_s3 + $0x38] sm:$0xff] }
 0x1c2   : > { %1841 = vmatprep.subr.mxu0 %v2103_v25  ;;  %v1281_v34 = vld [vmem:[%s2637_s3 + $0x30] sm:$0xff]  ;;  %v1280_v35 = vld [vmem:[%s2637_s3 + $0x28] sm:$0xff]  ;;  %v1279_v36 = vld [vmem:[%s2637_s3 + $0x20] sm:$0xff] }
 0x1c3   : > { %1842 = vmatpush3.msra.mxu0 %v1289_v26  ;;  %v1501_v38 = vld [vmem:[#allocation5] ss:$0 sm:$0xff]  ;;  %v1278_v39 = vld [vmem:[%s2637_s3 + $0x18] sm:$0xff]  ;;  %v1277_v40 = vld [vmem:[%s2637_s3 + $0x10] sm:$0xff] }
 0x1c4   : > { %1843 = vmatprep.subr.mxu0 %v2103_v25  ;;  %v1276_v42 = vld [vmem:[%s2637_s3 + $0x8] sm:$0xff]  ;;  %v1275_v43 = vld [vmem:[%s2637_s3] sm:$0xff] }
 0x1c5   : > { %1844 = vmatpush3.msra.mxu0 %v1288_v27  ;;  %v1265_v37 = vld [vmem:[#allocation2] sm:$0xff]  ;;  %v1502_v45 = vld [vmem:[#allocation7] ss:$0 sm:$0xff] }
 0x1c6   : > { %1845 = vmatprep.subr.mxu0 %v2103_v25  ;;  %v1273_v41 = vadd.f32 %v1501_v38, %v1265_v37 }
 0x1c7   : > { %1846 = vmatpush3.msra.mxu0 %v1287_v28 }
 0x1c8   : > { %1847 = vmatprep.subr.mxu0 %v2103_v25  ;;  %v1274_v44 = vmax.f32 %v1273_v41, 0.0 }
 0x1c9   : > { %1848 = vmatpush3.msra.mxu0 %v1286_v29 }
 0x1ca   : > { %1849 = vmatprep.subr.mxu0 %v2103_v25 }
 0x1cb   : > { %1850 = vmatpush3.msra.mxu0 %v1285_v30 }
 0x1cc   : > { %1851 = vmatprep.subr.mxu0 %v2103_v25 }
 0x1cd   : > { %1852 = vmatpush3.msra.mxu0 %v1284_v31 }
 0x1ce   : > { %1853 = vmatprep.subr.mxu0 %v2103_v25 }
 0x1cf   : > { %1854 = vmatpush3.msra.mxu0 %v1283_v32 }
 0x1d0   : > { %1855 = vmatprep.subr.mxu0 %v2103_v25 }
 0x1d1   : > { %1856 = vmatpush3.msra.mxu0 %v1282_v33 }
 0x1d2   : > { %1857 = vmatprep.subr.mxu0 %v2103_v25 }
 0x1d3   : > { %1858 = vmatpush3.msra.mxu0 %v1281_v34 }
 0x1d4   : > { %1859 = vmatprep.subr.mxu0 %v2103_v25 }
 0x1d5   : > { %1860 = vmatpush3.msra.mxu0 %v1280_v35 }
 0x1d6   : > { %1861 = vmatprep.subr.mxu0 %v2103_v25 }
 0x1d7   : > { %1862 = vmatpush3.msra.mxu0 %v1279_v36 }
 0x1d8   : > { %1863 = vmatprep.subr.mxu0 %v2103_v25 }
 0x1d9   : > { %1864 = vmatpush3.msra.mxu0 %v1278_v39 }
 0x1da   : > { %1865 = vmatprep.subr.mxu0 %v2103_v25 }
 0x1db   : > { %1866 = vmatpush3.msra.mxu0 %v1277_v40 }
 0x1dc   : > { %1867 = vmatprep.subr.mxu0 %v2103_v25 }
 0x1dd   : > { %1868 = vmatpush3.msra.mxu0 %v1276_v42 }
 0x1de   : > { %1869 = vmatprep.subr.mxu0 %v2103_v25 }
 0x1df   : > { %1870 = vmatpush3.msra.mxu0 %v1275_v43 }
 0x1e0   : > { %1872 = vmatmul.mubr.f32.vlgmr.msra.gmra.mxu0 %v1274_v44 }
 0x2a0   : > { %v1364_v46 = vpop.f32.mrf.mxu0 }
 0x2a1   : > { %v1365_v47 = vadd.f32 %v1502_v45, %v1364_v46 }
 0x2a2   : > { %v1873_v48 = vpop.f32.mrf.mxu0 }
 0x2a3   : > { %v1369_v49 = vsel %vm1368_vm1, %v1365_v47, -inf }
 0x2a4   : > { %1370 = vmax.xlane.f32.xlu0 %v1369_v49 }
 0x32d   : > { %v1371_v50 = vpop.xlane.xlu0 %1370 }
 0x32e   : > { %v1372_v51 = vsub.f32 %v1365_v47, %v1371_v50 }
 0x330   : > { %v1373_v52 = vmul.f32 1.442695, %v1372_v51 }
 0x332   : > { %1957 = vpow2.f32 %v1373_v52 }
 0x33f   : > { %v1958_v53 = vpop.eup %1957 }
 0x340   : > { %v1375_v54 = vsel %vm1368_vm1, %v1958_v53, 0.0 }
 0x341   : > { %1376 = vadd.xlane.f32.xlu0 %v1375_v54 }
 0x3ca   : > { %v1377_v55 = vpop.xlane.xlu0 %1376 }
 0x3cb   : > { %1959 = vlog2.f32 %v1377_v55 }
 0x3d8   : > { %v1960_v56 = vpop.eup %1959 }
 0x3d9   : > { %v1379_v57 = vmul.f32 0.6931472, %v1960_v56 }
 0x3db   : > { %v1380_v58 = vsub.f32 %v1372_v51, %v1379_v57 }
 0x3dd   : > { %1381 = vst.msk [vmem:[%s2639_s5] sm:$0xff] %vm1368_vm1, %v1380_v58 }
 0x3de PF: > { %s19_s23 = sadd.s32 1, %s2095_s23   ;;  %s2648_s18 = smov %s2079_s19 }
 0x3df   : > { %p16_p13 = scmp.ge.s32.totalorder %s19_s23, 6   ;;  %s2649_s19 = smov %s2083_s20 }
 0x3e0   : > { %s2650_s20 = smov %s2229_s15  ;;  %s2651_s21 = smov %s2091_s22 }
 0x3e1   : > { %s2652_s22 = smov %s2654_s14  ;;  %18 = sbr.rel (!%p16_p13) target bundleno = 5 (0x5), region = 99 }
 0x3e6   :  { %1401 = vsyncpa [#allocation4], 1 }
 0x3e7   :  { %1403 = vsyncpa [#allocation4 + $0x1], 1 }
 0x3e8   :  { %1404 = vsyncpa [#allocation6], 1 }

// kernel: dnn_forward.4
= control target key start
LH: loop header
LB: loop body
LE: loop exit
PB: predicated region body
PF: predicated region fallthrough
CT: control target
= control target key end

     0   :  { %8 = vsyncpa [#allocation4], 0  ;;  %s13389_s0 = inlined_call_operand.vmem [shape: f32[2,26,26,32], index: 0, kind: input, shape index: {}]   ;;  %s13390_s1 = inlined_call_operand.hbm [shape: f32[3,3,32,64], index: 1, kind: input, shape index: {}]   ;;  %s13391_s2 = inlined_call_operand.hbm [shape: f32[1,64], index: 2, kind: input, shape index: {}]   ;;  %s13392_s3 = inlined_call_operand.vmem [shape: f32[2,12,12,64], index: 3, kind: output, shape index: {}]  }
   0x1   :  { %9 = vsyncpa [#allocation6], 0  ;;  %s10712_s12 = smov 0  }
   0x2 LB: > { %s10718_s13 = sadd.s32 4294967295, %s10686_s12   ;;  %p7758_p0 = scmp.ge.s32.totalorder %s10686_s12, 1  ;;  %s10686_s12 = sphi %s10712_s12, %s15_s12  }
   0x3   : > { %p114_p1 = scmp.lt.s32.totalorder %s10686_s12, 3  ;;  %s10688_s14 = smov [#allocation3]  }
   0x4   : > { %s126_s15 = sshll.u32 %s10688_s14, 4  ;;  %p10603_p3 = scmp.eq.s32.totalorder %s10718_s13, 0  ;;  %s127_s15 = int_to_ptr.vmem [resolvable:$true] %s126_s15 }
   0x5   : > { %p10722_p2 = pnand %p7758_p0, %p114_p1  ;;  %s10689_s17 = smov [#allocation5]  }
   0x6   : > { %s140_s18 = sshll.u32 %s10689_s17, 4  ;;  %s10631_s20 = scalar_lea.vmem %s127_s15, 4608  ;;  %s141_s18 = int_to_ptr.vmem [resolvable:$true] %s140_s18 }
   0x7   : > { %p10596_p4 = pneg %p10722_p2  ;;  %p10632_p7 = scmp.ne.s32.totalorder %s127_s15, %s10631_s20 }
   0x8   : > { %p10639_p10 = scmp.lt.s32.totalorder %s127_s15, %s127_s15  ;;  %p10640_p11 = scmp.lt.s32.totalorder %s10631_s20, %s10631_s20 }
   0x9   : > { %p10731_p5 = pnand %p10603_p3, %p10596_p4 }
   0xa   : > { %p10641_p12 = por %p10640_p11, %p10639_p10 }
   0xb   : > { %p10622_p6 = pneg %p10731_p5 }
   0xd   : > { %p10634_p8 = pnand %p10632_p7, %p10622_p6 }
   0xf   : > { %p10635_p9 = pneg %p10634_p8 }
  0x11   : > { %p10642_p13 = pnand %p10641_p12, %p10635_p9 }
  0x13   : > { %10645 = shalt.err (!%p10642_p13)
}
  0x14   : > { %s10690_s21 = smov 128   ;;  %s10691_s22 = smov 8  }
  0x15   : > { %10599 = dma.hbm_to_vmem [thread:$0]  (!%p10731_p5), %s13390_s1, 4608, %s127_s15, [#allocation4], %s10690_s21, %s10690_s21, %s10691_s22  }
  0x16   : > { %s10657_s25 = scalar_lea.vmem %s141_s18, 16  ;;  %s10664_s26 = scalar_lea.vmem %s141_s18, 32 }
  0x17   : > { %p10658_p0 = scmp.ne.s32.totalorder %s141_s18, %s10657_s25  ;;  %p10665_p7 = scmp.lt.s32.totalorder %s141_s18, %s141_s18 }
  0x18   : > { %p10666_p8 = scmp.lt.s32.totalorder %s10664_s26, %s10657_s25 }
  0x19   : > { %p10660_p1 = pnand %p10658_p0, %p10622_p6 }
  0x1a   : > { %p10667_p9 = por %p10666_p8, %p10665_p7 }
  0x1b   : > { %p10661_p4 = pneg %p10660_p1 }
  0x1d   : > { %p10668_p10 = pnand %p10667_p9, %p10661_p4 }
  0x1f   : > { %10671 = shalt.err (!%p10668_p10)
}
  0x20   : > { %10602 = dma.hbm_to_vmem [thread:$0]  (!%p10731_p5), %s13391_s2, 16, %s141_s18, [#allocation6]  }
  0x21   : > { %161 = sbr.rel (%p10722_p2) target bundleno = 911 (0x38f), region = 32 }
  0x26   : > { %10677 = dma.done.wait (%p10603_p3), [#allocation4], 4608  }
  0x27   : > { %10679 = vsyncadd (%p10603_p3), [#allocation4], 4294962688 }
  0x28   : > { %10681 = dma.done.wait (%p10603_p3), [#allocation6], 16  }
  0x29   : > { %10683 = vsyncadd (%p10603_p3), [#allocation6], 4294967280  ;;  %p189_p6 = scmp.lt.s32.totalorder %s10718_s13, 1  ;;  %v351_v0 = vld [vmem:[#allocation3 + $0x38] sm:$0xff]  ;;  %v350_v1 = vld [vmem:[#allocation3 + $0x30] sm:$0xff]  ;;  %vm352_vm0 = vcmask 261120  }
  0x2a   : > { %10578 = vmatprep.subr.mxu1 %v351_v0  ;;  %9534 = vmatprep.subr.mxu0 %v351_v0  ;;  %v349_v2 = vld [vmem:[#allocation3 + $0x28] sm:$0xff]  ;;  %v348_v3 = vld [vmem:[#allocation3 + $0x20] sm:$0xff]  ;;  %v274_v7 = vld [vmem:[#allocation3 + $0x18] sm:$0xff]  ;;  %vm7318_vm1 = vcmask 523264   ;;  %vm7655_vm2 = vcmask 519168  }
  0x2b   : > { %s13681_s13 = smov (!%p189_p6, %s10718_s13), 1  ;;  %10582 = vmatpush3.msra.mxu1 %v351_v0  ;;  %9535 = vmatpush3.msra.mxu0 %v351_v0  ;;  %v1711_v9 = vld [vmem:[#allocation3 + $0x58] sm:$0xff]  ;;  %v273_v13 = vld [vmem:[#allocation3 + $0x10] sm:$0xff]  ;;  %v272_v19 = vld [vmem:[#allocation3 + $0x8] sm:$0xff] }
  0x2c   : > { %s10586_s29 = smul.u32 832, %s13681_s13  ;;  %10579 = vmatprep.subr.mxu1 %v350_v1  ;;  %9536 = vmatprep.subr.mxu0 %v350_v1  ;;  %v1710_v17 = vld [vmem:[#allocation3 + $0x50] sm:$0xff]  ;;  %v1709_v23 = vld [vmem:[#allocation3 + $0x48] sm:$0xff]  ;;  %v271_v28 = vld [vmem:[#allocation3] sm:$0xff] }
  0x2d   : > { %10583 = vmatpush3.msra.mxu1 %v350_v1  ;;  %9537 = vmatpush3.msra.mxu0 %v350_v1  ;;  %v1708_v30 = vld [vmem:[#allocation3 + $0x40] sm:$0xff]  ;;  %v10849_v38 = vld [vmem:[#allocation3 + $0x78] sm:$0xff]  ;;  %s10587_s6 = smul.u32 192, %s13681_s13 }
  0x2e   : > { %s10771_s5 = scalar_lea.vmem %s13389_s0, %s10586_s29  ;;  %10580 = vmatprep.subr.mxu1 %v349_v2  ;;  %9538 = vmatprep.subr.mxu0 %v349_v2  ;;  %v10851_v39 = vld [vmem:[#allocation3 + $0x98] sm:$0xff] }
  0x2f   : > { %v311_v4 = vld [vmem:[%s10771_s5 + $0x181] sm:$0xff]  ;;  %10584 = vmatpush3.msra.mxu1 %v349_v2  ;;  %9539 = vmatpush3.msra.mxu0 %v349_v2  ;;  %v312_v6 = vld [vmem:[%s10771_s5 + $0x189] sm:$0xff]  ;;  %v313_v10 = vld [vmem:[%s10771_s5 + $0x191] sm:$0xff]  ;;  %s13151_s9 = scalar_lea.vmem %s13392_s3, %s10587_s6 }
  0x30   : > { %v275_v5 = vld [vmem:[%s10771_s5 + $0x1] sm:$0xff]  ;;  %10581 = vmatprep.subr.mxu1 %v348_v3  ;;  %9540 = vmatprep.subr.mxu0 %v348_v3  ;;  %v276_v8 = vld [vmem:[%s10771_s5 + $0x9] sm:$0xff]  ;;  %v277_v11 = vld [vmem:[%s10771_s5 + $0x11] sm:$0xff] }
  0x31   : > { %10585 = vmatpush3.msra.mxu1 %v348_v3  ;;  %9596 = vmatprep.mubr.msk.f32.mxu1 %vm352_vm0, %v311_v4  ;;  %v314_v12 = vld [vmem:[%s10771_s5 + $0x1a1] sm:$0xff]  ;;  %v315_v15 = vld [vmem:[%s10771_s5 + $0x1a9] sm:$0xff]  ;;  %v316_v18 = vld [vmem:[%s10771_s5 + $0x1b1] sm:$0xff] }
  0x32   : > { %9541 = vmatpush3.msra.mxu0 %v348_v3  ;;  %9542 = vmatprep.mubr.msk.f32.mxu0 %vm352_vm0, %v275_v5  ;;  %v10786_v14 = vld [vmem:[%s10771_s5 + $0x21] sm:$0xff]  ;;  %v10791_v16 = vld [vmem:[%s10771_s5 + $0x29] sm:$0xff]  ;;  %v10801_v20 = vld [vmem:[%s10771_s5 + $0x31] sm:$0xff] }
  0x33   : > { %9597 = vmatmul.mubr.msk.f32.vlgmr.msra.gmra.mxu1 %vm352_vm0, %v312_v6  ;;  %9650 = vmatprep.subr.mxu1 %v274_v7  ;;  %v317_v21 = vld [vmem:[%s10771_s5 + $0x1c1] sm:$0xff]  ;;  %v318_v24 = vld [vmem:[%s10771_s5 + $0x1c9] sm:$0xff]  ;;  %v319_v26 = vld [vmem:[%s10771_s5 + $0x1d1] sm:$0xff] }
  0x34   : > { %9543 = vmatmul.mubr.msk.f32.vlgmr.msra.gmra.mxu0 %vm352_vm0, %v276_v8  ;;  %9651 = vmatpush3.msra.mxu1 %v274_v7  ;;  %v10805_v22 = vld [vmem:[%s10771_s5 + $0x41] sm:$0xff]  ;;  %v10815_v25 = vld [vmem:[%s10771_s5 + $0x49] sm:$0xff]  ;;  %v10819_v27 = vld [vmem:[%s10771_s5 + $0x51] sm:$0xff] }
  0x35   : > { %9766 = vmatprep.subr.mxu0 %v1711_v9  ;;  %9599 = vmatprep.mubr.msk.f32.mxu1 %vm352_vm0, %v313_v10  ;;  %v320_v29 = vld [vmem:[%s10771_s5 + $0x1e1] sm:$0xff]  ;;  %v321_v32 = vld [vmem:[%s10771_s5 + $0x1e9] sm:$0xff]  ;;  %v322_v34 = vld [vmem:[%s10771_s5 + $0x1f1] sm:$0xff] }
  0x36   : > { %9767 = vmatpush3.msra.mxu0 %v1711_v9  ;;  %9545 = vmatprep.mubr.msk.f32.mxu0 %vm352_vm0, %v277_v11  ;;  %v10829_v31 = vld [vmem:[%s10771_s5 + $0x61] sm:$0xff]  ;;  %v10833_v33 = vld [vmem:[%s10771_s5 + $0x69] sm:$0xff]  ;;  %v10843_v35 = vld [vmem:[%s10771_s5 + $0x71] sm:$0xff] }
  0x37   : > { %9600 = vmatmul.mubr.msk.f32.gmra.mxu1 %vm352_vm0, %v314_v12  ;;  %9652 = vmatprep.subr.mxu1 %v273_v13  ;;  %v323_v36 = vld [vmem:[%s10771_s5 + $0x201] sm:$0xff]  ;;  %v324_v40 = vld [vmem:[%s10771_s5 + $0x209] sm:$0xff]  ;;  %v325_v42 = vld [vmem:[%s10771_s5 + $0x211] sm:$0xff] }
  0x38   : > { %9546 = vmatmul.mubr.msk.f32.gmra.mxu0 %vm352_vm0, %v10786_v14  ;;  %9602 = vmatprep.mubr.msk.f32.mxu1 %vm352_vm0, %v315_v15  ;;  %v10847_v37 = vld [vmem:[%s10771_s5 + $0x81] sm:$0xff]  ;;  %v10862_v41 = vld [vmem:[%s10771_s5 + $0x89] sm:$0xff]  ;;  %v10867_v43 = vld [vmem:[%s10771_s5 + $0x91] sm:$0xff] }
  0x39   : > { %9548 = vmatprep.mubr.msk.f32.mxu0 %vm352_vm0, %v10791_v16  ;;  %9653 = vmatpush3.msra.mxu1 %v273_v13  ;;  %v326_v44 = vld [vmem:[%s10771_s5 + $0x221] sm:$0xff]  ;;  %v327_v46 = vld [vmem:[%s10771_s5 + $0x229] sm:$0xff]  ;;  %v328_v48 = vld [vmem:[%s10771_s5 + $0x231] sm:$0xff] }
  0x3a   : > { %9768 = vmatprep.subr.mxu0 %v1710_v17  ;;  %9654 = vmatprep.subr.mxu1 %v272_v19  ;;  %v290_v45 = vld [vmem:[%s10771_s5 + $0xa1] sm:$0xff]  ;;  %v10879_v47 = vld [vmem:[%s10771_s5 + $0xa9] sm:$0xff]  ;;  %v292_v49 = vld [vmem:[%s10771_s5 + $0xb1] sm:$0xff] }
  0x3b   : > { %9603 = vmatmul.mubr.msk.f32.gmra.mxu1 %vm352_vm0, %v316_v18  ;;  %9769 = vmatpush3.msra.mxu0 %v1710_v17  ;;  %v329_v50 = vld [vmem:[%s10771_s5 + $0x241] sm:$0xff]  ;;  %v330_v52 = vld [vmem:[%s10771_s5 + $0x249] sm:$0xff]  ;;  %v331_v54 = vld [vmem:[%s10771_s5 + $0x251] sm:$0xff] }
  0x3c   : > { %9549 = vmatmul.mubr.msk.f32.gmra.mxu0 %vm352_vm0, %v10801_v20  ;;  %9605 = vmatprep.mubr.msk.f32.mxu1 %vm352_vm0, %v317_v21  ;;  %v293_v51 = vld [vmem:[%s10771_s5 + $0xc1] sm:$0xff]  ;;  %v294_v53 = vld [vmem:[%s10771_s5 + $0xc9] sm:$0xff]  ;;  %v295_v55 = vld [vmem:[%s10771_s5 + $0xd1] sm:$0xff] }
  0x3d   : > { %9551 = vmatprep.mubr.msk.f32.mxu0 %vm352_vm0, %v10805_v22  ;;  %9655 = vmatpush3.msra.mxu1 %v272_v19  ;;  %v332_v56 = vld [vmem:[%s10771_s5 + $0x261] sm:$0xff]  ;;  %v333_v58 = vld [vmem:[%s10771_s5 + $0x269] sm:$0xff]  ;;  %v334_v60 = vld [vmem:[%s10771_s5 + $0x271] sm:$0xff] }
  0x3e   : > { %9770 = vmatprep.subr.mxu0 %v1709_v23  ;;  %9656 = vmatprep.subr.mxu1 %v271_v28  ;;  %v296_v57 = vld [vmem:[%s10771_s5 + $0xe1] sm:$0xff]  ;;  %v297_v59 = vld [vmem:[%s10771_s5 + $0xe9] sm:$0xff]  ;;  %v298_v61 = vld [vmem:[%s10771_s5 + $0xf1] sm:$0xff] }
  0x3f   : > { %9606 = vmatmul.mubr.msk.f32.gmra.mxu1 %vm352_vm0, %v318_v24  ;;  %9771 = vmatpush3.msra.mxu0 %v1709_v23  ;;  %v335_v62 = vld [vmem:[%s10771_s5 + $0x281] sm:$0xff]  ;;  %v336_v0 = vld [vmem:[%s10771_s5 + $0x289] sm:$0xff]  ;;  %v337_v2 = vld [vmem:[%s10771_s5 + $0x291] sm:$0xff] }
  0x40   : > { %9552 = vmatmul.mubr.msk.f32.gmra.mxu0 %vm352_vm0, %v10815_v25  ;;  %9608 = vmatprep.mubr.msk.f32.mxu1 %vm352_vm0, %v319_v26  ;;  %v299_v63 = vld [vmem:[%s10771_s5 + $0x101] sm:$0xff]  ;;  %v300_v1 = vld [vmem:[%s10771_s5 + $0x109] sm:$0xff]  ;;  %v301_v3 = vld [vmem:[%s10771_s5 + $0x111] sm:$0xff] }
  0x41   : > { %9554 = vmatprep.mubr.msk.f32.mxu0 %vm352_vm0, %v10819_v27  ;;  %9657 = vmatpush3.msra.mxu1 %v271_v28  ;;  %v338_v4 = vld [vmem:[%s10771_s5 + $0x2a1] sm:$0xff]  ;;  %v339_v6 = vld [vmem:[%s10771_s5 + $0x2a9] sm:$0xff]  ;;  %v340_v8 = vld [vmem:[%s10771_s5 + $0x2b1] sm:$0xff] }
  0x42   : > { %9772 = vmatprep.subr.mxu0 %v1708_v30  ;;  %9882 = vmatprep.subr.mxu1 %v10849_v38  ;;  %v302_v5 = vld [vmem:[%s10771_s5 + $0x121] sm:$0xff]  ;;  %v303_v7 = vld [vmem:[%s10771_s5 + $0x129] sm:$0xff]  ;;  %v304_v9 = vld [vmem:[%s10771_s5 + $0x131] sm:$0xff] }
  0x43   : > { %9609 = vmatmul.mubr.msk.f32.gmra.mxu1 %vm352_vm0, %v320_v29  ;;  %9773 = vmatpush3.msra.mxu0 %v1708_v30  ;;  %v341_v10 = vld [vmem:[%s10771_s5 + $0x2c1] sm:$0xff]  ;;  %v342_v12 = vld [vmem:[%s10771_s5 + $0x2c9] sm:$0xff]  ;;  %v343_v15 = vld [vmem:[%s10771_s5 + $0x2d1] sm:$0xff] }
  0x44   : > { %9555 = vmatmul.mubr.msk.f32.gmra.mxu0 %vm352_vm0, %v10829_v31  ;;  %9611 = vmatprep.mubr.msk.f32.mxu1 %vm352_vm0, %v321_v32  ;;  %v305_v11 = vld [vmem:[%s10771_s5 + $0x141] sm:$0xff]  ;;  %v306_v13 = vld [vmem:[%s10771_s5 + $0x149] sm:$0xff]  ;;  %v307_v17 = vld [vmem:[%s10771_s5 + $0x151] sm:$0xff] }
  0x45   : > { %9557 = vmatprep.mubr.msk.f32.mxu0 %vm352_vm0, %v10833_v33  ;;  %9998 = vmatprep.subr.mxu0 %v10851_v39  ;;  %v344_v18 = vld [vmem:[%s10771_s5 + $0x2e1] sm:$0xff]  ;;  %v345_v21 = vld [vmem:[%s10771_s5 + $0x2e9] sm:$0xff]  ;;  %v346_v24 = vld [vmem:[%s10771_s5 + $0x2f1] sm:$0xff] }
  0x46   : > { %v308_v19 = vld [vmem:[%s10771_s5 + $0x161] sm:$0xff]  ;;  %v309_v23 = vld [vmem:[%s10771_s5 + $0x169] sm:$0xff]  ;;  %v310_v26 = vld [vmem:[%s10771_s5 + $0x171] sm:$0xff] }
  0x47   : > { %9612 = vmatmul.mubr.msk.f32.gmra.mxu1 %vm352_vm0, %v322_v34  ;;  %v199_v28 = vld [vmem:[%s10771_s5] sm:$0xff]  ;;  %v200_v30 = vld [vmem:[%s10771_s5 + $0x8] sm:$0xff]  ;;  %v201_v34 = vld [vmem:[%s10771_s5 + $0x10] sm:$0xff] }
  0x48   : > { %9558 = vmatmul.mubr.msk.f32.gmra.mxu0 %vm352_vm0, %v10843_v35  ;;  %9614 = vmatprep.mubr.msk.f32.mxu1 %vm352_vm0, %v323_v36  ;;  %v1635_v29 = vld [vmem:[%s10771_s5 + $0x2] sm:$0xff]  ;;  %v1636_v32 = vld [vmem:[%s10771_s5 + $0xa] sm:$0xff]  ;;  %v1637_v36 = vld [vmem:[%s10771_s5 + $0x12] sm:$0xff] }
  0x49   : > { %9560 = vmatprep.mubr.msk.f32.mxu0 %vm352_vm0, %v10847_v37 }
  0x4b   : > { %9615 = vmatmul.mubr.msk.f32.gmra.mxu1 %vm352_vm0, %v324_v40  ;;  %v2501_v40 = vld [vmem:[#allocation3 + $0x70] sm:$0xff] }
  0x4c   : > { %9561 = vmatmul.mubr.msk.f32.gmra.mxu0 %vm352_vm0, %v10862_v41  ;;  %9617 = vmatprep.mubr.msk.f32.mxu1 %vm352_vm0, %v325_v42  ;;  %v10974_v42 = vld [vmem:[%s10771_s5 + $0x20] sm:$0xff] }
  0x4d   : > { %9563 = vmatprep.mubr.msk.f32.mxu0 %vm352_vm0, %v10867_v43 }
  0x4f   : > { %9618 = vmatmul.mubr.msk.f32.gmra.mxu1 %vm352_vm0, %v326_v44  ;;  %v3291_v44 = vld [vmem:[#allocation3 + $0x90] sm:$0xff] }
  0x50   : > { %9564 = vmatmul.mubr.msk.f32.gmra.mxu0 %vm352_vm0, %v290_v45  ;;  %9620 = vmatprep.mubr.msk.f32.mxu1 %vm352_vm0, %v327_v46  ;;  %v1638_v45 = vld [vmem:[%s10771_s5 + $0x22] sm:$0xff] }
  0x51   : > { %9566 = vmatprep.mubr.msk.f32.mxu0 %vm352_vm0, %v10879_v47  ;;  %v10980_v46 = vld [vmem:[%s10771_s5 + $0x28] sm:$0xff] }
  0x53   : > { %9621 = vmatmul.mubr.msk.f32.gmra.mxu1 %vm352_vm0, %v328_v48  ;;  %v1639_v48 = vld [vmem:[%s10771_s5 + $0x2a] sm:$0xff] }
  0x54   : > { %9567 = vmatmul.mubr.msk.f32.gmra.mxu0 %vm352_vm0, %v292_v49  ;;  %9623 = vmatprep.mubr.msk.f32.mxu1 %vm352_vm0, %v329_v50  ;;  %v3290_v49 = vld [vmem:[#allocation3 + $0x88] sm:$0xff]  ;;  %v1640_v50 = vld [vmem:[%s10771_s5 + $0x32] sm:$0xff] }
  0x55   : > { %9569 = vmatprep.mubr.msk.f32.mxu0 %vm352_vm0, %v293_v51  ;;  %v10995_v51 = vld [vmem:[%s10771_s5 + $0x40] sm:$0xff] }
  0x57   : > { %9624 = vmatmul.mubr.msk.f32.gmra.mxu1 %vm352_vm0, %v330_v52  ;;  %v1641_v52 = vld [vmem:[%s10771_s5 + $0x42] sm:$0xff] }
  0x58   : > { %9570 = vmatmul.mubr.msk.f32.gmra.mxu0 %vm352_vm0, %v294_v53  ;;  %9626 = vmatprep.mubr.msk.f32.mxu1 %vm352_vm0, %v331_v54  ;;  %v2499_v53 = vld [vmem:[#allocation3 + $0x60] sm:$0xff]  ;;  %v11004_v54 = vld [vmem:[%s10771_s5 + $0x48] sm:$0xff] }
  0x59   : > { %9572 = vmatprep.mubr.msk.f32.mxu0 %vm352_vm0, %v295_v55  ;;  %v3289_v55 = vld [vmem:[#allocation3 + $0x80] sm:$0xff] }
  0x5b   : > { %9627 = vmatmul.mubr.msk.f32.gmra.mxu1 %vm352_vm0, %v332_v56  ;;  %v1642_v56 = vld [vmem:[%s10771_s5 + $0x4a] sm:$0xff] }
  0x5c   : > { %9573 = vmatmul.mubr.msk.f32.gmra.mxu0 %vm352_vm0, %v296_v57  ;;  %9629 = vmatprep.mubr.msk.f32.mxu1 %vm352_vm0, %v333_v58  ;;  %v11009_v57 = vld [vmem:[%s10771_s5 + $0x50] sm:$0xff] }
  0x5d   : > { %9575 = vmatprep.mubr.msk.f32.mxu0 %vm352_vm0, %v297_v59  ;;  %v1643_v58 = vld [vmem:[%s10771_s5 + $0x52] sm:$0xff]  ;;  %v11018_v59 = vld [vmem:[%s10771_s5 + $0x60] sm:$0xff] }
  0x5f   : > { %9630 = vmatmul.mubr.msk.f32.gmra.mxu1 %vm352_vm0, %v334_v60  ;;  %v1644_v60 = vld [vmem:[%s10771_s5 + $0x62] sm:$0xff] }
  0x60   : > { %9576 = vmatmul.mubr.msk.f32.gmra.mxu0 %vm352_vm0, %v298_v61  ;;  %9632 = vmatprep.mubr.msk.f32.mxu1 %vm352_vm0, %v335_v62  ;;  %v11023_v61 = vld [vmem:[%s10771_s5 + $0x68] sm:$0xff] }
  0x61   : > { %9578 = vmatprep.mubr.msk.f32.mxu0 %vm352_vm0, %v299_v63  ;;  %v1645_v62 = vld [vmem:[%s10771_s5 + $0x6a] sm:$0xff]  ;;  %v11028_v63 = vld [vmem:[#allocation3 + $0xb8] sm:$0xff] }
  0x63   : > { %9633 = vmatmul.mubr.msk.f32.gmra.mxu1 %vm352_vm0, %v336_v0  ;;  %v11034_v0 = vld [vmem:[%s10771_s5 + $0x70] sm:$0xff] }
  0x64   : > { %9579 = vmatmul.mubr.msk.f32.gmra.mxu0 %vm352_vm0, %v300_v1  ;;  %9635 = vmatprep.mubr.msk.f32.mxu1 %vm352_vm0, %v337_v2  ;;  %v1646_v1 = vld [vmem:[%s10771_s5 + $0x72] sm:$0xff]  ;;  %v11039_v2 = vld [vmem:[%s10771_s5 + $0x80] sm:$0xff] }
  0x65   : > { %9581 = vmatprep.mubr.msk.f32.mxu0 %vm352_vm0, %v301_v3  ;;  %v11042_v3 = vld [vmem:[#allocation3 + $0xd8] sm:$0xff] }
  0x67   : > { %9636 = vmatmul.mubr.msk.f32.gmra.mxu1 %vm352_vm0, %v338_v4  ;;  %v1647_v4 = vld [vmem:[%s10771_s5 + $0x82] sm:$0xff] }
  0x68   : > { %9582 = vmatmul.mubr.msk.f32.gmra.mxu0 %vm352_vm0, %v302_v5  ;;  %9638 = vmatprep.mubr.msk.f32.mxu1 %vm352_vm0, %v339_v6  ;;  %v11052_v5 = vld [vmem:[%s10771_s5 + $0x88] sm:$0xff] }
  0x69   : > { %9584 = vmatprep.mubr.msk.f32.mxu0 %vm352_vm0, %v303_v7  ;;  %v1648_v6 = vld [vmem:[%s10771_s5 + $0x8a] sm:$0xff] }
  0x6a   : > { %v11057_v7 = vld [vmem:[%s10771_s5 + $0x90] sm:$0xff] }
  0x6b   : > { %9639 = vmatmul.mubr.msk.f32.gmra.mxu1 %vm352_vm0, %v340_v8  ;;  %v1649_v8 = vld [vmem:[%s10771_s5 + $0x92] sm:$0xff] }
  0x6c   : > { %9585 = vmatmul.mubr.msk.f32.gmra.mxu0 %vm352_vm0, %v304_v9  ;;  %9641 = vmatprep.mubr.msk.f32.mxu1 %vm352_vm0, %v341_v10  ;;  %v11066_v9 = vld [vmem:[%s10771_s5 + $0xa0] sm:$0xff] }
  0x6d   : > { %9587 = vmatprep.mubr.msk.f32.mxu0 %vm352_vm0, %v305_v11  ;;  %v1650_v10 = vld [vmem:[%s10771_s5 + $0xa2] sm:$0xff] }
  0x6e   : > { %v11071_v11 = vld [vmem:[%s10771_s5 + $0xa8] sm:$0xff] }
  0x6f   : > { %9642 = vmatmul.mubr.msk.f32.gmra.mxu1 %vm352_vm0, %v342_v12  ;;  %v1651_v12 = vld [vmem:[%s10771_s5 + $0xaa] sm:$0xff] }
  0x70   : > { %9588 = vmatmul.mubr.msk.f32.gmra.mxu0 %vm352_vm0, %v306_v13  ;;  %9644 = vmatprep.mubr.msk.f32.mxu1 %vm352_vm0, %v343_v15  ;;  %v11080_v13 = vld [vmem:[%s10771_s5 + $0xb0] sm:$0xff] }
  0x71   : > { %9590 = vmatprep.mubr.msk.f32.mxu0 %vm352_vm0, %v307_v17  ;;  %v1652_v15 = vld [vmem:[%s10771_s5 + $0xb2] sm:$0xff]  ;;  %v11085_v17 = vld [vmem:[%s10771_s5 + $0xc0] sm:$0xff] }
  0x73   : > { %9645 = vmatmul.mubr.msk.f32.gmra.mxu1 %vm352_vm0, %v344_v18  ;;  %v1653_v18 = vld [vmem:[%s10771_s5 + $0xc2] sm:$0xff] }
  0x74   : > { %9591 = vmatmul.mubr.msk.f32.gmra.mxu0 %vm352_vm0, %v308_v19  ;;  %9647 = vmatprep.mubr.msk.f32.mxu1 %vm352_vm0, %v345_v21  ;;  %v11094_v19 = vld [vmem:[%s10771_s5 + $0xc8] sm:$0xff] }
  0x75   : > { %9593 = vmatprep.mubr.msk.f32.mxu0 %vm352_vm0, %v309_v23  ;;  %v1654_v21 = vld [vmem:[%s10771_s5 + $0xca] sm:$0xff] }
  0x76   : > { %v11099_v23 = vld [vmem:[%s10771_s5 + $0xd0] sm:$0xff] }
  0x77   : > { %9648 = vmatmul.mubr.msk.f32.gmra.mxu1 %vm352_vm0, %v346_v24  ;;  %v1655_v24 = vld [vmem:[%s10771_s5 + $0xd2] sm:$0xff] }
  0x78   : > { %9594 = vmatmul.mubr.msk.f32.gmra.mxu0 %vm352_vm0, %v310_v26  ;;  %9658 = vmatprep.mubr.msk.f32.mxu1 %vm352_vm0, %v199_v28  ;;  %v11108_v26 = vld [vmem:[%s10771_s5 + $0xe0] sm:$0xff] }
  0x79   : > { %9774 = vmatprep.mubr.msk.f32.mxu0 %vm352_vm0, %v1635_v29  ;;  %v1656_v28 = vld [vmem:[%s10771_s5 + $0xe2] sm:$0xff] }
  0x7a   : > { %v11113_v29 = vld [vmem:[%s10771_s5 + $0xe8] sm:$0xff] }
  0x7b   : > { %9659 = vmatmul.mubr.msk.f32.vlgmr.msra.gmra.mxu1 %vm352_vm0, %v200_v30  ;;  %v1657_v30 = vld [vmem:[%s10771_s5 + $0xea] sm:$0xff] }
  0x7c   : > { %9775 = vmatmul.mubr.msk.f32.vlgmr.msra.gmra.mxu0 %vm352_vm0, %v1636_v32  ;;  %9883 = vmatpush3.msra.mxu1 %v10849_v38  ;;  %v2500_v38 = vld [vmem:[#allocation3 + $0x68] sm:$0xff]  ;;  %v11122_v32 = vld [vmem:[%s10771_s5 + $0xf0] sm:$0xff] }
  0x7d   : > { %9661 = vmatprep.mubr.msk.f32.mxu1 %vm352_vm0, %v201_v34  ;;  %9999 = vmatpush3.msra.mxu0 %v10851_v39  ;;  %v10990_v39 = vld [vmem:[%s10771_s5 + $0x30] sm:$0xff] }
  0x7e   : > { %9777 = vmatprep.mubr.msk.f32.mxu0 %vm352_vm0, %v1637_v36  ;;  %9884 = vmatprep.subr.mxu1 %v2501_v40  ;;  %v1658_v34 = vld [vmem:[%s10771_s5 + $0xf2] sm:$0xff]  ;;  %v11127_v36 = vld [vmem:[%s10771_s5 + $0x100] sm:$0xff] }
  0x7f   : > { %9662 = vmatmul.mubr.msk.f32.gmra.mxu1 %vm352_vm0, %v10974_v42  ;;  %10000 = vmatprep.subr.mxu0 %v3291_v44 }
  0x80   : > { %9778 = vmatmul.mubr.msk.f32.gmra.mxu0 %vm352_vm0, %v1638_v45  ;;  %9664 = vmatprep.mubr.msk.f32.mxu1 %vm352_vm0, %v10980_v46  ;;  %v1660_v45 = vld [vmem:[%s10771_s5 + $0x10a] sm:$0xff] }
  0x81   : > { %9780 = vmatprep.mubr.msk.f32.mxu0 %vm352_vm0, %v1639_v48  ;;  %9885 = vmatpush3.msra.mxu1 %v2501_v40  ;;  %v1659_v40 = vld [vmem:[%s10771_s5 + $0x102] sm:$0xff]  ;;  %v11141_v48 = vld [vmem:[%s10771_s5 + $0x110] sm:$0xff] }
  0x82   : > { %10001 = vmatpush3.msra.mxu0 %v3291_v44  ;;  %9886 = vmatprep.subr.mxu1 %v2500_v38  ;;  %v11136_v44 = vld [vmem:[%s10771_s5 + $0x108] sm:$0xff] }
  0x83   : > { %9665 = vmatmul.mubr.msk.f32.gmra.mxu1 %vm352_vm0, %v10990_v39  ;;  %10002 = vmatprep.subr.mxu0 %v3290_v49 }
  0x84   : > { %9781 = vmatmul.mubr.msk.f32.gmra.mxu0 %vm352_vm0, %v1640_v50  ;;  %9667 = vmatprep.mubr.msk.f32.mxu1 %vm352_vm0, %v10995_v51  ;;  %v1662_v50 = vld [vmem:[%s10771_s5 + $0x122] sm:$0xff] }
  0x85   : > { %9783 = vmatprep.mubr.msk.f32.mxu0 %vm352_vm0, %v1641_v52  ;;  %9887 = vmatpush3.msra.mxu1 %v2500_v38  ;;  %v1661_v38 = vld [vmem:[%s10771_s5 + $0x112] sm:$0xff]  ;;  %v11155_v52 = vld [vmem:[%s10771_s5 + $0x128] sm:$0xff] }
  0x86   : > { %10003 = vmatpush3.msra.mxu0 %v3290_v49  ;;  %9888 = vmatprep.subr.mxu1 %v2499_v53  ;;  %v11150_v49 = vld [vmem:[%s10771_s5 + $0x120] sm:$0xff] }
  0x87   : > { %9668 = vmatmul.mubr.msk.f32.gmra.mxu1 %vm352_vm0, %v11004_v54  ;;  %10004 = vmatprep.subr.mxu0 %v3289_v55 }
  0x88   : > { %9784 = vmatmul.mubr.msk.f32.gmra.mxu0 %vm352_vm0, %v1642_v56  ;;  %9670 = vmatprep.mubr.msk.f32.mxu1 %vm352_vm0, %v11009_v57  ;;  %v1664_v56 = vld [vmem:[%s10771_s5 + $0x132] sm:$0xff] }
  0x89   : > { %9786 = vmatprep.mubr.msk.f32.mxu0 %vm352_vm0, %v1643_v58  ;;  %9889 = vmatpush3.msra.mxu1 %v2499_v53  ;;  %v1663_v53 = vld [vmem:[%s10771_s5 + $0x12a] sm:$0xff]  ;;  %v11169_v58 = vld [vmem:[%s10771_s5 + $0x140] sm:$0xff] }
  0x8a   : > { %10005 = vmatpush3.msra.mxu0 %v3289_v55  ;;  %10114 = vmatprep.subr.mxu1 %v11028_v63  ;;  %v11164_v55 = vld [vmem:[%s10771_s5 + $0x130] sm:$0xff] }
  0x8b   : > { %9671 = vmatmul.mubr.msk.f32.gmra.mxu1 %vm352_vm0, %v11018_v59  ;;  %10230 = vmatprep.subr.mxu0 %v11042_v3 }
  0x8c   : > { %9787 = vmatmul.mubr.msk.f32.gmra.mxu0 %vm352_vm0, %v1644_v60  ;;  %9673 = vmatprep.mubr.msk.f32.mxu1 %vm352_vm0, %v11023_v61  ;;  %v1665_v60 = vld [vmem:[%s10771_s5 + $0x142] sm:$0xff] }
  0x8d   : > { %9789 = vmatprep.mubr.msk.f32.mxu0 %vm352_vm0, %v1645_v62  ;;  %v11178_v62 = vld [vmem:[%s10771_s5 + $0x148] sm:$0xff] }
  0x8f   : > { %9674 = vmatmul.mubr.msk.f32.gmra.mxu1 %vm352_vm0, %v11034_v0 }
  0x90   : > { %9790 = vmatmul.mubr.msk.f32.gmra.mxu0 %vm352_vm0, %v1646_v1  ;;  %9676 = vmatprep.mubr.msk.f32.mxu1 %vm352_vm0, %v11039_v2  ;;  %v1666_v1 = vld [vmem:[%s10771_s5 + $0x14a] sm:$0xff] }
  0x91   : > { %9792 = vmatprep.mubr.msk.f32.mxu0 %vm352_vm0, %v1647_v4  ;;  %v11183_v4 = vld [vmem:[%s10771_s5 + $0x150] sm:$0xff] }
  0x93   : > { %9677 = vmatmul.mubr.msk.f32.gmra.mxu1 %vm352_vm0, %v11052_v5 }
  0x94   : > { %9793 = vmatmul.mubr.msk.f32.gmra.mxu0 %vm352_vm0, %v1648_v6  ;;  %9679 = vmatprep.mubr.msk.f32.mxu1 %vm352_vm0, %v11057_v7  ;;  %v1667_v6 = vld [vmem:[%s10771_s5 + $0x152] sm:$0xff] }
  0x95   : > { %9795 = vmatprep.mubr.msk.f32.mxu0 %vm352_vm0, %v1649_v8  ;;  %v11192_v8 = vld [vmem:[%s10771_s5 + $0x160] sm:$0xff] }
  0x97   : > { %9680 = vmatmul.mubr.msk.f32.gmra.mxu1 %vm352_vm0, %v11066_v9 }
  0x98   : > { %9796 = vmatmul.mubr.msk.f32.gmra.mxu0 %vm352_vm0, %v1650_v10  ;;  %9682 = vmatprep.mubr.msk.f32.mxu1 %vm352_vm0, %v11071_v11  ;;  %v1668_v10 = vld [vmem:[%s10771_s5 + $0x162] sm:$0xff] }
  0x99   : > { %9798 = vmatprep.mubr.msk.f32.mxu0 %vm352_vm0, %v1651_v12  ;;  %v11197_v12 = vld [vmem:[%s10771_s5 + $0x168] sm:$0xff] }
  0x9a   : > { %13426 = vst [vmem:[#allocation9_spill] sm:$0xff] %v11197_v12 }
  0x9b   : > { %9683 = vmatmul.mubr.msk.f32.gmra.mxu1 %vm352_vm0, %v11080_v13 }
  0x9c   : > { %9799 = vmatmul.mubr.msk.f32.gmra.mxu0 %vm352_vm0, %v1652_v15  ;;  %9685 = vmatprep.mubr.msk.f32.mxu1 %vm352_vm0, %v11085_v17  ;;  %v1669_v15 = vld [vmem:[%s10771_s5 + $0x16a] sm:$0xff] }
  0x9d   : > { %9801 = vmatprep.mubr.msk.f32.mxu0 %vm352_vm0, %v1653_v18  ;;  %v11206_v18 = vld [vmem:[%s10771_s5 + $0x170] sm:$0xff] }
  0x9e   : > { %13427 = vst [vmem:[#allocation10_spill] sm:$0xff] %v11206_v18 }
  0x9f   : > { %9686 = vmatmul.mubr.msk.f32.gmra.mxu1 %vm352_vm0, %v11094_v19 }
  0xa0   : > { %9802 = vmatmul.mubr.msk.f32.gmra.mxu0 %vm352_vm0, %v1654_v21  ;;  %9688 = vmatprep.mubr.msk.f32.mxu1 %vm352_vm0, %v11099_v23  ;;  %v1670_v21 = vld [vmem:[%s10771_s5 + $0x172] sm:$0xff] }
  0xa1   : > { %9804 = vmatprep.mubr.msk.f32.mxu0 %vm352_vm0, %v1655_v24  ;;  %v11211_v24 = vld [vmem:[%s10771_s5 + $0x180] sm:$0xff] }
  0xa2   : > { %13428 = vst [vmem:[#allocation11_spill] sm:$0xff] %v11211_v24 }
  0xa3   : > { %9689 = vmatmul.mubr.msk.f32.gmra.mxu1 %vm352_vm0, %v11108_v26 }
  0xa4   : > { %9805 = vmatmul.mubr.msk.f32.gmra.mxu0 %vm352_vm0, %v1656_v28  ;;  %9691 = vmatprep.mubr.msk.f32.mxu1 %vm352_vm0, %v11113_v29  ;;  %v1671_v28 = vld [vmem:[%s10771_s5 + $0x182] sm:$0xff] }
  0xa5   : > { %9807 = vmatprep.mubr.msk.f32.mxu0 %vm352_vm0, %v1657_v30  ;;  %v11220_v30 = vld [vmem:[%s10771_s5 + $0x188] sm:$0xff] }
  0xa6   : > { %13429 = vst [vmem:[#allocation12_spill] sm:$0xff] %v11220_v30 }
  0xa7   : > { %9692 = vmatmul.mubr.msk.f32.gmra.mxu1 %vm352_vm0, %v11122_v32 }
  0xa8   : > { %9808 = vmatmul.mubr.msk.f32.gmra.mxu0 %vm352_vm0, %v1658_v34  ;;  %9694 = vmatprep.mubr.msk.f32.mxu1 %vm352_vm0, %v11127_v36  ;;  %v1672_v34 = vld [vmem:[%s10771_s5 + $0x18a] sm:$0xff] }
  0xa9   : > { %9810 = vmatprep.mubr.msk.f32.mxu0 %vm352_vm0, %v1659_v40  ;;  %v11225_v40 = vld [vmem:[%s10771_s5 + $0x190] sm:$0xff] }
  0xaa   : > { %13430 = vst [vmem:[#allocation13_spill] sm:$0xff] %v11225_v40 }
  0xab   : > { %9695 = vmatmul.mubr.msk.f32.gmra.mxu1 %vm352_vm0, %v11136_v44 }
  0xac   : > { %9811 = vmatmul.mubr.msk.f32.gmra.mxu0 %vm352_vm0, %v1660_v45  ;;  %9697 = vmatprep.mubr.msk.f32.mxu1 %vm352_vm0, %v11141_v48  ;;  %v1673_v45 = vld [vmem:[%s10771_s5 + $0x192] sm:$0xff] }
  0xad   : > { %9813 = vmatprep.mubr.msk.f32.mxu0 %vm352_vm0, %v1661_v38  ;;  %v11234_v38 = vld [vmem:[%s10771_s5 + $0x1a0] sm:$0xff] }
  0xae   : > { %13431 = vst [vmem:[#allocation14_spill] sm:$0xff] %v11234_v38 }
  0xaf   : > { %9698 = vmatmul.mubr.msk.f32.gmra.mxu1 %vm352_vm0, %v11150_v49 }
  0xb0   : > { %9814 = vmatmul.mubr.msk.f32.gmra.mxu0 %vm352_vm0, %v1662_v50  ;;  %9700 = vmatprep.mubr.msk.f32.mxu1 %vm352_vm0, %v11155_v52  ;;  %v1674_v50 = vld [vmem:[%s10771_s5 + $0x1a2] sm:$0xff] }
  0xb1   : > { %9816 = vmatprep.mubr.msk.f32.mxu0 %vm352_vm0, %v1663_v53  ;;  %v11239_v53 = vld [vmem:[%s10771_s5 + $0x1a8] sm:$0xff] }
  0xb2   : > { %13432 = vst [vmem:[#allocation15_spill] sm:$0xff] %v11239_v53 }
  0xb3   : > { %9701 = vmatmul.mubr.msk.f32.gmra.mxu1 %vm352_vm0, %v11164_v55 }
  0xb4   : > { %9817 = vmatmul.mubr.msk.f32.gmra.mxu0 %vm352_vm0, %v1664_v56  ;;  %9703 = vmatprep.mubr.msk.f32.mxu1 %vm352_vm0, %v11169_v58  ;;  %v1675_v56 = vld [vmem:[%s10771_s5 + $0x1aa] sm:$0xff] }
  0xb5   : > { %9819 = vmatprep.mubr.msk.f32.mxu0 %vm352_vm0, %v1665_v60  ;;  %v11248_v60 = vld [vmem:[%s10771_s5 + $0x1b0] sm:$0xff] }
  0xb6   : > { %13433 = vst [vmem:[#allocation16_spill] sm:$0xff] %v11248_v60 }
  0xb7   : > { %9704 = vmatmul.mubr.msk.f32.gmra.mxu1 %vm352_vm0, %v11178_v62 }
  0xb8   : > { %9820 = vmatmul.mubr.msk.f32.gmra.mxu0 %vm352_vm0, %v1666_v1  ;;  %9706 = vmatprep.mubr.msk.f32.mxu1 %vm352_vm0, %v11183_v4  ;;  %v1676_v1 = vld [vmem:[%s10771_s5 + $0x1b2] sm:$0xff] }
  0xb9   : > { %9822 = vmatprep.mubr.msk.f32.mxu0 %vm352_vm0, %v1667_v6  ;;  %v11253_v6 = vld [vmem:[%s10771_s5 + $0x1c0] sm:$0xff] }
  0xba   : > { %13434 = vst [vmem:[#allocation17_spill] sm:$0xff] %v11253_v6 }
  0xbb   : > { %9707 = vmatmul.mubr.msk.f32.gmra.mxu1 %vm352_vm0, %v11192_v8 }
  0xbc   : > { %9823 = vmatmul.mubr.msk.f32.gmra.mxu0 %vm352_vm0, %v1668_v10  ;;  %9709 = vmatprep.mubr.msk.f32.mxu1 %vm352_vm0, %v11197_v12  ;;  %v1677_v10 = vld [vmem:[%s10771_s5 + $0x1c2] sm:$0xff] }
  0xbd   : > { %9825 = vmatprep.mubr.msk.f32.mxu0 %vm352_vm0, %v1669_v15  ;;  %v11262_v15 = vld [vmem:[%s10771_s5 + $0x1c8] sm:$0xff] }
  0xbe   : > { %13435 = vst [vmem:[#allocation18_spill] sm:$0xff] %v11262_v15 }
  0xbf   : > { %9710 = vmatmul.mubr.msk.f32.gmra.mxu1 %vm352_vm0, %v11206_v18 }
  0xc0   : > { %9826 = vmatmul.mubr.msk.f32.gmra.mxu0 %vm352_vm0, %v1670_v21  ;;  %9712 = vmatprep.mubr.msk.f32.mxu1 %vm352_vm0, %v11211_v24  ;;  %v1678_v21 = vld [vmem:[%s10771_s5 + $0x1ca] sm:$0xff] }
  0xc1   : > { %9828 = vmatprep.mubr.msk.f32.mxu0 %vm352_vm0, %v1671_v28  ;;  %v11267_v28 = vld [vmem:[%s10771_s5 + $0x1d0] sm:$0xff]  ;;  %v269_v24 = vld [vmem:[%s10771_s5 + $0x2e8] sm:$0xff] }
  0xc2   : > { %13436 = vst [vmem:[#allocation19_spill] sm:$0xff] %v11267_v28 }
  0xc3   : > { %9713 = vmatmul.mubr.msk.f32.gmra.mxu1 %vm352_vm0, %v11220_v30 }
  0xc4   : > { %9829 = vmatmul.mubr.msk.f32.gmra.mxu0 %vm352_vm0, %v1672_v34  ;;  %9715 = vmatprep.mubr.msk.f32.mxu1 %vm352_vm0, %v11225_v40  ;;  %v1679_v34 = vld [vmem:[%s10771_s5 + $0x1d2] sm:$0xff] }
  0xc5   : > { %9831 = vmatprep.mubr.msk.f32.mxu0 %vm352_vm0, %v1673_v45  ;;  %v11276_v45 = vld [vmem:[%s10771_s5 + $0x1e0] sm:$0xff] }
  0xc6   : > { %13437 = vst [vmem:[#allocation20_spill] sm:$0xff] %v11276_v45 }
  0xc7   : > { %9716 = vmatmul.mubr.msk.f32.gmra.mxu1 %vm352_vm0, %v11234_v38 }
  0xc8   : > { %9832 = vmatmul.mubr.msk.f32.gmra.mxu0 %vm352_vm0, %v1674_v50  ;;  %9718 = vmatprep.mubr.msk.f32.mxu1 %vm352_vm0, %v11239_v53  ;;  %v1680_v50 = vld [vmem:[%s10771_s5 + $0x1e2] sm:$0xff] }
  0xc9   : > { %9834 = vmatprep.mubr.msk.f32.mxu0 %vm352_vm0, %v1675_v56  ;;  %v11281_v56 = vld [vmem:[%s10771_s5 + $0x1e8] sm:$0xff] }
  0xca   : > { %13438 = vst [vmem:[#allocation21_spill] sm:$0xff] %v11281_v56  ;;  %v1701_v53 = vld [vmem:[%s10771_s5 + $0x2c2] sm:$0xff] }
  0xcb   : > { %9719 = vmatmul.mubr.msk.f32.gmra.mxu1 %vm352_vm0, %v11248_v60 }
  0xcc   : > { %9835 = vmatmul.mubr.msk.f32.gmra.mxu0 %vm352_vm0, %v1676_v1  ;;  %9721 = vmatprep.mubr.msk.f32.mxu1 %vm352_vm0, %v11253_v6  ;;  %v1681_v1 = vld [vmem:[%s10771_s5 + $0x1ea] sm:$0xff] }
  0xcd   : > { %9837 = vmatprep.mubr.msk.f32.mxu0 %vm352_vm0, %v1677_v10  ;;  %v11290_v10 = vld [vmem:[%s10771_s5 + $0x1f0] sm:$0xff] }
  0xce   : > { %13439 = vst [vmem:[#allocation22_spill] sm:$0xff] %v11290_v10  ;;  %v1699_v6 = vld [vmem:[%s10771_s5 + $0x2aa] sm:$0xff] }
  0xcf   : > { %9722 = vmatmul.mubr.msk.f32.gmra.mxu1 %vm352_vm0, %v11262_v15 }
  0xd0   : > { %9838 = vmatmul.mubr.msk.f32.gmra.mxu0 %vm352_vm0, %v1678_v21  ;;  %9724 = vmatprep.mubr.msk.f32.mxu1 %vm352_vm0, %v11267_v28  ;;  %v1682_v21 = vld [vmem:[%s10771_s5 + $0x1f2] sm:$0xff]  ;;  %v1683_v28 = vld [vmem:[%s10771_s5 + $0x202] sm:$0xff] }
  0xd1   : > { %9840 = vmatprep.mubr.msk.f32.mxu0 %vm352_vm0, %v1679_v34  ;;  %v11295_v34 = vld [vmem:[%s10771_s5 + $0x200] sm:$0xff] }
  0xd2   : > { %13440 = vst [vmem:[#allocation23_spill] sm:$0xff] %v11295_v34 }
  0xd3   : > { %9725 = vmatmul.mubr.msk.f32.gmra.mxu1 %vm352_vm0, %v11276_v45  ;;  %v1685_v45 = vld [vmem:[%s10771_s5 + $0x212] sm:$0xff] }
  0xd4   : > { %9841 = vmatmul.mubr.msk.f32.gmra.mxu0 %vm352_vm0, %v1680_v50  ;;  %9727 = vmatprep.mubr.msk.f32.mxu1 %vm352_vm0, %v11281_v56  ;;  %v11304_v50 = vld [vmem:[%s10771_s5 + $0x208] sm:$0xff]  ;;  %v11309_v56 = vld [vmem:[%s10771_s5 + $0x210] sm:$0xff] }
  0xd5   : > { %9843 = vmatprep.mubr.msk.f32.mxu0 %vm352_vm0, %v1681_v1  ;;  %13441 = vst [vmem:[#allocation24_spill] sm:$0xff] %v11304_v50  ;;  %v1684_v1 = vld [vmem:[%s10771_s5 + $0x20a] sm:$0xff]  ;;  %13442 = vst [vmem:[#allocation25_spill] sm:$0xff] %v11309_v56 }
  0xd7   : > { %9728 = vmatmul.mubr.msk.f32.gmra.mxu1 %vm352_vm0, %v11290_v10  ;;  %v1687_v10 = vld [vmem:[%s10771_s5 + $0x22a] sm:$0xff] }
  0xd8   : > { %9844 = vmatmul.mubr.msk.f32.gmra.mxu0 %vm352_vm0, %v1682_v21  ;;  %9730 = vmatprep.mubr.msk.f32.mxu1 %vm352_vm0, %v11295_v34  ;;  %v11318_v21 = vld [vmem:[%s10771_s5 + $0x220] sm:$0xff]  ;;  %v11323_v34 = vld [vmem:[%s10771_s5 + $0x228] sm:$0xff] }
  0xd9   : > { %9846 = vmatprep.mubr.msk.f32.mxu0 %vm352_vm0, %v1683_v28  ;;  %13443 = vst [vmem:[#allocation26_spill] sm:$0xff] %v11318_v21  ;;  %v1686_v28 = vld [vmem:[%s10771_s5 + $0x222] sm:$0xff]  ;;  %13444 = vst [vmem:[#allocation27_spill] sm:$0xff] %v11323_v34 }
  0xdb   : > { %9731 = vmatmul.mubr.msk.f32.gmra.mxu1 %vm352_vm0, %v11304_v50  ;;  %v1689_v50 = vld [vmem:[%s10771_s5 + $0x242] sm:$0xff] }
  0xdc   : > { %9847 = vmatmul.mubr.msk.f32.gmra.mxu0 %vm352_vm0, %v1684_v1  ;;  %9733 = vmatprep.mubr.msk.f32.mxu1 %vm352_vm0, %v11309_v56  ;;  %v11332_v1 = vld [vmem:[%s10771_s5 + $0x230] sm:$0xff]  ;;  %v11337_v56 = vld [vmem:[%s10771_s5 + $0x240] sm:$0xff] }
  0xdd   : > { %9849 = vmatprep.mubr.msk.f32.mxu0 %vm352_vm0, %v1685_v45  ;;  %13445 = vst [vmem:[#allocation28_spill] sm:$0xff] %v11332_v1  ;;  %v1688_v45 = vld [vmem:[%s10771_s5 + $0x232] sm:$0xff]  ;;  %13446 = vst [vmem:[#allocation29_spill] sm:$0xff] %v11337_v56 }
  0xdf   : > { %9734 = vmatmul.mubr.msk.f32.gmra.mxu1 %vm352_vm0, %v11318_v21  ;;  %v1691_v21 = vld [vmem:[%s10771_s5 + $0x252] sm:$0xff] }
  0xe0   : > { %9850 = vmatmul.mubr.msk.f32.gmra.mxu0 %vm352_vm0, %v1686_v28  ;;  %9736 = vmatprep.mubr.msk.f32.mxu1 %vm352_vm0, %v11323_v34  ;;  %v11346_v28 = vld [vmem:[%s10771_s5 + $0x248] sm:$0xff]  ;;  %v11351_v34 = vld [vmem:[%s10771_s5 + $0x250] sm:$0xff] }
  0xe1   : > { %9852 = vmatprep.mubr.msk.f32.mxu0 %vm352_vm0, %v1687_v10  ;;  %13447 = vst [vmem:[#allocation30_spill] sm:$0xff] %v11346_v28  ;;  %v1690_v10 = vld [vmem:[%s10771_s5 + $0x24a] sm:$0xff]  ;;  %13448 = vst [vmem:[#allocation31_spill] sm:$0xff] %v11351_v34 }
  0xe3   : > { %9737 = vmatmul.mubr.msk.f32.gmra.mxu1 %vm352_vm0, %v11332_v1  ;;  %v1693_v1 = vld [vmem:[%s10771_s5 + $0x26a] sm:$0xff] }
  0xe4   : > { %9853 = vmatmul.mubr.msk.f32.gmra.mxu0 %vm352_vm0, %v1688_v45  ;;  %9739 = vmatprep.mubr.msk.f32.mxu1 %vm352_vm0, %v11337_v56  ;;  %v11360_v45 = vld [vmem:[%s10771_s5 + $0x260] sm:$0xff]  ;;  %v11365_v56 = vld [vmem:[%s10771_s5 + $0x268] sm:$0xff] }
  0xe5   : > { %9855 = vmatprep.mubr.msk.f32.mxu0 %vm352_vm0, %v1689_v50  ;;  %13449 = vst [vmem:[#allocation32_spill] sm:$0xff] %v11360_v45  ;;  %v1692_v50 = vld [vmem:[%s10771_s5 + $0x262] sm:$0xff]  ;;  %13450 = vst [vmem:[#allocation33_spill] sm:$0xff] %v11365_v56 }
  0xe7   : > { %9740 = vmatmul.mubr.msk.f32.gmra.mxu1 %vm352_vm0, %v11346_v28  ;;  %v1695_v28 = vld [vmem:[%s10771_s5 + $0x282] sm:$0xff] }
  0xe8   : > { %9856 = vmatmul.mubr.msk.f32.gmra.mxu0 %vm352_vm0, %v1690_v10  ;;  %9742 = vmatprep.mubr.msk.f32.mxu1 %vm352_vm0, %v11351_v34  ;;  %v11374_v10 = vld [vmem:[%s10771_s5 + $0x270] sm:$0xff]  ;;  %v11379_v34 = vld [vmem:[%s10771_s5 + $0x280] sm:$0xff] }
  0xe9   : > { %9858 = vmatprep.mubr.msk.f32.mxu0 %vm352_vm0, %v1691_v21  ;;  %13451 = vst [vmem:[#allocation34_spill] sm:$0xff] %v11374_v10  ;;  %v1694_v21 = vld [vmem:[%s10771_s5 + $0x272] sm:$0xff]  ;;  %13452 = vst [vmem:[#allocation35_spill] sm:$0xff] %v11379_v34 }
  0xeb   : > { %9743 = vmatmul.mubr.msk.f32.gmra.mxu1 %vm352_vm0, %v11360_v45  ;;  %v1697_v45 = vld [vmem:[%s10771_s5 + $0x292] sm:$0xff] }
  0xec   : > { %9859 = vmatmul.mubr.msk.f32.gmra.mxu0 %vm352_vm0, %v1692_v50  ;;  %9745 = vmatprep.mubr.msk.f32.mxu1 %vm352_vm0, %v11365_v56  ;;  %v11388_v50 = vld [vmem:[%s10771_s5 + $0x288] sm:$0xff]  ;;  %v11393_v56 = vld [vmem:[%s10771_s5 + $0x290] sm:$0xff] }
  0xed   : > { %9861 = vmatprep.mubr.msk.f32.mxu0 %vm352_vm0, %v1693_v1  ;;  %13453 = vst [vmem:[#allocation36_spill] sm:$0xff] %v11388_v50  ;;  %v1696_v1 = vld [vmem:[%s10771_s5 + $0x28a] sm:$0xff]  ;;  %13454 = vst [vmem:[#allocation37_spill] sm:$0xff] %v11393_v56 }
  0xef   : > { %9746 = vmatmul.mubr.msk.f32.gmra.mxu1 %vm352_vm0, %v11374_v10  ;;  %v11411_v10 = vld [vmem:[%s10771_s5 + $0x2a8] sm:$0xff] }
  0xf0   : > { %9862 = vmatmul.mubr.msk.f32.gmra.mxu0 %vm352_vm0, %v1694_v21  ;;  %9748 = vmatprep.mubr.msk.f32.mxu1 %vm352_vm0, %v11379_v34  ;;  %v262_v34 = vld [vmem:[%s10771_s5 + $0x2a0] sm:$0xff]  ;;  %13457 = vst [vmem:[#allocation40_spill] sm:$0xff] %v11411_v10 }
  0xf1   : > { %9864 = vmatprep.mubr.msk.f32.mxu0 %vm352_vm0, %v1695_v28 }
  0xf3   : > { %v11396_v15 = vpop.f32.mrf.mxu1  ;;  %9749 = vmatmul.mubr.msk.f32.gmra.mxu1 %vm352_vm0, %v11388_v50 }
  0xf4   : > { %13455 = vst [vmem:[#allocation38_spill] sm:$0xff] %v11396_v15  ;;  %v11400_v21 = vpop.f32.mrf.mxu0  ;;  %9865 = vmatmul.mubr.msk.f32.gmra.mxu0 %vm352_vm0, %v1696_v1  ;;  %9751 = vmatprep.mubr.msk.f32.mxu1 %vm352_vm0, %v11393_v56  ;;  %v1698_v15 = vld [vmem:[%s10771_s5 + $0x2a2] sm:$0xff]  ;;  %v1700_v56 = vld [vmem:[%s10771_s5 + $0x2b2] sm:$0xff] }
  0xf5   : > { %v11406_v28 = vpop.f32.mrf.mxu1  ;;  %9867 = vmatprep.mubr.msk.f32.mxu0 %vm352_vm0, %v1697_v45  ;;  %v264_v45 = vld [vmem:[%s10771_s5 + $0x2b0] sm:$0xff] }
  0xf6   : > { %13456 = vst [vmem:[#allocation39_spill] sm:$0xff] %v11406_v28  ;;  %v11413_v50 = vpop.f32.mrf.mxu0 }
  0xf7   : > { %v11416_v60 = vpop.f32.mrf.mxu1  ;;  %9752 = vmatmul.mubr.msk.f32.gmra.mxu1 %vm352_vm0, %v262_v34 }
  0xf8   : > { %13458 = vst [vmem:[#allocation41_spill] sm:$0xff] %v11416_v60  ;;  %v11419_v1 = vpop.f32.mrf.mxu0  ;;  %9868 = vmatmul.mubr.msk.f32.gmra.mxu0 %vm352_vm0, %v1698_v15  ;;  %9754 = vmatprep.mubr.msk.f32.mxu1 %vm352_vm0, %v11411_v10  ;;  %v11430_v60 = vld [vmem:[%s10771_s5 + $0x2c0] sm:$0xff]  ;;  %v1702_v10 = vld [vmem:[%s10771_s5 + $0x2ca] sm:$0xff] }
  0xf9   : > { %v11425_v28 = vpop.f32.mrf.mxu1  ;;  %9870 = vmatprep.mubr.msk.f32.mxu0 %vm352_vm0, %v1699_v6  ;;  %13460 = vst [vmem:[#allocation43_spill] sm:$0xff] %v11430_v60  ;;  %v266_v6 = vld [vmem:[%s10771_s5 + $0x2c8] sm:$0xff] }
  0xfa   : > { %13459 = vst [vmem:[#allocation42_spill] sm:$0xff] %v11425_v28  ;;  %v11432_v34 = vpop.f32.mrf.mxu0 }
  0xfb   : > { %v11435_v38 = vpop.f32.mrf.mxu1  ;;  %9755 = vmatmul.mubr.msk.f32.gmra.mxu1 %vm352_vm0, %v264_v45  ;;  %v1703_v45 = vld [vmem:[%s10771_s5 + $0x2d2] sm:$0xff] }
  0xfc   : > { %13461 = vst [vmem:[#allocation44_spill] sm:$0xff] %v11435_v38  ;;  %v11438_v15 = vpop.f32.mrf.mxu0  ;;  %9871 = vmatmul.mubr.msk.f32.gmra.mxu0 %vm352_vm0, %v1700_v56  ;;  %9757 = vmatprep.mubr.msk.f32.mxu1 %vm352_vm0, %v11430_v60  ;;  %v267_v38 = vld [vmem:[%s10771_s5 + $0x2d0] sm:$0xff]  ;;  %v1704_v60 = vld [vmem:[%s10771_s5 + $0x2e2] sm:$0xff] }
  0xfd   : > { %v11444_v28 = vpop.f32.mrf.mxu1  ;;  %9873 = vmatprep.mubr.msk.f32.mxu0 %vm352_vm0, %v1701_v53 }
  0xfe   : > { %13462 = vst [vmem:[#allocation45_spill] sm:$0xff] %v11444_v28  ;;  %v11449_v40 = vpop.f32.mrf.mxu0  ;;  %v268_v28 = vld [vmem:[%s10771_s5 + $0x2e0] sm:$0xff] }
  0xff   : > { %v11452_v30 = vpop.f32.mrf.mxu1  ;;  %9758 = vmatmul.mubr.msk.f32.gmra.mxu1 %vm352_vm0, %v266_v6 }
 0x100   : > { %13463 = vst [vmem:[#allocation46_spill] sm:$0xff] %v11452_v30  ;;  %v11455_v56 = vpop.f32.mrf.mxu0  ;;  %9874 = vmatmul.mubr.msk.f32.gmra.mxu0 %vm352_vm0, %v1702_v10  ;;  %9760 = vmatprep.mubr.msk.f32.mxu1 %vm352_vm0, %v267_v38  ;;  %v1705_v30 = vld [vmem:[%s10771_s5 + $0x2ea] sm:$0xff] }
 0x101   : > { %v11460_v53 = vpop.f32.mrf.mxu1  ;;  %9876 = vmatprep.mubr.msk.f32.mxu0 %vm352_vm0, %v1703_v45  ;;  %v270_v38 = vld [vmem:[%s10771_s5 + $0x2f0] sm:$0xff] }
 0x102   : > { %13464 = vst [vmem:[#allocation47_spill] sm:$0xff] %v11460_v53  ;;  %v11465_v18 = vpop.f32.mrf.mxu0  ;;  %v1706_v45 = vld [vmem:[%s10771_s5 + $0x2f2] sm:$0xff] }
 0x103   : > { %13465 = vst [vmem:[#allocation48_spill] sm:$0xff] %v11465_v18  ;;  %v11468_v12 = vpop.f32.mrf.mxu1  ;;  %9761 = vmatmul.mubr.msk.f32.gmra.mxu1 %vm352_vm0, %v268_v28  ;;  %v4081_v28 = vld [vmem:[#allocation3 + $0xb0] sm:$0xff] }
 0x104   : > { %13466 = vst [vmem:[#allocation49_spill] sm:$0xff] %v11468_v12  ;;  %v11471_v6 = vpop.f32.mrf.mxu0  ;;  %9877 = vmatmul.mubr.msk.f32.gmra.mxu0 %vm352_vm0, %v1704_v60  ;;  %9763 = vmatprep.mubr.msk.f32.mxu1 %vm352_vm0, %v269_v24 }
 0x105   : > { %v11476_v10 = vpop.f32.mrf.mxu1  ;;  %9879 = vmatprep.mubr.msk.f32.mxu0 %vm352_vm0, %v1705_v30 }
 0x106   : > { %v11480_v53 = vpop.f32.mrf.mxu0 }
 0x107   : > { %v11482_v18 = vpop.f32.mrf.mxu1  ;;  %9764 = vmatmul.mubr.msk.f32.gmra.mxu1 %vm352_vm0, %v270_v38 }
 0x108   : > { %v11485_v12 = vpop.f32.mrf.mxu0  ;;  %9880 = vmatmul.mubr.msk.f32.gmra.mxu0 %vm352_vm0, %v1706_v45  ;;  %9890 = vmatprep.mubr.msk.f32.mxu1 %vm352_vm0, %v10974_v42  ;;  %v4872_v42 = vld [vmem:[#allocation3 + $0xd0] sm:$0xff] }
 0x109   : > { %v11490_v24 = vpop.f32.mrf.mxu1  ;;  %10006 = vmatprep.mubr.msk.f32.mxu0 %vm352_vm0, %v10786_v14 }
 0x10a   : > { %v11494_v30 = vpop.f32.mrf.mxu0 }
 0x10b   : > { %v11496_v60 = vpop.f32.mrf.mxu1  ;;  %9891 = vmatmul.mubr.msk.f32.vlgmr.msra.gmra.mxu1 %vm352_vm0, %v10980_v46 }
 0x10c   : > { %v11500_v38 = vpop.f32.mrf.mxu0  ;;  %10007 = vmatmul.mubr.msk.f32.vlgmr.msra.gmra.mxu0 %vm352_vm0, %v10791_v16  ;;  %10115 = vmatpush3.msra.mxu1 %v11028_v63  ;;  %v4080_v16 = vld [vmem:[#allocation3 + $0xa8] sm:$0xff] }
 0x10d   : > { %v11505_v45 = vpop.f32.mrf.mxu1  ;;  %9893 = vmatprep.mubr.msk.f32.mxu1 %vm352_vm0, %v10990_v39  ;;  %10231 = vmatpush3.msra.mxu0 %v11042_v3  ;;  %v4871_v39 = vld [vmem:[#allocation3 + $0xc8] sm:$0xff] }
 0x10e   : > { %v11510_v14 = vpop.f32.mrf.mxu0  ;;  %10009 = vmatprep.mubr.msk.f32.mxu0 %vm352_vm0, %v10801_v20  ;;  %10116 = vmatprep.subr.mxu1 %v4081_v28 }
 0x10f   : > { %v11514_v46 = vpop.f32.mrf.mxu1  ;;  %9894 = vmatmul.mubr.msk.f32.gmra.mxu1 %vm352_vm0, %v10995_v51  ;;  %10232 = vmatprep.subr.mxu0 %v4872_v42 }
 0x110   : > { %13467 = vst [vmem:[#allocation50_spill] sm:$0xff] %v11514_v46  ;;  %v11518_v63 = vpop.f32.mrf.mxu0  ;;  %10010 = vmatmul.mubr.msk.f32.gmra.mxu0 %vm352_vm0, %v10805_v22  ;;  %9896 = vmatprep.mubr.msk.f32.mxu1 %vm352_vm0, %v11004_v54  ;;  %v4079_v22 = vld [vmem:[#allocation3 + $0xa0] sm:$0xff] }
 0x111   : > { %v11524_v3 = vpop.f32.mrf.mxu1  ;;  %10012 = vmatprep.mubr.msk.f32.mxu0 %vm352_vm0, %v10815_v25  ;;  %10117 = vmatpush3.msra.mxu1 %v4081_v28  ;;  %v4870_v25 = vld [vmem:[#allocation3 + $0xc0] sm:$0xff] }
 0x112   : > { %v11528_v20 = vpop.f32.mrf.mxu0  ;;  %10233 = vmatpush3.msra.mxu0 %v4872_v42  ;;  %10118 = vmatprep.subr.mxu1 %v4080_v16 }
 0x113   : > { %v11530_v51 = vpop.f32.mrf.mxu1  ;;  %9897 = vmatmul.mubr.msk.f32.gmra.mxu1 %vm352_vm0, %v11009_v57  ;;  %10234 = vmatprep.subr.mxu0 %v4871_v39 }
 0x114   : > { %v11534_v46 = vpop.f32.mrf.mxu0  ;;  %10013 = vmatmul.mubr.msk.f32.gmra.mxu0 %vm352_vm0, %v10819_v27  ;;  %9899 = vmatprep.mubr.msk.f32.mxu1 %vm352_vm0, %v11018_v59 }
 0x115   : > { %v11540_v54 = vpop.f32.mrf.mxu1  ;;  %10015 = vmatprep.mubr.msk.f32.mxu0 %vm352_vm0, %v10829_v31  ;;  %10119 = vmatpush3.msra.mxu1 %v4080_v16  ;;  %v11582_v16 = vld [vmem:[#allocation3 + $0x118] sm:$0xff] }
 0x116   : > { %v11544_v28 = vpop.f32.mrf.mxu0  ;;  %10235 = vmatpush3.msra.mxu0 %v4871_v39  ;;  %10120 = vmatprep.subr.mxu1 %v4079_v22 }
 0x117   : > { %v11546_v57 = vpop.f32.mrf.mxu1  ;;  %9900 = vmatmul.mubr.msk.f32.gmra.mxu1 %vm352_vm0, %v11023_v61  ;;  %10236 = vmatprep.subr.mxu0 %v4870_v25 }
 0x118   : > { %v11550_v27 = vpop.f32.mrf.mxu0  ;;  %10016 = vmatmul.mubr.msk.f32.gmra.mxu0 %vm352_vm0, %v10833_v33  ;;  %9902 = vmatprep.mubr.msk.f32.mxu1 %vm352_vm0, %v11034_v0  ;;  %v11572_v33 = vld [vmem:[#allocation3 + $0xf8] sm:$0xff] }
 0x119   : > { %v11556_v31 = vpop.f32.mrf.mxu1  ;;  %10018 = vmatprep.mubr.msk.f32.mxu0 %vm352_vm0, %v10843_v35  ;;  %10121 = vmatpush3.msra.mxu1 %v4079_v22  ;;  %v8141_v22 = vld [vmem:[%s10771_s5 + $0xb1] sm:$0xff] }
 0x11a   : > { %v11560_v59 = vpop.f32.mrf.mxu0  ;;  %10237 = vmatpush3.msra.mxu0 %v4870_v25  ;;  %10346 = vmatprep.subr.mxu1 %v11572_v33 }
 0x11b   : > { %v11562_v61 = vpop.f32.mrf.mxu1  ;;  %9903 = vmatmul.mubr.msk.f32.gmra.mxu1 %vm352_vm0, %v11039_v2  ;;  %v8139_v2 = vld [vmem:[%s10771_s5 + $0xa1] sm:$0xff]  ;;  %10462 = vmatprep.subr.mxu0 %v11582_v16 }
 0x11c   : > { %13468 = vst [vmem:[#allocation51_spill] sm:$0xff] %v11562_v61  ;;  %v11566_v42 = vpop.f32.mrf.mxu0  ;;  %10019 = vmatmul.mubr.msk.f32.gmra.mxu0 %vm352_vm0, %v10847_v37  ;;  %9905 = vmatprep.mubr.msk.f32.mxu1 %vm352_vm0, %v11052_v5 }
 0x11d   : > { %v11574_v35 = vpop.f32.mrf.mxu1  ;;  %10021 = vmatprep.mubr.msk.f32.mxu0 %vm352_vm0, %v10862_v41 }
 0x11e   : > { %13469 = vst [vmem:[#allocation52_spill] sm:$0xff] %v11574_v35  ;;  %v11579_v0 = vpop.f32.mrf.mxu0 }
 0x11f   : > { %v11584_v39 = vpop.f32.mrf.mxu1  ;;  %9906 = vmatmul.mubr.msk.f32.gmra.mxu1 %vm352_vm0, %v11057_v7 }
 0x120   : > { %13470 = vst [vmem:[#allocation53_spill] sm:$0xff] %v11584_v39  ;;  %v11589_v37 = vpop.f32.mrf.mxu0  ;;  %10022 = vmatmul.mubr.msk.f32.gmra.mxu0 %vm352_vm0, %v10867_v43  ;;  %9908 = vmatprep.mubr.msk.f32.mxu1 %vm352_vm0, %v11066_v9  ;;  %v8142_v9 = vld [vmem:[%s10771_s5 + $0xc1] sm:$0xff] }
 0x121   : > { %v11595_v41 = vpop.f32.mrf.mxu1  ;;  %10024 = vmatprep.mubr.msk.f32.mxu0 %vm352_vm0, %v8139_v2 }
 0x122   : > { %13471 = vst [vmem:[#allocation54_spill] sm:$0xff] %v11595_v41  ;;  %v11598_v5 = vpop.f32.mrf.mxu0 }
 0x123   : > { %v11601_v7 = vpop.f32.mrf.mxu1  ;;  %9909 = vmatmul.mubr.msk.f32.gmra.mxu1 %vm352_vm0, %v11071_v11 }
 0x124   : > { %13472 = vst [vmem:[#allocation55_spill] sm:$0xff] %v11601_v7  ;;  %v11605_v25 = vpop.f32.mrf.mxu0  ;;  %10025 = vmatmul.mubr.msk.f32.gmra.mxu0 %vm352_vm0, %v10879_v47  ;;  %9911 = vmatprep.mubr.msk.f32.mxu1 %vm352_vm0, %v11080_v13  ;;  %v8143_v7 = vld [vmem:[%s10771_s5 + $0xc9] sm:$0xff]  ;;  %v8144_v13 = vld [vmem:[%s10771_s5 + $0xd1] sm:$0xff] }
 0x125   : > { %v11611_v43 = vpop.f32.mrf.mxu1  ;;  %10027 = vmatprep.mubr.msk.f32.mxu0 %vm352_vm0, %v8141_v22 }
 0x126   : > { %13473 = vst [vmem:[#allocation56_spill] sm:$0xff] %v11611_v43  ;;  %v11615_v2 = vpop.f32.mrf.mxu0 }
 0x127   : > { %v11618_v41 = vpop.f32.mrf.mxu1  ;;  %9912 = vmatmul.mubr.msk.f32.gmra.mxu1 %vm352_vm0, %v11085_v17 }
 0x128   : > { %13474 = vst [vmem:[#allocation57_spill] sm:$0xff] %v11618_v41  ;;  %v11622_v11 = vpop.f32.mrf.mxu0  ;;  %10028 = vmatmul.mubr.msk.f32.gmra.mxu0 %vm352_vm0, %v8142_v9  ;;  %9914 = vmatprep.mubr.msk.f32.mxu1 %vm352_vm0, %v11094_v19  ;;  %v8145_v41 = vld [vmem:[%s10771_s5 + $0xe1] sm:$0xff] }
 0x129   : > { %v11627_v47 = vpop.f32.mrf.mxu1  ;;  %10030 = vmatprep.mubr.msk.f32.mxu0 %vm352_vm0, %v8143_v7  ;;  %v8146_v7 = vld [vmem:[%s10771_s5 + $0xe9] sm:$0xff] }
 0x12a   : > { %13475 = vst [vmem:[#allocation58_spill] sm:$0xff] %v11627_v47  ;;  %v11631_v22 = vpop.f32.mrf.mxu0 }
 0x12b   : > { %v11634_v43 = vpop.f32.mrf.mxu1  ;;  %9915 = vmatmul.mubr.msk.f32.gmra.mxu1 %vm352_vm0, %v11099_v23 }
 0x12c   : > { %13476 = vst [vmem:[#allocation59_spill] sm:$0xff] %v11634_v43  ;;  %v11638_v17 = vpop.f32.mrf.mxu0  ;;  %10031 = vmatmul.mubr.msk.f32.gmra.mxu0 %vm352_vm0, %v8144_v13  ;;  %9917 = vmatprep.mubr.msk.f32.mxu1 %vm352_vm0, %v11108_v26  ;;  %v8147_v43 = vld [vmem:[%s10771_s5 + $0xf1] sm:$0xff] }
 0x12d   : > { %v11643_v19 = vpop.f32.mrf.mxu1  ;;  %10033 = vmatprep.mubr.msk.f32.mxu0 %vm352_vm0, %v8145_v41  ;;  %v8148_v41 = vld [vmem:[%s10771_s5 + $0x101] sm:$0xff] }
 0x12e   : > { %13477 = vst [vmem:[#allocation60_spill] sm:$0xff] %v11643_v19  ;;  %v11647_v9 = vpop.f32.mrf.mxu0 }
 0x12f   : > { %v11650_v47 = vpop.f32.mrf.mxu1  ;;  %9918 = vmatmul.mubr.msk.f32.gmra.mxu1 %vm352_vm0, %v11113_v29 }
 0x130   : > { %13478 = vst [vmem:[#allocation61_spill] sm:$0xff] %v11650_v47  ;;  %v11654_v23 = vpop.f32.mrf.mxu0  ;;  %10034 = vmatmul.mubr.msk.f32.gmra.mxu0 %vm352_vm0, %v8146_v7  ;;  %9920 = vmatprep.mubr.msk.f32.mxu1 %vm352_vm0, %v11122_v32  ;;  %v8149_v47 = vld [vmem:[%s10771_s5 + $0x109] sm:$0xff] }
 0x131   : > { %v11659_v26 = vpop.f32.mrf.mxu1  ;;  %10036 = vmatprep.mubr.msk.f32.mxu0 %vm352_vm0, %v8147_v43  ;;  %v8150_v43 = vld [vmem:[%s10771_s5 + $0x111] sm:$0xff] }
 0x132   : > { %13479 = vst [vmem:[#allocation62_spill] sm:$0xff] %v11659_v26  ;;  %v11663_v13 = vpop.f32.mrf.mxu0 }
 0x133   : > { %v11666_v19 = vpop.f32.mrf.mxu1  ;;  %9921 = vmatmul.mubr.msk.f32.gmra.mxu1 %vm352_vm0, %v11127_v36 }
 0x134   : > { %13480 = vst [vmem:[#allocation63_spill] sm:$0xff] %v11666_v19  ;;  %v11670_v29 = vpop.f32.mrf.mxu0  ;;  %10037 = vmatmul.mubr.msk.f32.gmra.mxu0 %vm352_vm0, %v8148_v41  ;;  %9923 = vmatprep.mubr.msk.f32.mxu1 %vm352_vm0, %v11136_v44  ;;  %v8151_v19 = vld [vmem:[%s10771_s5 + $0x121] sm:$0xff] }
 0x135   : > { %v11675_v32 = vpop.f32.mrf.mxu1  ;;  %10039 = vmatprep.mubr.msk.f32.mxu0 %vm352_vm0, %v8149_v47  ;;  %v8152_v47 = vld [vmem:[%s10771_s5 + $0x129] sm:$0xff] }
 0x136   : > { %13481 = vst [vmem:[#allocation64_spill] sm:$0xff] %v11675_v32  ;;  %v11679_v7 = vpop.f32.mrf.mxu0 }
 0x137   : > { %v11682_v26 = vpop.f32.mrf.mxu1  ;;  %9924 = vmatmul.mubr.msk.f32.gmra.mxu1 %vm352_vm0, %v11141_v48 }
 0x138   : > { %13482 = vst [vmem:[#allocation65_spill] sm:$0xff] %v11682_v26  ;;  %v11686_v36 = vpop.f32.mrf.mxu0  ;;  %10040 = vmatmul.mubr.msk.f32.gmra.mxu0 %vm352_vm0, %v8150_v43  ;;  %9926 = vmatprep.mubr.msk.f32.mxu1 %vm352_vm0, %v11150_v49  ;;  %v8153_v26 = vld [vmem:[%s10771_s5 + $0x131] sm:$0xff] }
 0x139   : > { %v11691_v44 = vpop.f32.mrf.mxu1  ;;  %10042 = vmatprep.mubr.msk.f32.mxu0 %vm352_vm0, %v8151_v19  ;;  %v8154_v19 = vld [vmem:[%s10771_s5 + $0x141] sm:$0xff] }
 0x13a   : > { %13483 = vst [vmem:[#allocation66_spill] sm:$0xff] %v11691_v44  ;;  %v11695_v41 = vpop.f32.mrf.mxu0 }
 0x13b   : > { %v9660_v32 = vpop.f32.mrf.mxu1  ;;  %9927 = vmatmul.mubr.msk.f32.gmra.mxu1 %vm352_vm0, %v11155_v52  ;;  %v8155_v52 = vld [vmem:[%s10771_s5 + $0x149] sm:$0xff] }
 0x13c   : > { %v1282_v48 = vadd.f32 %v9660_v32, %v11400_v21  ;;  %v9776_v39 = vpop.f32.mrf.mxu0  ;;  %10043 = vmatmul.mubr.msk.f32.gmra.mxu0 %vm352_vm0, %v8152_v47  ;;  %9929 = vmatprep.mubr.msk.f32.mxu1 %vm352_vm0, %v11164_v55 }
 0x13d   : > { %v1276_v49 = vpop.f32.mrf.mxu1  ;;  %10045 = vmatprep.mubr.msk.f32.mxu0 %vm352_vm0, %v8153_v26 }
 0x13e   : > { %v11706_v43 = vadd.f32 %v9776_v39, %v1282_v48  ;;  %v1277_v44 = vadd.f32 %v1276_v49, %v11413_v50  ;;  %v1994_v35 = vpop.f32.mrf.mxu0  ;;  %v8156_v50 = vld [vmem:[%s10771_s5 + $0x151] sm:$0xff] }
 0x13f   : > { %v9663_v61 = vpop.f32.mrf.mxu1  ;;  %9930 = vmatmul.mubr.msk.f32.gmra.mxu1 %vm352_vm0, %v11169_v58 }
 0x140   : > { %v11712_v21 = vadd.f32 %v1994_v35, %v1277_v44  ;;  %v1292_v55 = vadd.f32 %v9663_v61, %v11419_v1  ;;  %v9779_v32 = vpop.f32.mrf.mxu0  ;;  %10046 = vmatmul.mubr.msk.f32.gmra.mxu0 %vm352_vm0, %v8154_v19  ;;  %9932 = vmatprep.mubr.msk.f32.mxu1 %vm352_vm0, %v11178_v62  ;;  %v8157_v35 = vld [vmem:[%s10771_s5 + $0x161] sm:$0xff] }
 0x141   : > { %v1286_v39 = vpop.f32.mrf.mxu1  ;;  %10048 = vmatprep.mubr.msk.f32.mxu0 %vm352_vm0, %v8155_v52  ;;  %v8159_v52 = vld [vmem:[%s10771_s5 + $0x171] sm:$0xff] }
 0x142   : > { %v11720_v26 = vadd.f32 %v9779_v32, %v1292_v55  ;;  %v1287_v47 = vadd.f32 %v1286_v39, %v11432_v34  ;;  %v2004_v58 = vpop.f32.mrf.mxu0  ;;  %v8158_v34 = vld [vmem:[%s10771_s5 + $0x169] sm:$0xff] }
 0x143   : > { %v9666_v44 = vpop.f32.mrf.mxu1  ;;  %9933 = vmatmul.mubr.msk.f32.gmra.mxu1 %vm352_vm0, %v11183_v4 }
 0x144   : > { %v11726_v1 = vadd.f32 %v2004_v58, %v1287_v47  ;;  %v1302_v62 = vadd.f32 %v9666_v44, %v11438_v15  ;;  %v9782_v61 = vpop.f32.mrf.mxu0  ;;  %10049 = vmatmul.mubr.msk.f32.gmra.mxu0 %vm352_vm0, %v8156_v50  ;;  %9935 = vmatprep.mubr.msk.f32.mxu1 %vm352_vm0, %v11192_v8  ;;  %v13484_v15 = vld [vmem:[#allocation9_spill] sm:$0xff]  ;;  %v13485_v50 = vld [vmem:[#allocation10_spill] sm:$0xff] }
 0x145   : > { %v1296_v48 = vpop.f32.mrf.mxu1  ;;  %10051 = vmatprep.mubr.msk.f32.mxu0 %vm352_vm0, %v8157_v35  ;;  %v13486_v35 = vld [vmem:[#allocation48_spill] sm:$0xff] }
 0x146   : > { %v11734_v49 = vadd.f32 %v9782_v61, %v1302_v62  ;;  %v1297_v19 = vadd.f32 %v1296_v48, %v11449_v40  ;;  %v2014_v4 = vpop.f32.mrf.mxu0  ;;  %v8160_v40 = vld [vmem:[%s10771_s5 + $0x181] sm:$0xff]  ;;  %v8161_v61 = vld [vmem:[%s10771_s5 + $0x189] sm:$0xff] }
 0x147   : > { %v9669_v55 = vpop.f32.mrf.mxu1  ;;  %9936 = vmatmul.mubr.msk.f32.gmra.mxu1 %vm352_vm0, %v13484_v15  ;;  %v8162_v15 = vld [vmem:[%s10771_s5 + $0x191] sm:$0xff] }
 0x148   : > { %v11740_v32 = vadd.f32 %v2014_v4, %v1297_v19  ;;  %v1312_v8 = vadd.f32 %v9669_v55, %v11455_v56  ;;  %v9785_v39 = vpop.f32.mrf.mxu0  ;;  %10052 = vmatmul.mubr.msk.f32.gmra.mxu0 %vm352_vm0, %v8158_v34  ;;  %9938 = vmatprep.mubr.msk.f32.mxu1 %vm352_vm0, %v13485_v50  ;;  %v13487_v56 = vld [vmem:[#allocation11_spill] sm:$0xff] }
 0x149   : > { %v1306_v47 = vpop.f32.mrf.mxu1  ;;  %10054 = vmatprep.mubr.msk.f32.mxu0 %vm352_vm0, %v8159_v52  ;;  %v13488_v52 = vld [vmem:[#allocation12_spill] sm:$0xff] }
 0x14a   : > { %v11748_v58 = vadd.f32 %v9785_v39, %v1312_v8  ;;  %v1307_v44 = vadd.f32 %v1306_v47, %v13486_v35  ;;  %v2024_v62 = vpop.f32.mrf.mxu0  ;;  %v8163_v47 = vld [vmem:[%s10771_s5 + $0x1a1] sm:$0xff] }
 0x14b   : > { %v9672_v48 = vpop.f32.mrf.mxu1  ;;  %9939 = vmatmul.mubr.msk.f32.gmra.mxu1 %vm352_vm0, %v13487_v56 }
 0x14c   : > { %v11754_v34 = vadd.f32 %v2024_v62, %v1307_v44  ;;  %v1322_v19 = vadd.f32 %v9672_v48, %v11471_v6  ;;  %v9788_v4 = vpop.f32.mrf.mxu0  ;;  %10055 = vmatmul.mubr.msk.f32.gmra.mxu0 %vm352_vm0, %v8160_v40  ;;  %9941 = vmatprep.mubr.msk.f32.mxu1 %vm352_vm0, %v13488_v52  ;;  %v13489_v6 = vld [vmem:[#allocation13_spill] sm:$0xff]  ;;  %v8165_v52 = vld [vmem:[%s10771_s5 + $0x1b1] sm:$0xff] }
 0x14d   : > { %v1316_v55 = vpop.f32.mrf.mxu1  ;;  %10057 = vmatprep.mubr.msk.f32.mxu0 %vm352_vm0, %v8161_v61  ;;  %v13490_v61 = vld [vmem:[#allocation14_spill] sm:$0xff] }
 0x14e   : > { %v11762_v8 = vadd.f32 %v9788_v4, %v1322_v19  ;;  %v1317_v39 = vadd.f32 %v1316_v55, %v11480_v53  ;;  %v2034_v50 = vpop.f32.mrf.mxu0  ;;  %v8164_v53 = vld [vmem:[%s10771_s5 + $0x1a9] sm:$0xff] }
 0x14f   : > { %v9675_v35 = vpop.f32.mrf.mxu1  ;;  %9942 = vmatmul.mubr.msk.f32.gmra.mxu1 %vm352_vm0, %v13489_v6 }
 0x150   : > { %v11768_v40 = vadd.f32 %v2034_v50, %v1317_v39  ;;  %v1332_v44 = vadd.f32 %v9675_v35, %v11485_v12  ;;  %v9791_v62 = vpop.f32.mrf.mxu0  ;;  %10058 = vmatmul.mubr.msk.f32.gmra.mxu0 %vm352_vm0, %v8162_v15  ;;  %9944 = vmatprep.mubr.msk.f32.mxu1 %vm352_vm0, %v13490_v61  ;;  %v13491_v12 = vld [vmem:[#allocation15_spill] sm:$0xff]  ;;  %v8167_v61 = vld [vmem:[%s10771_s5 + $0x1c9] sm:$0xff] }
 0x151   : > { %v1326_v48 = vpop.f32.mrf.mxu1  ;;  %10060 = vmatprep.mubr.msk.f32.mxu0 %vm352_vm0, %v8163_v47  ;;  %v13492_v47 = vld [vmem:[#allocation16_spill] sm:$0xff] }
 0x152   : > { %v11776_v56 = vadd.f32 %v9791_v62, %v1332_v44  ;;  %v1327_v19 = vadd.f32 %v1326_v48, %v11494_v30  ;;  %v2044_v4 = vpop.f32.mrf.mxu0  ;;  %v8166_v30 = vld [vmem:[%s10771_s5 + $0x1c1] sm:$0xff] }
 0x153   : > { %v9678_v55 = vpop.f32.mrf.mxu1  ;;  %9945 = vmatmul.mubr.msk.f32.gmra.mxu1 %vm352_vm0, %v13491_v12 }
 0x154   : > { %v11782_v15 = vadd.f32 %v2044_v4, %v1327_v19  ;;  %v1342_v39 = vadd.f32 %v9678_v55, %v11500_v38  ;;  %v9794_v50 = vpop.f32.mrf.mxu0  ;;  %10061 = vmatmul.mubr.msk.f32.gmra.mxu0 %vm352_vm0, %v8164_v53  ;;  %9947 = vmatprep.mubr.msk.f32.mxu1 %vm352_vm0, %v13492_v47  ;;  %v13493_v38 = vld [vmem:[#allocation17_spill] sm:$0xff] }
 0x155   : > { %v1336_v35 = vpop.f32.mrf.mxu1  ;;  %10063 = vmatprep.mubr.msk.f32.mxu0 %vm352_vm0, %v8165_v52  ;;  %v13494_v52 = vld [vmem:[#allocation18_spill] sm:$0xff]  ;;  %v8169_v47 = vld [vmem:[%s10771_s5 + $0x1e1] sm:$0xff] }
 0x156   : > { %v11790_v6 = vadd.f32 %v9794_v50, %v1342_v39  ;;  %v1337_v44 = vadd.f32 %v1336_v35, %v11510_v14  ;;  %v2054_v62 = vpop.f32.mrf.mxu0  ;;  %v8168_v14 = vld [vmem:[%s10771_s5 + $0x1d1] sm:$0xff] }
 0x157   : > { %v9681_v48 = vpop.f32.mrf.mxu1  ;;  %9948 = vmatmul.mubr.msk.f32.gmra.mxu1 %vm352_vm0, %v13493_v38 }
 0x158   : > { %v11796_v53 = vadd.f32 %v2054_v62, %v1337_v44  ;;  %v1352_v19 = vadd.f32 %v9681_v48, %v11518_v63  ;;  %v9797_v4 = vpop.f32.mrf.mxu0  ;;  %10064 = vmatmul.mubr.msk.f32.gmra.mxu0 %vm352_vm0, %v8166_v30  ;;  %9950 = vmatprep.mubr.msk.f32.mxu1 %vm352_vm0, %v13494_v52  ;;  %v13495_v63 = vld [vmem:[#allocation19_spill] sm:$0xff] }
 0x159   : > { %v1346_v55 = vpop.f32.mrf.mxu1  ;;  %10066 = vmatprep.mubr.msk.f32.mxu0 %vm352_vm0, %v8167_v61  ;;  %v13496_v61 = vld [vmem:[#allocation20_spill] sm:$0xff]  ;;  %v8171_v52 = vld [vmem:[%s10771_s5 + $0x1f1] sm:$0xff] }
 0x15a   : > { %v11804_v12 = vadd.f32 %v9797_v4, %v1352_v19  ;;  %v1347_v39 = vadd.f32 %v1346_v55, %v11528_v20  ;;  %v2064_v50 = vpop.f32.mrf.mxu0  ;;  %v8170_v20 = vld [vmem:[%s10771_s5 + $0x1e9] sm:$0xff] }
 0x15b   : > { %v9684_v35 = vpop.f32.mrf.mxu1  ;;  %9951 = vmatmul.mubr.msk.f32.gmra.mxu1 %vm352_vm0, %v13495_v63 }
 0x15c   : > { %v11810_v30 = vadd.f32 %v2064_v50, %v1347_v39  ;;  %v1362_v44 = vadd.f32 %v9684_v35, %v11534_v46  ;;  %v9800_v62 = vpop.f32.mrf.mxu0  ;;  %10067 = vmatmul.mubr.msk.f32.gmra.mxu0 %vm352_vm0, %v8168_v14  ;;  %9953 = vmatprep.mubr.msk.f32.mxu1 %vm352_vm0, %v13496_v61  ;;  %v13497_v46 = vld [vmem:[#allocation21_spill] sm:$0xff] }
 0x15d   : > { %v1356_v48 = vpop.f32.mrf.mxu1  ;;  %10069 = vmatprep.mubr.msk.f32.mxu0 %vm352_vm0, %v8169_v47  ;;  %v13498_v47 = vld [vmem:[#allocation22_spill] sm:$0xff] }
 0x15e   : > { %v11818_v38 = vadd.f32 %v9800_v62, %v1362_v44  ;;  %v1357_v19 = vadd.f32 %v1356_v48, %v11544_v28  ;;  %v2074_v4 = vpop.f32.mrf.mxu0  ;;  %v8172_v28 = vld [vmem:[%s10771_s5 + $0x201] sm:$0xff]  ;;  %v8173_v61 = vld [vmem:[%s10771_s5 + $0x209] sm:$0xff] }
 0x15f   : > { %v9687_v55 = vpop.f32.mrf.mxu1  ;;  %9954 = vmatmul.mubr.msk.f32.gmra.mxu1 %vm352_vm0, %v13497_v46 }
 0x160   : > { %v11824_v14 = vadd.f32 %v2074_v4, %v1357_v19  ;;  %v1372_v39 = vadd.f32 %v9687_v55, %v11550_v27  ;;  %v9803_v50 = vpop.f32.mrf.mxu0  ;;  %10070 = vmatmul.mubr.msk.f32.gmra.mxu0 %vm352_vm0, %v8170_v20  ;;  %9956 = vmatprep.mubr.msk.f32.mxu1 %vm352_vm0, %v13498_v47  ;;  %v13499_v27 = vld [vmem:[#allocation23_spill] sm:$0xff]  ;;  %v8175_v47 = vld [vmem:[%s10771_s5 + $0x221] sm:$0xff] }
 0x161   : > { %v1366_v35 = vpop.f32.mrf.mxu1  ;;  %10072 = vmatprep.mubr.msk.f32.mxu0 %vm352_vm0, %v8171_v52  ;;  %v13500_v52 = vld [vmem:[#allocation24_spill] sm:$0xff] }
 0x162   : > { %v11832_v63 = vadd.f32 %v9803_v50, %v1372_v39  ;;  %v1367_v44 = vadd.f32 %v1366_v35, %v11560_v59  ;;  %v2084_v62 = vpop.f32.mrf.mxu0  ;;  %v8174_v59 = vld [vmem:[%s10771_s5 + $0x211] sm:$0xff] }
 0x163   : > { %v9690_v48 = vpop.f32.mrf.mxu1  ;;  %9957 = vmatmul.mubr.msk.f32.gmra.mxu1 %vm352_vm0, %v13499_v27 }
 0x164   : > { %v11838_v20 = vadd.f32 %v2084_v62, %v1367_v44  ;;  %v1382_v19 = vadd.f32 %v9690_v48, %v11566_v42  ;;  %v9806_v4 = vpop.f32.mrf.mxu0  ;;  %10073 = vmatmul.mubr.msk.f32.gmra.mxu0 %vm352_vm0, %v8172_v28  ;;  %9959 = vmatprep.mubr.msk.f32.mxu1 %vm352_vm0, %v13500_v52  ;;  %v13501_v42 = vld [vmem:[#allocation25_spill] sm:$0xff]  ;;  %v8177_v52 = vld [vmem:[%s10771_s5 + $0x231] sm:$0xff] }
 0x165   : > { %v1376_v55 = vpop.f32.mrf.mxu1  ;;  %10075 = vmatprep.mubr.msk.f32.mxu0 %vm352_vm0, %v8173_v61  ;;  %v13502_v61 = vld [vmem:[#allocation26_spill] sm:$0xff] }
 0x166   : > { %v11846_v46 = vadd.f32 %v9806_v4, %v1382_v19  ;;  %v1377_v39 = vadd.f32 %v1376_v55, %v11579_v0  ;;  %v2094_v50 = vpop.f32.mrf.mxu0  ;;  %v8176_v0 = vld [vmem:[%s10771_s5 + $0x229] sm:$0xff] }
 0x167   : > { %v9693_v35 = vpop.f32.mrf.mxu1  ;;  %9960 = vmatmul.mubr.msk.f32.gmra.mxu1 %vm352_vm0, %v13501_v42 }
 0x168   : > { %v11852_v28 = vadd.f32 %v2094_v50, %v1377_v39  ;;  %v1392_v44 = vadd.f32 %v9693_v35, %v11589_v37  ;;  %v9809_v62 = vpop.f32.mrf.mxu0  ;;  %10076 = vmatmul.mubr.msk.f32.gmra.mxu0 %vm352_vm0, %v8174_v59  ;;  %9962 = vmatprep.mubr.msk.f32.mxu1 %vm352_vm0, %v13502_v61  ;;  %v13503_v37 = vld [vmem:[#allocation27_spill] sm:$0xff]  ;;  %v8179_v61 = vld [vmem:[%s10771_s5 + $0x249] sm:$0xff] }
 0x169   : > { %v1386_v48 = vpop.f32.mrf.mxu1  ;;  %10078 = vmatprep.mubr.msk.f32.mxu0 %vm352_vm0, %v8175_v47  ;;  %v13504_v47 = vld [vmem:[#allocation28_spill] sm:$0xff] }
 0x16a   : > { %v11860_v27 = vadd.f32 %v9809_v62, %v1392_v44  ;;  %v1387_v19 = vadd.f32 %v1386_v48, %v11598_v5  ;;  %v2104_v4 = vpop.f32.mrf.mxu0  ;;  %v8178_v5 = vld [vmem:[%s10771_s5 + $0x241] sm:$0xff] }
 0x16b   : > { %v9696_v55 = vpop.f32.mrf.mxu1  ;;  %9963 = vmatmul.mubr.msk.f32.gmra.mxu1 %vm352_vm0, %v13503_v37 }
 0x16c   : > { %v11866_v59 = vadd.f32 %v2104_v4, %v1387_v19  ;;  %v1402_v39 = vadd.f32 %v9696_v55, %v11605_v25  ;;  %v9812_v50 = vpop.f32.mrf.mxu0  ;;  %10079 = vmatmul.mubr.msk.f32.gmra.mxu0 %vm352_vm0, %v8176_v0  ;;  %9965 = vmatprep.mubr.msk.f32.mxu1 %vm352_vm0, %v13504_v47  ;;  %v13505_v25 = vld [vmem:[#allocation29_spill] sm:$0xff] }
 0x16d   : > { %v1396_v35 = vpop.f32.mrf.mxu1  ;;  %10081 = vmatprep.mubr.msk.f32.mxu0 %vm352_vm0, %v8177_v52  ;;  %v13506_v52 = vld [vmem:[#allocation30_spill] sm:$0xff]  ;;  %v8181_v47 = vld [vmem:[%s10771_s5 + $0x261] sm:$0xff] }
 0x16e   : > { %v11874_v42 = vadd.f32 %v9812_v50, %v1402_v39  ;;  %v1397_v44 = vadd.f32 %v1396_v35, %v11615_v2  ;;  %v2114_v62 = vpop.f32.mrf.mxu0  ;;  %v8180_v2 = vld [vmem:[%s10771_s5 + $0x251] sm:$0xff] }
 0x16f   : > { %v9699_v48 = vpop.f32.mrf.mxu1  ;;  %9966 = vmatmul.mubr.msk.f32.gmra.mxu1 %vm352_vm0, %v13505_v25 }
 0x170   : > { %v11880_v0 = vadd.f32 %v2114_v62, %v1397_v44  ;;  %v1412_v19 = vadd.f32 %v9699_v48, %v11622_v11  ;;  %v9815_v4 = vpop.f32.mrf.mxu0  ;;  %10082 = vmatmul.mubr.msk.f32.gmra.mxu0 %vm352_vm0, %v8178_v5  ;;  %9968 = vmatprep.mubr.msk.f32.mxu1 %vm352_vm0, %v13506_v52  ;;  %v13507_v11 = vld [vmem:[#allocation31_spill] sm:$0xff] }
 0x171   : > { %v1406_v55 = vpop.f32.mrf.mxu1  ;;  %10084 = vmatprep.mubr.msk.f32.mxu0 %vm352_vm0, %v8179_v61  ;;  %v13508_v61 = vld [vmem:[#allocation32_spill] sm:$0xff]  ;;  %v8183_v52 = vld [vmem:[%s10771_s5 + $0x271] sm:$0xff] }
 0x172   : > { %v11888_v37 = vadd.f32 %v9815_v4, %v1412_v19  ;;  %v1407_v39 = vadd.f32 %v1406_v55, %v11631_v22  ;;  %v2124_v50 = vpop.f32.mrf.mxu0  ;;  %v8182_v22 = vld [vmem:[%s10771_s5 + $0x269] sm:$0xff] }
 0x173   : > { %v9702_v35 = vpop.f32.mrf.mxu1  ;;  %9969 = vmatmul.mubr.msk.f32.gmra.mxu1 %vm352_vm0, %v13507_v11 }
 0x174   : > { %v11894_v5 = vadd.f32 %v2124_v50, %v1407_v39  ;;  %v1422_v44 = vadd.f32 %v9702_v35, %v11638_v17  ;;  %v9818_v62 = vpop.f32.mrf.mxu0  ;;  %10085 = vmatmul.mubr.msk.f32.gmra.mxu0 %vm352_vm0, %v8180_v2  ;;  %9971 = vmatprep.mubr.msk.f32.mxu1 %vm352_vm0, %v13508_v61  ;;  %v13509_v17 = vld [vmem:[#allocation33_spill] sm:$0xff] }
 0x175   : > { %v1416_v48 = vpop.f32.mrf.mxu1  ;;  %10087 = vmatprep.mubr.msk.f32.mxu0 %vm352_vm0, %v8181_v47  ;;  %v13510_v47 = vld [vmem:[#allocation34_spill] sm:$0xff] }
 0x176   : > { %v11902_v25 = vadd.f32 %v9818_v62, %v1422_v44  ;;  %v1417_v19 = vadd.f32 %v1416_v48, %v11647_v9  ;;  %v2134_v4 = vpop.f32.mrf.mxu0  ;;  %v8184_v9 = vld [vmem:[%s10771_s5 + $0x281] sm:$0xff]  ;;  %v8185_v61 = vld [vmem:[%s10771_s5 + $0x289] sm:$0xff]  ;;  %v13511_v48 = vld [vmem:[#allocation35_spill] sm:$0xff] }
 0x177   : > { %v9705_v55 = vpop.f32.mrf.mxu1  ;;  %9972 = vmatmul.mubr.msk.f32.gmra.mxu1 %vm352_vm0, %v13509_v17  ;;  %v8043_v17 = vld [vmem:[%s10771_s5 + $0x2a0] sm:$0xff] }
 0x178   : > { %v11908_v2 = vadd.f32 %v2134_v4, %v1417_v19  ;;  %v1432_v39 = vadd.f32 %v9705_v55, %v11654_v23  ;;  %v9821_v50 = vpop.f32.mrf.mxu0  ;;  %10088 = vmatmul.mubr.msk.f32.gmra.mxu0 %vm352_vm0, %v8182_v22  ;;  %9974 = vmatprep.mubr.msk.f32.mxu1 %vm352_vm0, %v13510_v47 }
 0x179   : > { %v1426_v35 = vpop.f32.mrf.mxu1  ;;  %10090 = vmatprep.mubr.msk.f32.mxu0 %vm352_vm0, %v8183_v52  ;;  %v13512_v52 = vld [vmem:[#allocation36_spill] sm:$0xff] }
 0x17a   : > { %v11916_v11 = vadd.f32 %v9821_v50, %v1432_v39  ;;  %v1427_v44 = vadd.f32 %v1426_v35, %v11663_v13  ;;  %v2144_v62 = vpop.f32.mrf.mxu0  ;;  %v8186_v13 = vld [vmem:[%s10771_s5 + $0x291] sm:$0xff] }
 0x17b   : > { %v9708_v23 = vpop.f32.mrf.mxu1  ;;  %9975 = vmatmul.mubr.msk.f32.gmra.mxu1 %vm352_vm0, %v13511_v48  ;;  %v8045_v48 = vld [vmem:[%s10771_s5 + $0x2b0] sm:$0xff] }
 0x17c   : > { %v11922_v22 = vadd.f32 %v2144_v62, %v1427_v44  ;;  %v1442_v19 = vadd.f32 %v9708_v23, %v11670_v29  ;;  %v9824_v4 = vpop.f32.mrf.mxu0  ;;  %10091 = vmatmul.mubr.msk.f32.gmra.mxu0 %vm352_vm0, %v8184_v9  ;;  %9977 = vmatprep.mubr.msk.f32.mxu1 %vm352_vm0, %v13512_v52  ;;  %v8187_v29 = vld [vmem:[%s10771_s5 + $0x2a1] sm:$0xff] }
 0x17d   : > { %v1436_v55 = vpop.f32.mrf.mxu1  ;;  %10093 = vmatprep.mubr.msk.f32.mxu0 %vm352_vm0, %v8185_v61  ;;  %v13513_v44 = vld [vmem:[#allocation37_spill] sm:$0xff] }
 0x17e   : > { %v11931_v39 = vadd.f32 %v9824_v4, %v1442_v19  ;;  %v1437_v50 = vadd.f32 %v1436_v55, %v11679_v7  ;;  %v2154_v47 = vpop.f32.mrf.mxu0  ;;  %v8188_v7 = vld [vmem:[%s10771_s5 + $0x2a9] sm:$0xff]  ;;  %v8189_v55 = vld [vmem:[%s10771_s5 + $0x2b1] sm:$0xff] }
 0x17f   : > { %v9711_v35 = vpop.f32.mrf.mxu1  ;;  %9978 = vmatmul.mubr.msk.f32.gmra.mxu1 %vm352_vm0, %v13513_v44  ;;  %v8047_v44 = vld [vmem:[%s10771_s5 + $0x2c8] sm:$0xff] }
 0x180   : > { %v11937_v9 = vadd.f32 %v2154_v47, %v1437_v50  ;;  %v1452_v62 = vadd.f32 %v9711_v35, %v11686_v36  ;;  %v9827_v61 = vpop.f32.mrf.mxu0  ;;  %10094 = vmatmul.mubr.msk.f32.gmra.mxu0 %vm352_vm0, %v8186_v13  ;;  %9980 = vmatprep.mubr.msk.f32.mxu1 %vm352_vm0, %v8043_v17  ;;  %v13514_v50 = vld [vmem:[#allocation40_spill] sm:$0xff]  ;;  %v13516_v17 = vld [vmem:[#allocation38_spill] sm:$0xff] }
 0x181   : > { %v1446_v23 = vpop.f32.mrf.mxu1  ;;  %10096 = vmatprep.mubr.msk.f32.mxu0 %vm352_vm0, %v8187_v29 }
 0x182   : > { %v11945_v19 = vadd.f32 %v9827_v61, %v1452_v62  ;;  %v1447_v4 = vadd.f32 %v1446_v23, %v11695_v41  ;;  %v2164_v52 = vpop.f32.mrf.mxu0  ;;  %v8190_v41 = vld [vmem:[%s10771_s5 + $0x2c1] sm:$0xff]  ;;  %v13518_v61 = vld [vmem:[#allocation39_spill] sm:$0xff] }
 0x183   : > { %v9714_v36 = vpop.f32.mrf.mxu1  ;;  %9981 = vmatmul.mubr.msk.f32.gmra.mxu1 %vm352_vm0, %v13514_v50  ;;  %v13519_v50 = vld [vmem:[#allocation43_spill] sm:$0xff] }
 0x184   : > { %v11951_v13 = vadd.f32 %v2164_v52, %v1447_v4  ;;  %v1462_v47 = vadd.f32 %v9714_v36, %v13516_v17  ;;  %v9830_v29 = vpop.f32.mrf.mxu0  ;;  %10097 = vmatmul.mubr.msk.f32.gmra.mxu0 %vm352_vm0, %v8188_v7  ;;  %9983 = vmatprep.mubr.msk.f32.mxu1 %vm352_vm0, %v8045_v48  ;;  %v8191_v52 = vld [vmem:[%s10771_s5 + $0x2c9] sm:$0xff] }
 0x185   : > { %v1456_v35 = vpop.f32.mrf.mxu1  ;;  %10099 = vmatprep.mubr.msk.f32.mxu0 %vm352_vm0, %v8189_v55  ;;  %v13521_v48 = vld [vmem:[#allocation41_spill] sm:$0xff] }
 0x186   : > { %13515 = vst [vmem:[#allocation9_spill] sm:$0xff] %v11951_v13  ;;  %v11959_v62 = vadd.f32 %v9830_v29, %v1462_v47  ;;  %v1457_v23 = vadd.f32 %v1456_v35, %v13518_v61  ;;  %v2174_v4 = vpop.f32.mrf.mxu0  ;;  %v8048_v47 = vld [vmem:[%s10771_s5 + $0x2d0] sm:$0xff]  ;;  %v8049_v61 = vld [vmem:[%s10771_s5 + $0x2e0] sm:$0xff] }
 0x187   : > { %v9717_v36 = vpop.f32.mrf.mxu1  ;;  %9984 = vmatmul.mubr.msk.f32.gmra.mxu1 %vm352_vm0, %v13519_v50  ;;  %v8192_v35 = vld [vmem:[%s10771_s5 + $0x2d1] sm:$0xff] }
 0x188   : > { %13517 = vst [vmem:[#allocation10_spill] sm:$0xff] %v11959_v62  ;;  %v11965_v7 = vadd.f32 %v2174_v4, %v1457_v23  ;;  %v1472_v17 = vadd.f32 %v9717_v36, %v13521_v48  ;;  %v9833_v55 = vpop.f32.mrf.mxu0  ;;  %10100 = vmatmul.mubr.msk.f32.gmra.mxu0 %vm352_vm0, %v8190_v41  ;;  %9986 = vmatprep.mubr.msk.f32.mxu1 %vm352_vm0, %v8047_v44  ;;  %v13523_v23 = vld [vmem:[#allocation42_spill] sm:$0xff]  ;;  %v8193_v36 = vld [vmem:[%s10771_s5 + $0x2e1] sm:$0xff] }
 0x189   : > { %v1466_v29 = vpop.f32.mrf.mxu1  ;;  %10102 = vmatprep.mubr.msk.f32.mxu0 %vm352_vm0, %v8191_v52  ;;  %v13525_v44 = vld [vmem:[#allocation44_spill] sm:$0xff]  ;;  %v8050_v52 = vld [vmem:[%s10771_s5 + $0x2e8] sm:$0xff] }
 0x18a   : > { %13520 = vst [vmem:[#allocation48_spill] sm:$0xff] %v11965_v7  ;;  %v11974_v62 = vadd.f32 %v9833_v55, %v1472_v17  ;;  %v1467_v4 = vadd.f32 %v1466_v29, %v13523_v23  ;;  %v2184_v50 = vpop.f32.mrf.mxu0  ;;  %v8194_v55 = vld [vmem:[%s10771_s5 + $0x2e9] sm:$0xff] }
 0x18b   : > { %v9720_v48 = vpop.f32.mrf.mxu1  ;;  %9987 = vmatmul.mubr.msk.f32.gmra.mxu1 %vm352_vm0, %v8048_v47  ;;  %v8051_v29 = vld [vmem:[%s10771_s5 + $0x2f0] sm:$0xff]  ;;  %v13527_v47 = vld [vmem:[#allocation45_spill] sm:$0xff] }
 0x18c   : > { %13522 = vst [vmem:[#allocation11_spill] sm:$0xff] %v11974_v62  ;;  %v11979_v41 = vadd.f32 %v2184_v50, %v1467_v4  ;;  %v1482_v7 = vadd.f32 %v9720_v48, %v13525_v44  ;;  %v9836_v13 = vpop.f32.mrf.mxu0  ;;  %10103 = vmatmul.mubr.msk.f32.gmra.mxu0 %vm352_vm0, %v8192_v35  ;;  %9989 = vmatprep.mubr.msk.f32.mxu1 %vm352_vm0, %v8049_v61  ;;  %v8195_v48 = vld [vmem:[%s10771_s5 + $0x2f1] sm:$0xff] }
 0x18d   : > { %v1476_v17 = vpop.f32.mrf.mxu1  ;;  %10105 = vmatprep.mubr.msk.f32.mxu0 %vm352_vm0, %v8193_v36  ;;  %v13529_v61 = vld [vmem:[#allocation46_spill] sm:$0xff]  ;;  %v8052_v36 = vld [vmem:[%s10771_s5 + $0x300] sm:$0xff] }
 0x18e   : > { %13524 = vst [vmem:[#allocation12_spill] sm:$0xff] %v11979_v41  ;;  %v11988_v23 = vadd.f32 %v9836_v13, %v1482_v7  ;;  %v1477_v4 = vadd.f32 %v1476_v17, %v13527_v47  ;;  %v2194_v50 = vpop.f32.mrf.mxu0  ;;  %v8196_v7 = vld [vmem:[%s10771_s5 + $0x301] sm:$0xff] }
 0x18f   : > { %v9723_v44 = vpop.f32.mrf.mxu1  ;;  %9990 = vmatmul.mubr.msk.f32.gmra.mxu1 %vm352_vm0, %v8050_v52  ;;  %v8053_v17 = vld [vmem:[%s10771_s5 + $0x308] sm:$0xff]  ;;  %v13530_v52 = vld [vmem:[#allocation47_spill] sm:$0xff] }
 0x190   : > { %13526 = vst [vmem:[#allocation13_spill] sm:$0xff] %v11988_v23  ;;  %v11993_v35 = vadd.f32 %v2194_v50, %v1477_v4  ;;  %v1492_v41 = vadd.f32 %v9723_v44, %v13529_v61  ;;  %v9839_v62 = vpop.f32.mrf.mxu0  ;;  %10106 = vmatmul.mubr.msk.f32.gmra.mxu0 %vm352_vm0, %v8194_v55  ;;  %9992 = vmatprep.mubr.msk.f32.mxu1 %vm352_vm0, %v8051_v29  ;;  %v8197_v44 = vld [vmem:[%s10771_s5 + $0x309] sm:$0xff] }
 0x191   : > { %v1486_v13 = vpop.f32.mrf.mxu1  ;;  %10108 = vmatprep.mubr.msk.f32.mxu0 %vm352_vm0, %v8195_v48  ;;  %v13531_v29 = vld [vmem:[#allocation49_spill] sm:$0xff]  ;;  %v8054_v48 = vld [vmem:[%s10771_s5 + $0x310] sm:$0xff] }
 0x192   : > { %13528 = vst [vmem:[#allocation14_spill] sm:$0xff] %v11993_v35  ;;  %v12002_v47 = vadd.f32 %v9839_v62, %v1492_v41  ;;  %v1487_v4 = vadd.f32 %v1486_v13, %v13530_v52  ;;  %v2204_v50 = vpop.f32.mrf.mxu0  ;;  %v8198_v41 = vld [vmem:[%s10771_s5 + $0x311] sm:$0xff]  ;;  %v8271_v13 = vld [vmem:[%s10771_s5 + $0x22] sm:$0xff] }
 0x193   : > { %v9726_v61 = vpop.f32.mrf.mxu1  ;;  %9993 = vmatmul.mubr.msk.f32.gmra.mxu1 %vm352_vm0, %v8052_v36 }
 0x194   : > { %v12007_v55 = vadd.f32 %v2204_v50, %v1487_v4  ;;  %v1502_v35 = vadd.f32 %v9726_v61, %v13531_v29  ;;  %v9842_v23 = vpop.f32.mrf.mxu0  ;;  %10109 = vmatmul.mubr.msk.f32.gmra.mxu0 %vm352_vm0, %v8196_v7  ;;  %9995 = vmatprep.mubr.msk.f32.mxu1 %vm352_vm0, %v8053_v17  ;;  %v8415_v50 = vld [vmem:[%s10771_s5 + $0x40] sm:$0xff] }
 0x195   : > { %v1496_v62 = vpop.f32.mrf.mxu1  ;;  %10111 = vmatprep.mubr.msk.f32.mxu0 %vm352_vm0, %v8197_v44 }
 0x196   : > { %v12016_v52 = vadd.f32 %v9842_v23, %v1502_v35  ;;  %v1497_v36 = vadd.f32 %v1496_v62, %v11476_v10  ;;  %v2214_v4 = vpop.f32.mrf.mxu0  ;;  %v8272_v23 = vld [vmem:[%s10771_s5 + $0x2a] sm:$0xff] }
 0x197   : > { %v9729_v61 = vpop.f32.mrf.mxu1  ;;  %9996 = vmatmul.mubr.msk.f32.gmra.mxu1 %vm352_vm0, %v8054_v48  ;;  %v8416_v10 = vld [vmem:[%s10771_s5 + $0x48] sm:$0xff] }
 0x198   : > { %v12021_v7 = vadd.f32 %v2214_v4, %v1497_v36  ;;  %v1512_v17 = vadd.f32 %v9729_v61, %v11482_v18  ;;  %v9845_v29 = vpop.f32.mrf.mxu0  ;;  %10112 = vmatmul.mubr.msk.f32.gmra.mxu0 %vm352_vm0, %v8198_v41  ;;  %10122 = vmatprep.mubr.msk.f32.mxu1 %vm352_vm0, %v8271_v13  ;;  %v8273_v36 = vld [vmem:[%s10771_s5 + $0x32] sm:$0xff] }
 0x199   : > { %v1506_v35 = vpop.f32.mrf.mxu1  ;;  %10238 = vmatprep.mubr.msk.f32.mxu0 %vm352_vm0, %v8415_v50  ;;  %v8417_v41 = vld [vmem:[%s10771_s5 + $0x50] sm:$0xff] }
 0x19a   : > { %v12029_v44 = vadd.f32 %v9845_v29, %v1512_v17  ;;  %v1507_v48 = vadd.f32 %v1506_v35, %v11490_v24  ;;  %v2224_v62 = vpop.f32.mrf.mxu0  ;;  %v5662_v4 = vld [vmem:[#allocation3 + $0xf0] sm:$0xff]  ;;  %v8274_v24 = vld [vmem:[%s10771_s5 + $0x42] sm:$0xff] }
 0x19b   : > { %v9732_v18 = vpop.f32.mrf.mxu1  ;;  %10123 = vmatmul.mubr.msk.f32.vlgmr.msra.gmra.mxu1 %vm352_vm0, %v8272_v23  ;;  %v6452_v17 = vld [vmem:[#allocation3 + $0x110] sm:$0xff]  ;;  %v8418_v23 = vld [vmem:[%s10771_s5 + $0x60] sm:$0xff] }
 0x19c   : > { %v12035_v13 = vadd.f32 %v2224_v62, %v1507_v48  ;;  %v1522_v61 = vadd.f32 %v9732_v18, %v11496_v60  ;;  %v9848_v50 = vpop.f32.mrf.mxu0  ;;  %10239 = vmatmul.mubr.msk.f32.vlgmr.msra.gmra.mxu0 %vm352_vm0, %v8416_v10  ;;  %10347 = vmatpush3.msra.mxu1 %v11572_v33  ;;  %v8275_v35 = vld [vmem:[%s10771_s5 + $0x4a] sm:$0xff] }
 0x19d   : > { %v1516_v29 = vpop.f32.mrf.mxu1  ;;  %10125 = vmatprep.mubr.msk.f32.mxu1 %vm352_vm0, %v8273_v36  ;;  %10463 = vmatpush3.msra.mxu0 %v11582_v16  ;;  %v8419_v10 = vld [vmem:[%s10771_s5 + $0x68] sm:$0xff] }
 0x19e   : > { %13532 = vst [vmem:[#allocation15_spill] sm:$0xff] %v12035_v13  ;;  %v12045_v48 = vadd.f32 %v9848_v50, %v1522_v61  ;;  %v1517_v62 = vadd.f32 %v1516_v29, %v11505_v45  ;;  %v2234_v60 = vpop.f32.mrf.mxu0  ;;  %10241 = vmatprep.mubr.msk.f32.mxu0 %vm352_vm0, %v8417_v41  ;;  %10348 = vmatprep.subr.mxu1 %v5662_v4  ;;  %v5661_v36 = vld [vmem:[#allocation3 + $0xe8] sm:$0xff]  ;;  %v8276_v45 = vld [vmem:[%s10771_s5 + $0x52] sm:$0xff] }
 0x19f   : > { %v9735_v33 = vpop.f32.mrf.mxu1  ;;  %10126 = vmatmul.mubr.msk.f32.gmra.mxu1 %vm352_vm0, %v8274_v24  ;;  %10464 = vmatprep.subr.mxu0 %v6452_v17  ;;  %v13534_v18 = vld [vmem:[#allocation50_spill] sm:$0xff]  ;;  %v8277_v13 = vld [vmem:[%s10771_s5 + $0x62] sm:$0xff] }
 0x1a0   : > { %13533 = vst [vmem:[#allocation16_spill] sm:$0xff] %v12045_v48  ;;  %v12051_v16 = vadd.f32 %v2234_v60, %v1517_v62  ;;  %v1532_v61 = vadd.f32 %v9735_v33, %v13534_v18  ;;  %v9851_v50 = vpop.f32.mrf.mxu0  ;;  %10242 = vmatmul.mubr.msk.f32.gmra.mxu0 %vm352_vm0, %v8418_v23  ;;  %10128 = vmatprep.mubr.msk.f32.mxu1 %vm352_vm0, %v8275_v35  ;;  %v6451_v41 = vld [vmem:[#allocation3 + $0x108] sm:$0xff]  ;;  %v8420_v48 = vld [vmem:[%s10771_s5 + $0x70] sm:$0xff]  ;;  %v8421_v33 = vld [vmem:[%s10771_s5 + $0x80] sm:$0xff] }
 0x1a1   : > { %v1526_v29 = vpop.f32.mrf.mxu1  ;;  %10244 = vmatprep.mubr.msk.f32.mxu0 %vm352_vm0, %v8419_v10  ;;  %10349 = vmatpush3.msra.mxu1 %v5662_v4  ;;  %v5660_v35 = vld [vmem:[#allocation3 + $0xe0] sm:$0xff] }
 0x1a2   : > { %v12060_v24 = vadd.f32 %v9851_v50, %v1532_v61  ;;  %v1527_v62 = vadd.f32 %v1526_v29, %v11524_v3  ;;  %v2244_v60 = vpop.f32.mrf.mxu0  ;;  %10465 = vmatpush3.msra.mxu0 %v6452_v17  ;;  %10350 = vmatprep.subr.mxu1 %v5661_v36  ;;  %v8278_v3 = vld [vmem:[%s10771_s5 + $0x6a] sm:$0xff]  ;;  %v6450_v61 = vld [vmem:[#allocation3 + $0x100] sm:$0xff]  ;;  %v8279_v29 = vld [vmem:[%s10771_s5 + $0x72] sm:$0xff] }
 0x1a3   : > { %v9738_v23 = vpop.f32.mrf.mxu1  ;;  %10129 = vmatmul.mubr.msk.f32.gmra.mxu1 %vm352_vm0, %v8276_v45  ;;  %10466 = vmatprep.subr.mxu0 %v6451_v41  ;;  %v8422_v50 = vld [vmem:[%s10771_s5 + $0x88] sm:$0xff] }
 0x1a4   : > { %v12065_v10 = vadd.f32 %v2244_v60, %v1527_v62  ;;  %v1542_v4 = vadd.f32 %v9738_v23, %v11530_v51  ;;  %v9854_v18 = vpop.f32.mrf.mxu0  ;;  %10245 = vmatmul.mubr.msk.f32.gmra.mxu0 %vm352_vm0, %v8420_v48  ;;  %10131 = vmatprep.mubr.msk.f32.mxu1 %vm352_vm0, %v8277_v13  ;;  %v8423_v60 = vld [vmem:[%s10771_s5 + $0x90] sm:$0xff] }
 0x1a5   : > { %v1536_v17 = vpop.f32.mrf.mxu1  ;;  %10247 = vmatprep.mubr.msk.f32.mxu0 %vm352_vm0, %v8421_v33  ;;  %10351 = vmatpush3.msra.mxu1 %v5661_v36 }
 0x1a6   : > { %v12074_v45 = vadd.f32 %v9854_v18, %v1542_v4  ;;  %v1537_v62 = vadd.f32 %v1536_v17, %v11540_v54  ;;  %v2254_v51 = vpop.f32.mrf.mxu0  ;;  %10467 = vmatpush3.msra.mxu0 %v6451_v41  ;;  %10352 = vmatprep.subr.mxu1 %v5660_v35  ;;  %v8280_v54 = vld [vmem:[%s10771_s5 + $0x82] sm:$0xff]  ;;  %v8281_v4 = vld [vmem:[%s10771_s5 + $0x8a] sm:$0xff] }
 0x1a7   : > { %v9741_v13 = vpop.f32.mrf.mxu1  ;;  %10132 = vmatmul.mubr.msk.f32.gmra.mxu1 %vm352_vm0, %v8278_v3  ;;  %10468 = vmatprep.subr.mxu0 %v6450_v61  ;;  %v8424_v41 = vld [vmem:[%s10771_s5 + $0xa0] sm:$0xff]  ;;  %v8425_v17 = vld [vmem:[%s10771_s5 + $0xa8] sm:$0xff] }
 0x1a8   : > { %v12079_v48 = vadd.f32 %v2254_v51, %v1537_v62  ;;  %v1552_v33 = vadd.f32 %v9741_v13, %v11546_v57  ;;  %v9857_v36 = vpop.f32.mrf.mxu0  ;;  %10248 = vmatmul.mubr.msk.f32.gmra.mxu0 %vm352_vm0, %v8422_v50  ;;  %10134 = vmatprep.mubr.msk.f32.mxu1 %vm352_vm0, %v8279_v29  ;;  %v13535_v62 = vld [vmem:[#allocation51_spill] sm:$0xff] }
 0x1a9   : > { %v1546_v23 = vpop.f32.mrf.mxu1  ;;  %10250 = vmatprep.mubr.msk.f32.mxu0 %vm352_vm0, %v8423_v60  ;;  %10353 = vmatpush3.msra.mxu1 %v5660_v35  ;;  %v8282_v35 = vld [vmem:[%s10771_s5 + $0x92] sm:$0xff] }
 0x1aa   : > { %v12088_v18 = vadd.f32 %v9857_v36, %v1552_v33  ;;  %v1547_v3 = vadd.f32 %v1546_v23, %v11556_v31  ;;  %v2264_v57 = vpop.f32.mrf.mxu0  ;;  %10469 = vmatpush3.msra.mxu0 %v6450_v61  ;;  %v8426_v31 = vld [vmem:[%s10771_s5 + $0xb0] sm:$0xff]  ;;  %v8283_v61 = vld [vmem:[%s10771_s5 + $0xa2] sm:$0xff]  ;;  %v13537_v36 = vld [vmem:[#allocation52_spill] sm:$0xff] }
 0x1ab   : > { %v9744_v50 = vpop.f32.mrf.mxu1  ;;  %10135 = vmatmul.mubr.msk.f32.gmra.mxu1 %vm352_vm0, %v8280_v54 }
 0x1ac   : > { %v12093_v29 = vadd.f32 %v2264_v57, %v1547_v3  ;;  %v1562_v51 = vadd.f32 %v9744_v50, %v13535_v62  ;;  %v9860_v60 = vpop.f32.mrf.mxu0  ;;  %10251 = vmatmul.mubr.msk.f32.gmra.mxu0 %vm352_vm0, %v8424_v41  ;;  %10137 = vmatprep.mubr.msk.f32.mxu1 %vm352_vm0, %v8281_v4  ;;  %v8427_v3 = vld [vmem:[%s10771_s5 + $0xc0] sm:$0xff] }
 0x1ad   : > { %v1556_v13 = vpop.f32.mrf.mxu1  ;;  %10253 = vmatprep.mubr.msk.f32.mxu0 %vm352_vm0, %v8425_v17  ;;  %v13539_v4 = vld [vmem:[#allocation53_spill] sm:$0xff]  ;;  %v8284_v17 = vld [vmem:[%s10771_s5 + $0xaa] sm:$0xff] }
 0x1ae   : > { %v12102_v33 = vadd.f32 %v9860_v60, %v1562_v51  ;;  %v1557_v54 = vadd.f32 %v1556_v13, %v13537_v36  ;;  %v2274_v23 = vpop.f32.mrf.mxu0  ;;  %v8428_v60 = vld [vmem:[%s10771_s5 + $0xc8] sm:$0xff]  ;;  %v8285_v13 = vld [vmem:[%s10771_s5 + $0xb2] sm:$0xff] }
 0x1af   : > { %v9747_v57 = vpop.f32.mrf.mxu1  ;;  %10138 = vmatmul.mubr.msk.f32.gmra.mxu1 %vm352_vm0, %v8282_v35  ;;  %v13541_v35 = vld [vmem:[#allocation54_spill] sm:$0xff] }
 0x1b0   : > { %13536 = vst [vmem:[#allocation17_spill] sm:$0xff] %v12102_v33  ;;  %v12107_v41 = vadd.f32 %v2274_v23, %v1557_v54  ;;  %v1572_v50 = vadd.f32 %v9747_v57, %v13539_v4  ;;  %v9863_v62 = vpop.f32.mrf.mxu0  ;;  %10254 = vmatmul.mubr.msk.f32.gmra.mxu0 %vm352_vm0, %v8426_v31  ;;  %10140 = vmatprep.mubr.msk.f32.mxu1 %vm352_vm0, %v8283_v61  ;;  %v8429_v57 = vld [vmem:[%s10771_s5 + $0xd0] sm:$0xff] }
 0x1b1   : > { %v1566_v51 = vpop.f32.mrf.mxu1  ;;  %10256 = vmatprep.mubr.msk.f32.mxu0 %vm352_vm0, %v8427_v3  ;;  %v13543_v61 = vld [vmem:[#allocation55_spill] sm:$0xff]  ;;  %v8286_v3 = vld [vmem:[%s10771_s5 + $0xc2] sm:$0xff] }
 0x1b2   : > { %13538 = vst [vmem:[#allocation18_spill] sm:$0xff] %v12107_v41  ;;  %v12116_v36 = vadd.f32 %v9863_v62, %v1572_v50  ;;  %v1567_v54 = vadd.f32 %v1566_v51, %v13541_v35  ;;  %v2284_v23 = vpop.f32.mrf.mxu0  ;;  %v8430_v62 = vld [vmem:[%s10771_s5 + $0xe0] sm:$0xff]  ;;  %v8287_v51 = vld [vmem:[%s10771_s5 + $0xca] sm:$0xff] }
 0x1b3   : > { %v9750_v4 = vpop.f32.mrf.mxu1  ;;  %10141 = vmatmul.mubr.msk.f32.gmra.mxu1 %vm352_vm0, %v8284_v17  ;;  %v13545_v17 = vld [vmem:[#allocation56_spill] sm:$0xff] }
 0x1b4   : > { %13540 = vst [vmem:[#allocation19_spill] sm:$0xff] %v12116_v36  ;;  %v12121_v31 = vadd.f32 %v2284_v23, %v1567_v54  ;;  %v1582_v41 = vadd.f32 %v9750_v4, %v13543_v61  ;;  %v9866_v33 = vpop.f32.mrf.mxu0  ;;  %10257 = vmatmul.mubr.msk.f32.gmra.mxu0 %vm352_vm0, %v8428_v60  ;;  %10143 = vmatprep.mubr.msk.f32.mxu1 %vm352_vm0, %v8285_v13  ;;  %v8431_v4 = vld [vmem:[%s10771_s5 + $0xe8] sm:$0xff] }
 0x1b5   : > { %v1576_v50 = vpop.f32.mrf.mxu1  ;;  %10259 = vmatprep.mubr.msk.f32.mxu0 %vm352_vm0, %v8429_v57  ;;  %v13547_v13 = vld [vmem:[#allocation57_spill] sm:$0xff]  ;;  %v8288_v57 = vld [vmem:[%s10771_s5 + $0xd2] sm:$0xff] }
 0x1b6   : > { %13542 = vst [vmem:[#allocation20_spill] sm:$0xff] %v12121_v31  ;;  %v12130_v35 = vadd.f32 %v9866_v33, %v1582_v41  ;;  %v1577_v54 = vadd.f32 %v1576_v50, %v13545_v17  ;;  %v2294_v23 = vpop.f32.mrf.mxu0  ;;  %v8432_v41 = vld [vmem:[%s10771_s5 + $0xf0] sm:$0xff]  ;;  %v8289_v50 = vld [vmem:[%s10771_s5 + $0xe2] sm:$0xff] }
 0x1b7   : > { %v9753_v61 = vpop.f32.mrf.mxu1  ;;  %10144 = vmatmul.mubr.msk.f32.gmra.mxu1 %vm352_vm0, %v8286_v3  ;;  %v13549_v3 = vld [vmem:[#allocation58_spill] sm:$0xff] }
 0x1b8   : > { %13544 = vst [vmem:[#allocation21_spill] sm:$0xff] %v12130_v35  ;;  %v12135_v60 = vadd.f32 %v2294_v23, %v1577_v54  ;;  %v1592_v31 = vadd.f32 %v9753_v61, %v13547_v13  ;;  %v9869_v36 = vpop.f32.mrf.mxu0  ;;  %10260 = vmatmul.mubr.msk.f32.gmra.mxu0 %vm352_vm0, %v8430_v62  ;;  %10146 = vmatprep.mubr.msk.f32.mxu1 %vm352_vm0, %v8287_v51  ;;  %v8433_v61 = vld [vmem:[%s10771_s5 + $0x100] sm:$0xff]  ;;  %v13551_v51 = vld [vmem:[#allocation59_spill] sm:$0xff] }
 0x1b9   : > { %v1586_v33 = vpop.f32.mrf.mxu1  ;;  %10262 = vmatprep.mubr.msk.f32.mxu0 %vm352_vm0, %v8431_v4  ;;  %v8290_v4 = vld [vmem:[%s10771_s5 + $0xea] sm:$0xff] }
 0x1ba   : > { %13546 = vst [vmem:[#allocation22_spill] sm:$0xff] %v12135_v60  ;;  %v12144_v17 = vadd.f32 %v9869_v36, %v1592_v31  ;;  %v1587_v54 = vadd.f32 %v1586_v33, %v13549_v3  ;;  %v2304_v23 = vpop.f32.mrf.mxu0  ;;  %v8434_v31 = vld [vmem:[%s10771_s5 + $0x108] sm:$0xff]  ;;  %v8291_v33 = vld [vmem:[%s10771_s5 + $0xf2] sm:$0xff] }
 0x1bb   : > { %v9756_v13 = vpop.f32.mrf.mxu1  ;;  %10147 = vmatmul.mubr.msk.f32.gmra.mxu1 %vm352_vm0, %v8288_v57  ;;  %v13553_v57 = vld [vmem:[#allocation60_spill] sm:$0xff] }
 0x1bc   : > { %13548 = vst [vmem:[#allocation23_spill] sm:$0xff] %v12144_v17  ;;  %v12149_v62 = vadd.f32 %v2304_v23, %v1587_v54  ;;  %v1602_v60 = vadd.f32 %v9756_v13, %v13551_v51  ;;  %v9872_v35 = vpop.f32.mrf.mxu0  ;;  %10263 = vmatmul.mubr.msk.f32.gmra.mxu0 %vm352_vm0, %v8432_v41  ;;  %10149 = vmatprep.mubr.msk.f32.mxu1 %vm352_vm0, %v8289_v50  ;;  %v8435_v13 = vld [vmem:[%s10771_s5 + $0x110] sm:$0xff]  ;;  %v13555_v50 = vld [vmem:[#allocation61_spill] sm:$0xff] }
 0x1bd   : > { %v1596_v36 = vpop.f32.mrf.mxu1  ;;  %10265 = vmatprep.mubr.msk.f32.mxu0 %vm352_vm0, %v8433_v61  ;;  %v8292_v61 = vld [vmem:[%s10771_s5 + $0x102] sm:$0xff] }
 0x1be   : > { %13550 = vst [vmem:[#allocation24_spill] sm:$0xff] %v12149_v62  ;;  %v12158_v3 = vadd.f32 %v9872_v35, %v1602_v60  ;;  %v1597_v54 = vadd.f32 %v1596_v36, %v13553_v57  ;;  %v2314_v23 = vpop.f32.mrf.mxu0  ;;  %v8436_v60 = vld [vmem:[%s10771_s5 + $0x120] sm:$0xff]  ;;  %v8293_v36 = vld [vmem:[%s10771_s5 + $0x10a] sm:$0xff] }
 0x1bf   : > { %v9759_v51 = vpop.f32.mrf.mxu1  ;;  %10150 = vmatmul.mubr.msk.f32.gmra.mxu1 %vm352_vm0, %v8290_v4  ;;  %v13557_v4 = vld [vmem:[#allocation62_spill] sm:$0xff] }
 0x1c0   : > { %13552 = vst [vmem:[#allocation25_spill] sm:$0xff] %v12158_v3  ;;  %v12163_v41 = vadd.f32 %v2314_v23, %v1597_v54  ;;  %v1612_v62 = vadd.f32 %v9759_v51, %v13555_v50  ;;  %v9875_v17 = vpop.f32.mrf.mxu0  ;;  %10266 = vmatmul.mubr.msk.f32.gmra.mxu0 %vm352_vm0, %v8434_v31  ;;  %10152 = vmatprep.mubr.msk.f32.mxu1 %vm352_vm0, %v8291_v33  ;;  %v8437_v51 = vld [vmem:[%s10771_s5 + $0x128] sm:$0xff]  ;;  %v13559_v33 = vld [vmem:[#allocation63_spill] sm:$0xff] }
 0x1c1   : > { %v1606_v35 = vpop.f32.mrf.mxu1  ;;  %10268 = vmatprep.mubr.msk.f32.mxu0 %vm352_vm0, %v8435_v13  ;;  %v8294_v13 = vld [vmem:[%s10771_s5 + $0x112] sm:$0xff] }
 0x1c2   : > { %13554 = vst [vmem:[#allocation26_spill] sm:$0xff] %v12163_v41  ;;  %v12172_v57 = vadd.f32 %v9875_v17, %v1612_v62  ;;  %v1607_v54 = vadd.f32 %v1606_v35, %v13557_v4  ;;  %v2324_v23 = vpop.f32.mrf.mxu0  ;;  %v8438_v62 = vld [vmem:[%s10771_s5 + $0x130] sm:$0xff]  ;;  %v8295_v35 = vld [vmem:[%s10771_s5 + $0x122] sm:$0xff] }
 0x1c3   : > { %v9762_v50 = vpop.f32.mrf.mxu1  ;;  %10153 = vmatmul.mubr.msk.f32.gmra.mxu1 %vm352_vm0, %v8292_v61  ;;  %v13560_v61 = vld [vmem:[#allocation64_spill] sm:$0xff] }
 0x1c4   : > { %13556 = vst [vmem:[#allocation27_spill] sm:$0xff] %v12172_v57  ;;  %v12177_v31 = vadd.f32 %v2324_v23, %v1607_v54  ;;  %v1622_v41 = vadd.f32 %v9762_v50, %v13559_v33  ;;  %v9878_v3 = vpop.f32.mrf.mxu0  ;;  %10269 = vmatmul.mubr.msk.f32.gmra.mxu0 %vm352_vm0, %v8436_v60  ;;  %10155 = vmatprep.mubr.msk.f32.mxu1 %vm352_vm0, %v8293_v36  ;;  %v8439_v50 = vld [vmem:[%s10771_s5 + $0x140] sm:$0xff] }
 0x1c5   : > { %v1616_v17 = vpop.f32.mrf.mxu1  ;;  %10271 = vmatprep.mubr.msk.f32.mxu0 %vm352_vm0, %v8437_v51  ;;  %v13562_v36 = vld [vmem:[#allocation65_spill] sm:$0xff]  ;;  %v8296_v51 = vld [vmem:[%s10771_s5 + $0x12a] sm:$0xff] }
 0x1c6   : > { %13558 = vst [vmem:[#allocation28_spill] sm:$0xff] %v12177_v31  ;;  %v12186_v4 = vadd.f32 %v9878_v3, %v1622_v41  ;;  %v1617_v54 = vadd.f32 %v1616_v17, %v13560_v61  ;;  %v2334_v23 = vpop.f32.mrf.mxu0  ;;  %v8440_v41 = vld [vmem:[%s10771_s5 + $0x148] sm:$0xff]  ;;  %v8297_v17 = vld [vmem:[%s10771_s5 + $0x132] sm:$0xff] }
 0x1c7   : > { %v9765_v33 = vpop.f32.mrf.mxu1  ;;  %10156 = vmatmul.mubr.msk.f32.gmra.mxu1 %vm352_vm0, %v8294_v13  ;;  %v13563_v13 = vld [vmem:[#allocation66_spill] sm:$0xff] }
 0x1c8   : > { %v12191_v60 = vadd.f32 %v2334_v23, %v1617_v54  ;;  %v1632_v31 = vadd.f32 %v9765_v33, %v13562_v36  ;;  %v9881_v57 = vpop.f32.mrf.mxu0  ;;  %10272 = vmatmul.mubr.msk.f32.gmra.mxu0 %vm352_vm0, %v8438_v62  ;;  %10158 = vmatprep.mubr.msk.f32.mxu1 %vm352_vm0, %v8295_v35  ;;  %v8441_v33 = vld [vmem:[%s10771_s5 + $0x150] sm:$0xff] }
 0x1c9   : > { %v1626_v3 = vpop.f32.mrf.mxu1  ;;  %10274 = vmatprep.mubr.msk.f32.mxu0 %vm352_vm0, %v8439_v50  ;;  %v8298_v50 = vld [vmem:[%s10771_s5 + $0x142] sm:$0xff] }
 0x1ca   : > { %13561 = vst [vmem:[#allocation29_spill] sm:$0xff] %v12191_v60  ;;  %v12200_v61 = vadd.f32 %v9881_v57, %v1632_v31  ;;  %v1627_v54 = vadd.f32 %v1626_v3, %v13563_v13  ;;  %v2344_v23 = vpop.f32.mrf.mxu0  ;;  %v8442_v31 = vld [vmem:[%s10771_s5 + $0x160] sm:$0xff]  ;;  %v8299_v3 = vld [vmem:[%s10771_s5 + $0x14a] sm:$0xff] }
 0x1cb   : > { %v9892_v36 = vpop.f32.mrf.mxu1  ;;  %10159 = vmatmul.mubr.msk.f32.gmra.mxu1 %vm352_vm0, %v8296_v51 }
 0x1cc   : > { %v12205_v62 = vadd.f32 %v2344_v23, %v1627_v54  ;;  %v3145_v35 = vadd.f32 %v9892_v36, %v11706_v43  ;;  %v10008_v60 = vpop.f32.mrf.mxu0  ;;  %10275 = vmatmul.mubr.msk.f32.gmra.mxu0 %vm352_vm0, %v8440_v41  ;;  %10161 = vmatprep.mubr.msk.f32.mxu1 %vm352_vm0, %v8297_v17  ;;  %v8443_v43 = vld [vmem:[%s10771_s5 + $0x168] sm:$0xff] }
 0x1cd   : > { %v2785_v57 = vpop.f32.mrf.mxu1  ;;  %10277 = vmatprep.mubr.msk.f32.mxu0 %vm352_vm0, %v8441_v33  ;;  %v8300_v33 = vld [vmem:[%s10771_s5 + $0x152] sm:$0xff] }
 0x1ce   : > { %v12214_v13 = vadd.f32 %v10008_v60, %v3145_v35  ;;  %v3144_v51 = vadd.f32 %v2785_v57, %v11712_v21  ;;  %v3575_v54 = vpop.f32.mrf.mxu0  ;;  %v8444_v21 = vld [vmem:[%s10771_s5 + $0x170] sm:$0xff]  ;;  %v8301_v35 = vld [vmem:[%s10771_s5 + $0x162] sm:$0xff] }
 0x1cf   : > { %v9895_v23 = vpop.f32.mrf.mxu1  ;;  %10162 = vmatmul.mubr.msk.f32.gmra.mxu1 %vm352_vm0, %v8298_v50 }
 0x1d0   : > { %v12219_v41 = vadd.f32 %v3575_v54, %v3144_v51  ;;  %v3147_v17 = vadd.f32 %v9895_v23, %v11720_v26  ;;  %v10011_v36 = vpop.f32.mrf.mxu0  ;;  %10278 = vmatmul.mubr.msk.f32.gmra.mxu0 %vm352_vm0, %v8442_v31  ;;  %10164 = vmatprep.mubr.msk.f32.mxu1 %vm352_vm0, %v8299_v3  ;;  %v8445_v26 = vld [vmem:[%s10771_s5 + $0x180] sm:$0xff] }
 0x1d1   : > { %v2795_v60 = vpop.f32.mrf.mxu1  ;;  %10280 = vmatprep.mubr.msk.f32.mxu0 %vm352_vm0, %v8443_v43  ;;  %v8302_v43 = vld [vmem:[%s10771_s5 + $0x16a] sm:$0xff] }
 0x1d2   : > { %v12228_v57 = vadd.f32 %v10011_v36, %v3147_v17  ;;  %v3146_v50 = vadd.f32 %v2795_v60, %v11726_v1  ;;  %v3585_v51 = vpop.f32.mrf.mxu0  ;;  %v8446_v1 = vld [vmem:[%s10771_s5 + $0x188] sm:$0xff]  ;;  %v8303_v36 = vld [vmem:[%s10771_s5 + $0x172] sm:$0xff] }
 0x1d3   : > { %v9898_v54 = vpop.f32.mrf.mxu1  ;;  %10165 = vmatmul.mubr.msk.f32.gmra.mxu1 %vm352_vm0, %v8300_v33 }
 0x1d4   : > { %v12233_v31 = vadd.f32 %v3585_v51, %v3146_v50  ;;  %v3149_v3 = vadd.f32 %v9898_v54, %v11734_v49  ;;  %v10014_v23 = vpop.f32.mrf.mxu0  ;;  %10281 = vmatmul.mubr.msk.f32.gmra.mxu0 %vm352_vm0, %v8444_v21  ;;  %10167 = vmatprep.mubr.msk.f32.mxu1 %vm352_vm0, %v8301_v35  ;;  %v8447_v49 = vld [vmem:[%s10771_s5 + $0x190] sm:$0xff] }
 0x1d5   : > { %v2805_v17 = vpop.f32.mrf.mxu1  ;;  %10283 = vmatprep.mubr.msk.f32.mxu0 %vm352_vm0, %v8445_v26  ;;  %v8304_v26 = vld [vmem:[%s10771_s5 + $0x182] sm:$0xff] }
 0x1d6   : > { %v12242_v60 = vadd.f32 %v10014_v23, %v3149_v3  ;;  %v3148_v33 = vadd.f32 %v2805_v17, %v11740_v32  ;;  %v3595_v50 = vpop.f32.mrf.mxu0  ;;  %v8448_v32 = vld [vmem:[%s10771_s5 + $0x1a0] sm:$0xff]  ;;  %v8305_v23 = vld [vmem:[%s10771_s5 + $0x18a] sm:$0xff] }
 0x1d7   : > { %v9901_v51 = vpop.f32.mrf.mxu1  ;;  %10168 = vmatmul.mubr.msk.f32.gmra.mxu1 %vm352_vm0, %v8302_v43 }
 0x1d8   : > { %v12247_v21 = vadd.f32 %v3595_v50, %v3148_v33  ;;  %v3151_v35 = vadd.f32 %v9901_v51, %v11748_v58  ;;  %v10017_v54 = vpop.f32.mrf.mxu0  ;;  %10284 = vmatmul.mubr.msk.f32.gmra.mxu0 %vm352_vm0, %v8446_v1  ;;  %10170 = vmatprep.mubr.msk.f32.mxu1 %vm352_vm0, %v8303_v36  ;;  %v8449_v58 = vld [vmem:[%s10771_s5 + $0x1a8] sm:$0xff] }
 0x1d9   : > { %v2815_v3 = vpop.f32.mrf.mxu1  ;;  %10286 = vmatprep.mubr.msk.f32.mxu0 %vm352_vm0, %v8447_v49  ;;  %v8306_v49 = vld [vmem:[%s10771_s5 + $0x192] sm:$0xff] }
 0x1da   : > { %v12256_v17 = vadd.f32 %v10017_v54, %v3151_v35  ;;  %v3150_v43 = vadd.f32 %v2815_v3, %v11754_v34  ;;  %v3605_v33 = vpop.f32.mrf.mxu0  ;;  %v8450_v34 = vld [vmem:[%s10771_s5 + $0x1b0] sm:$0xff]  ;;  %v8307_v54 = vld [vmem:[%s10771_s5 + $0x1a2] sm:$0xff] }
 0x1db   : > { %v9904_v50 = vpop.f32.mrf.mxu1  ;;  %10171 = vmatmul.mubr.msk.f32.gmra.mxu1 %vm352_vm0, %v8304_v26 }
 0x1dc   : > { %v12261_v1 = vadd.f32 %v3605_v33, %v3150_v43  ;;  %v3153_v36 = vadd.f32 %v9904_v50, %v11762_v8  ;;  %v10020_v51 = vpop.f32.mrf.mxu0  ;;  %10287 = vmatmul.mubr.msk.f32.gmra.mxu0 %vm352_vm0, %v8448_v32  ;;  %10173 = vmatprep.mubr.msk.f32.mxu1 %vm352_vm0, %v8305_v23  ;;  %v8451_v8 = vld [vmem:[%s10771_s5 + $0x1c0] sm:$0xff] }
 0x1dd   : > { %v2825_v35 = vpop.f32.mrf.mxu1  ;;  %10289 = vmatprep.mubr.msk.f32.mxu0 %vm352_vm0, %v8449_v58  ;;  %v8308_v58 = vld [vmem:[%s10771_s5 + $0x1aa] sm:$0xff] }
 0x1de   : > { %v12270_v3 = vadd.f32 %v10020_v51, %v3153_v36  ;;  %v3152_v26 = vadd.f32 %v2825_v35, %v11768_v40  ;;  %v3615_v43 = vpop.f32.mrf.mxu0  ;;  %v8452_v40 = vld [vmem:[%s10771_s5 + $0x1c8] sm:$0xff]  ;;  %v8309_v51 = vld [vmem:[%s10771_s5 + $0x1b2] sm:$0xff] }
 0x1df   : > { %v9907_v33 = vpop.f32.mrf.mxu1  ;;  %10174 = vmatmul.mubr.msk.f32.gmra.mxu1 %vm352_vm0, %v8306_v49 }
 0x1e0   : > { %v12275_v32 = vadd.f32 %v3615_v43, %v3152_v26  ;;  %v3155_v23 = vadd.f32 %v9907_v33, %v11776_v56  ;;  %v10023_v50 = vpop.f32.mrf.mxu0  ;;  %10290 = vmatmul.mubr.msk.f32.gmra.mxu0 %vm352_vm0, %v8450_v34  ;;  %10176 = vmatprep.mubr.msk.f32.mxu1 %vm352_vm0, %v8307_v54  ;;  %v8453_v56 = vld [vmem:[%s10771_s5 + $0x1d0] sm:$0xff] }
 0x1e1   : > { %v2835_v36 = vpop.f32.mrf.mxu1  ;;  %10292 = vmatprep.mubr.msk.f32.mxu0 %vm352_vm0, %v8451_v8  ;;  %v8310_v8 = vld [vmem:[%s10771_s5 + $0x1c2] sm:$0xff] }
 0x1e2   : > { %v12284_v35 = vadd.f32 %v10023_v50, %v3155_v23  ;;  %v3154_v49 = vadd.f32 %v2835_v36, %v11782_v15  ;;  %v3625_v26 = vpop.f32.mrf.mxu0  ;;  %v8454_v15 = vld [vmem:[%s10771_s5 + $0x1e0] sm:$0xff]  ;;  %v8311_v50 = vld [vmem:[%s10771_s5 + $0x1ca] sm:$0xff] }
 0x1e3   : > { %v9910_v43 = vpop.f32.mrf.mxu1  ;;  %10177 = vmatmul.mubr.msk.f32.gmra.mxu1 %vm352_vm0, %v8308_v58 }
 0x1e4   : > { %v12289_v34 = vadd.f32 %v3625_v26, %v3154_v49  ;;  %v3157_v54 = vadd.f32 %v9910_v43, %v11790_v6  ;;  %v10026_v33 = vpop.f32.mrf.mxu0  ;;  %10293 = vmatmul.mubr.msk.f32.gmra.mxu0 %vm352_vm0, %v8452_v40  ;;  %10179 = vmatprep.mubr.msk.f32.mxu1 %vm352_vm0, %v8309_v51  ;;  %v8455_v6 = vld [vmem:[%s10771_s5 + $0x1e8] sm:$0xff] }
 0x1e5   : > { %v2845_v23 = vpop.f32.mrf.mxu1  ;;  %10295 = vmatprep.mubr.msk.f32.mxu0 %vm352_vm0, %v8453_v56  ;;  %v8312_v56 = vld [vmem:[%s10771_s5 + $0x1d2] sm:$0xff] }
 0x1e6   : > { %v12298_v36 = vadd.f32 %v10026_v33, %v3157_v54  ;;  %v3156_v58 = vadd.f32 %v2845_v23, %v11796_v53  ;;  %v3635_v49 = vpop.f32.mrf.mxu0  ;;  %v8456_v53 = vld [vmem:[%s10771_s5 + $0x1f0] sm:$0xff]  ;;  %v8313_v33 = vld [vmem:[%s10771_s5 + $0x1e2] sm:$0xff] }
 0x1e7   : > { %v9913_v26 = vpop.f32.mrf.mxu1  ;;  %10180 = vmatmul.mubr.msk.f32.gmra.mxu1 %vm352_vm0, %v8310_v8 }
 0x1e8   : > { %v12303_v40 = vadd.f32 %v3635_v49, %v3156_v58  ;;  %v3159_v51 = vadd.f32 %v9913_v26, %v11804_v12  ;;  %v10029_v43 = vpop.f32.mrf.mxu0  ;;  %10296 = vmatmul.mubr.msk.f32.gmra.mxu0 %vm352_vm0, %v8454_v15  ;;  %10182 = vmatprep.mubr.msk.f32.mxu1 %vm352_vm0, %v8311_v50  ;;  %v8457_v12 = vld [vmem:[%s10771_s5 + $0x200] sm:$0xff] }
 0x1e9   : > { %v2855_v54 = vpop.f32.mrf.mxu1  ;;  %10298 = vmatprep.mubr.msk.f32.mxu0 %vm352_vm0, %v8455_v6  ;;  %v8314_v6 = vld [vmem:[%s10771_s5 + $0x1ea] sm:$0xff] }
 0x1ea   : > { %v12312_v23 = vadd.f32 %v10029_v43, %v3159_v51  ;;  %v3158_v8 = vadd.f32 %v2855_v54, %v11810_v30  ;;  %v3645_v58 = vpop.f32.mrf.mxu0  ;;  %v8458_v30 = vld [vmem:[%s10771_s5 + $0x208] sm:$0xff]  ;;  %v8315_v43 = vld [vmem:[%s10771_s5 + $0x1f2] sm:$0xff] }
 0x1eb   : > { %v9916_v49 = vpop.f32.mrf.mxu1  ;;  %10183 = vmatmul.mubr.msk.f32.gmra.mxu1 %vm352_vm0, %v8312_v56 }
 0x1ec   : > { %v12317_v15 = vadd.f32 %v3645_v58, %v3158_v8  ;;  %v3161_v50 = vadd.f32 %v9916_v49, %v11818_v38  ;;  %v10032_v26 = vpop.f32.mrf.mxu0  ;;  %10299 = vmatmul.mubr.msk.f32.gmra.mxu0 %vm352_vm0, %v8456_v53  ;;  %10185 = vmatprep.mubr.msk.f32.mxu1 %vm352_vm0, %v8313_v33  ;;  %v8459_v38 = vld [vmem:[%s10771_s5 + $0x210] sm:$0xff] }
 0x1ed   : > { %v2865_v51 = vpop.f32.mrf.mxu1  ;;  %10301 = vmatprep.mubr.msk.f32.mxu0 %vm352_vm0, %v8457_v12  ;;  %v8316_v12 = vld [vmem:[%s10771_s5 + $0x202] sm:$0xff] }
 0x1ee   : > { %v12326_v54 = vadd.f32 %v10032_v26, %v3161_v50  ;;  %v3160_v56 = vadd.f32 %v2865_v51, %v11824_v14  ;;  %v3655_v8 = vpop.f32.mrf.mxu0  ;;  %v8460_v14 = vld [vmem:[%s10771_s5 + $0x220] sm:$0xff]  ;;  %v8317_v26 = vld [vmem:[%s10771_s5 + $0x20a] sm:$0xff] }
 0x1ef   : > { %v9919_v58 = vpop.f32.mrf.mxu1  ;;  %10186 = vmatmul.mubr.msk.f32.gmra.mxu1 %vm352_vm0, %v8314_v6 }
 0x1f0   : > { %v12331_v53 = vadd.f32 %v3655_v8, %v3160_v56  ;;  %v3163_v33 = vadd.f32 %v9919_v58, %v11832_v63  ;;  %v10035_v49 = vpop.f32.mrf.mxu0  ;;  %10302 = vmatmul.mubr.msk.f32.gmra.mxu0 %vm352_vm0, %v8458_v30  ;;  %10188 = vmatprep.mubr.msk.f32.mxu1 %vm352_vm0, %v8315_v43  ;;  %v8461_v63 = vld [vmem:[%s10771_s5 + $0x228] sm:$0xff] }
 0x1f1   : > { %v2875_v50 = vpop.f32.mrf.mxu1  ;;  %10304 = vmatprep.mubr.msk.f32.mxu0 %vm352_vm0, %v8459_v38  ;;  %v8318_v38 = vld [vmem:[%s10771_s5 + $0x212] sm:$0xff] }
 0x1f2   : > { %v12340_v51 = vadd.f32 %v10035_v49, %v3163_v33  ;;  %v3162_v6 = vadd.f32 %v2875_v50, %v11838_v20  ;;  %v3665_v56 = vpop.f32.mrf.mxu0  ;;  %v8462_v20 = vld [vmem:[%s10771_s5 + $0x230] sm:$0xff]  ;;  %v8319_v49 = vld [vmem:[%s10771_s5 + $0x222] sm:$0xff] }
 0x1f3   : > { %v9922_v8 = vpop.f32.mrf.mxu1  ;;  %10189 = vmatmul.mubr.msk.f32.gmra.mxu1 %vm352_vm0, %v8316_v12 }
 0x1f4   : > { %v12345_v30 = vadd.f32 %v3665_v56, %v3162_v6  ;;  %v3165_v43 = vadd.f32 %v9922_v8, %v11846_v46  ;;  %v10038_v58 = vpop.f32.mrf.mxu0  ;;  %10305 = vmatmul.mubr.msk.f32.gmra.mxu0 %vm352_vm0, %v8460_v14  ;;  %10191 = vmatprep.mubr.msk.f32.mxu1 %vm352_vm0, %v8317_v26  ;;  %v8463_v46 = vld [vmem:[%s10771_s5 + $0x240] sm:$0xff] }
 0x1f5   : > { %v2885_v33 = vpop.f32.mrf.mxu1  ;;  %10307 = vmatprep.mubr.msk.f32.mxu0 %vm352_vm0, %v8461_v63  ;;  %v8320_v63 = vld [vmem:[%s10771_s5 + $0x22a] sm:$0xff] }
 0x1f6   : > { %v12354_v50 = vadd.f32 %v10038_v58, %v3165_v43  ;;  %v3164_v12 = vadd.f32 %v2885_v33, %v11852_v28  ;;  %v3675_v6 = vpop.f32.mrf.mxu0  ;;  %v8464_v28 = vld [vmem:[%s10771_s5 + $0x248] sm:$0xff]  ;;  %v8321_v58 = vld [vmem:[%s10771_s5 + $0x232] sm:$0xff] }
 0x1f7   : > { %v9925_v56 = vpop.f32.mrf.mxu1  ;;  %10192 = vmatmul.mubr.msk.f32.gmra.mxu1 %vm352_vm0, %v8318_v38 }
 0x1f8   : > { %v12359_v14 = vadd.f32 %v3675_v6, %v3164_v12  ;;  %v3167_v26 = vadd.f32 %v9925_v56, %v11860_v27  ;;  %v10041_v8 = vpop.f32.mrf.mxu0  ;;  %10308 = vmatmul.mubr.msk.f32.gmra.mxu0 %vm352_vm0, %v8462_v20  ;;  %10194 = vmatprep.mubr.msk.f32.mxu1 %vm352_vm0, %v8319_v49  ;;  %v8465_v27 = vld [vmem:[%s10771_s5 + $0x250] sm:$0xff] }
 0x1f9   : > { %v2895_v43 = vpop.f32.mrf.mxu1  ;;  %10310 = vmatprep.mubr.msk.f32.mxu0 %vm352_vm0, %v8463_v46  ;;  %v8322_v46 = vld [vmem:[%s10771_s5 + $0x242] sm:$0xff] }
 0x1fa   : > { %v12368_v33 = vadd.f32 %v10041_v8, %v3167_v26  ;;  %v3166_v38 = vadd.f32 %v2895_v43, %v11866_v59  ;;  %v3685_v12 = vpop.f32.mrf.mxu0  ;;  %v8466_v59 = vld [vmem:[%s10771_s5 + $0x260] sm:$0xff]  ;;  %v8323_v8 = vld [vmem:[%s10771_s5 + $0x24a] sm:$0xff] }
 0x1fb   : > { %v9928_v6 = vpop.f32.mrf.mxu1  ;;  %10195 = vmatmul.mubr.msk.f32.gmra.mxu1 %vm352_vm0, %v8320_v63 }
 0x1fc   : > { %v12373_v20 = vadd.f32 %v3685_v12, %v3166_v38  ;;  %v3169_v49 = vadd.f32 %v9928_v6, %v11874_v42  ;;  %v10044_v56 = vpop.f32.mrf.mxu0  ;;  %10311 = vmatmul.mubr.msk.f32.gmra.mxu0 %vm352_vm0, %v8464_v28  ;;  %10197 = vmatprep.mubr.msk.f32.mxu1 %vm352_vm0, %v8321_v58  ;;  %v8467_v42 = vld [vmem:[%s10771_s5 + $0x268] sm:$0xff] }
 0x1fd   : > { %v2905_v26 = vpop.f32.mrf.mxu1  ;;  %10313 = vmatprep.mubr.msk.f32.mxu0 %vm352_vm0, %v8465_v27  ;;  %v8324_v27 = vld [vmem:[%s10771_s5 + $0x252] sm:$0xff] }
 0x1fe   : > { %v12382_v43 = vadd.f32 %v10044_v56, %v3169_v49  ;;  %v3168_v63 = vadd.f32 %v2905_v26, %v11880_v0  ;;  %v3695_v38 = vpop.f32.mrf.mxu0  ;;  %v8468_v0 = vld [vmem:[%s10771_s5 + $0x270] sm:$0xff]  ;;  %v8325_v56 = vld [vmem:[%s10771_s5 + $0x262] sm:$0xff] }
 0x1ff   : > { %v9931_v12 = vpop.f32.mrf.mxu1  ;;  %10198 = vmatmul.mubr.msk.f32.gmra.mxu1 %vm352_vm0, %v8322_v46 }
 0x200   : > { %v12387_v28 = vadd.f32 %v3695_v38, %v3168_v63  ;;  %v3171_v58 = vadd.f32 %v9931_v12, %v11888_v37  ;;  %v10047_v6 = vpop.f32.mrf.mxu0  ;;  %10314 = vmatmul.mubr.msk.f32.gmra.mxu0 %vm352_vm0, %v8466_v59  ;;  %10200 = vmatprep.mubr.msk.f32.mxu1 %vm352_vm0, %v8323_v8  ;;  %v8469_v37 = vld [vmem:[%s10771_s5 + $0x280] sm:$0xff] }
 0x201   : > { %v2915_v49 = vpop.f32.mrf.mxu1  ;;  %10316 = vmatprep.mubr.msk.f32.mxu0 %vm352_vm0, %v8467_v42  ;;  %v8326_v42 = vld [vmem:[%s10771_s5 + $0x26a] sm:$0xff] }
 0x202   : > { %v12396_v26 = vadd.f32 %v10047_v6, %v3171_v58  ;;  %v3170_v46 = vadd.f32 %v2915_v49, %v11894_v5  ;;  %v3705_v63 = vpop.f32.mrf.mxu0  ;;  %v8470_v5 = vld [vmem:[%s10771_s5 + $0x288] sm:$0xff]  ;;  %v8327_v6 = vld [vmem:[%s10771_s5 + $0x272] sm:$0xff] }
 0x203   : > { %v9934_v38 = vpop.f32.mrf.mxu1  ;;  %10201 = vmatmul.mubr.msk.f32.gmra.mxu1 %vm352_vm0, %v8324_v27 }
 0x204   : > { %v12401_v59 = vadd.f32 %v3705_v63, %v3170_v46  ;;  %v3173_v8 = vadd.f32 %v9934_v38, %v11902_v25  ;;  %v10050_v12 = vpop.f32.mrf.mxu0  ;;  %10317 = vmatmul.mubr.msk.f32.gmra.mxu0 %vm352_vm0, %v8468_v0  ;;  %10203 = vmatprep.mubr.msk.f32.mxu1 %vm352_vm0, %v8325_v56  ;;  %v8471_v25 = vld [vmem:[%s10771_s5 + $0x290] sm:$0xff] }
 0x205   : > { %v2925_v58 = vpop.f32.mrf.mxu1  ;;  %10319 = vmatprep.mubr.msk.f32.mxu0 %vm352_vm0, %v8469_v37  ;;  %v8328_v37 = vld [vmem:[%s10771_s5 + $0x282] sm:$0xff] }
 0x206   : > { %v12410_v49 = vadd.f32 %v10050_v12, %v3173_v8  ;;  %v3172_v27 = vadd.f32 %v2925_v58, %v11908_v2  ;;  %v3715_v46 = vpop.f32.mrf.mxu0  ;;  %v8472_v2 = vld [vmem:[%s10771_s5 + $0x2a0] sm:$0xff]  ;;  %v8329_v12 = vld [vmem:[%s10771_s5 + $0x28a] sm:$0xff] }
 0x207   : > { %v9937_v63 = vpop.f32.mrf.mxu1  ;;  %10204 = vmatmul.mubr.msk.f32.gmra.mxu1 %vm352_vm0, %v8326_v42 }
 0x208   : > { %v12415_v0 = vadd.f32 %v3715_v46, %v3172_v27  ;;  %v3175_v56 = vadd.f32 %v9937_v63, %v11916_v11  ;;  %v10053_v38 = vpop.f32.mrf.mxu0  ;;  %10320 = vmatmul.mubr.msk.f32.gmra.mxu0 %vm352_vm0, %v8470_v5  ;;  %10206 = vmatprep.mubr.msk.f32.mxu1 %vm352_vm0, %v8327_v6  ;;  %v8473_v11 = vld [vmem:[%s10771_s5 + $0x2a8] sm:$0xff] }
 0x209   : > { %v2935_v8 = vpop.f32.mrf.mxu1  ;;  %10322 = vmatprep.mubr.msk.f32.mxu0 %vm352_vm0, %v8471_v25  ;;  %v8330_v25 = vld [vmem:[%s10771_s5 + $0x292] sm:$0xff] }
 0x20a   : > { %v12424_v58 = vadd.f32 %v10053_v38, %v3175_v56  ;;  %v3174_v42 = vadd.f32 %v2935_v8, %v11922_v22  ;;  %v3725_v27 = vpop.f32.mrf.mxu0  ;;  %v8474_v22 = vld [vmem:[%s10771_s5 + $0x2b0] sm:$0xff]  ;;  %v8331_v38 = vld [vmem:[%s10771_s5 + $0x2a2] sm:$0xff] }
 0x20b   : > { %v9940_v46 = vpop.f32.mrf.mxu1  ;;  %10207 = vmatmul.mubr.msk.f32.gmra.mxu1 %vm352_vm0, %v8328_v37 }
 0x20c   : > { %v12429_v5 = vadd.f32 %v3725_v27, %v3174_v42  ;;  %v3177_v6 = vadd.f32 %v9940_v46, %v11931_v39  ;;  %v10056_v63 = vpop.f32.mrf.mxu0  ;;  %10323 = vmatmul.mubr.msk.f32.gmra.mxu0 %vm352_vm0, %v8472_v2  ;;  %10209 = vmatprep.mubr.msk.f32.mxu1 %vm352_vm0, %v8329_v12  ;;  %v8475_v39 = vld [vmem:[%s10771_s5 + $0x2c0] sm:$0xff] }
 0x20d   : > { %v2945_v56 = vpop.f32.mrf.mxu1  ;;  %10325 = vmatprep.mubr.msk.f32.mxu0 %vm352_vm0, %v8473_v11  ;;  %v8332_v11 = vld [vmem:[%s10771_s5 + $0x2aa] sm:$0xff] }
 0x20e   : > { %v12438_v8 = vadd.f32 %v10056_v63, %v3177_v6  ;;  %v3176_v37 = vadd.f32 %v2945_v56, %v11937_v9  ;;  %v3735_v42 = vpop.f32.mrf.mxu0  ;;  %v8476_v9 = vld [vmem:[%s10771_s5 + $0x2c8] sm:$0xff]  ;;  %v8333_v63 = vld [vmem:[%s10771_s5 + $0x2b2] sm:$0xff] }
 0x20f   : > { %v9943_v27 = vpop.f32.mrf.mxu1  ;;  %10210 = vmatmul.mubr.msk.f32.gmra.mxu1 %vm352_vm0, %v8330_v25  ;;  %v13567_v25 = vld [vmem:[#allocation9_spill] sm:$0xff] }
 0x210   : > { %13564 = vst [vmem:[#allocation30_spill] sm:$0xff] %v12438_v8  ;;  %v12443_v2 = vadd.f32 %v3735_v42, %v3176_v37  ;;  %v3179_v12 = vadd.f32 %v9943_v27, %v11945_v19  ;;  %v10059_v46 = vpop.f32.mrf.mxu0  ;;  %10326 = vmatmul.mubr.msk.f32.gmra.mxu0 %vm352_vm0, %v8474_v22  ;;  %10212 = vmatprep.mubr.msk.f32.mxu1 %vm352_vm0, %v8331_v38  ;;  %v8477_v19 = vld [vmem:[%s10771_s5 + $0x2d0] sm:$0xff] }
 0x211   : > { %v2955_v6 = vpop.f32.mrf.mxu1  ;;  %10328 = vmatprep.mubr.msk.f32.mxu0 %vm352_vm0, %v8475_v39  ;;  %v13569_v38 = vld [vmem:[#allocation10_spill] sm:$0xff]  ;;  %v8334_v39 = vld [vmem:[%s10771_s5 + $0x2c2] sm:$0xff] }
 0x212   : > { %13565 = vst [vmem:[#allocation31_spill] sm:$0xff] %v12443_v2  ;;  %v12452_v56 = vadd.f32 %v10059_v46, %v3179_v12  ;;  %v3178_v37 = vadd.f32 %v2955_v6, %v13567_v25  ;;  %v3745_v42 = vpop.f32.mrf.mxu0  ;;  %v8478_v46 = vld [vmem:[%s10771_s5 + $0x2e0] sm:$0xff]  ;;  %v8335_v6 = vld [vmem:[%s10771_s5 + $0x2ca] sm:$0xff] }
 0x213   : > { %v9946_v27 = vpop.f32.mrf.mxu1  ;;  %10213 = vmatmul.mubr.msk.f32.gmra.mxu1 %vm352_vm0, %v8332_v11  ;;  %v13571_v11 = vld [vmem:[#allocation48_spill] sm:$0xff] }
 0x214   : > { %13566 = vst [vmem:[#allocation32_spill] sm:$0xff] %v12452_v56  ;;  %v12457_v22 = vadd.f32 %v3745_v42, %v3178_v37  ;;  %v3181_v2 = vadd.f32 %v9946_v27, %v13569_v38  ;;  %v10062_v8 = vpop.f32.mrf.mxu0  ;;  %10329 = vmatmul.mubr.msk.f32.gmra.mxu0 %vm352_vm0, %v8476_v9  ;;  %10215 = vmatprep.mubr.msk.f32.mxu1 %vm352_vm0, %v8333_v63  ;;  %v8479_v27 = vld [vmem:[%s10771_s5 + $0x2e8] sm:$0xff]  ;;  %v13573_v63 = vld [vmem:[#allocation11_spill] sm:$0xff] }
 0x215   : > { %v2965_v12 = vpop.f32.mrf.mxu1  ;;  %10331 = vmatprep.mubr.msk.f32.mxu0 %vm352_vm0, %v8477_v19  ;;  %v8336_v19 = vld [vmem:[%s10771_s5 + $0x2d2] sm:$0xff] }
 0x216   : > { %13568 = vst [vmem:[#allocation33_spill] sm:$0xff] %v12457_v22  ;;  %v12466_v25 = vadd.f32 %v10062_v8, %v3181_v2  ;;  %v3180_v37 = vadd.f32 %v2965_v12, %v13571_v11  ;;  %v3755_v42 = vpop.f32.mrf.mxu0  ;;  %v8480_v2 = vld [vmem:[%s10771_s5 + $0x2f0] sm:$0xff]  ;;  %v8337_v12 = vld [vmem:[%s10771_s5 + $0x2e2] sm:$0xff] }
 0x217   : > { %v9949_v38 = vpop.f32.mrf.mxu1  ;;  %10216 = vmatmul.mubr.msk.f32.gmra.mxu1 %vm352_vm0, %v8334_v39  ;;  %v13574_v39 = vld [vmem:[#allocation12_spill] sm:$0xff] }
 0x218   : > { %13570 = vst [vmem:[#allocation34_spill] sm:$0xff] %v12466_v25  ;;  %v12471_v9 = vadd.f32 %v3755_v42, %v3180_v37  ;;  %v3183_v22 = vadd.f32 %v9949_v38, %v13573_v63  ;;  %v10065_v56 = vpop.f32.mrf.mxu0  ;;  %10332 = vmatmul.mubr.msk.f32.gmra.mxu0 %vm352_vm0, %v8478_v46  ;;  %10218 = vmatprep.mubr.msk.f32.mxu1 %vm352_vm0, %v8335_v6  ;;  %v8481_v38 = vld [vmem:[%s10771_s5 + $0x300] sm:$0xff] }
 0x219   : > { %v2975_v8 = vpop.f32.mrf.mxu1  ;;  %10334 = vmatprep.mubr.msk.f32.mxu0 %vm352_vm0, %v8479_v27  ;;  %v13576_v6 = vld [vmem:[#allocation13_spill] sm:$0xff]  ;;  %v8338_v27 = vld [vmem:[%s10771_s5 + $0x2ea] sm:$0xff] }
 0x21a   : > { %13572 = vst [vmem:[#allocation35_spill] sm:$0xff] %v12471_v9  ;;  %v12480_v11 = vadd.f32 %v10065_v56, %v3183_v22  ;;  %v3182_v37 = vadd.f32 %v2975_v8, %v13574_v39  ;;  %v3765_v42 = vpop.f32.mrf.mxu0  ;;  %v8482_v22 = vld [vmem:[%s10771_s5 + $0x308] sm:$0xff]  ;;  %v8339_v8 = vld [vmem:[%s10771_s5 + $0x2f2] sm:$0xff] }
 0x21b   : > { %v9952_v63 = vpop.f32.mrf.mxu1  ;;  %10219 = vmatmul.mubr.msk.f32.gmra.mxu1 %vm352_vm0, %v8336_v19  ;;  %v13577_v19 = vld [vmem:[#allocation14_spill] sm:$0xff] }
 0x21c   : > { %v12485_v46 = vadd.f32 %v3765_v42, %v3182_v37  ;;  %v3185_v9 = vadd.f32 %v9952_v63, %v13576_v6  ;;  %v10068_v25 = vpop.f32.mrf.mxu0  ;;  %10335 = vmatmul.mubr.msk.f32.gmra.mxu0 %vm352_vm0, %v8480_v2  ;;  %10221 = vmatprep.mubr.msk.f32.mxu1 %vm352_vm0, %v8337_v12  ;;  %v8483_v63 = vld [vmem:[%s10771_s5 + $0x310] sm:$0xff] }
 0x21d   : > { %v2985_v56 = vpop.f32.mrf.mxu1  ;;  %10337 = vmatprep.mubr.msk.f32.mxu0 %vm352_vm0, %v8481_v38  ;;  %v8340_v38 = vld [vmem:[%s10771_s5 + $0x302] sm:$0xff] }
 0x21e   : > { %13575 = vst [vmem:[#allocation36_spill] sm:$0xff] %v12485_v46  ;;  %v12494_v39 = vadd.f32 %v10068_v25, %v3185_v9  ;;  %v3184_v37 = vadd.f32 %v2985_v56, %v13577_v19  ;;  %v3775_v42 = vpop.f32.mrf.mxu0  ;;  %v8484_v9 = vld [vmem:[%s10771_s5 + $0x320] sm:$0xff]  ;;  %v8341_v56 = vld [vmem:[%s10771_s5 + $0x30a] sm:$0xff] }
 0x21f   : > { %v9955_v6 = vpop.f32.mrf.mxu1  ;;  %10222 = vmatmul.mubr.msk.f32.gmra.mxu1 %vm352_vm0, %v8338_v27 }
 0x220   : > { %v12499_v2 = vadd.f32 %v3775_v42, %v3184_v37  ;;  %v3187_v12 = vadd.f32 %v9955_v6, %v12002_v47  ;;  %v10071_v46 = vpop.f32.mrf.mxu0  ;;  %10338 = vmatmul.mubr.msk.f32.gmra.mxu0 %vm352_vm0, %v8482_v22  ;;  %10224 = vmatprep.mubr.msk.f32.mxu1 %vm352_vm0, %v8339_v8  ;;  %v8485_v47 = vld [vmem:[%s10771_s5 + $0x328] sm:$0xff] }
 0x221   : > { %v2995_v25 = vpop.f32.mrf.mxu1  ;;  %10340 = vmatprep.mubr.msk.f32.mxu0 %vm352_vm0, %v8483_v63  ;;  %v8342_v63 = vld [vmem:[%s10771_s5 + $0x312] sm:$0xff] }
 0x222   : > { %v12508_v19 = vadd.f32 %v10071_v46, %v3187_v12  ;;  %v3186_v27 = vadd.f32 %v2995_v25, %v12007_v55  ;;  %v3785_v37 = vpop.f32.mrf.mxu0  ;;  %v8486_v55 = vld [vmem:[%s10771_s5 + $0x330] sm:$0xff]  ;;  %v8559_v12 = vld [vmem:[%s10771_s5 + $0x41] sm:$0xff] }
 0x223   : > { %v9958_v42 = vpop.f32.mrf.mxu1  ;;  %10225 = vmatmul.mubr.msk.f32.gmra.mxu1 %vm352_vm0, %v8340_v38 }
 0x224   : > { %v12513_v22 = vadd.f32 %v3785_v37, %v3186_v27  ;;  %v3189_v8 = vadd.f32 %v9958_v42, %v12016_v52  ;;  %v10074_v6 = vpop.f32.mrf.mxu0  ;;  %10341 = vmatmul.mubr.msk.f32.gmra.mxu0 %vm352_vm0, %v8484_v9  ;;  %10227 = vmatprep.mubr.msk.f32.mxu1 %vm352_vm0, %v8341_v56  ;;  %v8703_v52 = vld [vmem:[%s10771_s5 + $0x42] sm:$0xff] }
 0x225   : > { %v3005_v46 = vpop.f32.mrf.mxu1  ;;  %10343 = vmatprep.mubr.msk.f32.mxu0 %vm352_vm0, %v8485_v47  ;;  %v8560_v47 = vld [vmem:[%s10771_s5 + $0x49] sm:$0xff] }
 0x226   : > { %v12522_v25 = vadd.f32 %v10074_v6, %v3189_v8  ;;  %v3188_v38 = vadd.f32 %v3005_v46, %v12021_v7  ;;  %v3795_v27 = vpop.f32.mrf.mxu0  ;;  %v8704_v7 = vld [vmem:[%s10771_s5 + $0x4a] sm:$0xff] }
 0x227   : > { %v9961_v37 = vpop.f32.mrf.mxu1  ;;  %10228 = vmatmul.mubr.msk.f32.gmra.mxu1 %vm352_vm0, %v8342_v63  ;;  %v8561_v6 = vld [vmem:[%s10771_s5 + $0x51] sm:$0xff] }
 0x228   : > { %13578 = vst [vmem:[#allocation37_spill] sm:$0xff] %v12522_v25  ;;  %v12527_v9 = vadd.f32 %v3795_v27, %v3188_v38  ;;  %v3191_v56 = vadd.f32 %v9961_v37, %v12029_v44  ;;  %v10077_v42 = vpop.f32.mrf.mxu0  ;;  %10344 = vmatmul.mubr.msk.f32.gmra.mxu0 %vm352_vm0, %v8486_v55  ;;  %10354 = vmatprep.mubr.msk.f32.mxu1 %vm352_vm0, %v8559_v12  ;;  %v13580_v63 = vld [vmem:[#allocation15_spill] sm:$0xff]  ;;  %v13581_v12 = vld [vmem:[#allocation16_spill] sm:$0xff] }
 0x229   : > { %v3015_v8 = vpop.f32.mrf.mxu1  ;;  %10470 = vmatprep.mubr.msk.f32.mxu0 %vm352_vm0, %v8703_v52  ;;  %v8705_v44 = vld [vmem:[%s10771_s5 + $0x52] sm:$0xff]  ;;  %v8562_v52 = vld [vmem:[%s10771_s5 + $0x61] sm:$0xff] }
 0x22a   : > { %13579 = vst [vmem:[#allocation40_spill] sm:$0xff] %v12527_v9  ;;  %v12536_v46 = vadd.f32 %v10077_v42, %v3191_v56  ;;  %v3190_v38 = vadd.f32 %v3015_v8, %v13580_v63  ;;  %v3805_v27 = vpop.f32.mrf.mxu0  ;;  %v8706_v42 = vld [vmem:[%s10771_s5 + $0x62] sm:$0xff] }
 0x22b   : > { %v9964_v37 = vpop.f32.mrf.mxu1  ;;  %10355 = vmatmul.mubr.msk.f32.vlgmr.msra.gmra.mxu1 %vm352_vm0, %v8560_v47  ;;  %v8563_v8 = vld [vmem:[%s10771_s5 + $0x69] sm:$0xff] }
 0x22c   : > { %v12541_v55 = vadd.f32 %v3805_v27, %v3190_v38  ;;  %v3193_v9 = vadd.f32 %v9964_v37, %v13581_v12  ;;  %v10080_v25 = vpop.f32.mrf.mxu0  ;;  %10471 = vmatmul.mubr.msk.f32.vlgmr.msra.gmra.mxu0 %vm352_vm0, %v8704_v7  ;;  %10357 = vmatprep.mubr.msk.f32.mxu1 %vm352_vm0, %v8561_v6  ;;  %v8707_v27 = vld [vmem:[%s10771_s5 + $0x6a] sm:$0xff] }
 0x22d   : > { %v3025_v56 = vpop.f32.mrf.mxu1  ;;  %10473 = vmatprep.mubr.msk.f32.mxu0 %vm352_vm0, %v8705_v44  ;;  %v8564_v44 = vld [vmem:[%s10771_s5 + $0x71] sm:$0xff] }
 0x22e   : > { %v12550_v63 = vadd.f32 %v10080_v25, %v3193_v9  ;;  %v3192_v47 = vadd.f32 %v3025_v56, %v12051_v16  ;;  %v3815_v38 = vpop.f32.mrf.mxu0  ;;  %v8708_v16 = vld [vmem:[%s10771_s5 + $0x72] sm:$0xff]  ;;  %v8565_v9 = vld [vmem:[%s10771_s5 + $0x81] sm:$0xff] }
 0x22f   : > { %v9967_v37 = vpop.f32.mrf.mxu1  ;;  %10358 = vmatmul.mubr.msk.f32.gmra.mxu1 %vm352_vm0, %v8562_v52 }
 0x230   : > { %v12555_v7 = vadd.f32 %v3815_v38, %v3192_v47  ;;  %v3195_v6 = vadd.f32 %v9967_v37, %v12060_v24  ;;  %v10083_v12 = vpop.f32.mrf.mxu0  ;;  %10474 = vmatmul.mubr.msk.f32.gmra.mxu0 %vm352_vm0, %v8706_v42  ;;  %10360 = vmatprep.mubr.msk.f32.mxu1 %vm352_vm0, %v8563_v8  ;;  %v8709_v24 = vld [vmem:[%s10771_s5 + $0x82] sm:$0xff] }
 0x231   : > { %v3035_v25 = vpop.f32.mrf.mxu1  ;;  %10476 = vmatprep.mubr.msk.f32.mxu0 %vm352_vm0, %v8707_v27  ;;  %v8566_v27 = vld [vmem:[%s10771_s5 + $0x89] sm:$0xff] }
 0x232   : > { %v12564_v56 = vadd.f32 %v10083_v12, %v3195_v6  ;;  %v3194_v52 = vadd.f32 %v3035_v25, %v12065_v10  ;;  %v3825_v47 = vpop.f32.mrf.mxu0  ;;  %v8710_v10 = vld [vmem:[%s10771_s5 + $0x8a] sm:$0xff] }
 0x233   : > { %v9970_v38 = vpop.f32.mrf.mxu1  ;;  %10361 = vmatmul.mubr.msk.f32.gmra.mxu1 %vm352_vm0, %v8564_v44  ;;  %v8567_v12 = vld [vmem:[%s10771_s5 + $0x91] sm:$0xff] }
 0x234   : > { %v12569_v42 = vadd.f32 %v3825_v47, %v3194_v52  ;;  %v3197_v8 = vadd.f32 %v9970_v38, %v12074_v45  ;;  %v10086_v37 = vpop.f32.mrf.mxu0  ;;  %10477 = vmatmul.mubr.msk.f32.gmra.mxu0 %vm352_vm0, %v8708_v16  ;;  %10363 = vmatprep.mubr.msk.f32.mxu1 %vm352_vm0, %v8565_v9  ;;  %v8711_v45 = vld [vmem:[%s10771_s5 + $0x92] sm:$0xff] }
 0x235   : > { %v3045_v6 = vpop.f32.mrf.mxu1  ;;  %10479 = vmatprep.mubr.msk.f32.mxu0 %vm352_vm0, %v8709_v24  ;;  %v8568_v24 = vld [vmem:[%s10771_s5 + $0xa1] sm:$0xff] }
 0x236   : > { %v12578_v25 = vadd.f32 %v10086_v37, %v3197_v8  ;;  %v3196_v44 = vadd.f32 %v3045_v6, %v12079_v48  ;;  %v3835_v52 = vpop.f32.mrf.mxu0  ;;  %v8712_v48 = vld [vmem:[%s10771_s5 + $0xa2] sm:$0xff] }
 0x237   : > { %v9973_v47 = vpop.f32.mrf.mxu1  ;;  %10364 = vmatmul.mubr.msk.f32.gmra.mxu1 %vm352_vm0, %v8566_v27  ;;  %v8569_v37 = vld [vmem:[%s10771_s5 + $0xa9] sm:$0xff] }
 0x238   : > { %v12583_v16 = vadd.f32 %v3835_v52, %v3196_v44  ;;  %v3199_v9 = vadd.f32 %v9973_v47, %v12088_v18  ;;  %v10089_v38 = vpop.f32.mrf.mxu0  ;;  %10480 = vmatmul.mubr.msk.f32.gmra.mxu0 %vm352_vm0, %v8710_v10  ;;  %10366 = vmatprep.mubr.msk.f32.mxu1 %vm352_vm0, %v8567_v12  ;;  %v8713_v18 = vld [vmem:[%s10771_s5 + $0xaa] sm:$0xff]  ;;  %v13585_v12 = vld [vmem:[#allocation17_spill] sm:$0xff] }
 0x239   : > { %v3055_v8 = vpop.f32.mrf.mxu1  ;;  %10482 = vmatprep.mubr.msk.f32.mxu0 %vm352_vm0, %v8711_v45  ;;  %v8570_v45 = vld [vmem:[%s10771_s5 + $0xb1] sm:$0xff] }
 0x23a   : > { %13582 = vst [vmem:[#allocation38_spill] sm:$0xff] %v12583_v16  ;;  %v12592_v6 = vadd.f32 %v10089_v38, %v3199_v9  ;;  %v3198_v27 = vadd.f32 %v3055_v8, %v12093_v29  ;;  %v3845_v44 = vpop.f32.mrf.mxu0  ;;  %v8714_v29 = vld [vmem:[%s10771_s5 + $0xb2] sm:$0xff]  ;;  %v8571_v38 = vld [vmem:[%s10771_s5 + $0xc1] sm:$0xff] }
 0x23b   : > { %v9976_v52 = vpop.f32.mrf.mxu1  ;;  %10367 = vmatmul.mubr.msk.f32.gmra.mxu1 %vm352_vm0, %v8568_v24  ;;  %v13587_v24 = vld [vmem:[#allocation18_spill] sm:$0xff] }
 0x23c   : > { %13583 = vst [vmem:[#allocation39_spill] sm:$0xff] %v12592_v6  ;;  %v12597_v10 = vadd.f32 %v3845_v44, %v3198_v27  ;;  %v3201_v47 = vadd.f32 %v9976_v52, %v13585_v12  ;;  %v10092_v16 = vpop.f32.mrf.mxu0  ;;  %10483 = vmatmul.mubr.msk.f32.gmra.mxu0 %vm352_vm0, %v8712_v48  ;;  %10369 = vmatprep.mubr.msk.f32.mxu1 %vm352_vm0, %v8569_v37  ;;  %v8715_v52 = vld [vmem:[%s10771_s5 + $0xc2] sm:$0xff]  ;;  %v13589_v37 = vld [vmem:[#allocation19_spill] sm:$0xff] }
 0x23d   : > { %v3065_v9 = vpop.f32.mrf.mxu1  ;;  %10485 = vmatprep.mubr.msk.f32.mxu0 %vm352_vm0, %v8713_v18  ;;  %v8572_v18 = vld [vmem:[%s10771_s5 + $0xc9] sm:$0xff] }
 0x23e   : > { %13584 = vst [vmem:[#allocation43_spill] sm:$0xff] %v12597_v10  ;;  %v12606_v8 = vadd.f32 %v10092_v16, %v3201_v47  ;;  %v3200_v27 = vadd.f32 %v3065_v9, %v13587_v24  ;;  %v3855_v44 = vpop.f32.mrf.mxu0  ;;  %v8716_v47 = vld [vmem:[%s10771_s5 + $0xca] sm:$0xff] }
 0x23f   : > { %v9979_v12 = vpop.f32.mrf.mxu1  ;;  %10370 = vmatmul.mubr.msk.f32.gmra.mxu1 %vm352_vm0, %v8570_v45  ;;  %v8573_v9 = vld [vmem:[%s10771_s5 + $0xd1] sm:$0xff]  ;;  %v13591_v45 = vld [vmem:[#allocation20_spill] sm:$0xff] }
 0x240   : > { %13586 = vst [vmem:[#allocation41_spill] sm:$0xff] %v12606_v8  ;;  %v12611_v48 = vadd.f32 %v3855_v44, %v3200_v27  ;;  %v3203_v10 = vadd.f32 %v9979_v12, %v13589_v37  ;;  %v10095_v6 = vpop.f32.mrf.mxu0  ;;  %10486 = vmatmul.mubr.msk.f32.gmra.mxu0 %vm352_vm0, %v8714_v29  ;;  %10372 = vmatprep.mubr.msk.f32.mxu1 %vm352_vm0, %v8571_v38  ;;  %v8717_v12 = vld [vmem:[%s10771_s5 + $0xd2] sm:$0xff]  ;;  %v13593_v38 = vld [vmem:[#allocation21_spill] sm:$0xff] }
 0x241   : > { %v3075_v16 = vpop.f32.mrf.mxu1  ;;  %10488 = vmatprep.mubr.msk.f32.mxu0 %vm352_vm0, %v8715_v52  ;;  %v8574_v52 = vld [vmem:[%s10771_s5 + $0xe1] sm:$0xff] }
 0x242   : > { %13588 = vst [vmem:[#allocation42_spill] sm:$0xff] %v12611_v48  ;;  %v12620_v24 = vadd.f32 %v10095_v6, %v3203_v10  ;;  %v3202_v27 = vadd.f32 %v3075_v16, %v13591_v45  ;;  %v3865_v44 = vpop.f32.mrf.mxu0  ;;  %v8718_v10 = vld [vmem:[%s10771_s5 + $0xe2] sm:$0xff] }
 0x243   : > { %v9982_v37 = vpop.f32.mrf.mxu1  ;;  %10373 = vmatmul.mubr.msk.f32.gmra.mxu1 %vm352_vm0, %v8572_v18  ;;  %v8575_v16 = vld [vmem:[%s10771_s5 + $0xe9] sm:$0xff] }
 0x244   : > { %13590 = vst [vmem:[#allocation44_spill] sm:$0xff] %v12620_v24  ;;  %v12625_v29 = vadd.f32 %v3865_v44, %v3202_v27  ;;  %v3205_v48 = vadd.f32 %v9982_v37, %v13593_v38  ;;  %v10098_v8 = vpop.f32.mrf.mxu0  ;;  %10489 = vmatmul.mubr.msk.f32.gmra.mxu0 %vm352_vm0, %v8716_v47  ;;  %10375 = vmatprep.mubr.msk.f32.mxu1 %vm352_vm0, %v8573_v9  ;;  %v13595_v18 = vld [vmem:[#allocation22_spill] sm:$0xff]  ;;  %v13597_v9 = vld [vmem:[#allocation23_spill] sm:$0xff] }
 0x245   : > { %v3085_v6 = vpop.f32.mrf.mxu1  ;;  %10491 = vmatprep.mubr.msk.f32.mxu0 %vm352_vm0, %v8717_v12  ;;  %v8719_v37 = vld [vmem:[%s10771_s5 + $0xea] sm:$0xff] }
 0x246   : > { %13592 = vst [vmem:[#allocation45_spill] sm:$0xff] %v12625_v29  ;;  %v12634_v45 = vadd.f32 %v10098_v8, %v3205_v48  ;;  %v3204_v27 = vadd.f32 %v3085_v6, %v13595_v18  ;;  %v3875_v44 = vpop.f32.mrf.mxu0  ;;  %v8576_v12 = vld [vmem:[%s10771_s5 + $0xf1] sm:$0xff]  ;;  %v8577_v6 = vld [vmem:[%s10771_s5 + $0x101] sm:$0xff] }
 0x247   : > { %v9985_v38 = vpop.f32.mrf.mxu1  ;;  %10376 = vmatmul.mubr.msk.f32.gmra.mxu1 %vm352_vm0, %v8574_v52  ;;  %v8720_v48 = vld [vmem:[%s10771_s5 + $0xf2] sm:$0xff]  ;;  %v13599_v52 = vld [vmem:[#allocation24_spill] sm:$0xff] }
 0x248   : > { %13594 = vst [vmem:[#allocation46_spill] sm:$0xff] %v12634_v45  ;;  %v12639_v47 = vadd.f32 %v3875_v44, %v3204_v27  ;;  %v3207_v29 = vadd.f32 %v9985_v38, %v13597_v9  ;;  %v10101_v24 = vpop.f32.mrf.mxu0  ;;  %10492 = vmatmul.mubr.msk.f32.gmra.mxu0 %vm352_vm0, %v8718_v10  ;;  %10378 = vmatprep.mubr.msk.f32.mxu1 %vm352_vm0, %v8575_v16  ;;  %v8721_v38 = vld [vmem:[%s10771_s5 + $0x102] sm:$0xff] }
 0x249   : > { %v3095_v8 = vpop.f32.mrf.mxu1  ;;  %10494 = vmatprep.mubr.msk.f32.mxu0 %vm352_vm0, %v8719_v37  ;;  %v13601_v16 = vld [vmem:[#allocation25_spill] sm:$0xff] }
 0x24a   : > { %13596 = vst [vmem:[#allocation47_spill] sm:$0xff] %v12639_v47  ;;  %v12648_v18 = vadd.f32 %v10101_v24, %v3207_v29  ;;  %v3206_v27 = vadd.f32 %v3095_v8, %v13599_v52  ;;  %v3885_v44 = vpop.f32.mrf.mxu0  ;;  %v8578_v37 = vld [vmem:[%s10771_s5 + $0x109] sm:$0xff]  ;;  %v8579_v8 = vld [vmem:[%s10771_s5 + $0x111] sm:$0xff] }
 0x24b   : > { %v9988_v9 = vpop.f32.mrf.mxu1  ;;  %10379 = vmatmul.mubr.msk.f32.gmra.mxu1 %vm352_vm0, %v8576_v12  ;;  %v8722_v29 = vld [vmem:[%s10771_s5 + $0x10a] sm:$0xff] }
 0x24c   : > { %13598 = vst [vmem:[#allocation49_spill] sm:$0xff] %v12648_v18  ;;  %v12653_v10 = vadd.f32 %v3885_v44, %v3206_v27  ;;  %v3209_v47 = vadd.f32 %v9988_v9, %v13601_v16  ;;  %v10104_v45 = vpop.f32.mrf.mxu0  ;;  %10495 = vmatmul.mubr.msk.f32.gmra.mxu0 %vm352_vm0, %v8720_v48  ;;  %10381 = vmatprep.mubr.msk.f32.mxu1 %vm352_vm0, %v8577_v6  ;;  %v13602_v12 = vld [vmem:[#allocation26_spill] sm:$0xff]  ;;  %v8723_v9 = vld [vmem:[%s10771_s5 + $0x112] sm:$0xff] }
 0x24d   : > { %v3105_v24 = vpop.f32.mrf.mxu1  ;;  %10497 = vmatprep.mubr.msk.f32.mxu0 %vm352_vm0, %v8721_v38  ;;  %v13604_v6 = vld [vmem:[#allocation27_spill] sm:$0xff]  ;;  %v8580_v38 = vld [vmem:[%s10771_s5 + $0x121] sm:$0xff] }
 0x24e   : > { %13600 = vst [vmem:[#allocation50_spill] sm:$0xff] %v12653_v10  ;;  %v12662_v52 = vadd.f32 %v10104_v45, %v3209_v47  ;;  %v3208_v27 = vadd.f32 %v3105_v24, %v13602_v12  ;;  %v3895_v44 = vpop.f32.mrf.mxu0  ;;  %v8724_v47 = vld [vmem:[%s10771_s5 + $0x122] sm:$0xff] }
 0x24f   : > { %v9991_v16 = vpop.f32.mrf.mxu1  ;;  %10382 = vmatmul.mubr.msk.f32.gmra.mxu1 %vm352_vm0, %v8578_v37  ;;  %v8581_v24 = vld [vmem:[%s10771_s5 + $0x129] sm:$0xff]  ;;  %v13605_v37 = vld [vmem:[#allocation28_spill] sm:$0xff] }
 0x250   : > { %v12667_v48 = vadd.f32 %v3895_v44, %v3208_v27  ;;  %v3211_v10 = vadd.f32 %v9991_v16, %v13604_v6  ;;  %v10107_v18 = vpop.f32.mrf.mxu0  ;;  %10498 = vmatmul.mubr.msk.f32.gmra.mxu0 %vm352_vm0, %v8722_v29  ;;  %10384 = vmatprep.mubr.msk.f32.mxu1 %vm352_vm0, %v8579_v8  ;;  %v8725_v16 = vld [vmem:[%s10771_s5 + $0x12a] sm:$0xff] }
 0x251   : > { %v3115_v45 = vpop.f32.mrf.mxu1  ;;  %10500 = vmatprep.mubr.msk.f32.mxu0 %vm352_vm0, %v8723_v9  ;;  %v8582_v9 = vld [vmem:[%s10771_s5 + $0x131] sm:$0xff] }
 0x252   : > { %13603 = vst [vmem:[#allocation51_spill] sm:$0xff] %v12667_v48  ;;  %v12676_v12 = vadd.f32 %v10107_v18, %v3211_v10  ;;  %v3210_v27 = vadd.f32 %v3115_v45, %v13605_v37  ;;  %v3905_v44 = vpop.f32.mrf.mxu0  ;;  %v8726_v10 = vld [vmem:[%s10771_s5 + $0x132] sm:$0xff]  ;;  %v8583_v45 = vld [vmem:[%s10771_s5 + $0x141] sm:$0xff] }
 0x253   : > { %v9994_v6 = vpop.f32.mrf.mxu1  ;;  %10385 = vmatmul.mubr.msk.f32.gmra.mxu1 %vm352_vm0, %v8580_v38  ;;  %v13607_v38 = vld [vmem:[#allocation29_spill] sm:$0xff] }
 0x254   : > { %v12681_v29 = vadd.f32 %v3905_v44, %v3210_v27  ;;  %v3213_v8 = vadd.f32 %v9994_v6, %v12186_v4  ;;  %v10110_v48 = vpop.f32.mrf.mxu0  ;;  %10501 = vmatmul.mubr.msk.f32.gmra.mxu0 %vm352_vm0, %v8724_v47  ;;  %10387 = vmatprep.mubr.msk.f32.mxu1 %vm352_vm0, %v8581_v24  ;;  %v8727_v4 = vld [vmem:[%s10771_s5 + $0x142] sm:$0xff] }
 0x255   : > { %v3125_v18 = vpop.f32.mrf.mxu1  ;;  %10503 = vmatprep.mubr.msk.f32.mxu0 %vm352_vm0, %v8725_v16  ;;  %v8584_v16 = vld [vmem:[%s10771_s5 + $0x149] sm:$0xff] }
 0x256   : > { %13606 = vst [vmem:[#allocation52_spill] sm:$0xff] %v12681_v29  ;;  %v12690_v37 = vadd.f32 %v10110_v48, %v3213_v8  ;;  %v3212_v27 = vadd.f32 %v3125_v18, %v13607_v38  ;;  %v3915_v44 = vpop.f32.mrf.mxu0  ;;  %v8728_v8 = vld [vmem:[%s10771_s5 + $0x14a] sm:$0xff] }
 0x257   : > { %v9997_v6 = vpop.f32.mrf.mxu1  ;;  %10388 = vmatmul.mubr.msk.f32.gmra.mxu1 %vm352_vm0, %v8582_v9  ;;  %v8585_v18 = vld [vmem:[%s10771_s5 + $0x151] sm:$0xff] }
 0x258   : > { %v12695_v47 = vadd.f32 %v3915_v44, %v3212_v27  ;;  %v3215_v24 = vadd.f32 %v9997_v6, %v12200_v61  ;;  %v10113_v29 = vpop.f32.mrf.mxu0  ;;  %10504 = vmatmul.mubr.msk.f32.gmra.mxu0 %vm352_vm0, %v8726_v10  ;;  %10390 = vmatprep.mubr.msk.f32.mxu1 %vm352_vm0, %v8583_v45  ;;  %v8729_v61 = vld [vmem:[%s10771_s5 + $0x152] sm:$0xff] }
 0x259   : > { %v3135_v48 = vpop.f32.mrf.mxu1  ;;  %10506 = vmatprep.mubr.msk.f32.mxu0 %vm352_vm0, %v8727_v4  ;;  %v8586_v4 = vld [vmem:[%s10771_s5 + $0x161] sm:$0xff] }
 0x25a   : > { %v12704_v38 = vadd.f32 %v10113_v29, %v3215_v24  ;;  %v3214_v9 = vadd.f32 %v3135_v48, %v12205_v62  ;;  %v3925_v27 = vpop.f32.mrf.mxu0  ;;  %v8730_v62 = vld [vmem:[%s10771_s5 + $0x162] sm:$0xff] }
 0x25b   : > { %v10124_v44 = vpop.f32.mrf.mxu1  ;;  %10391 = vmatmul.mubr.msk.f32.gmra.mxu1 %vm352_vm0, %v8584_v16  ;;  %v8587_v24 = vld [vmem:[%s10771_s5 + $0x169] sm:$0xff] }
 0x25c   : > { %v12709_v10 = vadd.f32 %v3925_v27, %v3214_v9  ;;  %v4725_v45 = vadd.f32 %v10124_v44, %v12214_v13  ;;  %v10240_v6 = vpop.f32.mrf.mxu0  ;;  %10507 = vmatmul.mubr.msk.f32.gmra.mxu0 %vm352_vm0, %v8728_v8  ;;  %10393 = vmatprep.mubr.msk.f32.mxu1 %vm352_vm0, %v8585_v18  ;;  %v8731_v13 = vld [vmem:[%s10771_s5 + $0x16a] sm:$0xff] }
 0x25d   : > { %v4365_v29 = vpop.f32.mrf.mxu1  ;;  %10509 = vmatprep.mubr.msk.f32.mxu0 %vm352_vm0, %v8729_v61  ;;  %v8588_v61 = vld [vmem:[%s10771_s5 + $0x171] sm:$0xff] }
 0x25e   : > { %v12718_v48 = vadd.f32 %v10240_v6, %v4725_v45  ;;  %v4724_v16 = vadd.f32 %v4365_v29, %v12219_v41  ;;  %v5156_v9 = vpop.f32.mrf.mxu0  ;;  %v8732_v41 = vld [vmem:[%s10771_s5 + $0x172] sm:$0xff]  ;;  %v8589_v6 = vld [vmem:[%s10771_s5 + $0x181] sm:$0xff] }
 0x25f   : > { %v10127_v27 = vpop.f32.mrf.mxu1  ;;  %10394 = vmatmul.mubr.msk.f32.gmra.mxu1 %vm352_vm0, %v8586_v4 }
 0x260   : > { %v12723_v8 = vadd.f32 %v5156_v9, %v4724_v16  ;;  %v4727_v18 = vadd.f32 %v10127_v27, %v12228_v57  ;;  %v10243_v44 = vpop.f32.mrf.mxu0  ;;  %10510 = vmatmul.mubr.msk.f32.gmra.mxu0 %vm352_vm0, %v8730_v62  ;;  %10396 = vmatprep.mubr.msk.f32.mxu1 %vm352_vm0, %v8587_v24  ;;  %v8733_v57 = vld [vmem:[%s10771_s5 + $0x182] sm:$0xff] }
 0x261   : > { %v4375_v45 = vpop.f32.mrf.mxu1  ;;  %10512 = vmatprep.mubr.msk.f32.mxu0 %vm352_vm0, %v8731_v13  ;;  %v8590_v13 = vld [vmem:[%s10771_s5 + $0x189] sm:$0xff] }
 0x262   : > { %v12732_v29 = vadd.f32 %v10243_v44, %v4727_v18  ;;  %v4726_v4 = vadd.f32 %v4375_v45, %v12233_v31  ;;  %v5166_v16 = vpop.f32.mrf.mxu0  ;;  %v8734_v31 = vld [vmem:[%s10771_s5 + $0x18a] sm:$0xff] }
 0x263   : > { %v10130_v9 = vpop.f32.mrf.mxu1  ;;  %10397 = vmatmul.mubr.msk.f32.gmra.mxu1 %vm352_vm0, %v8588_v61  ;;  %v8591_v44 = vld [vmem:[%s10771_s5 + $0x191] sm:$0xff] }
 0x264   : > { %v12737_v62 = vadd.f32 %v5166_v16, %v4726_v4  ;;  %v4729_v24 = vadd.f32 %v10130_v9, %v12242_v60  ;;  %v10246_v27 = vpop.f32.mrf.mxu0  ;;  %10513 = vmatmul.mubr.msk.f32.gmra.mxu0 %vm352_vm0, %v8732_v41  ;;  %10399 = vmatprep.mubr.msk.f32.mxu1 %vm352_vm0, %v8589_v6  ;;  %v8735_v60 = vld [vmem:[%s10771_s5 + $0x192] sm:$0xff] }
 0x265   : > { %v4385_v18 = vpop.f32.mrf.mxu1  ;;  %10515 = vmatprep.mubr.msk.f32.mxu0 %vm352_vm0, %v8733_v57  ;;  %v8592_v57 = vld [vmem:[%s10771_s5 + $0x1a1] sm:$0xff] }
 0x266   : > { %v12746_v45 = vadd.f32 %v10246_v27, %v4729_v24  ;;  %v4728_v61 = vadd.f32 %v4385_v18, %v12247_v21  ;;  %v5176_v4 = vpop.f32.mrf.mxu0  ;;  %v8736_v21 = vld [vmem:[%s10771_s5 + $0x1a2] sm:$0xff] }
 0x267   : > { %v10133_v16 = vpop.f32.mrf.mxu1  ;;  %10400 = vmatmul.mubr.msk.f32.gmra.mxu1 %vm352_vm0, %v8590_v13  ;;  %v8593_v27 = vld [vmem:[%s10771_s5 + $0x1a9] sm:$0xff] }
 0x268   : > { %v12751_v41 = vadd.f32 %v5176_v4, %v4728_v61  ;;  %v4731_v6 = vadd.f32 %v10133_v16, %v12256_v17  ;;  %v10249_v9 = vpop.f32.mrf.mxu0  ;;  %10516 = vmatmul.mubr.msk.f32.gmra.mxu0 %vm352_vm0, %v8734_v31  ;;  %10402 = vmatprep.mubr.msk.f32.mxu1 %vm352_vm0, %v8591_v44  ;;  %v8737_v17 = vld [vmem:[%s10771_s5 + $0x1aa] sm:$0xff] }
 0x269   : > { %v4395_v24 = vpop.f32.mrf.mxu1  ;;  %10518 = vmatprep.mubr.msk.f32.mxu0 %vm352_vm0, %v8735_v60  ;;  %v8594_v60 = vld [vmem:[%s10771_s5 + $0x1b1] sm:$0xff] }
 0x26a   : > { %v12760_v18 = vadd.f32 %v10249_v9, %v4731_v6  ;;  %v4730_v13 = vadd.f32 %v4395_v24, %v12261_v1  ;;  %v5186_v61 = vpop.f32.mrf.mxu0  ;;  %v8738_v1 = vld [vmem:[%s10771_s5 + $0x1b2] sm:$0xff]  ;;  %v8595_v9 = vld [vmem:[%s10771_s5 + $0x1c1] sm:$0xff] }
 0x26b   : > { %v10136_v4 = vpop.f32.mrf.mxu1  ;;  %10403 = vmatmul.mubr.msk.f32.gmra.mxu1 %vm352_vm0, %v8592_v57 }
 0x26c   : > { %v12765_v31 = vadd.f32 %v5186_v61, %v4730_v13  ;;  %v4733_v44 = vadd.f32 %v10136_v4, %v12270_v3  ;;  %v10252_v16 = vpop.f32.mrf.mxu0  ;;  %10519 = vmatmul.mubr.msk.f32.gmra.mxu0 %vm352_vm0, %v8736_v21  ;;  %10405 = vmatprep.mubr.msk.f32.mxu1 %vm352_vm0, %v8593_v27  ;;  %v8739_v3 = vld [vmem:[%s10771_s5 + $0x1c2] sm:$0xff] }
 0x26d   : > { %v4405_v6 = vpop.f32.mrf.mxu1  ;;  %10521 = vmatprep.mubr.msk.f32.mxu0 %vm352_vm0, %v8737_v17  ;;  %v8596_v17 = vld [vmem:[%s10771_s5 + $0x1c9] sm:$0xff] }
 0x26e   : > { %v12774_v24 = vadd.f32 %v10252_v16, %v4733_v44  ;;  %v4732_v57 = vadd.f32 %v4405_v6, %v12275_v32  ;;  %v5196_v13 = vpop.f32.mrf.mxu0  ;;  %v8740_v32 = vld [vmem:[%s10771_s5 + $0x1ca] sm:$0xff] }
 0x26f   : > { %v10139_v61 = vpop.f32.mrf.mxu1  ;;  %10406 = vmatmul.mubr.msk.f32.gmra.mxu1 %vm352_vm0, %v8594_v60  ;;  %v8597_v16 = vld [vmem:[%s10771_s5 + $0x1d1] sm:$0xff] }
 0x270   : > { %v12779_v21 = vadd.f32 %v5196_v13, %v4732_v57  ;;  %v4735_v27 = vadd.f32 %v10139_v61, %v12284_v35  ;;  %v10255_v4 = vpop.f32.mrf.mxu0  ;;  %10522 = vmatmul.mubr.msk.f32.gmra.mxu0 %vm352_vm0, %v8738_v1  ;;  %10408 = vmatprep.mubr.msk.f32.mxu1 %vm352_vm0, %v8595_v9  ;;  %v8741_v35 = vld [vmem:[%s10771_s5 + $0x1d2] sm:$0xff] }
 0x271   : > { %v4415_v44 = vpop.f32.mrf.mxu1  ;;  %10524 = vmatprep.mubr.msk.f32.mxu0 %vm352_vm0, %v8739_v3  ;;  %v8598_v3 = vld [vmem:[%s10771_s5 + $0x1e1] sm:$0xff] }
 0x272   : > { %v12788_v6 = vadd.f32 %v10255_v4, %v4735_v27  ;;  %v4734_v60 = vadd.f32 %v4415_v44, %v12289_v34  ;;  %v5206_v57 = vpop.f32.mrf.mxu0  ;;  %v8742_v34 = vld [vmem:[%s10771_s5 + $0x1e2] sm:$0xff] }
 0x273   : > { %v10142_v13 = vpop.f32.mrf.mxu1  ;;  %10409 = vmatmul.mubr.msk.f32.gmra.mxu1 %vm352_vm0, %v8596_v17  ;;  %v8599_v4 = vld [vmem:[%s10771_s5 + $0x1e9] sm:$0xff] }
 0x274   : > { %v12793_v1 = vadd.f32 %v5206_v57, %v4734_v60  ;;  %v4737_v9 = vadd.f32 %v10142_v13, %v12298_v36  ;;  %v10258_v61 = vpop.f32.mrf.mxu0  ;;  %10525 = vmatmul.mubr.msk.f32.gmra.mxu0 %vm352_vm0, %v8740_v32  ;;  %10411 = vmatprep.mubr.msk.f32.mxu1 %vm352_vm0, %v8597_v16  ;;  %v8743_v36 = vld [vmem:[%s10771_s5 + $0x1ea] sm:$0xff] }
 0x275   : > { %v4425_v27 = vpop.f32.mrf.mxu1  ;;  %10527 = vmatprep.mubr.msk.f32.mxu0 %vm352_vm0, %v8741_v35  ;;  %v8600_v35 = vld [vmem:[%s10771_s5 + $0x1f1] sm:$0xff] }
 0x276   : > { %v12802_v44 = vadd.f32 %v10258_v61, %v4737_v9  ;;  %v4736_v17 = vadd.f32 %v4425_v27, %v12303_v40  ;;  %v5216_v60 = vpop.f32.mrf.mxu0  ;;  %v8744_v40 = vld [vmem:[%s10771_s5 + $0x1f2] sm:$0xff]  ;;  %v8601_v61 = vld [vmem:[%s10771_s5 + $0x201] sm:$0xff] }
 0x277   : > { %v10145_v57 = vpop.f32.mrf.mxu1  ;;  %10412 = vmatmul.mubr.msk.f32.gmra.mxu1 %vm352_vm0, %v8598_v3 }
 0x278   : > { %v12807_v32 = vadd.f32 %v5216_v60, %v4736_v17  ;;  %v4739_v16 = vadd.f32 %v10145_v57, %v12312_v23  ;;  %v10261_v13 = vpop.f32.mrf.mxu0  ;;  %10528 = vmatmul.mubr.msk.f32.gmra.mxu0 %vm352_vm0, %v8742_v34  ;;  %10414 = vmatprep.mubr.msk.f32.mxu1 %vm352_vm0, %v8599_v4  ;;  %v8745_v23 = vld [vmem:[%s10771_s5 + $0x202] sm:$0xff] }
 0x279   : > { %v4435_v9 = vpop.f32.mrf.mxu1  ;;  %10530 = vmatprep.mubr.msk.f32.mxu0 %vm352_vm0, %v8743_v36  ;;  %v8602_v36 = vld [vmem:[%s10771_s5 + $0x209] sm:$0xff] }
 0x27a   : > { %v12816_v27 = vadd.f32 %v10261_v13, %v4739_v16  ;;  %v4738_v3 = vadd.f32 %v4435_v9, %v12317_v15  ;;  %v5226_v17 = vpop.f32.mrf.mxu0  ;;  %v8746_v15 = vld [vmem:[%s10771_s5 + $0x20a] sm:$0xff] }
 0x27b   : > { %v10148_v60 = vpop.f32.mrf.mxu1  ;;  %10415 = vmatmul.mubr.msk.f32.gmra.mxu1 %vm352_vm0, %v8600_v35  ;;  %v8603_v13 = vld [vmem:[%s10771_s5 + $0x211] sm:$0xff] }
 0x27c   : > { %v12821_v34 = vadd.f32 %v5226_v17, %v4738_v3  ;;  %v4741_v4 = vadd.f32 %v10148_v60, %v12326_v54  ;;  %v10264_v57 = vpop.f32.mrf.mxu0  ;;  %10531 = vmatmul.mubr.msk.f32.gmra.mxu0 %vm352_vm0, %v8744_v40  ;;  %10417 = vmatprep.mubr.msk.f32.mxu1 %vm352_vm0, %v8601_v61  ;;  %v8747_v54 = vld [vmem:[%s10771_s5 + $0x212] sm:$0xff] }
 0x27d   : > { %v4445_v16 = vpop.f32.mrf.mxu1  ;;  %10533 = vmatprep.mubr.msk.f32.mxu0 %vm352_vm0, %v8745_v23  ;;  %v8604_v23 = vld [vmem:[%s10771_s5 + $0x221] sm:$0xff] }
 0x27e   : > { %v12830_v9 = vadd.f32 %v10264_v57, %v4741_v4  ;;  %v4740_v35 = vadd.f32 %v4445_v16, %v12331_v53  ;;  %v5236_v3 = vpop.f32.mrf.mxu0  ;;  %v8748_v53 = vld [vmem:[%s10771_s5 + $0x222] sm:$0xff] }
 0x27f   : > { %v10151_v17 = vpop.f32.mrf.mxu1  ;;  %10418 = vmatmul.mubr.msk.f32.gmra.mxu1 %vm352_vm0, %v8602_v36  ;;  %v8605_v57 = vld [vmem:[%s10771_s5 + $0x229] sm:$0xff] }
 0x280   : > { %v12835_v40 = vadd.f32 %v5236_v3, %v4740_v35  ;;  %v4743_v61 = vadd.f32 %v10151_v17, %v12340_v51  ;;  %v10267_v60 = vpop.f32.mrf.mxu0  ;;  %10534 = vmatmul.mubr.msk.f32.gmra.mxu0 %vm352_vm0, %v8746_v15  ;;  %10420 = vmatprep.mubr.msk.f32.mxu1 %vm352_vm0, %v8603_v13  ;;  %v8749_v51 = vld [vmem:[%s10771_s5 + $0x22a] sm:$0xff] }
 0x281   : > { %v4455_v4 = vpop.f32.mrf.mxu1  ;;  %10536 = vmatprep.mubr.msk.f32.mxu0 %vm352_vm0, %v8747_v54  ;;  %v8606_v54 = vld [vmem:[%s10771_s5 + $0x231] sm:$0xff] }
 0x282   : > { %v12844_v16 = vadd.f32 %v10267_v60, %v4743_v61  ;;  %v4742_v36 = vadd.f32 %v4455_v4, %v12345_v30  ;;  %v5246_v35 = vpop.f32.mrf.mxu0  ;;  %v8750_v30 = vld [vmem:[%s10771_s5 + $0x232] sm:$0xff]  ;;  %v8607_v60 = vld [vmem:[%s10771_s5 + $0x241] sm:$0xff] }
 0x283   : > { %v10154_v3 = vpop.f32.mrf.mxu1  ;;  %10421 = vmatmul.mubr.msk.f32.gmra.mxu1 %vm352_vm0, %v8604_v23 }
 0x284   : > { %v12849_v15 = vadd.f32 %v5246_v35, %v4742_v36  ;;  %v4745_v13 = vadd.f32 %v10154_v3, %v12354_v50  ;;  %v10270_v17 = vpop.f32.mrf.mxu0  ;;  %10537 = vmatmul.mubr.msk.f32.gmra.mxu0 %vm352_vm0, %v8748_v53  ;;  %10423 = vmatprep.mubr.msk.f32.mxu1 %vm352_vm0, %v8605_v57  ;;  %v8751_v50 = vld [vmem:[%s10771_s5 + $0x242] sm:$0xff] }
 0x285   : > { %v4465_v61 = vpop.f32.mrf.mxu1  ;;  %10539 = vmatprep.mubr.msk.f32.mxu0 %vm352_vm0, %v8749_v51  ;;  %v8608_v51 = vld [vmem:[%s10771_s5 + $0x249] sm:$0xff] }
 0x286   : > { %v12858_v4 = vadd.f32 %v10270_v17, %v4745_v13  ;;  %v4744_v23 = vadd.f32 %v4465_v61, %v12359_v14  ;;  %v5256_v36 = vpop.f32.mrf.mxu0  ;;  %v8752_v14 = vld [vmem:[%s10771_s5 + $0x24a] sm:$0xff] }
 0x287   : > { %v10157_v35 = vpop.f32.mrf.mxu1  ;;  %10424 = vmatmul.mubr.msk.f32.gmra.mxu1 %vm352_vm0, %v8606_v54  ;;  %v8609_v17 = vld [vmem:[%s10771_s5 + $0x251] sm:$0xff] }
 0x288   : > { %v12863_v53 = vadd.f32 %v5256_v36, %v4744_v23  ;;  %v4747_v57 = vadd.f32 %v10157_v35, %v12368_v33  ;;  %v10273_v3 = vpop.f32.mrf.mxu0  ;;  %10540 = vmatmul.mubr.msk.f32.gmra.mxu0 %vm352_vm0, %v8750_v30  ;;  %10426 = vmatprep.mubr.msk.f32.mxu1 %vm352_vm0, %v8607_v60  ;;  %v8753_v33 = vld [vmem:[%s10771_s5 + $0x252] sm:$0xff] }
 0x289   : > { %v4475_v13 = vpop.f32.mrf.mxu1  ;;  %10542 = vmatprep.mubr.msk.f32.mxu0 %vm352_vm0, %v8751_v50  ;;  %v8610_v50 = vld [vmem:[%s10771_s5 + $0x261] sm:$0xff] }
 0x28a   : > { %v12872_v61 = vadd.f32 %v10273_v3, %v4747_v57  ;;  %v4746_v54 = vadd.f32 %v4475_v13, %v12373_v20  ;;  %v5266_v23 = vpop.f32.mrf.mxu0  ;;  %v8754_v20 = vld [vmem:[%s10771_s5 + $0x262] sm:$0xff] }
 0x28b   : > { %v10160_v36 = vpop.f32.mrf.mxu1  ;;  %10427 = vmatmul.mubr.msk.f32.gmra.mxu1 %vm352_vm0, %v8608_v51  ;;  %v8611_v3 = vld [vmem:[%s10771_s5 + $0x269] sm:$0xff] }
 0x28c   : > { %v12877_v30 = vadd.f32 %v5266_v23, %v4746_v54  ;;  %v4749_v60 = vadd.f32 %v10160_v36, %v12382_v43  ;;  %v10276_v35 = vpop.f32.mrf.mxu0  ;;  %10543 = vmatmul.mubr.msk.f32.gmra.mxu0 %vm352_vm0, %v8752_v14  ;;  %10429 = vmatprep.mubr.msk.f32.mxu1 %vm352_vm0, %v8609_v17  ;;  %v8755_v43 = vld [vmem:[%s10771_s5 + $0x26a] sm:$0xff] }
 0x28d   : > { %v4485_v57 = vpop.f32.mrf.mxu1  ;;  %10545 = vmatprep.mubr.msk.f32.mxu0 %vm352_vm0, %v8753_v33  ;;  %v8612_v33 = vld [vmem:[%s10771_s5 + $0x271] sm:$0xff] }
 0x28e   : > { %v12886_v13 = vadd.f32 %v10276_v35, %v4749_v60  ;;  %v4748_v51 = vadd.f32 %v4485_v57, %v12387_v28  ;;  %v5276_v54 = vpop.f32.mrf.mxu0  ;;  %v8756_v28 = vld [vmem:[%s10771_s5 + $0x272] sm:$0xff]  ;;  %v8613_v35 = vld [vmem:[%s10771_s5 + $0x281] sm:$0xff] }
 0x28f   : > { %v10163_v23 = vpop.f32.mrf.mxu1  ;;  %10430 = vmatmul.mubr.msk.f32.gmra.mxu1 %vm352_vm0, %v8610_v50 }
 0x290   : > { %v12891_v14 = vadd.f32 %v5276_v54, %v4748_v51  ;;  %v4751_v17 = vadd.f32 %v10163_v23, %v12396_v26  ;;  %v10279_v36 = vpop.f32.mrf.mxu0  ;;  %10546 = vmatmul.mubr.msk.f32.gmra.mxu0 %vm352_vm0, %v8754_v20  ;;  %10432 = vmatprep.mubr.msk.f32.mxu1 %vm352_vm0, %v8611_v3  ;;  %v8757_v26 = vld [vmem:[%s10771_s5 + $0x282] sm:$0xff] }
 0x291   : > { %v4495_v60 = vpop.f32.mrf.mxu1  ;;  %10548 = vmatprep.mubr.msk.f32.mxu0 %vm352_vm0, %v8755_v43  ;;  %v8614_v43 = vld [vmem:[%s10771_s5 + $0x289] sm:$0xff] }
 0x292   : > { %v12900_v57 = vadd.f32 %v10279_v36, %v4751_v17  ;;  %v4750_v50 = vadd.f32 %v4495_v60, %v12401_v59  ;;  %v5286_v51 = vpop.f32.mrf.mxu0  ;;  %v8758_v59 = vld [vmem:[%s10771_s5 + $0x28a] sm:$0xff] }
 0x293   : > { %v10166_v54 = vpop.f32.mrf.mxu1  ;;  %10433 = vmatmul.mubr.msk.f32.gmra.mxu1 %vm352_vm0, %v8612_v33  ;;  %v8615_v36 = vld [vmem:[%s10771_s5 + $0x291] sm:$0xff] }
 0x294   : > { %v12905_v20 = vadd.f32 %v5286_v51, %v4750_v50  ;;  %v4753_v3 = vadd.f32 %v10166_v54, %v12410_v49  ;;  %v10282_v23 = vpop.f32.mrf.mxu0  ;;  %10549 = vmatmul.mubr.msk.f32.gmra.mxu0 %vm352_vm0, %v8756_v28  ;;  %10435 = vmatprep.mubr.msk.f32.mxu1 %vm352_vm0, %v8613_v35  ;;  %v8759_v49 = vld [vmem:[%s10771_s5 + $0x292] sm:$0xff] }
 0x295   : > { %v4505_v17 = vpop.f32.mrf.mxu1  ;;  %10551 = vmatprep.mubr.msk.f32.mxu0 %vm352_vm0, %v8757_v26  ;;  %v8616_v26 = vld [vmem:[%s10771_s5 + $0x2a1] sm:$0xff] }
 0x296   : > { %v12914_v60 = vadd.f32 %v10282_v23, %v4753_v3  ;;  %v4752_v33 = vadd.f32 %v4505_v17, %v12415_v0  ;;  %v5296_v50 = vpop.f32.mrf.mxu0  ;;  %v8760_v0 = vld [vmem:[%s10771_s5 + $0x2a2] sm:$0xff] }
 0x297   : > { %v10169_v51 = vpop.f32.mrf.mxu1  ;;  %10436 = vmatmul.mubr.msk.f32.gmra.mxu1 %vm352_vm0, %v8614_v43  ;;  %v8617_v23 = vld [vmem:[%s10771_s5 + $0x2a9] sm:$0xff] }
 0x298   : > { %v12919_v28 = vadd.f32 %v5296_v50, %v4752_v33  ;;  %v4755_v35 = vadd.f32 %v10169_v51, %v12424_v58  ;;  %v10285_v54 = vpop.f32.mrf.mxu0  ;;  %10552 = vmatmul.mubr.msk.f32.gmra.mxu0 %vm352_vm0, %v8758_v59  ;;  %10438 = vmatprep.mubr.msk.f32.mxu1 %vm352_vm0, %v8615_v36  ;;  %v8761_v58 = vld [vmem:[%s10771_s5 + $0x2aa] sm:$0xff] }
 0x299   : > { %v4515_v3 = vpop.f32.mrf.mxu1  ;;  %10554 = vmatprep.mubr.msk.f32.mxu0 %vm352_vm0, %v8759_v49  ;;  %v13611_v36 = vld [vmem:[#allocation30_spill] sm:$0xff] }
 0x29a   : > { %13608 = vst [vmem:[#allocation53_spill] sm:$0xff] %v12919_v28  ;;  %v12928_v17 = vadd.f32 %v10285_v54, %v4755_v35  ;;  %v4754_v43 = vadd.f32 %v4515_v3, %v12429_v5  ;;  %v5306_v33 = vpop.f32.mrf.mxu0  ;;  %v8618_v49 = vld [vmem:[%s10771_s5 + $0x2b1] sm:$0xff]  ;;  %v8619_v54 = vld [vmem:[%s10771_s5 + $0x2c1] sm:$0xff] }
 0x29b   : > { %v10172_v50 = vpop.f32.mrf.mxu1  ;;  %10439 = vmatmul.mubr.msk.f32.gmra.mxu1 %vm352_vm0, %v8616_v26  ;;  %v8762_v5 = vld [vmem:[%s10771_s5 + $0x2b2] sm:$0xff] }
 0x29c   : > { %13609 = vst [vmem:[#allocation54_spill] sm:$0xff] %v12928_v17  ;;  %v12933_v59 = vadd.f32 %v5306_v33, %v4754_v43  ;;  %v4757_v51 = vadd.f32 %v10172_v50, %v13611_v36  ;;  %v10288_v28 = vpop.f32.mrf.mxu0  ;;  %10555 = vmatmul.mubr.msk.f32.gmra.mxu0 %vm352_vm0, %v8760_v0  ;;  %10441 = vmatprep.mubr.msk.f32.mxu1 %vm352_vm0, %v8617_v23  ;;  %v13613_v26 = vld [vmem:[#allocation31_spill] sm:$0xff]  ;;  %v8763_v50 = vld [vmem:[%s10771_s5 + $0x2c2] sm:$0xff]  ;;  %v13615_v23 = vld [vmem:[#allocation32_spill] sm:$0xff] }
 0x29d   : > { %v4525_v35 = vpop.f32.mrf.mxu1  ;;  %10557 = vmatprep.mubr.msk.f32.mxu0 %vm352_vm0, %v8761_v58  ;;  %v8620_v58 = vld [vmem:[%s10771_s5 + $0x2c9] sm:$0xff] }
 0x29e   : > { %13610 = vst [vmem:[#allocation55_spill] sm:$0xff] %v12933_v59  ;;  %v12942_v3 = vadd.f32 %v10288_v28, %v4757_v51  ;;  %v4756_v43 = vadd.f32 %v4525_v35, %v13613_v26  ;;  %v5316_v33 = vpop.f32.mrf.mxu0  ;;  %v8764_v51 = vld [vmem:[%s10771_s5 + $0x2ca] sm:$0xff] }
 0x29f   : > { %v10175_v36 = vpop.f32.mrf.mxu1  ;;  %10442 = vmatmul.mubr.msk.f32.gmra.mxu1 %vm352_vm0, %v8618_v49  ;;  %v8621_v35 = vld [vmem:[%s10771_s5 + $0x2d1] sm:$0xff]  ;;  %v13616_v49 = vld [vmem:[#allocation33_spill] sm:$0xff] }
 0x2a0   : > { %13612 = vst [vmem:[#allocation56_spill] sm:$0xff] %v12942_v3  ;;  %v12947_v0 = vadd.f32 %v5316_v33, %v4756_v43  ;;  %v4759_v59 = vadd.f32 %v10175_v36, %v13615_v23  ;;  %v10291_v17 = vpop.f32.mrf.mxu0  ;;  %10558 = vmatmul.mubr.msk.f32.gmra.mxu0 %vm352_vm0, %v8762_v5  ;;  %10444 = vmatprep.mubr.msk.f32.mxu1 %vm352_vm0, %v8619_v54  ;;  %v8765_v36 = vld [vmem:[%s10771_s5 + $0x2d2] sm:$0xff]  ;;  %v13618_v54 = vld [vmem:[#allocation34_spill] sm:$0xff] }
 0x2a1   : > { %v4535_v28 = vpop.f32.mrf.mxu1  ;;  %10560 = vmatprep.mubr.msk.f32.mxu0 %vm352_vm0, %v8763_v50  ;;  %v8622_v50 = vld [vmem:[%s10771_s5 + $0x2e1] sm:$0xff] }
 0x2a2   : > { %13614 = vst [vmem:[#allocation57_spill] sm:$0xff] %v12947_v0  ;;  %v12956_v26 = vadd.f32 %v10291_v17, %v4759_v59  ;;  %v4758_v43 = vadd.f32 %v4535_v28, %v13616_v49  ;;  %v5326_v33 = vpop.f32.mrf.mxu0  ;;  %v8766_v59 = vld [vmem:[%s10771_s5 + $0x2e2] sm:$0xff] }
 0x2a3   : > { %v10178_v23 = vpop.f32.mrf.mxu1  ;;  %10445 = vmatmul.mubr.msk.f32.gmra.mxu1 %vm352_vm0, %v8620_v58  ;;  %v8623_v28 = vld [vmem:[%s10771_s5 + $0x2e9] sm:$0xff]  ;;  %v13619_v58 = vld [vmem:[#allocation35_spill] sm:$0xff] }
 0x2a4   : > { %v12961_v5 = vadd.f32 %v5326_v33, %v4758_v43  ;;  %v4761_v0 = vadd.f32 %v10178_v23, %v13618_v54  ;;  %v10294_v3 = vpop.f32.mrf.mxu0  ;;  %10561 = vmatmul.mubr.msk.f32.gmra.mxu0 %vm352_vm0, %v8764_v51  ;;  %10447 = vmatprep.mubr.msk.f32.mxu1 %vm352_vm0, %v8621_v35  ;;  %v8767_v23 = vld [vmem:[%s10771_s5 + $0x2ea] sm:$0xff] }
 0x2a5   : > { %v4545_v17 = vpop.f32.mrf.mxu1  ;;  %10563 = vmatprep.mubr.msk.f32.mxu0 %vm352_vm0, %v8765_v36  ;;  %v8624_v36 = vld [vmem:[%s10771_s5 + $0x2f1] sm:$0xff] }
 0x2a6   : > { %13617 = vst [vmem:[#allocation58_spill] sm:$0xff] %v12961_v5  ;;  %v12970_v49 = vadd.f32 %v10294_v3, %v4761_v0  ;;  %v4760_v43 = vadd.f32 %v4545_v17, %v13619_v58  ;;  %v5336_v33 = vpop.f32.mrf.mxu0  ;;  %v8768_v0 = vld [vmem:[%s10771_s5 + $0x2f2] sm:$0xff]  ;;  %v8625_v17 = vld [vmem:[%s10771_s5 + $0x301] sm:$0xff] }
 0x2a7   : > { %v10181_v54 = vpop.f32.mrf.mxu1  ;;  %10448 = vmatmul.mubr.msk.f32.gmra.mxu1 %vm352_vm0, %v8622_v50  ;;  %v13621_v50 = vld [vmem:[#allocation36_spill] sm:$0xff] }
 0x2a8   : > { %v12975_v51 = vadd.f32 %v5336_v33, %v4760_v43  ;;  %v4763_v35 = vadd.f32 %v10181_v54, %v12480_v11  ;;  %v10297_v5 = vpop.f32.mrf.mxu0  ;;  %10564 = vmatmul.mubr.msk.f32.gmra.mxu0 %vm352_vm0, %v8766_v59  ;;  %10450 = vmatprep.mubr.msk.f32.mxu1 %vm352_vm0, %v8623_v28  ;;  %v8769_v11 = vld [vmem:[%s10771_s5 + $0x302] sm:$0xff] }
 0x2a9   : > { %v4555_v3 = vpop.f32.mrf.mxu1  ;;  %10566 = vmatprep.mubr.msk.f32.mxu0 %vm352_vm0, %v8767_v23  ;;  %v8626_v23 = vld [vmem:[%s10771_s5 + $0x309] sm:$0xff] }
 0x2aa   : > { %13620 = vst [vmem:[#allocation59_spill] sm:$0xff] %v12975_v51  ;;  %v12984_v58 = vadd.f32 %v10297_v5, %v4763_v35  ;;  %v4762_v43 = vadd.f32 %v4555_v3, %v13621_v50  ;;  %v5346_v33 = vpop.f32.mrf.mxu0  ;;  %v8770_v35 = vld [vmem:[%s10771_s5 + $0x30a] sm:$0xff] }
 0x2ab   : > { %v10184_v54 = vpop.f32.mrf.mxu1  ;;  %10451 = vmatmul.mubr.msk.f32.gmra.mxu1 %vm352_vm0, %v8624_v36  ;;  %v8627_v3 = vld [vmem:[%s10771_s5 + $0x311] sm:$0xff] }
 0x2ac   : > { %v12989_v59 = vadd.f32 %v5346_v33, %v4762_v43  ;;  %v4765_v28 = vadd.f32 %v10184_v54, %v12494_v39  ;;  %v10300_v51 = vpop.f32.mrf.mxu0  ;;  %10567 = vmatmul.mubr.msk.f32.gmra.mxu0 %vm352_vm0, %v8768_v0  ;;  %10453 = vmatprep.mubr.msk.f32.mxu1 %vm352_vm0, %v8625_v17  ;;  %v8771_v39 = vld [vmem:[%s10771_s5 + $0x312] sm:$0xff] }
 0x2ad   : > { %v4565_v5 = vpop.f32.mrf.mxu1  ;;  %10569 = vmatprep.mubr.msk.f32.mxu0 %vm352_vm0, %v8769_v11  ;;  %v8628_v11 = vld [vmem:[%s10771_s5 + $0x321] sm:$0xff] }
 0x2ae   : > { %v12998_v50 = vadd.f32 %v10300_v51, %v4765_v28  ;;  %v4764_v36 = vadd.f32 %v4565_v5, %v12499_v2  ;;  %v5356_v43 = vpop.f32.mrf.mxu0  ;;  %v8772_v2 = vld [vmem:[%s10771_s5 + $0x322] sm:$0xff] }
 0x2af   : > { %v10187_v33 = vpop.f32.mrf.mxu1  ;;  %10454 = vmatmul.mubr.msk.f32.gmra.mxu1 %vm352_vm0, %v8626_v23  ;;  %v8629_v28 = vld [vmem:[%s10771_s5 + $0x329] sm:$0xff] }
 0x2b0   : > { %13622 = vst [vmem:[#allocation60_spill] sm:$0xff] %v12998_v50  ;;  %v13003_v0 = vadd.f32 %v5356_v43, %v4764_v36  ;;  %v4767_v17 = vadd.f32 %v10187_v33, %v12508_v19  ;;  %v10303_v54 = vpop.f32.mrf.mxu0  ;;  %10570 = vmatmul.mubr.msk.f32.gmra.mxu0 %vm352_vm0, %v8770_v35  ;;  %10456 = vmatprep.mubr.msk.f32.mxu1 %vm352_vm0, %v8627_v3  ;;  %v8773_v43 = vld [vmem:[%s10771_s5 + $0x32a] sm:$0xff]  ;;  %v13625_v3 = vld [vmem:[#allocation37_spill] sm:$0xff] }
 0x2b1   : > { %v4575_v51 = vpop.f32.mrf.mxu1  ;;  %10572 = vmatprep.mubr.msk.f32.mxu0 %vm352_vm0, %v8771_v39  ;;  %v8630_v39 = vld [vmem:[%s10771_s5 + $0x331] sm:$0xff] }
 0x2b2   : > { %13623 = vst [vmem:[#allocation61_spill] sm:$0xff] %v13003_v0  ;;  %v13012_v5 = vadd.f32 %v10303_v54, %v4767_v17  ;;  %v4766_v23 = vadd.f32 %v4575_v51, %v12513_v22  ;;  %v5366_v36 = vpop.f32.mrf.mxu0  ;;  %v8774_v17 = vld [vmem:[%s10771_s5 + $0x332] sm:$0xff]  ;;  %v13626_v54 = vld [vmem:[#allocation40_spill] sm:$0xff] }
 0x2b3   : > { %v10190_v19 = vpop.f32.mrf.mxu1  ;;  %10457 = vmatmul.mubr.msk.f32.gmra.mxu1 %vm352_vm0, %v8628_v11 }
 0x2b4   : > { %13624 = vst [vmem:[#allocation62_spill] sm:$0xff] %v13012_v5  ;;  %v13017_v35 = vadd.f32 %v5366_v36, %v4766_v23  ;;  %v4769_v33 = vadd.f32 %v10190_v19, %v13625_v3  ;;  %v10306_v0 = vpop.f32.mrf.mxu0  ;;  %10573 = vmatmul.mubr.msk.f32.gmra.mxu0 %vm352_vm0, %v8772_v2  ;;  %10459 = vmatprep.mubr.msk.f32.mxu1 %vm352_vm0, %v8629_v28 }
 0x2b5   : > { %v4585_v50 = vpop.f32.mrf.mxu1  ;;  %10575 = vmatprep.mubr.msk.f32.mxu0 %vm352_vm0, %v8773_v43 }
 0x2b6   : > { %v13025_v22 = vadd.f32 %v10306_v0, %v4769_v33  ;;  %v4768_v51 = vadd.f32 %v4585_v50, %v13626_v54  ;;  %v5376_v5 = vpop.f32.mrf.mxu0 }
 0x2b7   : > { %v10193_v11 = vpop.f32.mrf.mxu1  ;;  %10460 = vmatmul.mubr.msk.f32.gmra.mxu1 %vm352_vm0, %v8630_v39 }
 0x2b8   : > { %v13029_v23 = vadd.f32 %v5376_v5, %v4768_v51  ;;  %v4771_v36 = vadd.f32 %v10193_v11, %v12536_v46  ;;  %v10309_v2 = vpop.f32.mrf.mxu0  ;;  %10576 = vmatmul.mubr.msk.f32.gmra.mxu0 %vm352_vm0, %v8774_v17 }
 0x2b9   : > { %v4595_v28 = vpop.f32.mrf.mxu1 }
 0x2ba   : > { %v13033_v19 = vadd.f32 %v10309_v2, %v4771_v36  ;;  %v4770_v43 = vadd.f32 %v4595_v28, %v12541_v55  ;;  %v5386_v0 = vpop.f32.mrf.mxu0 }
 0x2bb   : > { %v10196_v3 = vpop.f32.mrf.mxu1 }
 0x2bc   : > { %v13036_v33 = vadd.f32 %v5386_v0, %v4770_v43  ;;  %v4773_v50 = vadd.f32 %v10196_v3, %v12550_v63  ;;  %v10312_v54 = vpop.f32.mrf.mxu0 }
 0x2bd   : > { %v4605_v39 = vpop.f32.mrf.mxu1 }
 0x2be   : > { %v13039_v5 = vadd.f32 %v10312_v54, %v4773_v50  ;;  %v4772_v46 = vadd.f32 %v4605_v39, %v12555_v7  ;;  %v5396_v51 = vpop.f32.mrf.mxu0 }
 0x2bf   : > { %v10199_v11 = vpop.f32.mrf.mxu1 }
 0x2c0   : > { %v13042_v17 = vadd.f32 %v5396_v51, %v4772_v46  ;;  %v4775_v36 = vadd.f32 %v10199_v11, %v12564_v56  ;;  %v10315_v2 = vpop.f32.mrf.mxu0  ;;  %v13631_v46 = vld [vmem:[#allocation38_spill] sm:$0xff] }
 0x2c1   : > { %v4615_v55 = vpop.f32.mrf.mxu1 }
 0x2c2   : > { %13627 = vst [vmem:[#allocation63_spill] sm:$0xff] %v13042_v17  ;;  %v13045_v28 = vadd.f32 %v10315_v2, %v4775_v36  ;;  %v4774_v43 = vadd.f32 %v4615_v55, %v12569_v42  ;;  %v5406_v0 = vpop.f32.mrf.mxu0  ;;  %v13633_v36 = vld [vmem:[#allocation39_spill] sm:$0xff] }
 0x2c3   : > { %v10202_v63 = vpop.f32.mrf.mxu1 }
 0x2c4   : > { %13628 = vst [vmem:[#allocation64_spill] sm:$0xff] %v13045_v28  ;;  %v13048_v3 = vadd.f32 %v5406_v0, %v4774_v43  ;;  %v4777_v50 = vadd.f32 %v10202_v63, %v12578_v25  ;;  %v10318_v54 = vpop.f32.mrf.mxu0  ;;  %v13635_v43 = vld [vmem:[#allocation43_spill] sm:$0xff] }
 0x2c5   : > { %v4625_v7 = vpop.f32.mrf.mxu1 }
 0x2c6   : > { %13629 = vst [vmem:[#allocation65_spill] sm:$0xff] %v13048_v3  ;;  %v13051_v39 = vadd.f32 %v10318_v54, %v4777_v50  ;;  %v4776_v51 = vadd.f32 %v4625_v7, %v13631_v46  ;;  %v5416_v17 = vpop.f32.mrf.mxu0  ;;  %v13637_v50 = vld [vmem:[#allocation41_spill] sm:$0xff] }
 0x2c7   : > { %v10205_v56 = vpop.f32.mrf.mxu1 }
 0x2c8   : > { %13630 = vst [vmem:[#allocation66_spill] sm:$0xff] %v13051_v39  ;;  %v13054_v11 = vadd.f32 %v5416_v17, %v4776_v51  ;;  %v4779_v2 = vadd.f32 %v10205_v56, %v13633_v36  ;;  %v10321_v28 = vpop.f32.mrf.mxu0  ;;  %v13639_v17 = vld [vmem:[#allocation42_spill] sm:$0xff] }
 0x2c9   : > { %v4635_v42 = vpop.f32.mrf.mxu1 }
 0x2ca   : > { %13632 = vst [vmem:[#allocation9_spill] sm:$0xff] %v13054_v11  ;;  %v13057_v55 = vadd.f32 %v10321_v28, %v4779_v2  ;;  %v4778_v0 = vadd.f32 %v4635_v42, %v13635_v43  ;;  %v5426_v3 = vpop.f32.mrf.mxu0  ;;  %v13641_v28 = vld [vmem:[#allocation44_spill] sm:$0xff] }
 0x2cb   : > { %v10208_v25 = vpop.f32.mrf.mxu1 }
 0x2cc   : > { %13634 = vst [vmem:[#allocation10_spill] sm:$0xff] %v13057_v55  ;;  %v13060_v63 = vadd.f32 %v5426_v3, %v4778_v0  ;;  %v4781_v54 = vadd.f32 %v10208_v25, %v13637_v50  ;;  %v10324_v39 = vpop.f32.mrf.mxu0  ;;  %v13643_v3 = vld [vmem:[#allocation45_spill] sm:$0xff] }
 0x2cd   : > { %v4645_v7 = vpop.f32.mrf.mxu1 }
 0x2ce   : > { %13636 = vst [vmem:[#allocation48_spill] sm:$0xff] %v13060_v63  ;;  %v13063_v46 = vadd.f32 %v10324_v39, %v4781_v54  ;;  %v4780_v51 = vadd.f32 %v4645_v7, %v13639_v17  ;;  %v5436_v11 = vpop.f32.mrf.mxu0  ;;  %v13645_v39 = vld [vmem:[#allocation46_spill] sm:$0xff] }
 0x2cf   : > { %v10211_v56 = vpop.f32.mrf.mxu1 }
 0x2d0   : > { %13638 = vst [vmem:[#allocation11_spill] sm:$0xff] %v13063_v46  ;;  %v13066_v36 = vadd.f32 %v5436_v11, %v4780_v51  ;;  %v4783_v2 = vadd.f32 %v10211_v56, %v13641_v28  ;;  %v10327_v55 = vpop.f32.mrf.mxu0  ;;  %v13646_v11 = vld [vmem:[#allocation47_spill] sm:$0xff] }
 0x2d1   : > { %v4655_v42 = vpop.f32.mrf.mxu1 }
 0x2d2   : > { %13640 = vst [vmem:[#allocation12_spill] sm:$0xff] %v13066_v36  ;;  %v13069_v43 = vadd.f32 %v10327_v55, %v4783_v2  ;;  %v4782_v0 = vadd.f32 %v4655_v42, %v13643_v3  ;;  %v5446_v63 = vpop.f32.mrf.mxu0  ;;  %v13648_v55 = vld [vmem:[#allocation49_spill] sm:$0xff] }
 0x2d3   : > { %v10214_v25 = vpop.f32.mrf.mxu1 }
 0x2d4   : > { %13642 = vst [vmem:[#allocation13_spill] sm:$0xff] %v13069_v43  ;;  %v13072_v50 = vadd.f32 %v5446_v63, %v4782_v0  ;;  %v4785_v54 = vadd.f32 %v10214_v25, %v13645_v39  ;;  %v10330_v46 = vpop.f32.mrf.mxu0  ;;  %v13649_v63 = vld [vmem:[#allocation50_spill] sm:$0xff] }
 0x2d5   : > { %v4665_v7 = vpop.f32.mrf.mxu1 }
 0x2d6   : > { %13644 = vst [vmem:[#allocation14_spill] sm:$0xff] %v13072_v50  ;;  %v13075_v17 = vadd.f32 %v10330_v46, %v4785_v54  ;;  %v4784_v51 = vadd.f32 %v4665_v7, %v13646_v11  ;;  %v5456_v36 = vpop.f32.mrf.mxu0 }
 0x2d7   : > { %v10217_v56 = vpop.f32.mrf.mxu1 }
 0x2d8   : > { %v13078_v28 = vadd.f32 %v5456_v36, %v4784_v51  ;;  %v4787_v2 = vadd.f32 %v10217_v56, %v13648_v55  ;;  %v10333_v43 = vpop.f32.mrf.mxu0  ;;  %v13651_v36 = vld [vmem:[#allocation51_spill] sm:$0xff] }
 0x2d9   : > { %v4675_v42 = vpop.f32.mrf.mxu1 }
 0x2da   : > { %13647 = vst [vmem:[#allocation15_spill] sm:$0xff] %v13078_v28  ;;  %v13081_v3 = vadd.f32 %v10333_v43, %v4787_v2  ;;  %v4786_v0 = vadd.f32 %v4675_v42, %v13649_v63  ;;  %v5466_v50 = vpop.f32.mrf.mxu0 }
 0x2db   : > { %v10220_v25 = vpop.f32.mrf.mxu1 }
 0x2dc   : > { %v13084_v39 = vadd.f32 %v5466_v50, %v4786_v0  ;;  %v4789_v46 = vadd.f32 %v10220_v25, %v12662_v52  ;;  %v10336_v54 = vpop.f32.mrf.mxu0  ;;  %v13652_v50 = vld [vmem:[#allocation52_spill] sm:$0xff] }
 0x2dd   : > { %v4685_v7 = vpop.f32.mrf.mxu1 }
 0x2de   : > { %13650 = vst [vmem:[#allocation16_spill] sm:$0xff] %v13084_v39  ;;  %v13087_v11 = vadd.f32 %v10336_v54, %v4789_v46  ;;  %v4788_v51 = vadd.f32 %v4685_v7, %v13651_v36  ;;  %v5476_v28 = vpop.f32.mrf.mxu0 }
 0x2df   : > { %v10223_v56 = vpop.f32.mrf.mxu1 }
 0x2e0   : > { %v13090_v55 = vadd.f32 %v5476_v28, %v4788_v51  ;;  %v4791_v43 = vadd.f32 %v10223_v56, %v12676_v12  ;;  %v10339_v2 = vpop.f32.mrf.mxu0 }
 0x2e1   : > { %v4695_v42 = vpop.f32.mrf.mxu1 }
 0x2e2   : > { %v13093_v63 = vadd.f32 %v10339_v2, %v4791_v43  ;;  %v4790_v0 = vadd.f32 %v4695_v42, %v13652_v50  ;;  %v5486_v39 = vpop.f32.mrf.mxu0 }
 0x2e3   : > { %v10226_v52 = vpop.f32.mrf.mxu1 }
 0x2e4   : > { %v13096_v25 = vadd.f32 %v5486_v39, %v4790_v0  ;;  %v4793_v46 = vadd.f32 %v10226_v52, %v12690_v37  ;;  %v10342_v54 = vpop.f32.mrf.mxu0 }
 0x2e5   : > { %v4705_v7 = vpop.f32.mrf.mxu1 }
 0x2e6   : > { %v13099_v36 = vadd.f32 %v10342_v54, %v4793_v46  ;;  %v4792_v28 = vadd.f32 %v4705_v7, %v12695_v47  ;;  %v5496_v51 = vpop.f32.mrf.mxu0  ;;  %v13111_v47 = vld [vmem:[#allocation5] ss:$0 sm:$0xff] }
 0x2e7   : > { %v10229_v12 = vpop.f32.mrf.mxu1 }
 0x2e8   : > { %v13102_v56 = vadd.f32 %v5496_v51, %v4792_v28  ;;  %v4795_v43 = vadd.f32 %v10229_v12, %v12704_v38  ;;  %v10345_v2 = vpop.f32.mrf.mxu0 }
 0x2e9   : > { %v4715_v42 = vpop.f32.mrf.mxu1 }
 0x2ea   : > { %v13105_v50 = vadd.f32 %v10345_v2, %v4795_v43  ;;  %v4794_v39 = vadd.f32 %v4715_v42, %v12709_v10  ;;  %v5506_v0 = vpop.f32.mrf.mxu0 }
 0x2eb   : > { %v10356_v37 = vpop.f32.mrf.mxu1 }
 0x2ec   : > { %13653 = vst [vmem:[#allocation17_spill] sm:$0xff] %v13105_v50  ;;  %v13108_v52 = vadd.f32 %v5506_v0, %v4794_v39  ;;  %v6306_v46 = vadd.f32 %v10356_v37, %v12718_v48  ;;  %v10472_v54 = vpop.f32.mrf.mxu0 }
 0x2ed   : > { %v5946_v7 = vpop.f32.mrf.mxu1 }
 0x2ee   : > { %13654 = vst [vmem:[#allocation18_spill] sm:$0xff] %v13108_v52  ;;  %v7096_v28 = vadd.f32 %v10472_v54, %v6306_v46  ;;  %v6305_v51 = vadd.f32 %v5946_v7, %v12723_v8  ;;  %v6736_v38 = vpop.f32.mrf.mxu0 }
 0x2ef   : > { %v10359_v12 = vpop.f32.mrf.mxu1 }
 0x2f0   : > { %v7175_v43 = vadd.f32 %v13111_v47, %v7096_v28  ;;  %v7095_v2 = vadd.f32 %v6736_v38, %v6305_v51  ;;  %v6308_v10 = vadd.f32 %v10359_v12, %v12732_v29  ;;  %v10475_v42 = vpop.f32.mrf.mxu0 }
 0x2f1   : > { %v5956_v39 = vpop.f32.mrf.mxu1 }
 0x2f2   : > { %v7247_v0 = vmax.f32 %v7175_v43, 0.0  ;;  %v7174_v48 = vadd.f32 %v13111_v47, %v7095_v2  ;;  %v7098_v37 = vadd.f32 %v10475_v42, %v6308_v10  ;;  %v6307_v52 = vadd.f32 %v5956_v39, %v12737_v62  ;;  %v6746_v50 = vpop.f32.mrf.mxu0 }
 0x2f3   : > { %v10362_v46 = vpop.f32.mrf.mxu1 }
 0x2f4   : > { %7320 = vst.msk [vmem:[#allocation2 + $0x8] sm:$0xff] %vm7318_vm1, %v7247_v0  ;;  %v7246_v8 = vmax.f32 %v7174_v48, 0.0  ;;  %v7177_v54 = vadd.f32 %v13111_v47, %v7098_v37  ;;  %v7097_v7 = vadd.f32 %v6746_v50, %v6307_v52  ;;  %v6310_v28 = vadd.f32 %v10362_v46, %v12746_v45  ;;  %v10478_v29 = vpop.f32.mrf.mxu0 }
 0x2f5   : > { %v5966_v51 = vpop.f32.mrf.mxu1 }
 0x2f6   : > { %7319 = vst.msk [vmem:[#allocation2] sm:$0xff] %vm7318_vm1, %v7246_v8  ;;  %v7249_v38 = vmax.f32 %v7177_v54, 0.0  ;;  %v7176_v12 = vadd.f32 %v13111_v47, %v7097_v7  ;;  %v7100_v43 = vadd.f32 %v10478_v29, %v6310_v28  ;;  %v6309_v62 = vadd.f32 %v5966_v51, %v12751_v41  ;;  %v6756_v2 = vpop.f32.mrf.mxu0 }
 0x2f7   : > { %v10365_v10 = vpop.f32.mrf.mxu1 }
 0x2f8   : > { %7322 = vst.msk [vmem:[#allocation2 + $0x18] sm:$0xff] %vm7318_vm1, %v7249_v38  ;;  %v7248_v42 = vmax.f32 %v7176_v12, 0.0  ;;  %v7179_v39 = vadd.f32 %v13111_v47, %v7100_v43  ;;  %v7099_v50 = vadd.f32 %v6756_v2, %v6309_v62  ;;  %v6312_v45 = vadd.f32 %v10365_v10, %v12760_v18  ;;  %v10481_v52 = vpop.f32.mrf.mxu0 }
 0x2f9   : > { %v5976_v0 = vpop.f32.mrf.mxu1 }
 0x2fa   : > { %7321 = vst.msk [vmem:[#allocation2 + $0x10] sm:$0xff] %vm7318_vm1, %v7248_v42  ;;  %v7251_v48 = vmax.f32 %v7179_v39, 0.0  ;;  %v7178_v37 = vadd.f32 %v13111_v47, %v7099_v50  ;;  %v7102_v46 = vadd.f32 %v10481_v52, %v6312_v45  ;;  %v6311_v41 = vadd.f32 %v5976_v0, %v12765_v31  ;;  %v6766_v8 = vpop.f32.mrf.mxu0 }
 0x2fb   : > { %v10368_v54 = vpop.f32.mrf.mxu1 }
 0x2fc   : > { %7324 = vst.msk [vmem:[#allocation2 + $0x28] sm:$0xff] %vm7318_vm1, %v7251_v48  ;;  %v7250_v7 = vmax.f32 %v7178_v37, 0.0  ;;  %v7181_v28 = vadd.f32 %v13111_v47, %v7102_v46  ;;  %v7101_v29 = vadd.f32 %v6766_v8, %v6311_v41  ;;  %v6314_v18 = vadd.f32 %v10368_v54, %v12774_v24  ;;  %v10484_v51 = vpop.f32.mrf.mxu0 }
 0x2fd   : > { %v5986_v38 = vpop.f32.mrf.mxu1  ;;  %v7391_v37 = vld [vmem:[#allocation2] ss:$2 sm:$0xff]  ;;  %v7487_v46 = vld [vmem:[#allocation2 + $0x1] ss:$2 sm:$0xff] }
 0x2fe   : > { %7323 = vst.msk [vmem:[#allocation2 + $0x20] sm:$0xff] %vm7318_vm1, %v7250_v7  ;;  %v7253_v12 = vmax.f32 %v7181_v28, 0.0  ;;  %v7180_v43 = vadd.f32 %v13111_v47, %v7101_v29  ;;  %v7104_v62 = vadd.f32 %v10484_v51, %v6314_v18  ;;  %v6776_v31 = vpop.f32.mrf.mxu0  ;;  %v6313_v2 = vadd.f32 %v5986_v38, %v12779_v21 }
 0x2ff   : > { %v10371_v10 = vpop.f32.mrf.mxu1 }
 0x300   : > { %7326 = vst.msk [vmem:[#allocation2 + $0x38] sm:$0xff] %vm7318_vm1, %v7253_v12  ;;  %v7252_v42 = vmax.f32 %v7180_v43, 0.0  ;;  %v7183_v39 = vadd.f32 %v13111_v47, %v7104_v62  ;;  %v6316_v24 = vadd.f32 %v10371_v10, %v12788_v6  ;;  %v10487_v50 = vpop.f32.mrf.mxu0  ;;  %v7103_v0 = vadd.f32 %v6776_v31, %v6313_v2 }
 0x301   : > { %v7393_v45 = vld [vmem:[#allocation2 + $0x10] ss:$2 sm:$0xf]  ;;  %v7489_v52 = vld [vmem:[#allocation2 + $0x11] ss:$2 sm:$0xf]  ;;  %v5996_v48 = vpop.f32.mrf.mxu1  ;;  %v7582_v31 = vmax.f32 %v7391_v37, %v7487_v46 }
 0x302   : > { %7325 = vst.msk [vmem:[#allocation2 + $0x30] sm:$0xff] %vm7318_vm1, %v7252_v42  ;;  %v7255_v41 = vmax.f32 %v7183_v39, 0.0  ;;  %v7106_v21 = vadd.f32 %v10487_v50, %v6316_v24  ;;  %v6315_v8 = vadd.f32 %v5996_v48, %v12793_v1  ;;  %v6786_v54 = vpop.f32.mrf.mxu0  ;;  %v7583_v7 = vmax.f32 %v7393_v45, %v7489_v52 }
 0x303   : > { %v7397_v28 = vld [vmem:[#allocation2 + $0x28] ss:$2 sm:$0xf]  ;;  %v7493_v29 = vld [vmem:[#allocation2 + $0x29] ss:$2 sm:$0xf]  ;;  %v7182_v6 = vadd.f32 %v13111_v47, %v7103_v0  ;;  %v10374_v18 = vpop.f32.mrf.mxu1 }
 0x304   : > { %v7585_v51 = vmax.f32 %v7397_v28, %v7493_v29  ;;  %7328 = vst.msk [vmem:[#allocation2 + $0x48] sm:$0xff] %vm7318_vm1, %v7255_v41  ;;  %v7185_v38 = vadd.f32 %v13111_v47, %v7106_v21  ;;  %v7105_v12 = vadd.f32 %v6786_v54, %v6315_v8  ;;  %v6318_v43 = vadd.f32 %v10374_v18, %v12802_v44  ;;  %v10490_v62 = vpop.f32.mrf.mxu0 }
 0x305   : > { %v7395_v1 = vld [vmem:[#allocation2 + $0x18] ss:$2 sm:$0xff]  ;;  %v7491_v2 = vld [vmem:[#allocation2 + $0x19] ss:$2 sm:$0xff]  ;;  %v7254_v10 = vmax.f32 %v7182_v6, 0.0  ;;  %v6006_v42 = vpop.f32.mrf.mxu1 }
 0x306   : > { %v7631_v39 = vmax.f32 %v7583_v7, %v7585_v51  ;;  %v7584_v24 = vmax.f32 %v7395_v1, %v7491_v2  ;;  %v7257_v50 = vmax.f32 %v7185_v38, 0.0  ;;  %v7184_v44 = vadd.f32 %v13111_v47, %v7105_v12  ;;  %v6796_v45 = vpop.f32.mrf.mxu0 }
 0x307   : > { %7327 = vst.msk [vmem:[#allocation2 + $0x40] sm:$0xff] %vm7318_vm1, %v7254_v10  ;;  %v7108_v52 = vadd.f32 %v10490_v62, %v6318_v43  ;;  %v6317_v0 = vadd.f32 %v6006_v42, %v12807_v32  ;;  %v10377_v48 = vpop.f32.mrf.mxu1 }
 0x308   : > { %7656 = vst.msk [vmem:[%s13151_s9 + $0x8] sm:$0xf] %vm7655_vm2, %v7631_v39  ;;  %v7630_v37 = vmax.f32 %v7582_v31, %v7584_v24  ;;  %v7256_v46 = vmax.f32 %v7184_v44, 0.0  ;;  %v6320_v41 = vadd.f32 %v10377_v48, %v12816_v27  ;;  %v10493_v21 = vpop.f32.mrf.mxu0 }
 0x309   : > { %7330 = vst.msk [vmem:[#allocation2 + $0x58] sm:$0xff] %vm7318_vm1, %v7257_v50  ;;  %v7187_v8 = vadd.f32 %v13111_v47, %v7108_v52  ;;  %v7107_v54 = vadd.f32 %v6796_v45, %v6317_v0  ;;  %v6016_v7 = vpop.f32.mrf.mxu1  ;;  %v7399_v62 = vld [vmem:[#allocation2 + $0x30] ss:$2 sm:$0xff]  ;;  %v7495_v31 = vld [vmem:[#allocation2 + $0x31] ss:$2 sm:$0xff] }
 0x30a   : > { %7654 = vst.msk [vmem:[%s13151_s9] sm:$0xff] %vm7318_vm1, %v7630_v37  ;;  %7329 = vst.msk [vmem:[#allocation2 + $0x50] sm:$0xff] %vm7318_vm1, %v7256_v46  ;;  %v7110_v28 = vadd.f32 %v10493_v21, %v6320_v41  ;;  %v6319_v32 = vadd.f32 %v6016_v7, %v12821_v34  ;;  %v6806_v29 = vpop.f32.mrf.mxu0  ;;  %v7586_v21 = vmax.f32 %v7399_v62, %v7495_v31 }
 0x30b   : > { %v7259_v6 = vmax.f32 %v7187_v8, 0.0  ;;  %v7186_v18 = vadd.f32 %v13111_v47, %v7107_v54  ;;  %v10380_v51 = vpop.f32.mrf.mxu1 }
 0x30c   : > { %v7189_v38 = vadd.f32 %v13111_v47, %v7110_v28  ;;  %v7109_v27 = vadd.f32 %v6806_v29, %v6319_v32  ;;  %v6322_v12 = vadd.f32 %v10380_v51, %v12830_v9  ;;  %v10496_v43 = vpop.f32.mrf.mxu0 }
 0x30d   : > { %7332 = vst.msk [vmem:[#allocation2 + $0x68] sm:$0xff] %vm7318_vm1, %v7259_v6  ;;  %v7258_v1 = vmax.f32 %v7186_v18, 0.0  ;;  %v6026_v2 = vpop.f32.mrf.mxu1 }
 0x30e   : > { %v7401_v10 = vld [vmem:[#allocation2 + $0x40] ss:$2 sm:$0xf]  ;;  %v7497_v42 = vld [vmem:[#allocation2 + $0x41] ss:$2 sm:$0xf]  ;;  %v7188_v34 = vadd.f32 %v13111_v47, %v7109_v27  ;;  %v7112_v39 = vadd.f32 %v10496_v43, %v6322_v12  ;;  %v6321_v24 = vadd.f32 %v6026_v2, %v12835_v40  ;;  %v6816_v50 = vpop.f32.mrf.mxu0 }
 0x30f   : > { %v7587_v44 = vmax.f32 %v7401_v10, %v7497_v42  ;;  %7331 = vst.msk [vmem:[#allocation2 + $0x60] sm:$0xff] %vm7318_vm1, %v7258_v1  ;;  %v10383_v9 = vpop.f32.mrf.mxu1  ;;  %v7261_v48 = vmax.f32 %v7189_v38, 0.0 }
 0x310   : > { %v7405_v45 = vld [vmem:[#allocation2 + $0x58] ss:$2 sm:$0xf]  ;;  %v7501_v52 = vld [vmem:[#allocation2 + $0x59] ss:$2 sm:$0xf]  ;;  %v7191_v46 = vadd.f32 %v13111_v47, %v7112_v39  ;;  %v10499_v41 = vpop.f32.mrf.mxu0  ;;  %v7111_v7 = vadd.f32 %v6816_v50, %v6321_v24  ;;  %v6324_v40 = vadd.f32 %v10383_v9, %v12844_v16 }
 0x311   : > { %v7589_v0 = vmax.f32 %v7405_v45, %v7501_v52  ;;  %v7260_v37 = vmax.f32 %v7188_v34, 0.0  ;;  %v7403_v8 = vld [vmem:[#allocation2 + $0x48] ss:$2 sm:$0xff]  ;;  %v7499_v54 = vld [vmem:[#allocation2 + $0x49] ss:$2 sm:$0xff]  ;;  %v6036_v28 = vpop.f32.mrf.mxu1  ;;  %7334 = vst.msk [vmem:[#allocation2 + $0x78] sm:$0xff] %vm7318_vm1, %v7261_v48 }
 0x312   : > { %v7588_v29 = vmax.f32 %v7403_v8, %v7499_v54  ;;  %v7263_v6 = vmax.f32 %v7191_v46, 0.0  ;;  %v6323_v18 = vadd.f32 %v6036_v28, %v12849_v15  ;;  %v6826_v51 = vpop.f32.mrf.mxu0  ;;  %v7190_v38 = vadd.f32 %v13111_v47, %v7111_v7 }
 0x313   : > { %v7633_v32 = vmax.f32 %v7587_v44, %v7589_v0  ;;  %7333 = vst.msk [vmem:[#allocation2 + $0x70] sm:$0xff] %vm7318_vm1, %v7260_v37  ;;  %v7114_v27 = vadd.f32 %v10499_v41, %v6324_v40  ;;  %v10386_v12 = vpop.f32.mrf.mxu1 }
 0x314   : > { %v7632_v43 = vmax.f32 %v7586_v21, %v7588_v29  ;;  %7336 = vst.msk [vmem:[#allocation2 + $0x88] sm:$0xff] %vm7318_vm1, %v7263_v6  ;;  %v7113_v16 = vadd.f32 %v6826_v51, %v6323_v18  ;;  %v6326_v62 = vadd.f32 %v10386_v12, %v12858_v4  ;;  %v10502_v31 = vpop.f32.mrf.mxu0  ;;  %v7262_v1 = vmax.f32 %v7190_v38, 0.0 }
 0x315   : > { %7658 = vst.msk [vmem:[%s13151_s9 + $0x18] sm:$0xf] %vm7655_vm2, %v7633_v32  ;;  %v7193_v2 = vadd.f32 %v13111_v47, %v7114_v27  ;;  %v6046_v10 = vpop.f32.mrf.mxu1 }
 0x316   : > { %7657 = vst.msk [vmem:[%s13151_s9 + $0x10] sm:$0xff] %vm7318_vm1, %v7632_v43  ;;  %v7192_v15 = vadd.f32 %v13111_v47, %v7113_v16  ;;  %v7116_v42 = vadd.f32 %v10502_v31, %v6326_v62  ;;  %v6325_v34 = vadd.f32 %v6046_v10, %v12863_v53  ;;  %v6836_v39 = vpop.f32.mrf.mxu0  ;;  %7335 = vst.msk [vmem:[#allocation2 + $0x80] sm:$0xff] %vm7318_vm1, %v7262_v1  ;;  %v7503_v32 = vld [vmem:[#allocation2 + $0x61] ss:$2 sm:$0xff] }
 0x317   : > { %v7265_v24 = vmax.f32 %v7193_v2, 0.0  ;;  %v10389_v50 = vpop.f32.mrf.mxu1 }
 0x318   : > { %v7264_v44 = vmax.f32 %v7192_v15, 0.0  ;;  %v7195_v4 = vadd.f32 %v13111_v47, %v7116_v42  ;;  %v7115_v45 = vadd.f32 %v6836_v39, %v6325_v34  ;;  %v6328_v52 = vadd.f32 %v10389_v50, %v12872_v61  ;;  %v10505_v9 = vpop.f32.mrf.mxu0  ;;  %v7407_v61 = vld [vmem:[#allocation2 + $0x60] ss:$2 sm:$0xff] }
 0x319   : > { %7338 = vst.msk [vmem:[#allocation2 + $0x98] sm:$0xff] %vm7318_vm1, %v7265_v24  ;;  %v6056_v37 = vpop.f32.mrf.mxu1  ;;  %v7590_v10 = vmax.f32 %v7407_v61, %v7503_v32  ;;  %v13655_v61 = vld [vmem:[#allocation53_spill] sm:$0xff] }
 0x31a   : > { %v7409_v0 = vld [vmem:[#allocation2 + $0x70] ss:$2 sm:$0xf]  ;;  %v7505_v48 = vld [vmem:[#allocation2 + $0x71] ss:$2 sm:$0xf]  ;;  %v7194_v46 = vadd.f32 %v13111_v47, %v7115_v45  ;;  %v7118_v41 = vadd.f32 %v10505_v9, %v6328_v52  ;;  %v6846_v21 = vpop.f32.mrf.mxu0  ;;  %v6327_v40 = vadd.f32 %v6056_v37, %v12877_v30 }
 0x31b   : > { %7337 = vst.msk [vmem:[#allocation2 + $0x90] sm:$0xff] %vm7318_vm1, %v7264_v44  ;;  %v7267_v53 = vmax.f32 %v7195_v4, 0.0  ;;  %v7591_v8 = vmax.f32 %v7409_v0, %v7505_v48  ;;  %v7413_v54 = vld [vmem:[#allocation2 + $0x88] ss:$2 sm:$0xf]  ;;  %v10392_v28 = vpop.f32.mrf.mxu1 }
 0x31c   : > { %v7509_v7 = vld [vmem:[#allocation2 + $0x89] ss:$2 sm:$0xf]  ;;  %v7266_v6 = vmax.f32 %v7194_v46, 0.0  ;;  %v7197_v18 = vadd.f32 %v13111_v47, %v7118_v41  ;;  %v6330_v51 = vadd.f32 %v10392_v28, %v12886_v13  ;;  %v10508_v38 = vpop.f32.mrf.mxu0  ;;  %v7117_v27 = vadd.f32 %v6846_v21, %v6327_v40 }
 0x31d   : > { %v7593_v29 = vmax.f32 %v7413_v54, %v7509_v7  ;;  %7340 = vst.msk [vmem:[#allocation2 + $0xa8] sm:$0xff] %vm7318_vm1, %v7267_v53  ;;  %v6066_v12 = vpop.f32.mrf.mxu1  ;;  %v7411_v16 = vld [vmem:[#allocation2 + $0x78] ss:$2 sm:$0xff]  ;;  %v7507_v62 = vld [vmem:[#allocation2 + $0x79] ss:$2 sm:$0xff] }
 0x31e   : > { %7339 = vst.msk [vmem:[#allocation2 + $0xa0] sm:$0xff] %vm7318_vm1, %v7266_v6  ;;  %v7269_v30 = vmax.f32 %v7197_v18, 0.0  ;;  %v7120_v31 = vadd.f32 %v10508_v38, %v6330_v51  ;;  %v6329_v1 = vadd.f32 %v6066_v12, %v12891_v14  ;;  %v6856_v2 = vpop.f32.mrf.mxu0  ;;  %v7592_v15 = vmax.f32 %v7411_v16, %v7507_v62  ;;  %v13656_v62 = vld [vmem:[#allocation54_spill] sm:$0xff] }
 0x31f   : > { %v7635_v43 = vmax.f32 %v7591_v8, %v7593_v29  ;;  %v7196_v42 = vadd.f32 %v13111_v47, %v7117_v27  ;;  %v10395_v13 = vpop.f32.mrf.mxu1 }
 0x320   : > { %7342 = vst.msk [vmem:[#allocation2 + $0xb8] sm:$0xff] %vm7318_vm1, %v7269_v30  ;;  %v7199_v34 = vadd.f32 %v13111_v47, %v7120_v31  ;;  %v7119_v39 = vadd.f32 %v6856_v2, %v6329_v1  ;;  %v6332_v24 = vadd.f32 %v10395_v13, %v12900_v57  ;;  %v10511_v50 = vpop.f32.mrf.mxu0  ;;  %v7634_v44 = vmax.f32 %v7590_v10, %v7592_v15 }
 0x321   : > { %7660 = vst.msk [vmem:[%s13151_s9 + $0x28] sm:$0xf] %vm7655_vm2, %v7635_v43  ;;  %v7268_v4 = vmax.f32 %v7196_v42, 0.0  ;;  %v6076_v14 = vpop.f32.mrf.mxu1 }
 0x322   : > { %v7271_v45 = vmax.f32 %v7199_v34, 0.0  ;;  %v7198_v52 = vadd.f32 %v13111_v47, %v7119_v39  ;;  %v7122_v9 = vadd.f32 %v10511_v50, %v6332_v24  ;;  %v6866_v0 = vpop.f32.mrf.mxu0  ;;  %7659 = vst.msk [vmem:[%s13151_s9 + $0x20] sm:$0xff] %vm7318_vm1, %v7634_v44  ;;  %v6331_v48 = vadd.f32 %v6076_v14, %v12905_v20  ;;  %v7415_v27 = vld [vmem:[#allocation2 + $0x90] ss:$2 sm:$0xff] }
 0x323   : > { %7341 = vst.msk [vmem:[#allocation2 + $0xb0] sm:$0xff] %vm7318_vm1, %v7268_v4  ;;  %v10398_v37 = vpop.f32.mrf.mxu1  ;;  %v13657_v4 = vld [vmem:[#allocation55_spill] sm:$0xff] }
 0x324   : > { %7344 = vst.msk [vmem:[#allocation2 + $0xc8] sm:$0xff] %vm7318_vm1, %v7271_v45  ;;  %v7270_v53 = vmax.f32 %v7198_v52, 0.0  ;;  %v7201_v57 = vadd.f32 %v13111_v47, %v7122_v9  ;;  %v6334_v46 = vadd.f32 %v10398_v37, %v12914_v60  ;;  %v10514_v41 = vpop.f32.mrf.mxu0  ;;  %v7121_v54 = vadd.f32 %v6866_v0, %v6331_v48  ;;  %v7511_v60 = vld [vmem:[#allocation2 + $0x91] ss:$2 sm:$0xff] }
 0x325   : > { %v7417_v21 = vld [vmem:[#allocation2 + $0xa0] ss:$2 sm:$0xf]  ;;  %v7513_v8 = vld [vmem:[#allocation2 + $0xa1] ss:$2 sm:$0xf]  ;;  %v6086_v7 = vpop.f32.mrf.mxu1  ;;  %v7594_v50 = vmax.f32 %v7415_v27, %v7511_v60 }
 0x326   : > { %7343 = vst.msk [vmem:[#allocation2 + $0xc0] sm:$0xff] %vm7318_vm1, %v7270_v53  ;;  %v7273_v40 = vmax.f32 %v7201_v57, 0.0  ;;  %v7124_v28 = vadd.f32 %v10514_v41, %v6334_v46  ;;  %v6333_v32 = vadd.f32 %v6086_v7, %v13655_v61  ;;  %v6876_v20 = vpop.f32.mrf.mxu0  ;;  %v7595_v29 = vmax.f32 %v7417_v21, %v7513_v8  ;;  %v13658_v0 = vld [vmem:[#allocation56_spill] sm:$0xff]  ;;  %v13659_v8 = vld [vmem:[#allocation57_spill] sm:$0xff] }
 0x327   : > { %v7421_v6 = vld [vmem:[#allocation2 + $0xb8] ss:$2 sm:$0xf]  ;;  %v7517_v18 = vld [vmem:[#allocation2 + $0xb9] ss:$2 sm:$0xf]  ;;  %v7200_v51 = vadd.f32 %v13111_v47, %v7121_v54  ;;  %v10401_v38 = vpop.f32.mrf.mxu1 }
 0x328   : > { %v7597_v12 = vmax.f32 %v7421_v6, %v7517_v18  ;;  %7346 = vst.msk [vmem:[#allocation2 + $0xd8] sm:$0xff] %vm7318_vm1, %v7273_v40  ;;  %v7203_v43 = vadd.f32 %v13111_v47, %v7124_v28  ;;  %v7123_v16 = vadd.f32 %v6876_v20, %v6333_v32  ;;  %v6336_v30 = vadd.f32 %v10401_v38, %v13656_v62  ;;  %v10517_v31 = vpop.f32.mrf.mxu0 }
 0x329   : > { %v7272_v1 = vmax.f32 %v7200_v51, 0.0  ;;  %v6096_v2 = vpop.f32.mrf.mxu1 }
 0x32a   : > { %v7637_v10 = vmax.f32 %v7595_v29, %v7597_v12  ;;  %v7419_v15 = vld [vmem:[#allocation2 + $0xa8] ss:$2 sm:$0xff]  ;;  %v7515_v42 = vld [vmem:[#allocation2 + $0xa9] ss:$2 sm:$0xff]  ;;  %v7275_v13 = vmax.f32 %v7203_v43, 0.0  ;;  %v7202_v34 = vadd.f32 %v13111_v47, %v7123_v16  ;;  %v7126_v39 = vadd.f32 %v10517_v31, %v6336_v30  ;;  %v6886_v24 = vpop.f32.mrf.mxu0 }
 0x32b   : > { %v7596_v44 = vmax.f32 %v7419_v15, %v7515_v42  ;;  %7345 = vst.msk [vmem:[#allocation2 + $0xd0] sm:$0xff] %vm7318_vm1, %v7272_v1  ;;  %v6335_v14 = vadd.f32 %v6096_v2, %v13657_v4  ;;  %v10404_v45 = vpop.f32.mrf.mxu1  ;;  %v13660_v16 = vld [vmem:[#allocation58_spill] sm:$0xff] }
 0x32c   : > { %7662 = vst.msk [vmem:[%s13151_s9 + $0x38] sm:$0xf] %vm7655_vm2, %v7637_v10  ;;  %v7274_v52 = vmax.f32 %v7202_v34, 0.0  ;;  %v7205_v9 = vadd.f32 %v13111_v47, %v7126_v39  ;;  %v6338_v48 = vadd.f32 %v10404_v45, %v13658_v0  ;;  %v10520_v37 = vpop.f32.mrf.mxu0  ;;  %v13661_v0 = vld [vmem:[#allocation59_spill] sm:$0xff] }
 0x32d   : > { %7348 = vst.msk [vmem:[#allocation2 + $0xe8] sm:$0xff] %vm7318_vm1, %v7275_v13  ;;  %v7636_v53 = vmax.f32 %v7594_v50, %v7596_v44  ;;  %v7125_v57 = vadd.f32 %v6886_v24, %v6335_v14  ;;  %v6106_v46 = vpop.f32.mrf.mxu1  ;;  %v7423_v6 = vld [vmem:[#allocation2 + $0xc0] ss:$2 sm:$0xff]  ;;  %v7519_v18 = vld [vmem:[#allocation2 + $0xc1] ss:$2 sm:$0xff] }
 0x32e   : > { %7347 = vst.msk [vmem:[#allocation2 + $0xe0] sm:$0xff] %vm7318_vm1, %v7274_v52  ;;  %v7277_v41 = vmax.f32 %v7205_v9, 0.0  ;;  %v7128_v21 = vadd.f32 %v10520_v37, %v6338_v48  ;;  %v6337_v54 = vadd.f32 %v6106_v46, %v13659_v8  ;;  %v6896_v7 = vpop.f32.mrf.mxu0  ;;  %v7598_v39 = vmax.f32 %v7423_v6, %v7519_v18 }
 0x32f   : > { %7661 = vst.msk [vmem:[%s13151_s9 + $0x30] sm:$0xff] %vm7318_vm1, %v7636_v53  ;;  %v7204_v40 = vadd.f32 %v13111_v47, %v7125_v57  ;;  %v10407_v28 = vpop.f32.mrf.mxu1 }
 0x330   : > { %7350 = vst.msk [vmem:[#allocation2 + $0xf8] sm:$0xff] %vm7318_vm1, %v7277_v41  ;;  %v7207_v61 = vadd.f32 %v13111_v47, %v7128_v21  ;;  %v7127_v32 = vadd.f32 %v6896_v7, %v6337_v54  ;;  %v6340_v20 = vadd.f32 %v10407_v28, %v12956_v26  ;;  %v10523_v29 = vpop.f32.mrf.mxu0 }
 0x331   : > { %v7276_v51 = vmax.f32 %v7204_v40, 0.0  ;;  %v6116_v38 = vpop.f32.mrf.mxu1 }
 0x332   : > { %v7425_v27 = vld [vmem:[#allocation2 + $0xd0] ss:$2 sm:$0xf]  ;;  %v7521_v60 = vld [vmem:[#allocation2 + $0xd1] ss:$2 sm:$0xf]  ;;  %v7206_v12 = vadd.f32 %v13111_v47, %v7127_v32  ;;  %v7130_v43 = vadd.f32 %v10523_v29, %v6340_v20  ;;  %v6339_v62 = vadd.f32 %v6116_v38, %v13660_v16  ;;  %v6906_v30 = vpop.f32.mrf.mxu0 }
 0x333   : > { %v7599_v31 = vmax.f32 %v7425_v27, %v7521_v60  ;;  %7349 = vst.msk [vmem:[#allocation2 + $0xf0] sm:$0xff] %vm7318_vm1, %v7276_v51  ;;  %v10410_v10 = vpop.f32.mrf.mxu1  ;;  %v7279_v15 = vmax.f32 %v7207_v61, 0.0  ;;  %v13662_v38 = vld [vmem:[#allocation60_spill] sm:$0xff] }
 0x334   : > { %v7429_v1 = vld [vmem:[#allocation2 + $0xe8] ss:$2 sm:$0xf]  ;;  %v7525_v2 = vld [vmem:[#allocation2 + $0xe9] ss:$2 sm:$0xf]  ;;  %v7209_v13 = vadd.f32 %v13111_v47, %v7130_v43  ;;  %v10526_v34 = vpop.f32.mrf.mxu0  ;;  %v7129_v44 = vadd.f32 %v6906_v30, %v6339_v62  ;;  %v6342_v4 = vadd.f32 %v10410_v10, %v12970_v49 }
 0x335   : > { %v7601_v26 = vmax.f32 %v7429_v1, %v7525_v2  ;;  %v7278_v42 = vmax.f32 %v7206_v12, 0.0  ;;  %v7427_v24 = vld [vmem:[#allocation2 + $0xd8] ss:$2 sm:$0xff]  ;;  %v7523_v50 = vld [vmem:[#allocation2 + $0xd9] ss:$2 sm:$0xff]  ;;  %v6126_v14 = vpop.f32.mrf.mxu1  ;;  %7352 = vst.msk [vmem:[#allocation2 + $0x108] sm:$0xff] %vm7318_vm1, %v7279_v15 }
 0x336   : > { %v7600_v52 = vmax.f32 %v7427_v24, %v7523_v50  ;;  %v7281_v9 = vmax.f32 %v7209_v13, 0.0  ;;  %v6341_v48 = vadd.f32 %v6126_v14, %v13661_v0  ;;  %v6916_v37 = vpop.f32.mrf.mxu0  ;;  %v7208_v53 = vadd.f32 %v13111_v47, %v7129_v44  ;;  %v13664_v44 = vld [vmem:[#allocation62_spill] sm:$0xff] }
 0x337   : > { %v7639_v45 = vmax.f32 %v7599_v31, %v7601_v26  ;;  %7351 = vst.msk [vmem:[#allocation2 + $0x100] sm:$0xff] %vm7318_vm1, %v7278_v42  ;;  %v7132_v57 = vadd.f32 %v10526_v34, %v6342_v4  ;;  %v10413_v46 = vpop.f32.mrf.mxu1  ;;  %v13663_v26 = vld [vmem:[#allocation61_spill] sm:$0xff] }
 0x338   : > { %v7638_v41 = vmax.f32 %v7598_v39, %v7600_v52  ;;  %7354 = vst.msk [vmem:[#allocation2 + $0x118] sm:$0xff] %vm7318_vm1, %v7281_v9  ;;  %v7131_v49 = vadd.f32 %v6916_v37, %v6341_v48  ;;  %v6344_v21 = vadd.f32 %v10413_v46, %v12984_v58  ;;  %v10529_v8 = vpop.f32.mrf.mxu0  ;;  %v7280_v54 = vmax.f32 %v7208_v53, 0.0 }
 0x339   : > { %7664 = vst.msk [vmem:[%s13151_s9 + $0x48] sm:$0xf] %vm7655_vm2, %v7639_v45  ;;  %v7211_v7 = vadd.f32 %v13111_v47, %v7132_v57  ;;  %v6136_v40 = vpop.f32.mrf.mxu1 }
 0x33a   : > { %7663 = vst.msk [vmem:[%s13151_s9 + $0x40] sm:$0xff] %vm7318_vm1, %v7638_v41  ;;  %v7210_v28 = vadd.f32 %v13111_v47, %v7131_v49  ;;  %v7134_v61 = vadd.f32 %v10529_v8, %v6344_v21  ;;  %v6343_v32 = vadd.f32 %v6136_v40, %v12989_v59  ;;  %v6926_v20 = vpop.f32.mrf.mxu0  ;;  %7353 = vst.msk [vmem:[#allocation2 + $0x110] sm:$0xff] %vm7318_vm1, %v7280_v54  ;;  %v7431_v13 = vld [vmem:[#allocation2 + $0xf0] ss:$2 sm:$0xff]  ;;  %v7527_v34 = vld [vmem:[#allocation2 + $0xf1] ss:$2 sm:$0xff] }
 0x33b   : > { %v7283_v29 = vmax.f32 %v7211_v7, 0.0  ;;  %v10416_v6 = vpop.f32.mrf.mxu1  ;;  %v7602_v41 = vmax.f32 %v7431_v13, %v7527_v34 }
 0x33c   : > { %v7282_v18 = vmax.f32 %v7210_v28, 0.0  ;;  %v7213_v58 = vadd.f32 %v13111_v47, %v7134_v61  ;;  %v7133_v51 = vadd.f32 %v6926_v20, %v6343_v32  ;;  %v6346_v27 = vadd.f32 %v10416_v6, %v13662_v38  ;;  %v10532_v60 = vpop.f32.mrf.mxu0 }
 0x33d   : > { %7356 = vst.msk [vmem:[#allocation2 + $0x128] sm:$0xff] %vm7318_vm1, %v7283_v29  ;;  %v6146_v16 = vpop.f32.mrf.mxu1 }
 0x33e   : > { %v7433_v12 = vld [vmem:[#allocation2 + $0x100] ss:$2 sm:$0xf]  ;;  %v7529_v43 = vld [vmem:[#allocation2 + $0x101] ss:$2 sm:$0xf]  ;;  %v7212_v62 = vadd.f32 %v13111_v47, %v7133_v51  ;;  %v7136_v30 = vadd.f32 %v10532_v60, %v6346_v27  ;;  %v6936_v31 = vpop.f32.mrf.mxu0  ;;  %v6345_v15 = vadd.f32 %v6146_v16, %v13663_v26 }
 0x33f   : > { %7355 = vst.msk [vmem:[#allocation2 + $0x120] sm:$0xff] %vm7318_vm1, %v7282_v18  ;;  %v7285_v59 = vmax.f32 %v7213_v58, 0.0  ;;  %v7603_v1 = vmax.f32 %v7433_v12, %v7529_v43  ;;  %v7437_v2 = vld [vmem:[#allocation2 + $0x118] ss:$2 sm:$0xf]  ;;  %v10419_v42 = vpop.f32.mrf.mxu1 }
 0x340   : > { %v7533_v10 = vld [vmem:[#allocation2 + $0x119] ss:$2 sm:$0xf]  ;;  %v7284_v24 = vmax.f32 %v7212_v62, 0.0  ;;  %v7215_v50 = vadd.f32 %v13111_v47, %v7136_v30  ;;  %v6348_v4 = vadd.f32 %v10419_v42, %v13664_v44  ;;  %v10535_v14 = vpop.f32.mrf.mxu0  ;;  %v7135_v45 = vadd.f32 %v6936_v31, %v6345_v15 }
 0x341   : > { %v7605_v39 = vmax.f32 %v7437_v2, %v7533_v10  ;;  %7358 = vst.msk [vmem:[#allocation2 + $0x138] sm:$0xff] %vm7318_vm1, %v7285_v59  ;;  %v6156_v52 = vpop.f32.mrf.mxu1  ;;  %v7435_v0 = vld [vmem:[#allocation2 + $0x108] ss:$2 sm:$0xff]  ;;  %v7531_v48 = vld [vmem:[#allocation2 + $0x109] ss:$2 sm:$0xff] }
 0x342   : > { %7357 = vst.msk [vmem:[#allocation2 + $0x130] sm:$0xff] %vm7318_vm1, %v7284_v24  ;;  %v7287_v37 = vmax.f32 %v7215_v50, 0.0  ;;  %v7138_v53 = vadd.f32 %v10535_v14, %v6348_v4  ;;  %v6347_v57 = vadd.f32 %v6156_v52, %v13017_v35  ;;  %v6946_v46 = vpop.f32.mrf.mxu0  ;;  %v7604_v49 = vmax.f32 %v7435_v0, %v7531_v48 }
 0x343   : > { %v7641_v9 = vmax.f32 %v7603_v1, %v7605_v39  ;;  %v7214_v21 = vadd.f32 %v13111_v47, %v7135_v45  ;;  %v10422_v8 = vpop.f32.mrf.mxu1 }
 0x344   : > { %7360 = vst.msk [vmem:[#allocation2 + $0x148] sm:$0xff] %vm7318_vm1, %v7287_v37  ;;  %v7217_v54 = vadd.f32 %v13111_v47, %v7138_v53  ;;  %v7137_v7 = vadd.f32 %v6946_v46, %v6347_v57  ;;  %v6350_v40 = vadd.f32 %v10422_v8, %v13025_v22  ;;  %v10538_v28 = vpop.f32.mrf.mxu0  ;;  %v7640_v61 = vmax.f32 %v7602_v41, %v7604_v49  ;;  %v13665_v57 = vld [vmem:[#allocation63_spill] sm:$0xff] }
 0x345   : > { %7666 = vst.msk [vmem:[%s13151_s9 + $0x58] sm:$0xf] %vm7655_vm2, %v7641_v9  ;;  %v7286_v32 = vmax.f32 %v7214_v21, 0.0  ;;  %v6166_v35 = vpop.f32.mrf.mxu1  ;;  %v13666_v21 = vld [vmem:[#allocation64_spill] sm:$0xff] }
 0x346   : > { %v7289_v20 = vmax.f32 %v7217_v54, 0.0  ;;  %v7216_v29 = vadd.f32 %v13111_v47, %v7137_v7  ;;  %v7140_v6 = vadd.f32 %v10538_v28, %v6350_v40  ;;  %v6956_v18 = vpop.f32.mrf.mxu0  ;;  %7665 = vst.msk [vmem:[%s13151_s9 + $0x50] sm:$0xff] %vm7318_vm1, %v7640_v61  ;;  %v6349_v58 = vadd.f32 %v6166_v35, %v13029_v23  ;;  %v7439_v42 = vld [vmem:[#allocation2 + $0x120] ss:$2 sm:$0xff] }
 0x347   : > { %7359 = vst.msk [vmem:[#allocation2 + $0x140] sm:$0xff] %vm7318_vm1, %v7286_v32  ;;  %v10425_v51 = vpop.f32.mrf.mxu1  ;;  %v13667_v35 = vld [vmem:[#allocation65_spill] sm:$0xff] }
 0x348   : > { %7362 = vst.msk [vmem:[#allocation2 + $0x158] sm:$0xff] %vm7318_vm1, %v7289_v20  ;;  %v7288_v38 = vmax.f32 %v7216_v29, 0.0  ;;  %v7219_v22 = vadd.f32 %v13111_v47, %v7140_v6  ;;  %v6352_v27 = vadd.f32 %v10425_v51, %v13033_v19  ;;  %v10541_v60 = vpop.f32.mrf.mxu0  ;;  %v7139_v16 = vadd.f32 %v6956_v18, %v6349_v58  ;;  %v7535_v19 = vld [vmem:[#allocation2 + $0x121] ss:$2 sm:$0xff] }
 0x349   : > { %v7441_v12 = vld [vmem:[#allocation2 + $0x130] ss:$2 sm:$0xf]  ;;  %v7537_v43 = vld [vmem:[#allocation2 + $0x131] ss:$2 sm:$0xf]  ;;  %v6176_v59 = vpop.f32.mrf.mxu1  ;;  %v7606_v37 = vmax.f32 %v7439_v42, %v7535_v19 }
 0x34a   : > { %7361 = vst.msk [vmem:[#allocation2 + $0x150] sm:$0xff] %vm7318_vm1, %v7288_v38  ;;  %v7291_v62 = vmax.f32 %v7219_v22, 0.0  ;;  %v7142_v30 = vadd.f32 %v10541_v60, %v6352_v27  ;;  %v6351_v31 = vadd.f32 %v6176_v59, %v13036_v33  ;;  %v6966_v23 = vpop.f32.mrf.mxu0  ;;  %v7607_v1 = vmax.f32 %v7441_v12, %v7537_v43  ;;  %v13668_v38 = vld [vmem:[#allocation66_spill] sm:$0xff] }
 0x34b   : > { %v7445_v2 = vld [vmem:[#allocation2 + $0x148] ss:$2 sm:$0xf]  ;;  %v7541_v10 = vld [vmem:[#allocation2 + $0x149] ss:$2 sm:$0xf]  ;;  %v7218_v26 = vadd.f32 %v13111_v47, %v7139_v16  ;;  %v10428_v15 = vpop.f32.mrf.mxu1 }
 0x34c   : > { %v7609_v13 = vmax.f32 %v7445_v2, %v7541_v10  ;;  %7364 = vst.msk [vmem:[#allocation2 + $0x168] sm:$0xff] %vm7318_vm1, %v7291_v62  ;;  %v7221_v34 = vadd.f32 %v13111_v47, %v7142_v30  ;;  %v7141_v39 = vadd.f32 %v6966_v23, %v6351_v31  ;;  %v6354_v24 = vadd.f32 %v10428_v15, %v13039_v5  ;;  %v10544_v50 = vpop.f32.mrf.mxu0  ;;  %v13669_v23 = vld [vmem:[#allocation9_spill] sm:$0xff] }
 0x34d   : > { %v7290_v33 = vmax.f32 %v7218_v26, 0.0  ;;  %v6186_v44 = vpop.f32.mrf.mxu1 }
 0x34e   : > { %v7643_v4 = vmax.f32 %v7607_v1, %v7609_v13  ;;  %v7443_v14 = vld [vmem:[#allocation2 + $0x138] ss:$2 sm:$0xff]  ;;  %v7539_v45 = vld [vmem:[#allocation2 + $0x139] ss:$2 sm:$0xff]  ;;  %v7293_v52 = vmax.f32 %v7221_v34, 0.0  ;;  %v7220_v9 = vadd.f32 %v13111_v47, %v7141_v39  ;;  %v7144_v0 = vadd.f32 %v10544_v50, %v6354_v24  ;;  %v6976_v48 = vpop.f32.mrf.mxu0 }
 0x34f   : > { %v7608_v53 = vmax.f32 %v7443_v14, %v7539_v45  ;;  %7363 = vst.msk [vmem:[#allocation2 + $0x160] sm:$0xff] %vm7318_vm1, %v7290_v33  ;;  %v6353_v46 = vadd.f32 %v6186_v44, %v13665_v57  ;;  %v10431_v5 = vpop.f32.mrf.mxu1  ;;  %v13670_v14 = vld [vmem:[#allocation10_spill] sm:$0xff] }
 0x350   : > { %7668 = vst.msk [vmem:[%s13151_s9 + $0x68] sm:$0xf] %vm7655_vm2, %v7643_v4  ;;  %v7292_v41 = vmax.f32 %v7220_v9, 0.0  ;;  %v7223_v49 = vadd.f32 %v13111_v47, %v7144_v0  ;;  %v6356_v8 = vadd.f32 %v10431_v5, %v13666_v21  ;;  %v10547_v54 = vpop.f32.mrf.mxu0 }
 0x351   : > { %7366 = vst.msk [vmem:[#allocation2 + $0x178] sm:$0xff] %vm7318_vm1, %v7293_v52  ;;  %v7642_v7 = vmax.f32 %v7606_v37, %v7608_v53  ;;  %v7143_v40 = vadd.f32 %v6976_v48, %v6353_v46  ;;  %v6196_v28 = vpop.f32.mrf.mxu1  ;;  %v7447_v60 = vld [vmem:[#allocation2 + $0x150] ss:$2 sm:$0xff]  ;;  %v7543_v12 = vld [vmem:[#allocation2 + $0x151] ss:$2 sm:$0xff] }
 0x352   : > { %7365 = vst.msk [vmem:[#allocation2 + $0x170] sm:$0xff] %vm7318_vm1, %v7292_v41  ;;  %v7295_v61 = vmax.f32 %v7223_v49, 0.0  ;;  %v7146_v32 = vadd.f32 %v10547_v54, %v6356_v8  ;;  %v6355_v20 = vadd.f32 %v6196_v28, %v13667_v35  ;;  %v6986_v29 = vpop.f32.mrf.mxu0  ;;  %v7610_v50 = vmax.f32 %v7447_v60, %v7543_v12  ;;  %v13671_v37 = vld [vmem:[#allocation48_spill] sm:$0xff]  ;;  %v13672_v8 = vld [vmem:[#allocation11_spill] sm:$0xff] }
 0x353   : > { %7667 = vst.msk [vmem:[%s13151_s9 + $0x60] sm:$0xff] %vm7318_vm1, %v7642_v7  ;;  %v7222_v6 = vadd.f32 %v13111_v47, %v7143_v40  ;;  %v10434_v18 = vpop.f32.mrf.mxu1  ;;  %v13314_v28 = vld [vmem:[#allocation5] ss:$0 sm:$0xff] }
 0x354   : > { %7368 = vst.msk [vmem:[#allocation2 + $0x188] sm:$0xff] %vm7318_vm1, %v7295_v61  ;;  %v7225_v58 = vadd.f32 %v13111_v47, %v7146_v32  ;;  %v7145_v51 = vadd.f32 %v6986_v29, %v6355_v20  ;;  %v6358_v22 = vadd.f32 %v10434_v18, %v13668_v38  ;;  %v10550_v27 = vpop.f32.mrf.mxu0  ;;  %v13673_v20 = vld [vmem:[#allocation12_spill] sm:$0xff] }
 0x355   : > { %v7294_v43 = vmax.f32 %v7222_v6, 0.0  ;;  %v6206_v16 = vpop.f32.mrf.mxu1 }
 0x356   : > { %v7449_v59 = vld [vmem:[#allocation2 + $0x160] ss:$2 sm:$0xf]  ;;  %v7545_v62 = vld [vmem:[#allocation2 + $0x161] ss:$2 sm:$0xf]  ;;  %v7224_v30 = vadd.f32 %v13111_v47, %v7145_v51  ;;  %v7148_v31 = vadd.f32 %v10550_v27, %v6358_v22  ;;  %v6357_v1 = vadd.f32 %v6206_v16, %v13669_v23  ;;  %v6996_v2 = vpop.f32.mrf.mxu0 }
 0x357   : > { %v7611_v10 = vmax.f32 %v7449_v59, %v7545_v62  ;;  %7367 = vst.msk [vmem:[#allocation2 + $0x180] sm:$0xff] %vm7318_vm1, %v7294_v43  ;;  %v10437_v42 = vpop.f32.mrf.mxu1  ;;  %v7297_v13 = vmax.f32 %v7225_v58, 0.0  ;;  %v13674_v27 = vld [vmem:[#allocation13_spill] sm:$0xff] }
 0x358   : > { %v7453_v26 = vld [vmem:[#allocation2 + $0x178] ss:$2 sm:$0xf]  ;;  %v7549_v15 = vld [vmem:[#allocation2 + $0x179] ss:$2 sm:$0xf]  ;;  %v7227_v39 = vadd.f32 %v13111_v47, %v7148_v31  ;;  %v10553_v24 = vpop.f32.mrf.mxu0  ;;  %v7147_v4 = vadd.f32 %v6996_v2, %v6357_v1  ;;  %v6360_v45 = vadd.f32 %v10437_v42, %v13670_v14 }
 0x359   : > { %v7613_v19 = vmax.f32 %v7453_v26, %v7549_v15  ;;  %v7296_v34 = vmax.f32 %v7224_v30, 0.0  ;;  %v7451_v33 = vld [vmem:[#allocation2 + $0x168] ss:$2 sm:$0xff]  ;;  %v7547_v44 = vld [vmem:[#allocation2 + $0x169] ss:$2 sm:$0xff]  ;;  %v6216_v52 = vpop.f32.mrf.mxu1  ;;  %7370 = vst.msk [vmem:[#allocation2 + $0x198] sm:$0xff] %vm7318_vm1, %v7297_v13 }
 0x35a   : > { %v7612_v0 = vmax.f32 %v7451_v33, %v7547_v44  ;;  %v7299_v48 = vmax.f32 %v7227_v39, 0.0  ;;  %v6359_v53 = vadd.f32 %v6216_v52, %v13671_v37  ;;  %v7006_v57 = vpop.f32.mrf.mxu0  ;;  %v7226_v46 = vadd.f32 %v13111_v47, %v7147_v4  ;;  %v13675_v26 = vld [vmem:[#allocation14_spill] sm:$0xff] }
 0x35b   : > { %v7645_v9 = vmax.f32 %v7611_v10, %v7613_v19  ;;  %7369 = vst.msk [vmem:[#allocation2 + $0x190] sm:$0xff] %vm7318_vm1, %v7296_v34  ;;  %v7150_v5 = vadd.f32 %v10553_v24, %v6360_v45  ;;  %v10440_v41 = vpop.f32.mrf.mxu1 }
 0x35c   : > { %v7644_v49 = vmax.f32 %v7610_v50, %v7612_v0  ;;  %7372 = vst.msk [vmem:[#allocation2 + $0x1a8] sm:$0xff] %vm7318_vm1, %v7299_v48  ;;  %v7149_v21 = vadd.f32 %v7006_v57, %v6359_v53  ;;  %v6362_v54 = vadd.f32 %v10440_v41, %v13672_v8  ;;  %v10556_v7 = vpop.f32.mrf.mxu0  ;;  %v7298_v40 = vmax.f32 %v7226_v46, 0.0  ;;  %v13676_v48 = vld [vmem:[#allocation15_spill] sm:$0xff] }
 0x35d   : > { %7670 = vst.msk [vmem:[%s13151_s9 + $0x78] sm:$0xf] %vm7655_vm2, %v7645_v9  ;;  %v7229_v61 = vadd.f32 %v13314_v28, %v7150_v5  ;;  %v6226_v32 = vpop.f32.mrf.mxu1 }
 0x35e   : > { %7669 = vst.msk [vmem:[%s13151_s9 + $0x70] sm:$0xff] %vm7318_vm1, %v7644_v49  ;;  %v7228_v47 = vadd.f32 %v13314_v28, %v7149_v21  ;;  %v7152_v35 = vadd.f32 %v10556_v7, %v6362_v54  ;;  %v6361_v29 = vadd.f32 %v6226_v32, %v13673_v20  ;;  %v7016_v6 = vpop.f32.mrf.mxu0  ;;  %7371 = vst.msk [vmem:[#allocation2 + $0x1a0] sm:$0xff] %vm7318_vm1, %v7298_v40  ;;  %v7455_v19 = vld [vmem:[#allocation2 + $0x180] ss:$2 sm:$0xff]  ;;  %v7551_v13 = vld [vmem:[#allocation2 + $0x181] ss:$2 sm:$0xff] }
 0x35f   : > { %v7301_v18 = vmax.f32 %v7229_v61, 0.0  ;;  %v10443_v58 = vpop.f32.mrf.mxu1  ;;  %v7614_v57 = vmax.f32 %v7455_v19, %v7551_v13  ;;  %v13677_v20 = vld [vmem:[#allocation16_spill] sm:$0xff] }
 0x360   : > { %v7300_v51 = vmax.f32 %v7228_v47, 0.0  ;;  %v7231_v38 = vadd.f32 %v13314_v28, %v7152_v35  ;;  %v7151_v22 = vadd.f32 %v7016_v6, %v6361_v29  ;;  %v6364_v60 = vadd.f32 %v10443_v58, %v13674_v27  ;;  %v10559_v12 = vpop.f32.mrf.mxu0 }
 0x361   : > { %7374 = vst.msk [vmem:[#allocation2 + $0x1b8] sm:$0xff] %vm7318_vm1, %v7301_v18  ;;  %v6236_v59 = vpop.f32.mrf.mxu1 }
 0x362   : > { %v7457_v43 = vld [vmem:[#allocation2 + $0x190] ss:$2 sm:$0xf]  ;;  %v7553_v16 = vld [vmem:[#allocation2 + $0x191] ss:$2 sm:$0xf]  ;;  %v7230_v30 = vadd.f32 %v13314_v28, %v7151_v22  ;;  %v7154_v31 = vadd.f32 %v10559_v12, %v6364_v60  ;;  %v7026_v23 = vpop.f32.mrf.mxu0  ;;  %v6363_v15 = vadd.f32 %v6236_v59, %v13675_v26 }
 0x363   : > { %7373 = vst.msk [vmem:[#allocation2 + $0x1b0] sm:$0xff] %vm7318_vm1, %v7300_v51  ;;  %v7303_v62 = vmax.f32 %v7231_v38, 0.0  ;;  %v7615_v1 = vmax.f32 %v7457_v43, %v7553_v16  ;;  %v7461_v2 = vld [vmem:[#allocation2 + $0x1a8] ss:$2 sm:$0xf]  ;;  %v10446_v42 = vpop.f32.mrf.mxu1 }
 0x364   : > { %v7557_v10 = vld [vmem:[#allocation2 + $0x1a9] ss:$2 sm:$0xf]  ;;  %v7302_v39 = vmax.f32 %v7230_v30, 0.0  ;;  %v7233_v24 = vadd.f32 %v13314_v28, %v7154_v31  ;;  %v6366_v50 = vadd.f32 %v10446_v42, %v13075_v17  ;;  %v10562_v33 = vpop.f32.mrf.mxu0  ;;  %v7153_v44 = vadd.f32 %v7026_v23, %v6363_v15 }
 0x365   : > { %v7617_v34 = vmax.f32 %v7461_v2, %v7557_v10  ;;  %7376 = vst.msk [vmem:[#allocation2 + $0x1c8] sm:$0xff] %vm7318_vm1, %v7303_v62  ;;  %v6246_v4 = vpop.f32.mrf.mxu1  ;;  %v7459_v45 = vld [vmem:[#allocation2 + $0x198] ss:$2 sm:$0xff]  ;;  %v7555_v52 = vld [vmem:[#allocation2 + $0x199] ss:$2 sm:$0xff] }
 0x366   : > { %7375 = vst.msk [vmem:[#allocation2 + $0x1c0] sm:$0xff] %vm7318_vm1, %v7302_v39  ;;  %v7305_v9 = vmax.f32 %v7233_v24, 0.0  ;;  %v7156_v0 = vadd.f32 %v10562_v33, %v6366_v50  ;;  %v6365_v37 = vadd.f32 %v6246_v4, %v13676_v48  ;;  %v7036_v53 = vpop.f32.mrf.mxu0  ;;  %v7616_v46 = vmax.f32 %v7459_v45, %v7555_v52 }
 0x367   : > { %v7647_v14 = vmax.f32 %v7615_v1, %v7617_v34  ;;  %v7232_v5 = vadd.f32 %v13314_v28, %v7153_v44  ;;  %v10449_v17 = vpop.f32.mrf.mxu1 }
 0x368   : > { %7378 = vst.msk [vmem:[#allocation2 + $0x1d8] sm:$0xff] %vm7318_vm1, %v7305_v9  ;;  %v7235_v41 = vadd.f32 %v13314_v28, %v7156_v0  ;;  %v7155_v49 = vadd.f32 %v7036_v53, %v6365_v37  ;;  %v6368_v21 = vadd.f32 %v10449_v17, %v13081_v3  ;;  %v10565_v8 = vpop.f32.mrf.mxu0  ;;  %v7646_v54 = vmax.f32 %v7614_v57, %v7616_v46 }
 0x369   : > { %7672 = vst.msk [vmem:[%s13151_s9 + $0x88] sm:$0xf] %vm7655_vm2, %v7647_v14  ;;  %v7304_v7 = vmax.f32 %v7232_v5, 0.0  ;;  %v6256_v40 = vpop.f32.mrf.mxu1 }
 0x36a   : > { %v7307_v61 = vmax.f32 %v7235_v41, 0.0  ;;  %v7234_v32 = vadd.f32 %v13314_v28, %v7155_v49  ;;  %v7158_v47 = vadd.f32 %v10565_v8, %v6368_v21  ;;  %v7046_v35 = vpop.f32.mrf.mxu0  ;;  %7671 = vst.msk [vmem:[%s13151_s9 + $0x80] sm:$0xff] %vm7318_vm1, %v7646_v54  ;;  %v6367_v29 = vadd.f32 %v6256_v40, %v13677_v20  ;;  %v7463_v2 = vld [vmem:[#allocation2 + $0x1b0] ss:$2 sm:$0xff]  ;;  %v13678_v54 = vld [vmem:[#allocation17_spill] sm:$0xff] }
 0x36b   : > { %7377 = vst.msk [vmem:[#allocation2 + $0x1d0] sm:$0xff] %vm7318_vm1, %v7304_v7  ;;  %v10452_v6 = vpop.f32.mrf.mxu1 }
 0x36c   : > { %7380 = vst.msk [vmem:[#allocation2 + $0x1e8] sm:$0xff] %vm7318_vm1, %v7307_v61  ;;  %v7306_v18 = vmax.f32 %v7234_v32, 0.0  ;;  %v7237_v3 = vadd.f32 %v13314_v28, %v7158_v47  ;;  %v6370_v58 = vadd.f32 %v10452_v6, %v13087_v11  ;;  %v10568_v51 = vpop.f32.mrf.mxu0  ;;  %v7157_v27 = vadd.f32 %v7046_v35, %v6367_v29  ;;  %v7559_v11 = vld [vmem:[#allocation2 + $0x1b1] ss:$2 sm:$0xff] }
 0x36d   : > { %v7465_v38 = vld [vmem:[#allocation2 + $0x1c0] ss:$2 sm:$0xf]  ;;  %v7561_v22 = vld [vmem:[#allocation2 + $0x1c1] ss:$2 sm:$0xf]  ;;  %v6266_v60 = vpop.f32.mrf.mxu1  ;;  %v7618_v14 = vmax.f32 %v7463_v2, %v7559_v11 }
 0x36e   : > { %7379 = vst.msk [vmem:[#allocation2 + $0x1e0] sm:$0xff] %vm7318_vm1, %v7306_v18  ;;  %v7309_v12 = vmax.f32 %v7237_v3, 0.0  ;;  %v7160_v43 = vadd.f32 %v10568_v51, %v6370_v58  ;;  %v6369_v16 = vadd.f32 %v6266_v60, %v13090_v55  ;;  %v7056_v59 = vpop.f32.mrf.mxu0  ;;  %v7619_v62 = vmax.f32 %v7465_v38, %v7561_v22  ;;  %v13679_v18 = vld [vmem:[#allocation18_spill] sm:$0xff] }
 0x36f   : > { %v7469_v30 = vld [vmem:[#allocation2 + $0x1d8] ss:$2 sm:$0xf]  ;;  %v7565_v31 = vld [vmem:[#allocation2 + $0x1d9] ss:$2 sm:$0xf]  ;;  %v7236_v23 = vadd.f32 %v13314_v28, %v7157_v27  ;;  %v10455_v1 = vpop.f32.mrf.mxu1 }
 0x370   : > { %v7621_v10 = vmax.f32 %v7469_v30, %v7565_v31  ;;  %7382 = vst.msk [vmem:[#allocation2 + $0x1f8] sm:$0xff] %vm7318_vm1, %v7309_v12  ;;  %v7239_v26 = vadd.f32 %v13314_v28, %v7160_v43  ;;  %v7159_v15 = vadd.f32 %v7056_v59, %v6369_v16  ;;  %v6372_v42 = vadd.f32 %v10455_v1, %v13093_v63  ;;  %v10571_v19 = vpop.f32.mrf.mxu0 }
 0x371   : > { %v7308_v55 = vmax.f32 %v7236_v23, 0.0  ;;  %v6276_v13 = vpop.f32.mrf.mxu1 }
 0x372   : > { %v7649_v34 = vmax.f32 %v7619_v62, %v7621_v10  ;;  %v7467_v39 = vld [vmem:[#allocation2 + $0x1c8] ss:$2 sm:$0xff]  ;;  %v7563_v24 = vld [vmem:[#allocation2 + $0x1c9] ss:$2 sm:$0xff]  ;;  %v7311_v50 = vmax.f32 %v7239_v26, 0.0  ;;  %v7238_v33 = vadd.f32 %v13314_v28, %v7159_v15  ;;  %v7162_v44 = vadd.f32 %v10571_v19, %v6372_v42  ;;  %v7066_v4 = vpop.f32.mrf.mxu0 }
 0x373   : > { %v7620_v45 = vmax.f32 %v7467_v39, %v7563_v24  ;;  %7381 = vst.msk [vmem:[#allocation2 + $0x1f0] sm:$0xff] %vm7318_vm1, %v7308_v55  ;;  %v6371_v52 = vadd.f32 %v6276_v13, %v13096_v25  ;;  %v10458_v63 = vpop.f32.mrf.mxu1 }
 0x374   : > { %7674 = vst.msk [vmem:[%s13151_s9 + $0x98] sm:$0xf] %vm7655_vm2, %v7649_v34  ;;  %v7310_v9 = vmax.f32 %v7238_v33, 0.0  ;;  %v7241_v0 = vadd.f32 %v13314_v28, %v7162_v44  ;;  %v6374_v48 = vadd.f32 %v10458_v63, %v13099_v36  ;;  %v10574_v37 = vpop.f32.mrf.mxu0 }
 0x375   : > { %7384 = vst.msk [vmem:[#allocation2 + $0x208] sm:$0xff] %vm7318_vm1, %v7311_v50  ;;  %v7648_v53 = vmax.f32 %v7618_v14, %v7620_v45  ;;  %v7161_v57 = vadd.f32 %v7066_v4, %v6371_v52  ;;  %v6286_v46 = vpop.f32.mrf.mxu1  ;;  %v7471_v61 = vld [vmem:[#allocation2 + $0x1e0] ss:$2 sm:$0xff]  ;;  %v7567_v32 = vld [vmem:[#allocation2 + $0x1e1] ss:$2 sm:$0xff] }
 0x376   : > { %7383 = vst.msk [vmem:[#allocation2 + $0x200] sm:$0xff] %vm7318_vm1, %v7310_v9  ;;  %v7313_v5 = vmax.f32 %v7241_v0, 0.0  ;;  %v7164_v17 = vadd.f32 %v10574_v37, %v6374_v48  ;;  %v6373_v25 = vadd.f32 %v6286_v46, %v13102_v56  ;;  %v7076_v41 = vpop.f32.mrf.mxu0  ;;  %v7622_v30 = vmax.f32 %v7471_v61, %v7567_v32 }
 0x377   : > { %7673 = vst.msk [vmem:[%s13151_s9 + $0x90] sm:$0xff] %vm7318_vm1, %v7648_v53  ;;  %v7240_v49 = vadd.f32 %v13314_v28, %v7161_v57  ;;  %v10461_v21 = vpop.f32.mrf.mxu1 }
 0x378   : > { %7386 = vst.msk [vmem:[#allocation2 + $0x218] sm:$0xff] %vm7318_vm1, %v7313_v5  ;;  %v7243_v36 = vadd.f32 %v13314_v28, %v7164_v17  ;;  %v7163_v8 = vadd.f32 %v7076_v41, %v6373_v25  ;;  %v6376_v7 = vadd.f32 %v10461_v21, %v13678_v54  ;;  %v10577_v40 = vpop.f32.mrf.mxu0 }
 0x379   : > { %v7312_v47 = vmax.f32 %v7240_v49, 0.0  ;;  %v6296_v35 = vpop.f32.mrf.mxu1 }
 0x37a   : > { %v7473_v20 = vld [vmem:[#allocation2 + $0x1f0] ss:$2 sm:$0xf]  ;;  %v7569_v56 = vld [vmem:[#allocation2 + $0x1f1] ss:$2 sm:$0xf]  ;;  %v7242_v29 = vadd.f32 %v13314_v28, %v7163_v8  ;;  %v7166_v6 = vadd.f32 %v10577_v40, %v6376_v7  ;;  %v6375_v3 = vadd.f32 %v6296_v35, %v13679_v18  ;;  %v7086_v43 = vpop.f32.mrf.mxu0 }
 0x37b   : > { %v7623_v58 = vmax.f32 %v7473_v20, %v7569_v56  ;;  %7385 = vst.msk [vmem:[#allocation2 + $0x210] sm:$0xff] %vm7318_vm1, %v7312_v47  ;;  %v7315_v27 = vmax.f32 %v7243_v36, 0.0 }
 0x37c   : > { %v7477_v51 = vld [vmem:[#allocation2 + $0x208] ss:$2 sm:$0xf]  ;;  %v7573_v38 = vld [vmem:[#allocation2 + $0x209] ss:$2 sm:$0xf]  ;;  %v7245_v12 = vadd.f32 %v13314_v28, %v7166_v6  ;;  %v7165_v62 = vadd.f32 %v7086_v43, %v6375_v3 }
 0x37d   : > { %v7625_v22 = vmax.f32 %v7477_v51, %v7573_v38  ;;  %v7314_v60 = vmax.f32 %v7242_v29, 0.0  ;;  %v7475_v16 = vld [vmem:[#allocation2 + $0x1f8] ss:$2 sm:$0xff]  ;;  %v7571_v59 = vld [vmem:[#allocation2 + $0x1f9] ss:$2 sm:$0xff]  ;;  %7388 = vst.msk [vmem:[#allocation2 + $0x228] sm:$0xff] %vm7318_vm1, %v7315_v27 }
 0x37e   : > { %v7624_v23 = vmax.f32 %v7475_v16, %v7571_v59  ;;  %v7317_v1 = vmax.f32 %v7245_v12, 0.0  ;;  %v7244_v2 = vadd.f32 %v13314_v28, %v7165_v62 }
 0x37f   : > { %v7651_v31 = vmax.f32 %v7623_v58, %v7625_v22  ;;  %7387 = vst.msk [vmem:[#allocation2 + $0x220] sm:$0xff] %vm7318_vm1, %v7314_v60 }
 0x380   : > { %v7650_v11 = vmax.f32 %v7622_v30, %v7624_v23  ;;  %7390 = vst.msk [vmem:[#allocation2 + $0x238] sm:$0xff] %vm7318_vm1, %v7317_v1  ;;  %v7316_v10 = vmax.f32 %v7244_v2, 0.0 }
 0x381   : > { %7676 = vst.msk [vmem:[%s13151_s9 + $0xa8] sm:$0xf] %vm7655_vm2, %v7651_v31 }
 0x382   : > { %7675 = vst.msk [vmem:[%s13151_s9 + $0xa0] sm:$0xff] %vm7318_vm1, %v7650_v11  ;;  %7389 = vst.msk [vmem:[#allocation2 + $0x230] sm:$0xff] %vm7318_vm1, %v7316_v10  ;;  %v7479_v55 = vld [vmem:[#allocation2 + $0x210] ss:$2 sm:$0xff]  ;;  %v7575_v13 = vld [vmem:[#allocation2 + $0x211] ss:$2 sm:$0xff] }
 0x383   : > { %v7626_v33 = vmax.f32 %v7479_v55, %v7575_v13 }
 0x386   : > { %v7481_v26 = vld [vmem:[#allocation2 + $0x220] ss:$2 sm:$0xf]  ;;  %v7577_v15 = vld [vmem:[#allocation2 + $0x221] ss:$2 sm:$0xf] }
 0x387   : > { %v7485_v42 = vld [vmem:[#allocation2 + $0x238] ss:$2 sm:$0xf]  ;;  %v7581_v19 = vld [vmem:[#allocation2 + $0x239] ss:$2 sm:$0xf]  ;;  %v7627_v34 = vmax.f32 %v7481_v26, %v7577_v15 }
 0x388   : > { %v7629_v28 = vmax.f32 %v7485_v42, %v7581_v19 }
 0x389   : > { %v7483_v24 = vld [vmem:[#allocation2 + $0x228] ss:$2 sm:$0xff]  ;;  %v7579_v50 = vld [vmem:[#allocation2 + $0x229] ss:$2 sm:$0xff] }
 0x38a   : > { %v7653_v39 = vmax.f32 %v7627_v34, %v7629_v28  ;;  %v7628_v44 = vmax.f32 %v7483_v24, %v7579_v50 }
 0x38c   : > { %7678 = vst.msk [vmem:[%s13151_s9 + $0xb8] sm:$0xf] %vm7655_vm2, %v7653_v39  ;;  %v7652_v4 = vmax.f32 %v7626_v33, %v7628_v44 }
 0x38e   : > { %7677 = vst.msk [vmem:[%s13151_s9 + $0xb0] sm:$0xff] %vm7318_vm1, %v7652_v4 }
 0x38f PF: > { %s15_s12 = sadd.s32 1, %s10686_s12  }
 0x390   : > { %p12_p2 = scmp.ge.s32.totalorder %s15_s12, 4  }
 0x392   :  { %14 = sbr.rel (!%p12_p2) target bundleno = 2 (0x2), region = 176 }
 0x397   :  { %7700 = vsyncpa [#allocation4], 1 }
 0x398   :  { %7702 = vsyncpa [#allocation4 + $0x1], 1 }
 0x399   :  { %7703 = vsyncpa [#allocation6], 1 }

</bundles_post_ra>
